<compile_context>
chip_gen: v7x
topology: tpu7x:2x2x1
jax: 0.10.0
libtpu: 0.0.40
codegen_flags: <defaults>
</compile_context>

<pallas_src>
import functools

import jax
import jax.numpy as jnp
from jax.experimental import pallas as pl
from jax.experimental.pallas import tpu as pltpu

C_IN, C1, C2 = 2048, 512, 256
KH = KW = 3
STRIDE = 2
EPS = 1e-5
NEG_SLOPE = 0.2
VMEM_LIMIT = 32 * 1024 * 1024   # safe on v5e/v6e (128 MiB phys) and v7x (64 MiB phys)


# ---------------- kernel A (1-TC path): conv1 + BN1 + LReLU + full head, fused ----------------
def _fused_kernel(a_ref, w1_ref, g1_ref, be1_ref, w2_ref, g2_ref, be2_ref,
                  w3_ref, b3_ref, out_ref, acc_ref):
    k = pl.program_id(0)

    @pl.when(k == 0)
    def _():
        acc_ref[...] = jnp.zeros_like(acc_ref)

    # Hot path: K-tiled bf16 matmul (im2col form of the 3x3/s2 conv), f32 accumulate.
    acc_ref[...] += jnp.dot(a_ref[...], w1_ref[...],
                            preferred_element_type=jnp.float32)

    @pl.when(k == pl.num_programs(0) - 1)
    def _():
        y = acc_ref[...]
        # Conv bias omitted: cancelled exactly by the batch-stat mean subtraction.
        mean = jnp.mean(y, axis=0, keepdims=True)
        var = jnp.mean((y - mean) ** 2, axis=0, keepdims=True)          # biased var
        y = (y - mean) * jax.lax.rsqrt(var + EPS) * g1_ref[...] + be1_ref[...]
        y = jnp.where(y > 0, y, NEG_SLOPE * y)
        # 1x1 conv #2 (512->256), f32 weights (tiny GEMM, accuracy > speed here).
        y2 = jnp.dot(y, w2_ref[...], preferred_element_type=jnp.float32)
        m2 = jnp.mean(y2, axis=0, keepdims=True)
        v2 = jnp.mean((y2 - m2) ** 2, axis=0, keepdims=True)            # biased var
        y2 = (y2 - m2) * jax.lax.rsqrt(v2 + EPS) * g2_ref[...] + be2_ref[...]
        y2 = jnp.where(y2 > 0, y2, NEG_SLOPE * y2)
        # 1-output-channel conv == per-row dot with w3: VPU reduction, not a
        # degenerate 1-column MXU pass.
        y3 = jnp.sum(y2 * w3_ref[...], axis=-1, keepdims=True) + b3_ref[...]
        out_ref[...] = jax.nn.sigmoid(y3)


# --------------- kernels B (2-TC path): split conv1+BN1+LReLU, then tiny head ---------------
def _conv1_bn_lrelu_kernel(a_ref, w1_ref, g1_ref, be1_ref, y1_ref, acc_ref):
    k = pl.program_id(1)

    @pl.when(k == 0)
    def _():
        acc_ref[...] = jnp.zeros_like(acc_ref)

    acc_ref[...] += jnp.dot(a_ref[...], w1_ref[...],
                            preferred_element_type=jnp.float32)

    @pl.when(k == pl.num_programs(1) - 1)
    def _():
        y = acc_ref[...]
        mean = jnp.mean(y, axis=0, keepdims=True)
        var = jnp.mean((y - mean) ** 2, axis=0, keepdims=True)          # biased var
        y = (y - mean) * jax.lax.rsqrt(var + EPS) * g1_ref[...] + be1_ref[...]
        y1_ref[...] = jnp.where(y > 0, y, NEG_SLOPE * y)


def _head_kernel(y1_ref, w2_ref, g2_ref, be2_ref, w3_ref, b3_ref, out_ref):
    y2 = jnp.dot(y1_ref[...], w2_ref[...], preferred_element_type=jnp.float32)
    mean = jnp.mean(y2, axis=0, keepdims=True)
    var = jnp.mean((y2 - mean) ** 2, axis=0, keepdims=True)             # biased var
    y2 = (y2 - mean) * jax.lax.rsqrt(var + EPS) * g2_ref[...] + be2_ref[...]
    y2 = jnp.where(y2 > 0, y2, NEG_SLOPE * y2)
    y3 = jnp.sum(y2 * w3_ref[...], axis=-1, keepdims=True) + b3_ref[...]
    out_ref[...] = jax.nn.sigmoid(y3)


# ------------------------------------- glue -------------------------------------
def _im2col(x, k, s):
    """x: [N, C, H, W] -> A: [N*OH*OW, C*k*k] (K order = c, kh, kw)."""
    n, c, h, w = x.shape
    oh = (h - k) // s + 1
    ow = (w - k) // s + 1
    cols = []
    for kh in range(k):
        for kw in range(k):
            cols.append(x[:, :, kh:kh + s * oh:s, kw:kw + s * ow:s])  # [N,C,OH,OW]
    p = jnp.stack(cols, axis=0).reshape(k, k, n, c, oh, ow)
    p = p.transpose(2, 4, 5, 3, 0, 1)  # [N, OH, OW, C, kh, kw]
    return p.reshape(n * oh * ow, c * k * k), oh, ow


def prepare_kernel_params(p, nsplit):
    """One-time layout transform of PyTorch-layout weights into kernel layout."""
    assert C1 % nsplit == 0
    cn = C1 // nsplit
    ktot = C_IN * KH * KW
    w1m = p["w1"].reshape(C1, ktot).T.astype(jnp.bfloat16)              # [K, 512]
    w1s = w1m.reshape(ktot, nsplit, cn).transpose(1, 0, 2)              # [nsplit, K, cn]
    return dict(
        w1=w1s,
        g1=p["g1"].reshape(1, C1).astype(jnp.float32),
        be1=p["be1"].reshape(1, C1).astype(jnp.float32),
        w2=p["w2"].reshape(C2, C1).T.astype(jnp.float32),               # [512, 256]
        g2=p["g2"].reshape(1, C2).astype(jnp.float32),
        be2=p["be2"].reshape(1, C2).astype(jnp.float32),
        w3=p["w3"].reshape(1, C2).astype(jnp.float32),
        b3=p["b3"].reshape(1, 1).astype(jnp.float32),
    )


@functools.partial(jax.jit, static_argnames=("nsplit", "tk"))
def netd_resnet_forward(x, kp, *, nsplit=1, tk=9216):
    # bf16 input -> half-size im2col intermediates and A stream; f32 accumulate in-kernel.
    a, _, _ = _im2col(x.astype(jnp.bfloat16), KH, STRIDE)
    m, ktot = a.shape
    assert ktot % tk == 0, (ktot, tk)
    cn = C1 // nsplit

    if nsplit == 1:
        # Single fused kernel: conv1 K-pipeline + BN1/LReLU + conv2/BN2/LReLU
        # + conv3/sigmoid all in the last-step epilogue.
        out = pl.pallas_call(
            _fused_kernel,
            out_shape=jax.ShapeDtypeStruct((m, 1), jnp.float32),
            grid_spec=pltpu.PrefetchScalarGridSpec(
                num_scalar_prefetch=0,
                grid=(ktot // tk,),
                in_specs=[
                    pl.BlockSpec((m, tk), lambda k: (0, k)),              # A tile (bf16)
                    pl.BlockSpec((None, tk, C1), lambda k: (0, k, 0)),    # W1 tile (bf16)
                    pl.BlockSpec((1, C1), lambda k: (0, 0)),              # gamma1
                    pl.BlockSpec((1, C1), lambda k: (0, 0)),              # beta1
                    pl.BlockSpec((C1, C2), lambda k: (0, 0)),             # W2 (f32)
                    pl.BlockSpec((1, C2), lambda k: (0, 0)),              # gamma2
                    pl.BlockSpec((1, C2), lambda k: (0, 0)),              # beta2
                    pl.BlockSpec((1, C2), lambda k: (0, 0)),              # w3
                    pl.BlockSpec((1, 1), lambda k: (0, 0)),               # b3
                ],
                out_specs=pl.BlockSpec((m, 1), lambda k: (0, 0)),
                scratch_shapes=[pltpu.VMEM((m, C1), jnp.float32)],
            ),
            compiler_params=pltpu.CompilerParams(
                dimension_semantics=("arbitrary",),
                vmem_limit_bytes=VMEM_LIMIT,
            ),
        )(a, kp["w1"], kp["g1"], kp["be1"], kp["w2"], kp["g2"], kp["be2"],
          kp["w3"], kp["b3"])
        return out.reshape(-1)

    # nsplit == 2 (v7x): shard the C1 output-channel axis across the two
    # TensorCores (each core streams ~half of W1), then a tiny head kernel that
    # needs all 512 channels.
    y1 = pl.pallas_call(
        _conv1_bn_lrelu_kernel,
        out_shape=jax.ShapeDtypeStruct((m, C1), jnp.float32),
        grid_spec=pltpu.PrefetchScalarGridSpec(
            num_scalar_prefetch=0,
            grid=(nsplit, ktot // tk),
            in_specs=[
                pl.BlockSpec((m, tk), lambda j, k: (0, k)),               # A tile (bf16)
                pl.BlockSpec((None, tk, cn), lambda j, k: (j, k, 0)),     # W1 half-tile
                pl.BlockSpec((1, cn), lambda j, k: (0, j)),               # gamma1 half
                pl.BlockSpec((1, cn), lambda j, k: (0, j)),               # beta1 half
            ],
            out_specs=pl.BlockSpec((m, cn), lambda j, k: (0, j)),
            scratch_shapes=[pltpu.VMEM((m, cn), jnp.float32)],
        ),
        compiler_params=pltpu.CompilerParams(
            dimension_semantics=(pltpu.CORE_PARALLEL, "arbitrary"),
            vmem_limit_bytes=VMEM_LIMIT,
        ),
    )(a, kp["w1"], kp["g1"], kp["be1"])

    out = pl.pallas_call(
        _head_kernel,
        out_shape=jax.ShapeDtypeStruct((m, 1), jnp.float32),
        in_specs=[pl.BlockSpec(memory_space=pltpu.MemorySpace.VMEM)] * 6,
        out_specs=pl.BlockSpec(memory_space=pltpu.MemorySpace.VMEM),
    )(y1, kp["w2"], kp["g2"], kp["be2"], kp["w3"], kp["b3"])
    return out.reshape(-1)   # == output.view(-1, 1).squeeze(1)


def _detect_nsplit():
    """2 on multi-TensorCore chips (v7x-style), else 1."""
    try:
        kind = jax.devices()[0].device_kind.lower()
    except Exception:
        return 1
    if "v7" in kind or "7x" in kind:
        return 2
    return 1


# -------------------------- deterministic parameters --------------------------
def init_params(key):
    ks = jax.random.split(key, 6)

    def conv_init(kw_key, kb_key, shape):
        fan_in = shape[1] * shape[2] * shape[3]
        bound = 1.0 / jnp.sqrt(fan_in)
        w = jax.random.uniform(kw_key, shape, jnp.float32, -bound, bound)
        b = jax.random.uniform(kb_key, (shape[0],), jnp.float32, -bound, bound)
        return w, b

    w1, b1 = conv_init(ks[0], ks[1], (C1, C_IN, KH, KW))
    w2, b2 = conv_init(ks[2], ks[3], (C2, C1, 1, 1))
    w3, b3 = conv_init(ks[4], ks[5], (1, C2, 1, 1))
    return dict(
        w1=w1, b1=b1, w2=w2, b2=b2, w3=w3, b3=b3,
        g1=jnp.ones((C1,), jnp.float32), be1=jnp.zeros((C1,), jnp.float32),
        g2=jnp.ones((C2,), jnp.float32), be2=jnp.zeros((C2,), jnp.float32),
    )


# ------------------------------ pure-JAX reference -----------------------------
def reference_forward(x, p):
    def conv(y, w, b, s):
        y = jax.lax.conv_general_dilated(
            y, w, (s, s), "VALID", dimension_numbers=("NCHW", "OIHW", "NCHW"))
        return y + b.reshape(1, -1, 1, 1)

    def bn_lrelu(y, g, be):
        mean = y.mean(axis=(0, 2, 3), keepdims=True)
        var = ((y - mean) ** 2).mean(axis=(0, 2, 3), keepdims=True)
        y = (y - mean) / jnp.sqrt(var + EPS) * g.reshape(1, -1, 1, 1) + be.reshape(1, -1, 1, 1)
        return jnp.where(y > 0, y, NEG_SLOPE * y)

    y = bn_lrelu(conv(x, p["w1"], p["b1"], STRIDE), p["g1"], p["be1"])
    y = bn_lrelu(conv(y, p["w2"], p["b2"], 1), p["g2"], p["be2"])
    y = jax.nn.sigmoid(conv(y, p["w3"], p["b3"], 1))
    return y.reshape(-1, 1).squeeze(1)


if __name__ == "__main__":
    key = jax.random.PRNGKey(0)
    k_x, k_p = jax.random.split(key)
    # Module-consistent input: ResNet layer4 features are (N, 2048, 7, 7).
    x = jax.random.normal(k_x, (2, C_IN, 7, 7), jnp.float32)
    params = init_params(k_p)

    nsplit = _detect_nsplit()
    out = None
    if nsplit == 2:
        try:
            kp = prepare_kernel_params(params, 2)
            out = jax.block_until_ready(netd_resnet_forward(x, kp, nsplit=2))
        except Exception:
            nsplit = 1   # fall back to the single-core fused path
    if out is None:
        kp = prepare_kernel_params(params, 1)
        out = jax.block_until_ready(netd_resnet_forward(x, kp, nsplit=1))

    ref = jax.block_until_ready(reference_forward(x, params))

    assert out.shape == ref.shape == (2 * 3 * 3,)
    # bf16 streaming of A/W1 (f32 accumulate) adds ~1e-3-level error at the
    # sigmoid output vs the f32 reference.
    assert jnp.allclose(out, ref, atol=1e-2, rtol=1e-2), (out, ref)
    print("KERNEL_OK")
</pallas_src>

<mosaic_0001>
module attributes {stable_mosaic.version = 11 : i64} {
  func.func @_fused_kernel(%arg0: i32, %arg1: memref<18x9216xbf16, #tpu.memory_space<vmem>>, %arg2: memref<1x9216x512xbf16, #tpu.memory_space<vmem>>, %arg3: memref<1x512xf32, #tpu.memory_space<vmem>>, %arg4: memref<1x512xf32, #tpu.memory_space<vmem>>, %arg5: memref<512x256xf32, #tpu.memory_space<vmem>>, %arg6: memref<1x256xf32, #tpu.memory_space<vmem>>, %arg7: memref<1x256xf32, #tpu.memory_space<vmem>>, %arg8: memref<1x256xf32, #tpu.memory_space<vmem>>, %arg9: memref<1x1xf32, #tpu.memory_space<vmem>>, %arg10: memref<18x1xf32, #tpu.memory_space<vmem>>, %arg11: memref<18x512xf32, #tpu.memory_space<vmem>>) attributes {dimension_semantics = [#tpu.dimension_semantics<arbitrary>], iteration_bounds = array<i64: 2>, scalar_prefetch = 0 : i64, scratch_operands = 1 : i64, tpu.core_type = #tpu.core_type<tc>, window_params = [{transform_indices = @transform_0, window_bounds = array<i64: 18, 9216>}, {transform_indices = @transform_1, window_bounds = array<i64: 1, 9216, 512>}, {pipeline_mode = #tpu.pipeline_mode<synchronous>, transform_indices = @transform_2, window_bounds = array<i64: 1, 512>}, {pipeline_mode = #tpu.pipeline_mode<synchronous>, transform_indices = @transform_3, window_bounds = array<i64: 1, 512>}, {pipeline_mode = #tpu.pipeline_mode<synchronous>, transform_indices = @transform_4, window_bounds = array<i64: 512, 256>}, {pipeline_mode = #tpu.pipeline_mode<synchronous>, transform_indices = @transform_5, window_bounds = array<i64: 1, 256>}, {pipeline_mode = #tpu.pipeline_mode<synchronous>, transform_indices = @transform_6, window_bounds = array<i64: 1, 256>}, {pipeline_mode = #tpu.pipeline_mode<synchronous>, transform_indices = @transform_7, window_bounds = array<i64: 1, 256>}, {pipeline_mode = #tpu.pipeline_mode<synchronous>, transform_indices = @transform_8, window_bounds = array<i64: 1, 1>}, {pipeline_mode = #tpu.pipeline_mode<synchronous>, transform_indices = @transform_9, window_bounds = array<i64: 18, 1>}]} {
    %c0_i32 = arith.constant 0 : i32
    %0 = arith.cmpi eq, %arg0, %c0_i32 : i32
    %1 = arith.extui %0 : i1 to i32
    %c0_i32_0 = arith.constant 0 : i32
    %2 = arith.cmpi ne, %1, %c0_i32_0 : i32
    scf.if %2 {
      %cst_10 = arith.constant 0.000000e+00 : f32
      %13 = vector.broadcast %cst_10 : f32 to vector<18x512xf32>
      %c0_11 = arith.constant 0 : index
      %c0_12 = arith.constant 0 : index
      %14 = vector.load %arg11[%c0_11, %c0_12] : memref<18x512xf32, #tpu.memory_space<vmem>>, vector<18x512xf32>
      tpu.vector_store %arg11[%c0_11, %c0_12], %13 {strides = array<i32>} : memref<18x512xf32, #tpu.memory_space<vmem>>, vector<18x512xf32>,
    } else {
    }
    %c0 = arith.constant 0 : index
    %c0_1 = arith.constant 0 : index
    %3 = vector.load %arg11[%c0, %c0_1] : memref<18x512xf32, #tpu.memory_space<vmem>>, vector<18x512xf32>
    %c0_2 = arith.constant 0 : index
    %c0_3 = arith.constant 0 : index
    %4 = vector.load %arg1[%c0_2, %c0_3] : memref<18x9216xbf16, #tpu.memory_space<vmem>>, vector<18x9216xbf16>
    %c0_4 = arith.constant 0 : index
    %c0_5 = arith.constant 0 : index
    %c0_6 = arith.constant 0 : index
    %5 = vector.load %arg2[%c0_4, %c0_5, %c0_6] : memref<1x9216x512xbf16, #tpu.memory_space<vmem>>, vector<1x9216x512xbf16>
    %6 = vector.shape_cast %5 : vector<1x9216x512xbf16> to vector<9216x512xbf16>
    %cst = arith.constant dense<0.000000e+00> : vector<18x512xf32>
    %7 = tpu.matmul %4, %6, %cst {dimension_numbers = #tpu.dot_dimension_numbers<[1], [0], [0], [1], [0, 0, 1, 1], [], []>} : vector<18x9216xbf16>, vector<9216x512xbf16>, vector<18x512xf32> -> vector<18x512xf32>
    %8 = arith.addf %3, %7 : vector<18x512xf32>
    %c0_7 = arith.constant 0 : index
    %c0_8 = arith.constant 0 : index
    %9 = vector.load %arg11[%c0_7, %c0_8] : memref<18x512xf32, #tpu.memory_space<vmem>>, vector<18x512xf32>
    tpu.vector_store %arg11[%c0_7, %c0_8], %8 {strides = array<i32>} : memref<18x512xf32, #tpu.memory_space<vmem>>, vector<18x512xf32>,
    %c1_i32 = arith.constant 1 : i32
    %10 = arith.cmpi eq, %arg0, %c1_i32 : i32
    %11 = arith.extui %10 : i1 to i32
    %c0_i32_9 = arith.constant 0 : i32
    %12 = arith.cmpi ne, %11, %c0_i32_9 : i32
    scf.if %12 {
      %c0_10 = arith.constant 0 : index
      %c0_11 = arith.constant 0 : index
      %13 = vector.load %arg11[%c0_10, %c0_11] : memref<18x512xf32, #tpu.memory_space<vmem>>, vector<18x512xf32>
      %cst_12 = arith.constant dense<0.000000e+00> : vector<512xf32>
      %14 = vector.multi_reduction <add>, %13, %cst_12 [0] : vector<18x512xf32> to vector<512xf32>
      %15 = vector.shape_cast %14 : vector<512xf32> to vector<1x512xf32>
      %cst_13 = arith.constant 1.800000e+01 : f32
      %16 = vector.broadcast %cst_13 : f32 to vector<1x512xf32>
      %17 = arith.divf %15, %16 : vector<1x512xf32>
      %18 = vector.broadcast %17 : vector<1x512xf32> to vector<18x512xf32>
      %19 = arith.subf %13, %18 : vector<18x512xf32>
      %20 = arith.mulf %19, %19 : vector<18x512xf32>
      %cst_14 = arith.constant dense<0.000000e+00> : vector<512xf32>
      %21 = vector.multi_reduction <add>, %20, %cst_14 [0] : vector<18x512xf32> to vector<512xf32>
      %22 = vector.shape_cast %21 : vector<512xf32> to vector<1x512xf32>
      %cst_15 = arith.constant 1.800000e+01 : f32
      %23 = vector.broadcast %cst_15 : f32 to vector<1x512xf32>
      %24 = arith.divf %22, %23 : vector<1x512xf32>
      %25 = vector.broadcast %17 : vector<1x512xf32> to vector<18x512xf32>
      %26 = arith.subf %13, %25 : vector<18x512xf32>
      %cst_16 = arith.constant 9.99999974E-6 : f32
      %27 = vector.broadcast %cst_16 : f32 to vector<1x512xf32>
      %28 = arith.addf %24, %27 : vector<1x512xf32>
      %29 = math.rsqrt %28 : vector<1x512xf32>
      %30 = vector.broadcast %29 : vector<1x512xf32> to vector<18x512xf32>
      %31 = arith.mulf %26, %30 : vector<18x512xf32>
      %c0_17 = arith.constant 0 : index
      %c0_18 = arith.constant 0 : index
      %32 = vector.load %arg3[%c0_17, %c0_18] : memref<1x512xf32, #tpu.memory_space<vmem>>, vector<1x512xf32>
      %33 = vector.broadcast %32 : vector<1x512xf32> to vector<18x512xf32>
      %34 = arith.mulf %31, %33 : vector<18x512xf32>
      %c0_19 = arith.constant 0 : index
      %c0_20 = arith.constant 0 : index
      %35 = vector.load %arg4[%c0_19, %c0_20] : memref<1x512xf32, #tpu.memory_space<vmem>>, vector<1x512xf32>
      %36 = vector.broadcast %35 : vector<1x512xf32> to vector<18x512xf32>
      %37 = arith.addf %34, %36 : vector<18x512xf32>
      %cst_21 = arith.constant 0.000000e+00 : f32
      %38 = vector.broadcast %cst_21 : f32 to vector<18x512xf32>
      %39 = arith.cmpf ogt, %37, %38 : vector<18x512xf32>
      %cst_22 = arith.constant 2.000000e-01 : f32
      %40 = vector.broadcast %cst_22 : f32 to vector<18x512xf32>
      %41 = arith.mulf %40, %37 : vector<18x512xf32>
      %42 = arith.select %39, %37, %41 : vector<18x512xi1>, vector<18x512xf32>
      %c0_23 = arith.constant 0 : index
      %c0_24 = arith.constant 0 : index
      %43 = vector.load %arg5[%c0_23, %c0_24] : memref<512x256xf32, #tpu.memory_space<vmem>>, vector<512x256xf32>
      %cst_25 = arith.constant dense<0.000000e+00> : vector<18x256xf32>
      %44 = tpu.matmul %42, %43, %cst_25 {dimension_numbers = #tpu.dot_dimension_numbers<[1], [0], [0], [1], [0, 0, 1, 1], [], []>} : vector<18x512xf32>, vector<512x256xf32>, vector<18x256xf32> -> vector<18x256xf32>
      %cst_26 = arith.constant dense<0.000000e+00> : vector<256xf32>
      %45 = vector.multi_reduction <add>, %44, %cst_26 [0] : vector<18x256xf32> to vector<256xf32>
      %46 = vector.shape_cast %45 : vector<256xf32> to vector<1x256xf32>
      %cst_27 = arith.constant 1.800000e+01 : f32
      %47 = vector.broadcast %cst_27 : f32 to vector<1x256xf32>
      %48 = arith.divf %46, %47 : vector<1x256xf32>
      %49 = vector.broadcast %48 : vector<1x256xf32> to vector<18x256xf32>
      %50 = arith.subf %44, %49 : vector<18x256xf32>
      %51 = arith.mulf %50, %50 : vector<18x256xf32>
      %cst_28 = arith.constant dense<0.000000e+00> : vector<256xf32>
      %52 = vector.multi_reduction <add>, %51, %cst_28 [0] : vector<18x256xf32> to vector<256xf32>
      %53 = vector.shape_cast %52 : vector<256xf32> to vector<1x256xf32>
      %cst_29 = arith.constant 1.800000e+01 : f32
      %54 = vector.broadcast %cst_29 : f32 to vector<1x256xf32>
      %55 = arith.divf %53, %54 : vector<1x256xf32>
      %56 = vector.broadcast %48 : vector<1x256xf32> to vector<18x256xf32>
      %57 = arith.subf %44, %56 : vector<18x256xf32>
      %cst_30 = arith.constant 9.99999974E-6 : f32
      %58 = vector.broadcast %cst_30 : f32 to vector<1x256xf32>
      %59 = arith.addf %55, %58 : vector<1x256xf32>
      %60 = math.rsqrt %59 : vector<1x256xf32>
      %61 = vector.broadcast %60 : vector<1x256xf32> to vector<18x256xf32>
      %62 = arith.mulf %57, %61 : vector<18x256xf32>
      %c0_31 = arith.constant 0 : index
      %c0_32 = arith.constant 0 : index
      %63 = vector.load %arg6[%c0_31, %c0_32] : memref<1x256xf32, #tpu.memory_space<vmem>>, vector<1x256xf32>
      %64 = vector.broadcast %63 : vector<1x256xf32> to vector<18x256xf32>
      %65 = arith.mulf %62, %64 : vector<18x256xf32>
      %c0_33 = arith.constant 0 : index
      %c0_34 = arith.constant 0 : index
      %66 = vector.load %arg7[%c0_33, %c0_34] : memref<1x256xf32, #tpu.memory_space<vmem>>, vector<1x256xf32>
      %67 = vector.broadcast %66 : vector<1x256xf32> to vector<18x256xf32>
      %68 = arith.addf %65, %67 : vector<18x256xf32>
      %cst_35 = arith.constant 0.000000e+00 : f32
      %69 = vector.broadcast %cst_35 : f32 to vector<18x256xf32>
      %70 = arith.cmpf ogt, %68, %69 : vector<18x256xf32>
      %cst_36 = arith.constant 2.000000e-01 : f32
      %71 = vector.broadcast %cst_36 : f32 to vector<18x256xf32>
      %72 = arith.mulf %71, %68 : vector<18x256xf32>
      %73 = arith.select %70, %68, %72 : vector<18x256xi1>, vector<18x256xf32>
      %c0_37 = arith.constant 0 : index
      %c0_38 = arith.constant 0 : index
      %74 = vector.load %arg8[%c0_37, %c0_38] : memref<1x256xf32, #tpu.memory_space<vmem>>, vector<1x256xf32>
      %75 = vector.broadcast %74 : vector<1x256xf32> to vector<18x256xf32>
      %76 = arith.mulf %73, %75 : vector<18x256xf32>
      %cst_39 = arith.constant dense<0.000000e+00> : vector<18xf32>
      %77 = vector.multi_reduction <add>, %76, %cst_39 [1] : vector<18x256xf32> to vector<18xf32>
      %78 = vector.shape_cast %77 : vector<18xf32> to vector<18x1xf32>
      %c0_40 = arith.constant 0 : index
      %c0_41 = arith.constant 0 : index
      %79 = vector.load %arg9[%c0_40, %c0_41] : memref<1x1xf32, #tpu.memory_space<vmem>>, vector<1x1xf32>
      %80 = vector.broadcast %79 : vector<1x1xf32> to vector<18x1xf32>
      %81 = arith.addf %78, %80 : vector<18x1xf32>
      %82 = arith.negf %81 : vector<18x1xf32>
      %83 = math.exp %82 : vector<18x1xf32>
      %cst_42 = arith.constant 1.000000e+00 : f32
      %84 = vector.broadcast %cst_42 : f32 to vector<18x1xf32>
      %85 = arith.addf %84, %83 : vector<18x1xf32>
      %86 = arith.divf %84, %85 : vector<18x1xf32>
      %c0_43 = arith.constant 0 : index
      %c0_44 = arith.constant 0 : index
      %87 = vector.load %arg10[%c0_43, %c0_44] : memref<18x1xf32, #tpu.memory_space<vmem>>, vector<18x1xf32>
      tpu.vector_store %arg10[%c0_43, %c0_44], %86 {strides = array<i32>} : memref<18x1xf32, #tpu.memory_space<vmem>>, vector<18x1xf32>,
    } else {
    }
    return
  }
  func.func @transform_0(%arg0: i32) -> (i32, i32) {
    %c0_i32 = arith.constant 0 : i32
    %c0_i32_0 = arith.constant 0 : i32
    return %c0_i32, %arg0 : i32, i32
  }
  func.func @transform_1(%arg0: i32) -> (i32, i32, i32) {
    %c0_i32 = arith.constant 0 : i32
    %c0_i32_0 = arith.constant 0 : i32
    %c0_i32_1 = arith.constant 0 : i32
    return %c0_i32, %arg0, %c0_i32_0 : i32, i32, i32
  }
  func.func @transform_2(%arg0: i32) -> (i32, i32) {
    %c0_i32 = arith.constant 0 : i32
    %c0_i32_0 = arith.constant 0 : i32
    %c0_i32_1 = arith.constant 0 : i32
    return %c0_i32, %c0_i32_0 : i32, i32
  }
  func.func @transform_3(%arg0: i32) -> (i32, i32) {
    %c0_i32 = arith.constant 0 : i32
    %c0_i32_0 = arith.constant 0 : i32
    %c0_i32_1 = arith.constant 0 : i32
    return %c0_i32, %c0_i32_0 : i32, i32
  }
  func.func @transform_4(%arg0: i32) -> (i32, i32) {
    %c0_i32 = arith.constant 0 : i32
    %c0_i32_0 = arith.constant 0 : i32
    %c0_i32_1 = arith.constant 0 : i32
    return %c0_i32, %c0_i32_0 : i32, i32
  }
  func.func @transform_5(%arg0: i32) -> (i32, i32) {
    %c0_i32 = arith.constant 0 : i32
    %c0_i32_0 = arith.constant 0 : i32
    %c0_i32_1 = arith.constant 0 : i32
    return %c0_i32, %c0_i32_0 : i32, i32
  }
  func.func @transform_6(%arg0: i32) -> (i32, i32) {
    %c0_i32 = arith.constant 0 : i32
    %c0_i32_0 = arith.constant 0 : i32
    %c0_i32_1 = arith.constant 0 : i32
    return %c0_i32, %c0_i32_0 : i32, i32
  }
  func.func @transform_7(%arg0: i32) -> (i32, i32) {
    %c0_i32 = arith.constant 0 : i32
    %c0_i32_0 = arith.constant 0 : i32
    %c0_i32_1 = arith.constant 0 : i32
    return %c0_i32, %c0_i32_0 : i32, i32
  }
  func.func @transform_8(%arg0: i32) -> (i32, i32) {
    %c0_i32 = arith.constant 0 : i32
    %c0_i32_0 = arith.constant 0 : i32
    %c0_i32_1 = arith.constant 0 : i32
    return %c0_i32, %c0_i32_0 : i32, i32
  }
  func.func @transform_9(%arg0: i32) -> (i32, i32) {
    %c0_i32 = arith.constant 0 : i32
    %c0_i32_0 = arith.constant 0 : i32
    %c0_i32_1 = arith.constant 0 : i32
    return %c0_i32, %c0_i32_0 : i32, i32
  }
}

</mosaic_0001>

<bundles_post_ra>
// kernel: netd_resnet_forward.1
= control target key start
LH: loop header
LB: loop body
LE: loop exit
PB: predicated region body
PF: predicated region fallthrough
CT: control target
= control target key end

     0   :  { %s30068_s0 = inlined_call_operand.vmem [shape: bf16[18,18432], index: 0, kind: input, shape index: {}]   ;;  %s30069_s1 = inlined_call_operand.vmem [shape: bf16[1,18432,512], index: 1, kind: input, shape index: {}]   ;;  %s30070_s2 = inlined_call_operand.vmem [shape: f32[1,512], index: 2, kind: input, shape index: {}]   ;;  %s30071_s3 = inlined_call_operand.vmem [shape: f32[1,512], index: 3, kind: input, shape index: {}]   ;;  %s30072_s4 = inlined_call_operand.vmem [shape: f32[512,256], index: 4, kind: input, shape index: {}]   ;;  %s30073_s5 = inlined_call_operand.vmem [shape: f32[1,256], index: 5, kind: input, shape index: {}]   ;;  %s30074_s6 = inlined_call_operand.vmem [shape: f32[1,256], index: 6, kind: input, shape index: {}]   ;;  %s30075_s7 = inlined_call_operand.vmem [shape: f32[1,256], index: 7, kind: input, shape index: {}]   ;;  %s30076_s8 = inlined_call_operand.<no memory space> [shape: f32[1,1], index: 8, kind: input, shape index: {}]   ;;  %s30077_s9 = inlined_call_operand.vmem [shape: f32[18,1], index: 9, kind: output, shape index: {}]  }
   0x1   :  { %v14_v0 = vstv %s30076_s8 }
   0x2   :  { %15 = vst [vmem:[#allocation3] sm:$0x1] %v14_v0 }
   0x3   :  { %s26148_s11 = smov 0   ;;  %s26150_s12 = smov 0  }
   0x4   :  { %s26152_s13 = smov 0  }
   0x5 LB: > { %s26164_s8 = sadd.s32 4294967295, %s26092_s13   ;;  %s26167_s14 = sadd.s32 1, %s26092_s13   ;;  %s26092_s13 = sphi %s26152_s13, %s30080_s13   ;;  %s26088_s12 = sphi %s26150_s12, %s30079_s12   ;;  %s26084_s11 = sphi %s26148_s11, %s30078_s11  }
   0x6   : > { %s25_s15 = ssub.s32 %s26092_s13, %s26167_s14  ;;  %s28_s16 = sadd.s32 1, %s26088_s12 }
   0x7   : > { %p26_p0 = scmp.eq.s32.totalorder %s25_s15, 0  ;;  %p35_p1 = scmp.ne.s32.totalorder %s26088_s12, %s26084_s11 }
   0x8   : > { %p36_p2 = scmp.eq.s32.totalorder %s26092_s13, 0  ;;  %p19614_p4 = scmp.ge.s32.totalorder %s26092_s13, 2 }
   0x9   : > { %s26176_s17 = scalar_select %p26_p0, %s26088_s12, %s28_s16  }
   0xa   : > { %p37_p3 = por %p36_p2, %p35_p1  ;;  %276 = sbr.rel (%p19614_p4) target bundleno = 76 (0x4c), region = 44 }
  0x11   : > { %279 = sbr.rel (!%p37_p3) target bundleno = 76 (0x4c), region = 48  ;;  %s281_s18 = sand.u32 (%p37_p3), 1, %s26088_s12  }
  0x12   : > { %s22075_s19 = smul.u32 (%p37_p3), 288, %s26092_s13 }
  0x13   : > { %s22491_s20 = smul.u32 (%p37_p3), 864, %s281_s18 }
  0x14   : > { %s26184_s23 = scalar_lea.vmem (%p37_p3), %s30068_s0, %s22075_s19 }
  0x15   : > { %v299_v1 = vld [vmem:[%s26184_s23] sm:$0xff] (%p37_p3)  ;;  %v301_v2 = vld [vmem:[%s26184_s23 + $0x8] sm:$0xff] (%p37_p3)  ;;  %v303_v3 = vld [vmem:[%s26184_s23 + $0x10] sm:$0xff] (%p37_p3)  ;;  %s26189_s24 = scalar_lea.vmem (%p37_p3), [#allocation4], %s22491_s20 }
  0x16   : > { %300 = vst [vmem:[%s26189_s24] sm:$0xff] (%p37_p3), %v299_v1  ;;  %302 = vst [vmem:[%s26189_s24 + $0x8] sm:$0xff] (%p37_p3), %v301_v2  ;;  %v305_v4 = vld [vmem:[%s26184_s23 + $0x18] sm:$0xff] (%p37_p3)  ;;  %v307_v5 = vld [vmem:[%s26184_s23 + $0x20] sm:$0xff] (%p37_p3) }
  0x17   : > { %304 = vst [vmem:[%s26189_s24 + $0x10] sm:$0xff] (%p37_p3), %v303_v3  ;;  %v309_v6 = vld [vmem:[%s26184_s23 + $0x28] sm:$0xff] (%p37_p3)  ;;  %306 = vst [vmem:[%s26189_s24 + $0x18] sm:$0xff] (%p37_p3), %v305_v4  ;;  %v311_v7 = vld [vmem:[%s26184_s23 + $0x30] sm:$0xff] (%p37_p3) }
  0x18   : > { %308 = vst [vmem:[%s26189_s24 + $0x20] sm:$0xff] %v307_v5  ;;  %310 = vst [vmem:[%s26189_s24 + $0x28] sm:$0xff] %v309_v6  ;;  %v313_v8 = vld [vmem:[%s26184_s23 + $0x38] sm:$0xff]  ;;  %v315_v9 = vld [vmem:[%s26184_s23 + $0x40] sm:$0xff] }
  0x19   : > { %312 = vst [vmem:[%s26189_s24 + $0x30] sm:$0xff] %v311_v7  ;;  %314 = vst [vmem:[%s26189_s24 + $0x38] sm:$0xff] %v313_v8  ;;  %v317_v10 = vld [vmem:[%s26184_s23 + $0x48] sm:$0xff]  ;;  %v319_v11 = vld [vmem:[%s26184_s23 + $0x50] sm:$0xff] }
  0x1a   : > { %316 = vst [vmem:[%s26189_s24 + $0x40] sm:$0xff] %v315_v9  ;;  %v321_v12 = vld [vmem:[%s26184_s23 + $0x58] sm:$0xff]  ;;  %318 = vst [vmem:[%s26189_s24 + $0x48] sm:$0xff] %v317_v10  ;;  %v323_v13 = vld [vmem:[%s26184_s23 + $0x60] sm:$0xff] }
  0x1b   : > { %320 = vst [vmem:[%s26189_s24 + $0x50] sm:$0xff] %v319_v11  ;;  %322 = vst [vmem:[%s26189_s24 + $0x58] sm:$0xff] %v321_v12  ;;  %v325_v14 = vld [vmem:[%s26184_s23 + $0x68] sm:$0xff]  ;;  %v327_v15 = vld [vmem:[%s26184_s23 + $0x70] sm:$0xff] }
  0x1c   : > { %324 = vst [vmem:[%s26189_s24 + $0x60] sm:$0xff] %v323_v13  ;;  %326 = vst [vmem:[%s26189_s24 + $0x68] sm:$0xff] %v325_v14  ;;  %v329_v16 = vld [vmem:[%s26184_s23 + $0x78] sm:$0xff]  ;;  %v331_v17 = vld [vmem:[%s26184_s23 + $0x80] sm:$0xff] }
  0x1d   : > { %328 = vst [vmem:[%s26189_s24 + $0x70] sm:$0xff] %v327_v15  ;;  %v333_v18 = vld [vmem:[%s26184_s23 + $0x88] sm:$0xff]  ;;  %330 = vst [vmem:[%s26189_s24 + $0x78] sm:$0xff] %v329_v16  ;;  %v335_v19 = vld [vmem:[%s26184_s23 + $0x90] sm:$0xff] }
  0x1e   : > { %332 = vst [vmem:[%s26189_s24 + $0x80] sm:$0xff] %v331_v17  ;;  %334 = vst [vmem:[%s26189_s24 + $0x88] sm:$0xff] %v333_v18  ;;  %v337_v20 = vld [vmem:[%s26184_s23 + $0x98] sm:$0xff]  ;;  %v339_v21 = vld [vmem:[%s26184_s23 + $0xa0] sm:$0xff] }
  0x1f   : > { %336 = vst [vmem:[%s26189_s24 + $0x90] sm:$0xff] %v335_v19  ;;  %338 = vst [vmem:[%s26189_s24 + $0x98] sm:$0xff] %v337_v20  ;;  %v341_v22 = vld [vmem:[%s26184_s23 + $0xa8] sm:$0xff]  ;;  %v343_v23 = vld [vmem:[%s26184_s23 + $0xb0] sm:$0xff] }
  0x20   : > { %340 = vst [vmem:[%s26189_s24 + $0xa0] sm:$0xff] %v339_v21  ;;  %v345_v24 = vld [vmem:[%s26184_s23 + $0xb8] sm:$0xff]  ;;  %342 = vst [vmem:[%s26189_s24 + $0xa8] sm:$0xff] %v341_v22  ;;  %v347_v25 = vld [vmem:[%s26184_s23 + $0xc0] sm:$0xff] }
  0x21   : > { %344 = vst [vmem:[%s26189_s24 + $0xb0] sm:$0xff] %v343_v23  ;;  %346 = vst [vmem:[%s26189_s24 + $0xb8] sm:$0xff] %v345_v24  ;;  %v349_v26 = vld [vmem:[%s26184_s23 + $0xc8] sm:$0xff]  ;;  %v351_v27 = vld [vmem:[%s26184_s23 + $0xd0] sm:$0xff] }
  0x22   : > { %348 = vst [vmem:[%s26189_s24 + $0xc0] sm:$0xff] %v347_v25  ;;  %350 = vst [vmem:[%s26189_s24 + $0xc8] sm:$0xff] %v349_v26  ;;  %v353_v28 = vld [vmem:[%s26184_s23 + $0xd8] sm:$0xff]  ;;  %v355_v29 = vld [vmem:[%s26184_s23 + $0xe0] sm:$0xff] }
  0x23   : > { %352 = vst [vmem:[%s26189_s24 + $0xd0] sm:$0xff] %v351_v27  ;;  %v357_v30 = vld [vmem:[%s26184_s23 + $0xe8] sm:$0xff]  ;;  %354 = vst [vmem:[%s26189_s24 + $0xd8] sm:$0xff] %v353_v28  ;;  %v359_v31 = vld [vmem:[%s26184_s23 + $0xf0] sm:$0xff] }
  0x24   : > { %356 = vst [vmem:[%s26189_s24 + $0xe0] sm:$0xff] %v355_v29  ;;  %358 = vst [vmem:[%s26189_s24 + $0xe8] sm:$0xff] %v357_v30  ;;  %v361_v32 = vld [vmem:[%s26184_s23 + $0xf8] sm:$0xff]  ;;  %v363_v33 = vld [vmem:[%s26184_s23 + $0x100] sm:$0xff] }
  0x25   : > { %360 = vst [vmem:[%s26189_s24 + $0xf0] sm:$0xff] %v359_v31  ;;  %362 = vst [vmem:[%s26189_s24 + $0xf8] sm:$0xff] %v361_v32  ;;  %v365_v34 = vld [vmem:[%s26184_s23 + $0x108] sm:$0xff]  ;;  %v367_v35 = vld [vmem:[%s26184_s23 + $0x110] sm:$0xff] }
  0x26   : > { %364 = vst [vmem:[%s26189_s24 + $0x100] sm:$0xff] %v363_v33  ;;  %v369_v36 = vld [vmem:[%s26184_s23 + $0x118] sm:$0xff]  ;;  %366 = vst [vmem:[%s26189_s24 + $0x108] sm:$0xff] %v365_v34  ;;  %v371_v37 = vld [vmem:[%s26184_s23 + $0x240] sm:$0xff] }
  0x27   : > { %368 = vst [vmem:[%s26189_s24 + $0x110] sm:$0xff] %v367_v35  ;;  %370 = vst [vmem:[%s26189_s24 + $0x118] sm:$0xff] %v369_v36  ;;  %v373_v38 = vld [vmem:[%s26184_s23 + $0x248] sm:$0xff]  ;;  %v375_v39 = vld [vmem:[%s26184_s23 + $0x250] sm:$0xff] }
  0x28   : > { %372 = vst [vmem:[%s26189_s24 + $0x120] sm:$0xff] %v371_v37  ;;  %374 = vst [vmem:[%s26189_s24 + $0x128] sm:$0xff] %v373_v38  ;;  %v377_v40 = vld [vmem:[%s26184_s23 + $0x258] sm:$0xff]  ;;  %v379_v41 = vld [vmem:[%s26184_s23 + $0x260] sm:$0xff] }
  0x29   : > { %376 = vst [vmem:[%s26189_s24 + $0x130] sm:$0xff] %v375_v39  ;;  %v381_v42 = vld [vmem:[%s26184_s23 + $0x268] sm:$0xff]  ;;  %378 = vst [vmem:[%s26189_s24 + $0x138] sm:$0xff] %v377_v40  ;;  %v383_v43 = vld [vmem:[%s26184_s23 + $0x270] sm:$0xff] }
  0x2a   : > { %380 = vst [vmem:[%s26189_s24 + $0x140] sm:$0xff] %v379_v41  ;;  %382 = vst [vmem:[%s26189_s24 + $0x148] sm:$0xff] %v381_v42  ;;  %v385_v44 = vld [vmem:[%s26184_s23 + $0x278] sm:$0xff]  ;;  %v387_v45 = vld [vmem:[%s26184_s23 + $0x280] sm:$0xff] }
  0x2b   : > { %384 = vst [vmem:[%s26189_s24 + $0x150] sm:$0xff] %v383_v43  ;;  %386 = vst [vmem:[%s26189_s24 + $0x158] sm:$0xff] %v385_v44  ;;  %v389_v46 = vld [vmem:[%s26184_s23 + $0x288] sm:$0xff]  ;;  %v391_v47 = vld [vmem:[%s26184_s23 + $0x290] sm:$0xff] }
  0x2c   : > { %388 = vst [vmem:[%s26189_s24 + $0x160] sm:$0xff] %v387_v45  ;;  %v393_v48 = vld [vmem:[%s26184_s23 + $0x298] sm:$0xff]  ;;  %390 = vst [vmem:[%s26189_s24 + $0x168] sm:$0xff] %v389_v46  ;;  %v395_v49 = vld [vmem:[%s26184_s23 + $0x2a0] sm:$0xff] }
  0x2d   : > { %392 = vst [vmem:[%s26189_s24 + $0x170] sm:$0xff] %v391_v47  ;;  %394 = vst [vmem:[%s26189_s24 + $0x178] sm:$0xff] %v393_v48  ;;  %v397_v50 = vld [vmem:[%s26184_s23 + $0x2a8] sm:$0xff]  ;;  %v399_v51 = vld [vmem:[%s26184_s23 + $0x2b0] sm:$0xff] }
  0x2e   : > { %396 = vst [vmem:[%s26189_s24 + $0x180] sm:$0xff] %v395_v49  ;;  %398 = vst [vmem:[%s26189_s24 + $0x188] sm:$0xff] %v397_v50  ;;  %v401_v52 = vld [vmem:[%s26184_s23 + $0x2b8] sm:$0xff]  ;;  %v403_v53 = vld [vmem:[%s26184_s23 + $0x2c0] sm:$0xff] }
  0x2f   : > { %400 = vst [vmem:[%s26189_s24 + $0x190] sm:$0xff] %v399_v51  ;;  %v405_v54 = vld [vmem:[%s26184_s23 + $0x2c8] sm:$0xff]  ;;  %402 = vst [vmem:[%s26189_s24 + $0x198] sm:$0xff] %v401_v52  ;;  %v407_v55 = vld [vmem:[%s26184_s23 + $0x2d0] sm:$0xff] }
  0x30   : > { %404 = vst [vmem:[%s26189_s24 + $0x1a0] sm:$0xff] %v403_v53  ;;  %406 = vst [vmem:[%s26189_s24 + $0x1a8] sm:$0xff] %v405_v54  ;;  %v409_v56 = vld [vmem:[%s26184_s23 + $0x2d8] sm:$0xff]  ;;  %v411_v57 = vld [vmem:[%s26184_s23 + $0x2e0] sm:$0xff] }
  0x31   : > { %408 = vst [vmem:[%s26189_s24 + $0x1b0] sm:$0xff] %v407_v55  ;;  %410 = vst [vmem:[%s26189_s24 + $0x1b8] sm:$0xff] %v409_v56  ;;  %v413_v58 = vld [vmem:[%s26184_s23 + $0x2e8] sm:$0xff]  ;;  %v415_v59 = vld [vmem:[%s26184_s23 + $0x2f0] sm:$0xff] }
  0x32   : > { %412 = vst [vmem:[%s26189_s24 + $0x1c0] sm:$0xff] %v411_v57  ;;  %v417_v60 = vld [vmem:[%s26184_s23 + $0x2f8] sm:$0xff]  ;;  %414 = vst [vmem:[%s26189_s24 + $0x1c8] sm:$0xff] %v413_v58  ;;  %v419_v61 = vld [vmem:[%s26184_s23 + $0x300] sm:$0xff] }
  0x33   : > { %416 = vst [vmem:[%s26189_s24 + $0x1d0] sm:$0xff] %v415_v59  ;;  %418 = vst [vmem:[%s26189_s24 + $0x1d8] sm:$0xff] %v417_v60  ;;  %v421_v62 = vld [vmem:[%s26184_s23 + $0x308] sm:$0xff]  ;;  %v423_v63 = vld [vmem:[%s26184_s23 + $0x310] sm:$0xff] }
  0x34   : > { %420 = vst [vmem:[%s26189_s24 + $0x1e0] sm:$0xff] %v419_v61  ;;  %422 = vst [vmem:[%s26189_s24 + $0x1e8] sm:$0xff] %v421_v62  ;;  %v425_v0 = vld [vmem:[%s26184_s23 + $0x318] sm:$0xff]  ;;  %v427_v1 = vld [vmem:[%s26184_s23 + $0x320] sm:$0xff] }
  0x35   : > { %424 = vst [vmem:[%s26189_s24 + $0x1f0] sm:$0xff] %v423_v63  ;;  %v429_v2 = vld [vmem:[%s26184_s23 + $0x328] sm:$0xff]  ;;  %426 = vst [vmem:[%s26189_s24 + $0x1f8] sm:$0xff] %v425_v0  ;;  %v431_v3 = vld [vmem:[%s26184_s23 + $0x330] sm:$0xff] }
  0x36   : > { %428 = vst [vmem:[%s26189_s24 + $0x200] sm:$0xff] %v427_v1  ;;  %430 = vst [vmem:[%s26189_s24 + $0x208] sm:$0xff] %v429_v2  ;;  %v433_v4 = vld [vmem:[%s26184_s23 + $0x338] sm:$0xff]  ;;  %v435_v5 = vld [vmem:[%s26184_s23 + $0x340] sm:$0xff] }
  0x37   : > { %432 = vst [vmem:[%s26189_s24 + $0x210] sm:$0xff] %v431_v3  ;;  %434 = vst [vmem:[%s26189_s24 + $0x218] sm:$0xff] %v433_v4  ;;  %v437_v6 = vld [vmem:[%s26184_s23 + $0x348] sm:$0xff]  ;;  %v439_v7 = vld [vmem:[%s26184_s23 + $0x350] sm:$0xff] }
  0x38   : > { %436 = vst [vmem:[%s26189_s24 + $0x220] sm:$0xff] %v435_v5  ;;  %v441_v8 = vld [vmem:[%s26184_s23 + $0x358] sm:$0xff]  ;;  %438 = vst [vmem:[%s26189_s24 + $0x228] sm:$0xff] %v437_v6  ;;  %v443_v9 = vld [vmem:[%s26184_s23 + $0x480] sm:$0xff] }
  0x39   : > { %440 = vst [vmem:[%s26189_s24 + $0x230] sm:$0xff] %v439_v7  ;;  %442 = vst [vmem:[%s26189_s24 + $0x238] sm:$0xff] %v441_v8  ;;  %v445_v10 = vld [vmem:[%s26184_s23 + $0x488] sm:$0xff]  ;;  %v447_v11 = vld [vmem:[%s26184_s23 + $0x490] sm:$0xff] }
  0x3a   : > { %444 = vst [vmem:[%s26189_s24 + $0x240] sm:$0xff] %v443_v9  ;;  %446 = vst [vmem:[%s26189_s24 + $0x248] sm:$0xff] %v445_v10  ;;  %v449_v12 = vld [vmem:[%s26184_s23 + $0x498] sm:$0xff]  ;;  %v451_v13 = vld [vmem:[%s26184_s23 + $0x4a0] sm:$0xff] }
  0x3b   : > { %448 = vst [vmem:[%s26189_s24 + $0x250] sm:$0xff] %v447_v11  ;;  %v453_v14 = vld [vmem:[%s26184_s23 + $0x4a8] sm:$0xff]  ;;  %450 = vst [vmem:[%s26189_s24 + $0x258] sm:$0xff] %v449_v12  ;;  %v455_v15 = vld [vmem:[%s26184_s23 + $0x4b0] sm:$0xff] }
  0x3c   : > { %452 = vst [vmem:[%s26189_s24 + $0x260] sm:$0xff] %v451_v13  ;;  %454 = vst [vmem:[%s26189_s24 + $0x268] sm:$0xff] %v453_v14  ;;  %v457_v16 = vld [vmem:[%s26184_s23 + $0x4b8] sm:$0xff]  ;;  %v459_v17 = vld [vmem:[%s26184_s23 + $0x4c0] sm:$0xff] }
  0x3d   : > { %456 = vst [vmem:[%s26189_s24 + $0x270] sm:$0xff] %v455_v15  ;;  %458 = vst [vmem:[%s26189_s24 + $0x278] sm:$0xff] %v457_v16  ;;  %v461_v18 = vld [vmem:[%s26184_s23 + $0x4c8] sm:$0xff]  ;;  %v463_v19 = vld [vmem:[%s26184_s23 + $0x4d0] sm:$0xff] }
  0x3e   : > { %460 = vst [vmem:[%s26189_s24 + $0x280] sm:$0xff] %v459_v17  ;;  %v465_v20 = vld [vmem:[%s26184_s23 + $0x4d8] sm:$0xff]  ;;  %462 = vst [vmem:[%s26189_s24 + $0x288] sm:$0xff] %v461_v18  ;;  %v467_v21 = vld [vmem:[%s26184_s23 + $0x4e0] sm:$0xff] }
  0x3f   : > { %464 = vst [vmem:[%s26189_s24 + $0x290] sm:$0xff] %v463_v19  ;;  %466 = vst [vmem:[%s26189_s24 + $0x298] sm:$0xff] %v465_v20  ;;  %v469_v22 = vld [vmem:[%s26184_s23 + $0x4e8] sm:$0xff]  ;;  %v471_v23 = vld [vmem:[%s26184_s23 + $0x4f0] sm:$0xff] }
  0x40   : > { %468 = vst [vmem:[%s26189_s24 + $0x2a0] sm:$0xff] %v467_v21  ;;  %470 = vst [vmem:[%s26189_s24 + $0x2a8] sm:$0xff] %v469_v22  ;;  %v473_v24 = vld [vmem:[%s26184_s23 + $0x4f8] sm:$0xff]  ;;  %v475_v25 = vld [vmem:[%s26184_s23 + $0x500] sm:$0xff] }
  0x41   : > { %472 = vst [vmem:[%s26189_s24 + $0x2b0] sm:$0xff] %v471_v23  ;;  %v477_v26 = vld [vmem:[%s26184_s23 + $0x508] sm:$0xff]  ;;  %474 = vst [vmem:[%s26189_s24 + $0x2b8] sm:$0xff] %v473_v24  ;;  %v479_v27 = vld [vmem:[%s26184_s23 + $0x510] sm:$0xff] }
  0x42   : > { %476 = vst [vmem:[%s26189_s24 + $0x2c0] sm:$0xff] %v475_v25  ;;  %478 = vst [vmem:[%s26189_s24 + $0x2c8] sm:$0xff] %v477_v26  ;;  %v481_v28 = vld [vmem:[%s26184_s23 + $0x518] sm:$0xff]  ;;  %v483_v29 = vld [vmem:[%s26184_s23 + $0x520] sm:$0xff] }
  0x43   : > { %480 = vst [vmem:[%s26189_s24 + $0x2d0] sm:$0xff] %v479_v27  ;;  %482 = vst [vmem:[%s26189_s24 + $0x2d8] sm:$0xff] %v481_v28  ;;  %v485_v30 = vld [vmem:[%s26184_s23 + $0x528] sm:$0xff]  ;;  %v487_v31 = vld [vmem:[%s26184_s23 + $0x530] sm:$0xff] }
  0x44   : > { %484 = vst [vmem:[%s26189_s24 + $0x2e0] sm:$0xff] %v483_v29  ;;  %v489_v32 = vld [vmem:[%s26184_s23 + $0x538] sm:$0xff]  ;;  %486 = vst [vmem:[%s26189_s24 + $0x2e8] sm:$0xff] %v485_v30  ;;  %v491_v33 = vld [vmem:[%s26184_s23 + $0x540] sm:$0xff] }
  0x45   : > { %488 = vst [vmem:[%s26189_s24 + $0x2f0] sm:$0xff] %v487_v31  ;;  %490 = vst [vmem:[%s26189_s24 + $0x2f8] sm:$0xff] %v489_v32  ;;  %v493_v34 = vld [vmem:[%s26184_s23 + $0x548] sm:$0xff]  ;;  %v495_v35 = vld [vmem:[%s26184_s23 + $0x550] sm:$0xff] }
  0x46   : > { %492 = vst [vmem:[%s26189_s24 + $0x300] sm:$0xff] %v491_v33  ;;  %494 = vst [vmem:[%s26189_s24 + $0x308] sm:$0xff] %v493_v34  ;;  %v497_v36 = vld [vmem:[%s26184_s23 + $0x558] sm:$0xff]  ;;  %v499_v37 = vld [vmem:[%s26184_s23 + $0x560] sm:$0xff] }
  0x47   : > { %496 = vst [vmem:[%s26189_s24 + $0x310] sm:$0xff] %v495_v35  ;;  %v501_v38 = vld [vmem:[%s26184_s23 + $0x568] sm:$0xff]  ;;  %498 = vst [vmem:[%s26189_s24 + $0x318] sm:$0xff] %v497_v36  ;;  %v503_v39 = vld [vmem:[%s26184_s23 + $0x570] sm:$0xff] }
  0x48   : > { %500 = vst [vmem:[%s26189_s24 + $0x320] sm:$0xff] %v499_v37  ;;  %502 = vst [vmem:[%s26189_s24 + $0x328] sm:$0xff] %v501_v38  ;;  %v505_v40 = vld [vmem:[%s26184_s23 + $0x578] sm:$0xff]  ;;  %v507_v41 = vld [vmem:[%s26184_s23 + $0x580] sm:$0xff] }
  0x49   : > { %504 = vst [vmem:[%s26189_s24 + $0x330] sm:$0xff] %v503_v39  ;;  %506 = vst [vmem:[%s26189_s24 + $0x338] sm:$0xff] %v505_v40  ;;  %v509_v42 = vld [vmem:[%s26184_s23 + $0x588] sm:$0xff]  ;;  %v511_v43 = vld [vmem:[%s26184_s23 + $0x590] sm:$0xff] }
  0x4a   : > { %508 = vst [vmem:[%s26189_s24 + $0x340] sm:$0xff] %v507_v41  ;;  %v513_v44 = vld [vmem:[%s26184_s23 + $0x598] sm:$0xff]  ;;  %510 = vst [vmem:[%s26189_s24 + $0x348] sm:$0xff] %v509_v42 }
  0x4b   : > { %512 = vst [vmem:[%s26189_s24 + $0x350] sm:$0xff] %v511_v43  ;;  %514 = vst [vmem:[%s26189_s24 + $0x358] sm:$0xff] %v513_v44 }
  0x4c PF: > { %p19616_p5 = scmp.ge.s32.totalorder %s26092_s13, 1  ;;  %p529_p6 = scmp.lt.s32.totalorder %s26092_s13, 3 }
  0x4e   : > { %p530_p7 = pnand %p19616_p5, %p529_p6 }
  0x4f   : > { %s536_s25 = sand.u32 (!%p530_p7), 1, %s26084_s11   ;;  %s573_s26 = smul.u32 (!%p530_p7), 1152, %s26164_s8 }
  0x50   : > { %533 = sbr.rel (%p530_p7) target bundleno = 3186 (0xc72), region = 75  ;;  %p19619_p9 = scmp.ne.s32.totalorder (!%p530_p7), %s26164_s8, 0 }
  0x51   : > { %s22492_s27 = smul.u32 (!%p530_p7), 864, %s536_s25  ;;  %p574_p8 = scmp.lt.s32.totalorder (!%p530_p7), %s573_s26, 2303 }
  0x53   : > { %s26413_s15 = scalar_lea.vmem (!%p530_p7), [#allocation4], %s22492_s27 }
  0x57   : > { %s30082_s26 = smov (!%p574_p8, %s573_s26), 2303  ;;  %583 = sbr.rel (%p19619_p9) target bundleno = 95 (0x5f), region = 83 }
  0x58   : > { %s22076_s28 = sshll.u32 %s30082_s26, 4  ;;  %v26094_v45 = vmov (!%p19619_p9), 0.0  }
  0x59   : > { %s26411_s10 = scalar_lea.vmem %s30069_s1, %s22076_s28  ;;  %584 = vst [vmem:[#allocation2] sm:$0xff] (!%p19619_p9), %v26094_v45  ;;  %585 = vst [vmem:[#allocation2 + $0x8] sm:$0xff] (!%p19619_p9), %v26094_v45 }
  0x5a   : > { %586 = vst [vmem:[#allocation2 + $0x10] sm:$0xff] (!%p19619_p9), %v26094_v45  ;;  %587 = vst [vmem:[#allocation2 + $0x18] sm:$0xff] (!%p19619_p9), %v26094_v45 }
  0x5b   : > { %588 = vst [vmem:[#allocation2 + $0x20] sm:$0xff] (!%p19619_p9), %v26094_v45  ;;  %589 = vst [vmem:[#allocation2 + $0x28] sm:$0xff] (!%p19619_p9), %v26094_v45 }
  0x5c   : > { %590 = vst [vmem:[#allocation2 + $0x30] sm:$0xff] (!%p19619_p9), %v26094_v45  ;;  %591 = vst [vmem:[#allocation2 + $0x38] sm:$0xff] (!%p19619_p9), %v26094_v45 }
  0x5d   : > { %592 = vst [vmem:[#allocation2 + $0x40] sm:$0x3] (!%p19619_p9), %v26094_v45  ;;  %593 = vst [vmem:[#allocation2 + $0x48] sm:$0x3] (!%p19619_p9), %v26094_v45 }
  0x5e   : > { %594 = vst [vmem:[#allocation2 + $0x50] sm:$0x3] %v26094_v45  ;;  %595 = vst [vmem:[#allocation2 + $0x58] sm:$0x3] %v26094_v45 }
  0x5f PF: > { %v22518_v46 = vld [vmem:[%s26411_s10 + $0x4] ss:$16 sps:$4 sm:$0xff]   ;;  %v22520_v47 = vld [vmem:[%s26411_s10 + $0xc] ss:$16 sps:$4 sm:$0xff]   ;;  %v22522_v48 = vld [vmem:[%s26411_s10] ss:$16 sps:$4 sm:$0xff]  }
  0x60   : > { %15152 = vmatprep.subr.bf16.mxu0 %v22518_v46  ;;  %v22523_v49 = vld [vmem:[%s26411_s10 + $0x8] ss:$16 sps:$4 sm:$0xff]   ;;  %16988 = vmatprep.subr.bf16.mxu1 %v22520_v47  ;;  %v22524_v50 = vld [vmem:[%s26411_s10 + $0x24] ss:$16 sps:$4 sm:$0xff]   ;;  %v22526_v51 = vld [vmem:[%s26411_s10 + $0x2c] ss:$16 sps:$4 sm:$0xff]  }
  0x61   : > { %15153 = vmatpush1.bf16.msra.mxu0 %v22522_v48  ;;  %16989 = vmatpush1.bf16.msra.mxu1 %v22523_v49  ;;  %v22528_v52 = vld [vmem:[%s26411_s10 + $0x20] ss:$16 sps:$4 sm:$0xff]   ;;  %v22529_v53 = vld [vmem:[%s26411_s10 + $0x28] ss:$16 sps:$4 sm:$0xff]   ;;  %v22530_v54 = vld [vmem:[%s26411_s10 + $0x44] ss:$16 sps:$4 sm:$0xff]  }
  0x62   : > { %15154 = vmatprep.subr.bf16.mxu0 %v22524_v50  ;;  %16990 = vmatprep.subr.bf16.mxu1 %v22526_v51  ;;  %v22532_v55 = vld [vmem:[%s26411_s10 + $0x4c] ss:$16 sps:$4 sm:$0xff]   ;;  %v22534_v56 = vld [vmem:[%s26411_s10 + $0x40] ss:$16 sps:$4 sm:$0xff]   ;;  %v22535_v57 = vld [vmem:[%s26411_s10 + $0x48] ss:$16 sps:$4 sm:$0xff]  }
  0x63   : > { %v22536_v58 = vld [vmem:[%s26411_s10 + $0x64] ss:$16 sps:$4 sm:$0xff]   ;;  %v22538_v59 = vld [vmem:[%s26411_s10 + $0x6c] ss:$16 sps:$4 sm:$0xff]   ;;  %v22540_v60 = vld [vmem:[%s26411_s10 + $0x60] ss:$16 sps:$4 sm:$0xff]  }
  0x64   : > { %v22541_v61 = vld [vmem:[%s26411_s10 + $0x68] ss:$16 sps:$4 sm:$0xff]   ;;  %v22542_v62 = vld [vmem:[%s26411_s10 + $0x84] ss:$16 sps:$4 sm:$0xff]   ;;  %v22544_v63 = vld [vmem:[%s26411_s10 + $0x8c] ss:$16 sps:$4 sm:$0xff]  }
  0x65   : > { %15155 = vmatpush1.bf16.msra.mxu0 %v22528_v52  ;;  %16991 = vmatpush1.bf16.msra.mxu1 %v22529_v53  ;;  %v22546_v0 = vld [vmem:[%s26411_s10 + $0x80] ss:$16 sps:$4 sm:$0xff]   ;;  %v22547_v1 = vld [vmem:[%s26411_s10 + $0x88] ss:$16 sps:$4 sm:$0xff]   ;;  %v22548_v2 = vld [vmem:[%s26411_s10 + $0xa4] ss:$16 sps:$4 sm:$0xff]  }
  0x66   : > { %15156 = vmatprep.subr.bf16.mxu0 %v22530_v54  ;;  %16992 = vmatprep.subr.bf16.mxu1 %v22532_v55  ;;  %v22550_v3 = vld [vmem:[%s26411_s10 + $0xac] ss:$16 sps:$4 sm:$0xff]   ;;  %v22552_v4 = vld [vmem:[%s26411_s10 + $0xa0] ss:$16 sps:$4 sm:$0xff]   ;;  %v22553_v5 = vld [vmem:[%s26411_s10 + $0xa8] ss:$16 sps:$4 sm:$0xff]  }
  0x67   : > { %v22554_v6 = vld [vmem:[%s26411_s10 + $0xc4] ss:$16 sps:$4 sm:$0xff]   ;;  %v22556_v7 = vld [vmem:[%s26411_s10 + $0xcc] ss:$16 sps:$4 sm:$0xff]   ;;  %v22558_v8 = vld [vmem:[%s26411_s10 + $0xc0] ss:$16 sps:$4 sm:$0xff]  }
  0x68   : > { %v22559_v9 = vld [vmem:[%s26411_s10 + $0xc8] ss:$16 sps:$4 sm:$0xff]   ;;  %v22560_v10 = vld [vmem:[%s26411_s10 + $0xe4] ss:$16 sps:$4 sm:$0xff]   ;;  %v22562_v11 = vld [vmem:[%s26411_s10 + $0xec] ss:$16 sps:$4 sm:$0xff]  }
  0x69   : > { %15157 = vmatpush1.bf16.msra.mxu0 %v22534_v56  ;;  %16993 = vmatpush1.bf16.msra.mxu1 %v22535_v57  ;;  %v22564_v12 = vld [vmem:[%s26411_s10 + $0xe0] ss:$16 sps:$4 sm:$0xff]   ;;  %v22565_v13 = vld [vmem:[%s26411_s10 + $0xe8] ss:$16 sps:$4 sm:$0xff]   ;;  %v22566_v14 = vld [vmem:[%s26411_s10 + $0x104] ss:$16 sps:$4 sm:$0xff]  }
  0x6a   : > { %15158 = vmatprep.subr.bf16.mxu0 %v22536_v58  ;;  %16994 = vmatprep.subr.bf16.mxu1 %v22538_v59  ;;  %v22568_v15 = vld [vmem:[%s26411_s10 + $0x10c] ss:$16 sps:$4 sm:$0xff]   ;;  %v22570_v16 = vld [vmem:[%s26411_s10 + $0x100] ss:$16 sps:$4 sm:$0xff]   ;;  %v22571_v17 = vld [vmem:[%s26411_s10 + $0x108] ss:$16 sps:$4 sm:$0xff]  }
  0x6b   : > { %v22572_v18 = vld [vmem:[%s26411_s10 + $0x124] ss:$16 sps:$4 sm:$0xff]   ;;  %v22574_v19 = vld [vmem:[%s26411_s10 + $0x12c] ss:$16 sps:$4 sm:$0xff]   ;;  %v22576_v20 = vld [vmem:[%s26411_s10 + $0x120] ss:$16 sps:$4 sm:$0xff]  }
  0x6c   : > { %v22577_v21 = vld [vmem:[%s26411_s10 + $0x128] ss:$16 sps:$4 sm:$0xff]   ;;  %v22578_v22 = vld [vmem:[%s26411_s10 + $0x144] ss:$16 sps:$4 sm:$0xff]   ;;  %v22580_v23 = vld [vmem:[%s26411_s10 + $0x14c] ss:$16 sps:$4 sm:$0xff]  }
  0x6d   : > { %15159 = vmatpush1.bf16.msra.mxu0 %v22540_v60  ;;  %16995 = vmatpush1.bf16.msra.mxu1 %v22541_v61  ;;  %v22582_v24 = vld [vmem:[%s26411_s10 + $0x140] ss:$16 sps:$4 sm:$0xff]   ;;  %v22583_v25 = vld [vmem:[%s26411_s10 + $0x148] ss:$16 sps:$4 sm:$0xff]   ;;  %v22584_v26 = vld [vmem:[%s26411_s10 + $0x164] ss:$16 sps:$4 sm:$0xff]  }
  0x6e   : > { %15160 = vmatprep.subr.bf16.mxu0 %v22542_v62  ;;  %16996 = vmatprep.subr.bf16.mxu1 %v22544_v63  ;;  %v22586_v27 = vld [vmem:[%s26411_s10 + $0x16c] ss:$16 sps:$4 sm:$0xff]   ;;  %v608_v28 = vld [vmem:[%s26413_s15] sm:$0xff]  ;;  %p22068_p10 = scmp.ne.s32.totalorder %s26164_s8, 1 }
  0x6f   : > { %v644_v29 = vld [vmem:[%s26413_s15 + $0x120] sm:$0xff]  ;;  %v22592_v34 = vld [vmem:[%s26411_s10 + $0x18c] ss:$16 sps:$4 sm:$0xff]   ;;  %vm18865_vm0 = vcmask (!%p22068_p10), 1041408  }
  0x70   : > { %v22588_v30 = vld [vmem:[%s26411_s10 + $0x160] ss:$16 sps:$4 sm:$0xff]   ;;  %v22589_v31 = vld [vmem:[%s26411_s10 + $0x168] ss:$16 sps:$4 sm:$0xff]   ;;  %v19621_v32 = vcombine.high %v608_v28, %v644_v29  ;;  %v22590_v33 = vld [vmem:[%s26411_s10 + $0x184] ss:$16 sps:$4 sm:$0xff]   ;;  %v19620_v51 = vcombine.low %v608_v28, %v644_v29 }
  0x71   : > { %15161 = vmatpush1.bf16.msra.mxu0 %v22546_v0  ;;  %16997 = vmatpush1.bf16.msra.mxu1 %v22547_v1  ;;  %v22594_v35 = vld [vmem:[%s26411_s10 + $0x180] ss:$16 sps:$4 sm:$0xff]   ;;  %v22595_v36 = vld [vmem:[%s26411_s10 + $0x188] ss:$16 sps:$4 sm:$0xff]   ;;  %v22596_v37 = vld [vmem:[%s26411_s10 + $0x1a4] ss:$16 sps:$4 sm:$0xff]  }
  0x72   : > { %15162 = vmatprep.subr.bf16.mxu0 %v22548_v2  ;;  %16998 = vmatprep.subr.bf16.mxu1 %v22550_v3  ;;  %v22598_v38 = vld [vmem:[%s26411_s10 + $0x1ac] ss:$16 sps:$4 sm:$0xff]   ;;  %v22600_v39 = vld [vmem:[%s26411_s10 + $0x1a0] ss:$16 sps:$4 sm:$0xff]   ;;  %v22601_v40 = vld [vmem:[%s26411_s10 + $0x1a8] ss:$16 sps:$4 sm:$0xff]  }
  0x73   : > { %15184 = vmatprep.mubr.bf16.mxu0 %v19621_v32  ;;  %17020 = vmatprep.mubr.bf16.mxu1 %v19621_v32  ;;  %v22602_v41 = vld [vmem:[%s26411_s10 + $0x1c4] ss:$16 sps:$4 sm:$0xff]   ;;  %v22604_v42 = vld [vmem:[%s26411_s10 + $0x1cc] ss:$16 sps:$4 sm:$0xff]   ;;  %v22606_v43 = vld [vmem:[%s26411_s10 + $0x1c0] ss:$16 sps:$4 sm:$0xff]  }
  0x74   : > { %v22607_v44 = vld [vmem:[%s26411_s10 + $0x1c8] ss:$16 sps:$4 sm:$0xff]   ;;  %v22608_v45 = vld [vmem:[%s26411_s10 + $0x1e4] ss:$16 sps:$4 sm:$0xff]   ;;  %v22610_v46 = vld [vmem:[%s26411_s10 + $0x1ec] ss:$16 sps:$4 sm:$0xff]  }
  0x75   : > { %15163 = vmatpush1.bf16.msra.mxu0 %v22552_v4  ;;  %16999 = vmatpush1.bf16.msra.mxu1 %v22553_v5  ;;  %v22612_v47 = vld [vmem:[%s26411_s10 + $0x1e0] ss:$16 sps:$4 sm:$0xff]   ;;  %v22613_v48 = vld [vmem:[%s26411_s10 + $0x1e8] ss:$16 sps:$4 sm:$0xff]   ;;  %v22616_v49 = vld [vmem:[%s26411_s10 + $0x204] ss:$16 sps:$4 sm:$0xff]  }
  0x76   : > { %15164 = vmatprep.subr.bf16.mxu0 %v22554_v6  ;;  %17000 = vmatprep.subr.bf16.mxu1 %v22556_v7  ;;  %v22619_v50 = vld [vmem:[%s26411_s10 + $0x20c] ss:$16 sps:$4 sm:$0xff]   ;;  %v22614_v52 = vld [vmem:[%s26411_s10 + $0x200] ss:$16 sps:$4 sm:$0xff]   ;;  %v22617_v53 = vld [vmem:[%s26411_s10 + $0x208] ss:$16 sps:$4 sm:$0xff]  }
  0x77   : > { %v22622_v54 = vld [vmem:[%s26411_s10 + $0x224] ss:$16 sps:$4 sm:$0xff]   ;;  %v22625_v55 = vld [vmem:[%s26411_s10 + $0x22c] ss:$16 sps:$4 sm:$0xff]   ;;  %v22620_v56 = vld [vmem:[%s26411_s10 + $0x220] ss:$16 sps:$4 sm:$0xff]  }
  0x78   : > { %v22623_v57 = vld [vmem:[%s26411_s10 + $0x228] ss:$16 sps:$4 sm:$0xff]   ;;  %v22628_v58 = vld [vmem:[%s26411_s10 + $0x244] ss:$16 sps:$4 sm:$0xff]   ;;  %v22631_v59 = vld [vmem:[%s26411_s10 + $0x24c] ss:$16 sps:$4 sm:$0xff]  }
  0x79   : > { %15165 = vmatpush1.bf16.msra.mxu0 %v22558_v8  ;;  %17001 = vmatpush1.bf16.msra.mxu1 %v22559_v9  ;;  %v22626_v60 = vld [vmem:[%s26411_s10 + $0x240] ss:$16 sps:$4 sm:$0xff]   ;;  %v22629_v61 = vld [vmem:[%s26411_s10 + $0x248] ss:$16 sps:$4 sm:$0xff]   ;;  %v22634_v62 = vld [vmem:[%s26411_s10 + $0x264] ss:$16 sps:$4 sm:$0xff]  }
  0x7a   : > { %15166 = vmatprep.subr.bf16.mxu0 %v22560_v10  ;;  %17002 = vmatprep.subr.bf16.mxu1 %v22562_v11  ;;  %v22637_v63 = vld [vmem:[%s26411_s10 + $0x26c] ss:$16 sps:$4 sm:$0xff]   ;;  %v22632_v0 = vld [vmem:[%s26411_s10 + $0x260] ss:$16 sps:$4 sm:$0xff]   ;;  %v22635_v1 = vld [vmem:[%s26411_s10 + $0x268] ss:$16 sps:$4 sm:$0xff]  }
  0x7b   : > { %v22640_v2 = vld [vmem:[%s26411_s10 + $0x284] ss:$16 sps:$4 sm:$0xff]   ;;  %v22643_v3 = vld [vmem:[%s26411_s10 + $0x28c] ss:$16 sps:$4 sm:$0xff]   ;;  %v22638_v4 = vld [vmem:[%s26411_s10 + $0x280] ss:$16 sps:$4 sm:$0xff]  }
  0x7c   : > { %v22641_v5 = vld [vmem:[%s26411_s10 + $0x288] ss:$16 sps:$4 sm:$0xff]   ;;  %v22646_v6 = vld [vmem:[%s26411_s10 + $0x2a4] ss:$16 sps:$4 sm:$0xff]   ;;  %v22649_v8 = vld [vmem:[%s26411_s10 + $0x2ac] ss:$16 sps:$4 sm:$0xff]  }
  0x7d   : > { %15167 = vmatpush1.bf16.msra.mxu0 %v22564_v12  ;;  %17003 = vmatpush1.bf16.msra.mxu1 %v22565_v13  ;;  %v680_v7 = vld [vmem:[%s26413_s15 + $0x240] sm:$0x11]  ;;  %v22647_v12 = vld [vmem:[%s26411_s10 + $0x2a8] ss:$16 sps:$4 sm:$0xff]   ;;  %v22673_v29 = vld [vmem:[%s26411_s10 + $0x32c] ss:$16 sps:$4 sm:$0xff]  }
  0x7e   : > { %15168 = vmatprep.subr.bf16.mxu0 %v22566_v14  ;;  %17004 = vmatprep.subr.bf16.mxu1 %v22568_v15  ;;  %v19693_v9 = vcombine.high %v680_v7, %v680_v7  ;;  %v19692_v10 = vcombine.low %v680_v7, %v680_v7  ;;  %v22644_v11 = vld [vmem:[%s26411_s10 + $0x2a0] ss:$16 sps:$4 sm:$0xff]   ;;  %v22652_v13 = vld [vmem:[%s26411_s10 + $0x2c4] ss:$16 sps:$4 sm:$0xff]   ;;  %v22655_v14 = vld [vmem:[%s26411_s10 + $0x2cc] ss:$16 sps:$4 sm:$0xff]  }
  0x7f   : > { %v26510_v15 = vld [vmem:[%s26413_s15 + $0x8] sm:$0xff]  ;;  %v22670_v28 = vld [vmem:[%s26411_s10 + $0x324] ss:$16 sps:$4 sm:$0xff]  }
  0x80   : > { %v22676_v32 = vld [vmem:[%s26411_s10 + $0x344] ss:$16 sps:$4 sm:$0xff]  }
  0x81   : > { %15169 = vmatpush1.bf16.msra.mxu0 %v22570_v16  ;;  %17005 = vmatpush1.bf16.msra.mxu1 %v22571_v17  ;;  %v26513_v16 = vld [vmem:[%s26413_s15 + $0x128] sm:$0xff]  ;;  %v26570_v7 = vld [vmem:[%s26413_s15 + $0x10] sm:$0xff] }
  0x82   : > { %15170 = vmatprep.subr.bf16.mxu0 %v22572_v18  ;;  %17006 = vmatprep.subr.bf16.mxu1 %v22574_v19  ;;  %v22650_v17 = vld [vmem:[%s26411_s10 + $0x2c0] ss:$16 sps:$4 sm:$0xff]   ;;  %v19623_v18 = vcombine.high %v26510_v15, %v26513_v16  ;;  %v22653_v19 = vld [vmem:[%s26411_s10 + $0x2c8] ss:$16 sps:$4 sm:$0xff]  }
  0x85   : > { %15171 = vmatpush1.bf16.msra.mxu0 %v22576_v20  ;;  %17007 = vmatpush1.bf16.msra.mxu1 %v22577_v21  ;;  %v22658_v20 = vld [vmem:[%s26411_s10 + $0x2e4] ss:$16 sps:$4 sm:$0xff]   ;;  %v22661_v21 = vld [vmem:[%s26411_s10 + $0x2ec] ss:$16 sps:$4 sm:$0xff]  }
  0x86   : > { %15172 = vmatprep.subr.bf16.mxu0 %v22578_v22  ;;  %17008 = vmatprep.subr.bf16.mxu1 %v22580_v23  ;;  %v22656_v22 = vld [vmem:[%s26411_s10 + $0x2e0] ss:$16 sps:$4 sm:$0xff]   ;;  %v22659_v23 = vld [vmem:[%s26411_s10 + $0x2e8] ss:$16 sps:$4 sm:$0xff]  }
  0x89   : > { %15173 = vmatpush1.bf16.msra.mxu0 %v22582_v24  ;;  %17009 = vmatpush1.bf16.msra.mxu1 %v22583_v25  ;;  %v22664_v24 = vld [vmem:[%s26411_s10 + $0x304] ss:$16 sps:$4 sm:$0xff]   ;;  %v22667_v25 = vld [vmem:[%s26411_s10 + $0x30c] ss:$16 sps:$4 sm:$0xff]  }
  0x8a   : > { %15174 = vmatprep.subr.bf16.mxu0 %v22584_v26  ;;  %17010 = vmatprep.subr.bf16.mxu1 %v22586_v27  ;;  %v22662_v26 = vld [vmem:[%s26411_s10 + $0x300] ss:$16 sps:$4 sm:$0xff]   ;;  %v22665_v27 = vld [vmem:[%s26411_s10 + $0x308] ss:$16 sps:$4 sm:$0xff]  }
  0x8d   : > { %15175 = vmatpush1.bf16.msra.mxu0 %v22588_v30  ;;  %17011 = vmatpush1.bf16.msra.mxu1 %v22589_v31  ;;  %v22668_v30 = vld [vmem:[%s26411_s10 + $0x320] ss:$16 sps:$4 sm:$0xff]   ;;  %v22671_v31 = vld [vmem:[%s26411_s10 + $0x328] ss:$16 sps:$4 sm:$0xff]  }
  0x8e   : > { %15176 = vmatprep.subr.bf16.mxu0 %v22590_v33  ;;  %17012 = vmatprep.subr.bf16.mxu1 %v22592_v34  ;;  %v22679_v33 = vld [vmem:[%s26411_s10 + $0x34c] ss:$16 sps:$4 sm:$0xff]   ;;  %v22674_v34 = vld [vmem:[%s26411_s10 + $0x340] ss:$16 sps:$4 sm:$0xff]  }
  0x91   : > { %15177 = vmatpush1.bf16.msra.mxu0 %v22594_v35  ;;  %17013 = vmatpush1.bf16.msra.mxu1 %v22595_v36  ;;  %v22677_v35 = vld [vmem:[%s26411_s10 + $0x348] ss:$16 sps:$4 sm:$0xff]   ;;  %v22682_v36 = vld [vmem:[%s26411_s10 + $0x364] ss:$16 sps:$4 sm:$0xff]  }
  0x92   : > { %15178 = vmatprep.subr.bf16.mxu0 %v22596_v37  ;;  %17014 = vmatprep.subr.bf16.mxu1 %v22598_v38  ;;  %v22685_v37 = vld [vmem:[%s26411_s10 + $0x36c] ss:$16 sps:$4 sm:$0xff]   ;;  %v22680_v38 = vld [vmem:[%s26411_s10 + $0x360] ss:$16 sps:$4 sm:$0xff]  }
  0x95   : > { %15179 = vmatpush1.bf16.msra.mxu0 %v22600_v39  ;;  %17015 = vmatpush1.bf16.msra.mxu1 %v22601_v40  ;;  %v22683_v39 = vld [vmem:[%s26411_s10 + $0x368] ss:$16 sps:$4 sm:$0xff]   ;;  %v22688_v40 = vld [vmem:[%s26411_s10 + $0x384] ss:$16 sps:$4 sm:$0xff]  }
  0x96   : > { %15180 = vmatprep.subr.bf16.mxu0 %v22602_v41  ;;  %17016 = vmatprep.subr.bf16.mxu1 %v22604_v42  ;;  %v22691_v41 = vld [vmem:[%s26411_s10 + $0x38c] ss:$16 sps:$4 sm:$0xff]   ;;  %v22686_v42 = vld [vmem:[%s26411_s10 + $0x380] ss:$16 sps:$4 sm:$0xff]  }
  0x99   : > { %15181 = vmatpush1.bf16.msra.mxu0 %v22606_v43  ;;  %17017 = vmatpush1.bf16.msra.mxu1 %v22607_v44  ;;  %v22689_v43 = vld [vmem:[%s26411_s10 + $0x388] ss:$16 sps:$4 sm:$0xff]   ;;  %v22694_v44 = vld [vmem:[%s26411_s10 + $0x3a4] ss:$16 sps:$4 sm:$0xff]  }
  0x9a   : > { %15182 = vmatprep.subr.bf16.mxu0 %v22608_v45  ;;  %17018 = vmatprep.subr.bf16.mxu1 %v22610_v46  ;;  %v22697_v45 = vld [vmem:[%s26411_s10 + $0x3ac] ss:$16 sps:$4 sm:$0xff]   ;;  %v22692_v46 = vld [vmem:[%s26411_s10 + $0x3a0] ss:$16 sps:$4 sm:$0xff]  }
  0x9d   : > { %15183 = vmatpush1.bf16.msra.mxu0 %v22612_v47  ;;  %17019 = vmatpush1.bf16.msra.mxu1 %v22613_v48  ;;  %v22695_v47 = vld [vmem:[%s26411_s10 + $0x3a8] ss:$16 sps:$4 sm:$0xff]   ;;  %v22702_v48 = vld [vmem:[%s26411_s10 + $0x3c4] ss:$16 sps:$4 sm:$0xff]  }
  0x9e   : > { %15203 = vmatprep.subr.bf16.mxu0 %v22616_v49  ;;  %17039 = vmatprep.subr.bf16.mxu1 %v22619_v50  ;;  %v22705_v49 = vld [vmem:[%s26411_s10 + $0x3cc] ss:$16 sps:$4 sm:$0xff]   ;;  %v22700_v50 = vld [vmem:[%s26411_s10 + $0x3c0] ss:$16 sps:$4 sm:$0xff]  }
  0xa0   : > { %15185 = vmatmul.mubr.bf16.vlgmr.msra.gmra.mrb[0].mxu0 %v19620_v51  ;;  %17021 = vmatmul.mubr.bf16.vlgmr.msra.gmra.mrb[0].mxu1 %v19620_v51  ;;  %v22703_v51 = vld [vmem:[%s26411_s10 + $0x3c8] ss:$16 sps:$4 sm:$0xff]  }
  0xa1   : > { %15204 = vmatpush1.bf16.msra.mxu0 %v22614_v52  ;;  %17040 = vmatpush1.bf16.msra.mxu1 %v22617_v53  ;;  %v22708_v52 = vld [vmem:[%s26411_s10 + $0x3e4] ss:$16 sps:$4 sm:$0xff]   ;;  %v22711_v53 = vld [vmem:[%s26411_s10 + $0x3ec] ss:$16 sps:$4 sm:$0xff]  }
  0xa2   : > { %15205 = vmatprep.subr.bf16.mxu0 %v22622_v54  ;;  %17041 = vmatprep.subr.bf16.mxu1 %v22625_v55  ;;  %v22706_v54 = vld [vmem:[%s26411_s10 + $0x3e0] ss:$16 sps:$4 sm:$0xff]   ;;  %v22709_v55 = vld [vmem:[%s26411_s10 + $0x3e8] ss:$16 sps:$4 sm:$0xff]  }
  0xa3   : > { %15194 = vmatprep.mubr.bf16.mxu0 %v19693_v9  ;;  %17030 = vmatprep.mubr.bf16.mxu1 %v19693_v9  ;;  %v22729_v9 = vld [vmem:[%s26411_s10 + $0x448] ss:$16 sps:$4 sm:$0xff]  }
  0xa5   : > { %15206 = vmatpush1.bf16.msra.mxu0 %v22620_v56  ;;  %17042 = vmatpush1.bf16.msra.mxu1 %v22623_v57  ;;  %v22714_v56 = vld [vmem:[%s26411_s10 + $0x404] ss:$16 sps:$4 sm:$0xff]   ;;  %v22717_v57 = vld [vmem:[%s26411_s10 + $0x40c] ss:$16 sps:$4 sm:$0xff]  }
  0xa6   : > { %15207 = vmatprep.subr.bf16.mxu0 %v22628_v58  ;;  %17043 = vmatprep.subr.bf16.mxu1 %v22631_v59  ;;  %v19622_v58 = vcombine.low %v26510_v15, %v26513_v16  ;;  %v681_v59 = vld [vmem:[%s26413_s15 + $0x248] sm:$0x11]  ;;  %v22740_v15 = vld [vmem:[%s26411_s10 + $0x484] ss:$16 sps:$4 sm:$0xff]  }
  0xa7   : > { %v22743_v16 = vld [vmem:[%s26411_s10 + $0x48c] ss:$16 sps:$4 sm:$0xff]  }
  0xa8   : > { %15195 = vmatmul.mubr.bf16.gmra.mrb[4].mxu0 %v19692_v10  ;;  %17031 = vmatmul.mubr.bf16.gmra.mrb[4].mxu1 %v19692_v10  ;;  %v22734_v10 = vld [vmem:[%s26411_s10 + $0x464] ss:$16 sps:$4 sm:$0xff]  }
  0xa9   : > { %15208 = vmatpush1.bf16.msra.mxu0 %v22626_v60  ;;  %17044 = vmatpush1.bf16.msra.mxu1 %v22629_v61  ;;  %v22712_v60 = vld [vmem:[%s26411_s10 + $0x400] ss:$16 sps:$4 sm:$0xff]   ;;  %v22715_v61 = vld [vmem:[%s26411_s10 + $0x408] ss:$16 sps:$4 sm:$0xff]  }
  0xaa   : > { %15209 = vmatprep.subr.bf16.mxu0 %v22634_v62  ;;  %17045 = vmatprep.subr.bf16.mxu1 %v22637_v63  ;;  %v22720_v62 = vld [vmem:[%s26411_s10 + $0x424] ss:$16 sps:$4 sm:$0xff]   ;;  %v22723_v63 = vld [vmem:[%s26411_s10 + $0x42c] ss:$16 sps:$4 sm:$0xff]  }
  0xab   : > { %15235 = vmatprep.mubr.bf16.mxu0 %v19623_v18  ;;  %17071 = vmatprep.mubr.bf16.mxu1 %v19623_v18  ;;  %v22741_v18 = vld [vmem:[%s26411_s10 + $0x488] ss:$16 sps:$4 sm:$0xff]  }
  0xad   : > { %15210 = vmatpush1.bf16.msra.mxu0 %v22632_v0  ;;  %17046 = vmatpush1.bf16.msra.mxu1 %v22635_v1  ;;  %v19695_v0 = vcombine.high %v681_v59, %v681_v59  ;;  %v22718_v1 = vld [vmem:[%s26411_s10 + $0x420] ss:$16 sps:$4 sm:$0xff]  }
  0xae   : > { %15211 = vmatprep.subr.bf16.mxu0 %v22640_v2  ;;  %17047 = vmatprep.subr.bf16.mxu1 %v22643_v3  ;;  %v22721_v2 = vld [vmem:[%s26411_s10 + $0x428] ss:$16 sps:$4 sm:$0xff]   ;;  %v22728_v3 = vld [vmem:[%s26411_s10 + $0x444] ss:$16 sps:$4 sm:$0xff]  }
  0xb1   : > { %15212 = vmatpush1.bf16.msra.mxu0 %v22638_v4  ;;  %17048 = vmatpush1.bf16.msra.mxu1 %v22641_v5  ;;  %v22731_v4 = vld [vmem:[%s26411_s10 + $0x44c] ss:$16 sps:$4 sm:$0xff]   ;;  %v22726_v5 = vld [vmem:[%s26411_s10 + $0x440] ss:$16 sps:$4 sm:$0xff]  }
  0xb2   : > { %15213 = vmatprep.subr.bf16.mxu0 %v22646_v6  ;;  %17049 = vmatprep.subr.bf16.mxu1 %v22649_v8  ;;  %v19694_v6 = vcombine.low %v681_v59, %v681_v59  ;;  %v26573_v8 = vld [vmem:[%s26413_s15 + $0x130] sm:$0xff] }
  0xb3   : > { %v22806_v59 = vld [vmem:[%s26411_s10 + $0x5e4] ss:$16 sps:$4 sm:$0xff]  }
  0xb5   : > { %15214 = vmatpush1.bf16.msra.mxu0 %v22644_v11  ;;  %17050 = vmatpush1.bf16.msra.mxu1 %v22647_v12  ;;  %v22737_v11 = vld [vmem:[%s26411_s10 + $0x46c] ss:$16 sps:$4 sm:$0xff]   ;;  %v19625_v12 = vcombine.high %v26570_v7, %v26573_v8 }
  0xb6   : > { %15215 = vmatprep.subr.bf16.mxu0 %v22652_v13  ;;  %17051 = vmatprep.subr.bf16.mxu1 %v22655_v14  ;;  %v22732_v13 = vld [vmem:[%s26411_s10 + $0x460] ss:$16 sps:$4 sm:$0xff]   ;;  %v22735_v14 = vld [vmem:[%s26411_s10 + $0x468] ss:$16 sps:$4 sm:$0xff]  }
  0xb9   : > { %15216 = vmatpush1.bf16.msra.mxu0 %v22650_v17  ;;  %17052 = vmatpush1.bf16.msra.mxu1 %v22653_v19  ;;  %v22738_v17 = vld [vmem:[%s26411_s10 + $0x480] ss:$16 sps:$4 sm:$0xff]   ;;  %v22746_v19 = vld [vmem:[%s26411_s10 + $0x4a4] ss:$16 sps:$4 sm:$0xff]  }
  0xba   : > { %15217 = vmatprep.subr.bf16.mxu0 %v22658_v20  ;;  %17053 = vmatprep.subr.bf16.mxu1 %v22661_v21  ;;  %v22749_v20 = vld [vmem:[%s26411_s10 + $0x4ac] ss:$16 sps:$4 sm:$0xff]   ;;  %v22744_v21 = vld [vmem:[%s26411_s10 + $0x4a0] ss:$16 sps:$4 sm:$0xff]  }
  0xbd   : > { %15218 = vmatpush1.bf16.msra.mxu0 %v22656_v22  ;;  %17054 = vmatpush1.bf16.msra.mxu1 %v22659_v23  ;;  %v22747_v22 = vld [vmem:[%s26411_s10 + $0x4a8] ss:$16 sps:$4 sm:$0xff]   ;;  %v22752_v23 = vld [vmem:[%s26411_s10 + $0x4c4] ss:$16 sps:$4 sm:$0xff]  }
  0xbe   : > { %15219 = vmatprep.subr.bf16.mxu0 %v22664_v24  ;;  %17055 = vmatprep.subr.bf16.mxu1 %v22667_v25  ;;  %v22755_v24 = vld [vmem:[%s26411_s10 + $0x4cc] ss:$16 sps:$4 sm:$0xff]   ;;  %v22750_v25 = vld [vmem:[%s26411_s10 + $0x4c0] ss:$16 sps:$4 sm:$0xff]  }
  0xc1   : > { %15220 = vmatpush1.bf16.msra.mxu0 %v22662_v26  ;;  %17056 = vmatpush1.bf16.msra.mxu1 %v22665_v27  ;;  %v22753_v26 = vld [vmem:[%s26411_s10 + $0x4c8] ss:$16 sps:$4 sm:$0xff]   ;;  %v22758_v27 = vld [vmem:[%s26411_s10 + $0x4e4] ss:$16 sps:$4 sm:$0xff]  }
  0xc2   : > { %15221 = vmatprep.subr.bf16.mxu0 %v22670_v28  ;;  %17057 = vmatprep.subr.bf16.mxu1 %v22673_v29  ;;  %v22761_v28 = vld [vmem:[%s26411_s10 + $0x4ec] ss:$16 sps:$4 sm:$0xff]   ;;  %v22756_v29 = vld [vmem:[%s26411_s10 + $0x4e0] ss:$16 sps:$4 sm:$0xff]  }
  0xc5   : > { %15222 = vmatpush1.bf16.msra.mxu0 %v22668_v30  ;;  %17058 = vmatpush1.bf16.msra.mxu1 %v22671_v31  ;;  %v22759_v30 = vld [vmem:[%s26411_s10 + $0x4e8] ss:$16 sps:$4 sm:$0xff]   ;;  %v22764_v31 = vld [vmem:[%s26411_s10 + $0x504] ss:$16 sps:$4 sm:$0xff]  }
  0xc6   : > { %15223 = vmatprep.subr.bf16.mxu0 %v22676_v32  ;;  %17059 = vmatprep.subr.bf16.mxu1 %v22679_v33  ;;  %v22767_v32 = vld [vmem:[%s26411_s10 + $0x50c] ss:$16 sps:$4 sm:$0xff]   ;;  %v22762_v33 = vld [vmem:[%s26411_s10 + $0x500] ss:$16 sps:$4 sm:$0xff]  }
  0xc9   : > { %15224 = vmatpush1.bf16.msra.mxu0 %v22674_v34  ;;  %17060 = vmatpush1.bf16.msra.mxu1 %v22677_v35  ;;  %v22765_v34 = vld [vmem:[%s26411_s10 + $0x508] ss:$16 sps:$4 sm:$0xff]   ;;  %v22770_v35 = vld [vmem:[%s26411_s10 + $0x524] ss:$16 sps:$4 sm:$0xff]  }
  0xca   : > { %15225 = vmatprep.subr.bf16.mxu0 %v22682_v36  ;;  %17061 = vmatprep.subr.bf16.mxu1 %v22685_v37  ;;  %v22773_v36 = vld [vmem:[%s26411_s10 + $0x52c] ss:$16 sps:$4 sm:$0xff]   ;;  %v22768_v37 = vld [vmem:[%s26411_s10 + $0x520] ss:$16 sps:$4 sm:$0xff]  }
  0xcd   : > { %15226 = vmatpush1.bf16.msra.mxu0 %v22680_v38  ;;  %17062 = vmatpush1.bf16.msra.mxu1 %v22683_v39  ;;  %v22771_v38 = vld [vmem:[%s26411_s10 + $0x528] ss:$16 sps:$4 sm:$0xff]   ;;  %v22776_v39 = vld [vmem:[%s26411_s10 + $0x544] ss:$16 sps:$4 sm:$0xff]  }
  0xce   : > { %15227 = vmatprep.subr.bf16.mxu0 %v22688_v40  ;;  %17063 = vmatprep.subr.bf16.mxu1 %v22691_v41  ;;  %v22779_v40 = vld [vmem:[%s26411_s10 + $0x54c] ss:$16 sps:$4 sm:$0xff]   ;;  %v22774_v41 = vld [vmem:[%s26411_s10 + $0x540] ss:$16 sps:$4 sm:$0xff]  }
  0xd1   : > { %15228 = vmatpush1.bf16.msra.mxu0 %v22686_v42  ;;  %17064 = vmatpush1.bf16.msra.mxu1 %v22689_v43  ;;  %v22777_v42 = vld [vmem:[%s26411_s10 + $0x548] ss:$16 sps:$4 sm:$0xff]   ;;  %v22782_v43 = vld [vmem:[%s26411_s10 + $0x564] ss:$16 sps:$4 sm:$0xff]  }
  0xd2   : > { %15229 = vmatprep.subr.bf16.mxu0 %v22694_v44  ;;  %17065 = vmatprep.subr.bf16.mxu1 %v22697_v45  ;;  %v22785_v44 = vld [vmem:[%s26411_s10 + $0x56c] ss:$16 sps:$4 sm:$0xff]   ;;  %v22780_v45 = vld [vmem:[%s26411_s10 + $0x560] ss:$16 sps:$4 sm:$0xff]  }
  0xd5   : > { %15230 = vmatpush1.bf16.msra.mxu0 %v22692_v46  ;;  %17066 = vmatpush1.bf16.msra.mxu1 %v22695_v47  ;;  %v22783_v46 = vld [vmem:[%s26411_s10 + $0x568] ss:$16 sps:$4 sm:$0xff]   ;;  %v22788_v47 = vld [vmem:[%s26411_s10 + $0x584] ss:$16 sps:$4 sm:$0xff]  }
  0xd6   : > { %15231 = vmatprep.subr.bf16.mxu0 %v22702_v48  ;;  %17067 = vmatprep.subr.bf16.mxu1 %v22705_v49  ;;  %v22791_v48 = vld [vmem:[%s26411_s10 + $0x58c] ss:$16 sps:$4 sm:$0xff]   ;;  %v22786_v49 = vld [vmem:[%s26411_s10 + $0x580] ss:$16 sps:$4 sm:$0xff]  }
  0xd9   : > { %15232 = vmatpush1.bf16.msra.mxu0 %v22700_v50  ;;  %17068 = vmatpush1.bf16.msra.mxu1 %v22703_v51  ;;  %v22789_v50 = vld [vmem:[%s26411_s10 + $0x588] ss:$16 sps:$4 sm:$0xff]   ;;  %v22794_v51 = vld [vmem:[%s26411_s10 + $0x5a4] ss:$16 sps:$4 sm:$0xff]  }
  0xda   : > { %15233 = vmatprep.subr.bf16.mxu0 %v22708_v52  ;;  %17069 = vmatprep.subr.bf16.mxu1 %v22711_v53  ;;  %v22797_v52 = vld [vmem:[%s26411_s10 + $0x5ac] ss:$16 sps:$4 sm:$0xff]   ;;  %v22792_v53 = vld [vmem:[%s26411_s10 + $0x5a0] ss:$16 sps:$4 sm:$0xff]  }
  0xdd   : > { %15234 = vmatpush1.bf16.msra.mxu0 %v22706_v54  ;;  %17070 = vmatpush1.bf16.msra.mxu1 %v22709_v55  ;;  %v22795_v54 = vld [vmem:[%s26411_s10 + $0x5a8] ss:$16 sps:$4 sm:$0xff]   ;;  %v22800_v55 = vld [vmem:[%s26411_s10 + $0x5c4] ss:$16 sps:$4 sm:$0xff]  }
  0xde   : > { %15254 = vmatprep.subr.bf16.mxu0 %v22714_v56  ;;  %17090 = vmatprep.subr.bf16.mxu1 %v22717_v57  ;;  %v22803_v56 = vld [vmem:[%s26411_s10 + $0x5cc] ss:$16 sps:$4 sm:$0xff]   ;;  %v22798_v57 = vld [vmem:[%s26411_s10 + $0x5c0] ss:$16 sps:$4 sm:$0xff]  }
  0xe0   : > { %15236 = vmatmul.mubr.bf16.vlgmr.msra.gmra.mrb[0].mxu0 %v19622_v58  ;;  %17072 = vmatmul.mubr.bf16.vlgmr.msra.gmra.mrb[0].mxu1 %v19622_v58  ;;  %v22801_v58 = vld [vmem:[%s26411_s10 + $0x5c8] ss:$16 sps:$4 sm:$0xff]  }
  0xe1   : > { %15255 = vmatpush1.bf16.msra.mxu0 %v22712_v60  ;;  %17091 = vmatpush1.bf16.msra.mxu1 %v22715_v61  ;;  %v22809_v60 = vld [vmem:[%s26411_s10 + $0x5ec] ss:$16 sps:$4 sm:$0xff]   ;;  %v22804_v61 = vld [vmem:[%s26411_s10 + $0x5e0] ss:$16 sps:$4 sm:$0xff]  }
  0xe2   : > { %15256 = vmatprep.subr.bf16.mxu0 %v22720_v62  ;;  %17092 = vmatprep.subr.bf16.mxu1 %v22723_v63  ;;  %v22807_v62 = vld [vmem:[%s26411_s10 + $0x5e8] ss:$16 sps:$4 sm:$0xff]   ;;  %v22812_v63 = vld [vmem:[%s26411_s10 + $0x604] ss:$16 sps:$4 sm:$0xff]  }
  0xe3   : > { %15245 = vmatprep.mubr.bf16.mxu0 %v19695_v0  ;;  %17081 = vmatprep.mubr.bf16.mxu1 %v19695_v0  ;;  %v22815_v0 = vld [vmem:[%s26411_s10 + $0x60c] ss:$16 sps:$4 sm:$0xff]  }
  0xe5   : > { %15257 = vmatpush1.bf16.msra.mxu0 %v22718_v1  ;;  %17093 = vmatpush1.bf16.msra.mxu1 %v22721_v2  ;;  %v22810_v1 = vld [vmem:[%s26411_s10 + $0x600] ss:$16 sps:$4 sm:$0xff]   ;;  %v19624_v2 = vcombine.low %v26570_v7, %v26573_v8  ;;  %v22826_v7 = vld [vmem:[%s26411_s10 + $0x644] ss:$16 sps:$4 sm:$0xff]   ;;  %v22829_v8 = vld [vmem:[%s26411_s10 + $0x64c] ss:$16 sps:$4 sm:$0xff]  }
  0xe6   : > { %15258 = vmatprep.subr.bf16.mxu0 %v22728_v3  ;;  %17094 = vmatprep.subr.bf16.mxu1 %v22731_v4  ;;  %v22813_v3 = vld [vmem:[%s26411_s10 + $0x608] ss:$16 sps:$4 sm:$0xff]   ;;  %v682_v4 = vld [vmem:[%s26413_s15 + $0x250] sm:$0x11] }
  0xe8   : > { %15246 = vmatmul.mubr.bf16.gmra.mrb[8].mxu0 %v19694_v6  ;;  %17082 = vmatmul.mubr.bf16.gmra.mrb[8].mxu1 %v19694_v6  ;;  %v22821_v6 = vld [vmem:[%s26411_s10 + $0x62c] ss:$16 sps:$4 sm:$0xff]  }
  0xe9   : > { %15259 = vmatpush1.bf16.msra.mxu0 %v22726_v5  ;;  %17095 = vmatpush1.bf16.msra.mxu1 %v22729_v9  ;;  %v22818_v5 = vld [vmem:[%s26411_s10 + $0x624] ss:$16 sps:$4 sm:$0xff]   ;;  %v19697_v9 = vcombine.high %v682_v4, %v682_v4 }
  0xea   : > { %15260 = vmatprep.subr.bf16.mxu0 %v22734_v10  ;;  %17096 = vmatprep.subr.bf16.mxu1 %v22737_v11  ;;  %v22816_v10 = vld [vmem:[%s26411_s10 + $0x620] ss:$16 sps:$4 sm:$0xff]   ;;  %v22819_v11 = vld [vmem:[%s26411_s10 + $0x628] ss:$16 sps:$4 sm:$0xff]  }
  0xeb   : > { %15286 = vmatprep.mubr.bf16.mxu0 %v19625_v12  ;;  %17122 = vmatprep.mubr.bf16.mxu1 %v19625_v12  ;;  %v22824_v12 = vld [vmem:[%s26411_s10 + $0x640] ss:$16 sps:$4 sm:$0xff]  }
  0xed   : > { %15261 = vmatpush1.bf16.msra.mxu0 %v22732_v13  ;;  %17097 = vmatpush1.bf16.msra.mxu1 %v22735_v14  ;;  %v22827_v13 = vld [vmem:[%s26411_s10 + $0x648] ss:$16 sps:$4 sm:$0xff]   ;;  %v19696_v14 = vcombine.low %v682_v4, %v682_v4  ;;  %v22902_v4 = vld [vmem:[%s26411_s10 + $0x7e0] ss:$16 sps:$4 sm:$0xff]  }
  0xee   : > { %15262 = vmatprep.subr.bf16.mxu0 %v22740_v15  ;;  %17098 = vmatprep.subr.bf16.mxu1 %v22743_v16  ;;  %v26646_v15 = vld [vmem:[%s26413_s15 + $0x18] sm:$0xff] }
  0xef   : > { %v26649_v16 = vld [vmem:[%s26413_s15 + $0x138] sm:$0xff] }
  0xf1   : > { %15263 = vmatpush1.bf16.msra.mxu0 %v22738_v17  ;;  %17099 = vmatpush1.bf16.msra.mxu1 %v22741_v18  ;;  %v22832_v17 = vld [vmem:[%s26411_s10 + $0x664] ss:$16 sps:$4 sm:$0xff]   ;;  %v22835_v18 = vld [vmem:[%s26411_s10 + $0x66c] ss:$16 sps:$4 sm:$0xff]  }
  0xf2   : > { %15264 = vmatprep.subr.bf16.mxu0 %v22746_v19  ;;  %17100 = vmatprep.subr.bf16.mxu1 %v22749_v20  ;;  %v19627_v19 = vcombine.high %v26646_v15, %v26649_v16  ;;  %v22830_v20 = vld [vmem:[%s26411_s10 + $0x660] ss:$16 sps:$4 sm:$0xff]  }
  0xf5   : > { %15265 = vmatpush1.bf16.msra.mxu0 %v22744_v21  ;;  %17101 = vmatpush1.bf16.msra.mxu1 %v22747_v22  ;;  %v22833_v21 = vld [vmem:[%s26411_s10 + $0x668] ss:$16 sps:$4 sm:$0xff]   ;;  %v22838_v22 = vld [vmem:[%s26411_s10 + $0x684] ss:$16 sps:$4 sm:$0xff]  }
  0xf6   : > { %15266 = vmatprep.subr.bf16.mxu0 %v22752_v23  ;;  %17102 = vmatprep.subr.bf16.mxu1 %v22755_v24  ;;  %v22841_v23 = vld [vmem:[%s26411_s10 + $0x68c] ss:$16 sps:$4 sm:$0xff]   ;;  %v22836_v24 = vld [vmem:[%s26411_s10 + $0x680] ss:$16 sps:$4 sm:$0xff]  }
  0xf9   : > { %15267 = vmatpush1.bf16.msra.mxu0 %v22750_v25  ;;  %17103 = vmatpush1.bf16.msra.mxu1 %v22753_v26  ;;  %v22839_v25 = vld [vmem:[%s26411_s10 + $0x688] ss:$16 sps:$4 sm:$0xff]   ;;  %v22844_v26 = vld [vmem:[%s26411_s10 + $0x6a4] ss:$16 sps:$4 sm:$0xff]  }
  0xfa   : > { %15268 = vmatprep.subr.bf16.mxu0 %v22758_v27  ;;  %17104 = vmatprep.subr.bf16.mxu1 %v22761_v28  ;;  %v22847_v27 = vld [vmem:[%s26411_s10 + $0x6ac] ss:$16 sps:$4 sm:$0xff]   ;;  %v22842_v28 = vld [vmem:[%s26411_s10 + $0x6a0] ss:$16 sps:$4 sm:$0xff]  }
  0xfd   : > { %15269 = vmatpush1.bf16.msra.mxu0 %v22756_v29  ;;  %17105 = vmatpush1.bf16.msra.mxu1 %v22759_v30  ;;  %v22845_v29 = vld [vmem:[%s26411_s10 + $0x6a8] ss:$16 sps:$4 sm:$0xff]   ;;  %v22850_v30 = vld [vmem:[%s26411_s10 + $0x6c4] ss:$16 sps:$4 sm:$0xff]  }
  0xfe   : > { %15270 = vmatprep.subr.bf16.mxu0 %v22764_v31  ;;  %17106 = vmatprep.subr.bf16.mxu1 %v22767_v32  ;;  %v22853_v31 = vld [vmem:[%s26411_s10 + $0x6cc] ss:$16 sps:$4 sm:$0xff]   ;;  %v22848_v32 = vld [vmem:[%s26411_s10 + $0x6c0] ss:$16 sps:$4 sm:$0xff]  }
 0x101   : > { %15271 = vmatpush1.bf16.msra.mxu0 %v22762_v33  ;;  %17107 = vmatpush1.bf16.msra.mxu1 %v22765_v34  ;;  %v22851_v33 = vld [vmem:[%s26411_s10 + $0x6c8] ss:$16 sps:$4 sm:$0xff]   ;;  %v22856_v34 = vld [vmem:[%s26411_s10 + $0x6e4] ss:$16 sps:$4 sm:$0xff]  }
 0x102   : > { %15272 = vmatprep.subr.bf16.mxu0 %v22770_v35  ;;  %17108 = vmatprep.subr.bf16.mxu1 %v22773_v36  ;;  %v22859_v35 = vld [vmem:[%s26411_s10 + $0x6ec] ss:$16 sps:$4 sm:$0xff]   ;;  %v22854_v36 = vld [vmem:[%s26411_s10 + $0x6e0] ss:$16 sps:$4 sm:$0xff]  }
 0x105   : > { %15273 = vmatpush1.bf16.msra.mxu0 %v22768_v37  ;;  %17109 = vmatpush1.bf16.msra.mxu1 %v22771_v38  ;;  %v22857_v37 = vld [vmem:[%s26411_s10 + $0x6e8] ss:$16 sps:$4 sm:$0xff]   ;;  %v22862_v38 = vld [vmem:[%s26411_s10 + $0x704] ss:$16 sps:$4 sm:$0xff]  }
 0x106   : > { %15274 = vmatprep.subr.bf16.mxu0 %v22776_v39  ;;  %17110 = vmatprep.subr.bf16.mxu1 %v22779_v40  ;;  %v22865_v39 = vld [vmem:[%s26411_s10 + $0x70c] ss:$16 sps:$4 sm:$0xff]   ;;  %v22860_v40 = vld [vmem:[%s26411_s10 + $0x700] ss:$16 sps:$4 sm:$0xff]  }
 0x109   : > { %15275 = vmatpush1.bf16.msra.mxu0 %v22774_v41  ;;  %17111 = vmatpush1.bf16.msra.mxu1 %v22777_v42  ;;  %v22863_v41 = vld [vmem:[%s26411_s10 + $0x708] ss:$16 sps:$4 sm:$0xff]   ;;  %v22868_v42 = vld [vmem:[%s26411_s10 + $0x724] ss:$16 sps:$4 sm:$0xff]  }
 0x10a   : > { %15276 = vmatprep.subr.bf16.mxu0 %v22782_v43  ;;  %17112 = vmatprep.subr.bf16.mxu1 %v22785_v44  ;;  %v22871_v43 = vld [vmem:[%s26411_s10 + $0x72c] ss:$16 sps:$4 sm:$0xff]   ;;  %v22866_v44 = vld [vmem:[%s26411_s10 + $0x720] ss:$16 sps:$4 sm:$0xff]  }
 0x10d   : > { %15277 = vmatpush1.bf16.msra.mxu0 %v22780_v45  ;;  %17113 = vmatpush1.bf16.msra.mxu1 %v22783_v46  ;;  %v22869_v45 = vld [vmem:[%s26411_s10 + $0x728] ss:$16 sps:$4 sm:$0xff]   ;;  %v22874_v46 = vld [vmem:[%s26411_s10 + $0x744] ss:$16 sps:$4 sm:$0xff]  }
 0x10e   : > { %15278 = vmatprep.subr.bf16.mxu0 %v22788_v47  ;;  %17114 = vmatprep.subr.bf16.mxu1 %v22791_v48  ;;  %v22877_v47 = vld [vmem:[%s26411_s10 + $0x74c] ss:$16 sps:$4 sm:$0xff]   ;;  %v22872_v48 = vld [vmem:[%s26411_s10 + $0x740] ss:$16 sps:$4 sm:$0xff]  }
 0x111   : > { %15279 = vmatpush1.bf16.msra.mxu0 %v22786_v49  ;;  %17115 = vmatpush1.bf16.msra.mxu1 %v22789_v50  ;;  %v22875_v49 = vld [vmem:[%s26411_s10 + $0x748] ss:$16 sps:$4 sm:$0xff]   ;;  %v22880_v50 = vld [vmem:[%s26411_s10 + $0x764] ss:$16 sps:$4 sm:$0xff]  }
 0x112   : > { %15280 = vmatprep.subr.bf16.mxu0 %v22794_v51  ;;  %17116 = vmatprep.subr.bf16.mxu1 %v22797_v52  ;;  %v22883_v51 = vld [vmem:[%s26411_s10 + $0x76c] ss:$16 sps:$4 sm:$0xff]   ;;  %v22878_v52 = vld [vmem:[%s26411_s10 + $0x760] ss:$16 sps:$4 sm:$0xff]  }
 0x115   : > { %15281 = vmatpush1.bf16.msra.mxu0 %v22792_v53  ;;  %17117 = vmatpush1.bf16.msra.mxu1 %v22795_v54  ;;  %v22881_v53 = vld [vmem:[%s26411_s10 + $0x768] ss:$16 sps:$4 sm:$0xff]   ;;  %v22886_v54 = vld [vmem:[%s26411_s10 + $0x784] ss:$16 sps:$4 sm:$0xff]  }
 0x116   : > { %15282 = vmatprep.subr.bf16.mxu0 %v22800_v55  ;;  %17118 = vmatprep.subr.bf16.mxu1 %v22803_v56  ;;  %v22889_v55 = vld [vmem:[%s26411_s10 + $0x78c] ss:$16 sps:$4 sm:$0xff]   ;;  %v22884_v56 = vld [vmem:[%s26411_s10 + $0x780] ss:$16 sps:$4 sm:$0xff]  }
 0x119   : > { %15283 = vmatpush1.bf16.msra.mxu0 %v22798_v57  ;;  %17119 = vmatpush1.bf16.msra.mxu1 %v22801_v58  ;;  %v22887_v57 = vld [vmem:[%s26411_s10 + $0x788] ss:$16 sps:$4 sm:$0xff]   ;;  %v22892_v58 = vld [vmem:[%s26411_s10 + $0x7a4] ss:$16 sps:$4 sm:$0xff]  }
 0x11a   : > { %15284 = vmatprep.subr.bf16.mxu0 %v22806_v59  ;;  %17120 = vmatprep.subr.bf16.mxu1 %v22809_v60  ;;  %v22895_v59 = vld [vmem:[%s26411_s10 + $0x7ac] ss:$16 sps:$4 sm:$0xff]   ;;  %v22890_v60 = vld [vmem:[%s26411_s10 + $0x7a0] ss:$16 sps:$4 sm:$0xff]  }
 0x11d   : > { %15285 = vmatpush1.bf16.msra.mxu0 %v22804_v61  ;;  %17121 = vmatpush1.bf16.msra.mxu1 %v22807_v62  ;;  %v22893_v61 = vld [vmem:[%s26411_s10 + $0x7a8] ss:$16 sps:$4 sm:$0xff]   ;;  %v22898_v62 = vld [vmem:[%s26411_s10 + $0x7c4] ss:$16 sps:$4 sm:$0xff]  }
 0x11e   : > { %15305 = vmatprep.subr.bf16.mxu0 %v22812_v63  ;;  %17141 = vmatprep.subr.bf16.mxu1 %v22815_v0  ;;  %v22901_v63 = vld [vmem:[%s26411_s10 + $0x7cc] ss:$16 sps:$4 sm:$0xff]   ;;  %v22896_v0 = vld [vmem:[%s26411_s10 + $0x7c0] ss:$16 sps:$4 sm:$0xff]  }
 0x120   : > { %15287 = vmatmul.mubr.bf16.vlgmr.msra.gmra.mrb[0].mxu0 %v19624_v2  ;;  %17123 = vmatmul.mubr.bf16.vlgmr.msra.gmra.mrb[0].mxu1 %v19624_v2  ;;  %v22904_v2 = vld [vmem:[%s26411_s10 + $0x7e4] ss:$16 sps:$4 sm:$0xff]  }
 0x121   : > { %15306 = vmatpush1.bf16.msra.mxu0 %v22810_v1  ;;  %17142 = vmatpush1.bf16.msra.mxu1 %v22813_v3  ;;  %v22899_v1 = vld [vmem:[%s26411_s10 + $0x7c8] ss:$16 sps:$4 sm:$0xff]   ;;  %v22907_v3 = vld [vmem:[%s26411_s10 + $0x7ec] ss:$16 sps:$4 sm:$0xff]  }
 0x122   : > { %15307 = vmatprep.subr.bf16.mxu0 %v22818_v5  ;;  %17143 = vmatprep.subr.bf16.mxu1 %v22821_v6  ;;  %v22905_v5 = vld [vmem:[%s26411_s10 + $0x7e8] ss:$16 sps:$4 sm:$0xff]   ;;  %v22910_v6 = vld [vmem:[%s26411_s10 + $0x804] ss:$16 sps:$4 sm:$0xff]  }
 0x123   : > { %15296 = vmatprep.mubr.bf16.mxu0 %v19697_v9  ;;  %17132 = vmatprep.mubr.bf16.mxu1 %v19697_v9  ;;  %v22913_v9 = vld [vmem:[%s26411_s10 + $0x80c] ss:$16 sps:$4 sm:$0xff]  }
 0x125   : > { %15308 = vmatpush1.bf16.msra.mxu0 %v22816_v10  ;;  %17144 = vmatpush1.bf16.msra.mxu1 %v22819_v11  ;;  %v19626_v10 = vcombine.low %v26646_v15, %v26649_v16  ;;  %v22908_v11 = vld [vmem:[%s26411_s10 + $0x800] ss:$16 sps:$4 sm:$0xff]   ;;  %v22917_v16 = vld [vmem:[%s26411_s10 + $0x828] ss:$16 sps:$4 sm:$0xff]  }
 0x126   : > { %15309 = vmatprep.subr.bf16.mxu0 %v22826_v7  ;;  %17145 = vmatprep.subr.bf16.mxu1 %v22829_v8  ;;  %v683_v7 = vld [vmem:[%s26413_s15 + $0x258] sm:$0x11]  ;;  %v22914_v15 = vld [vmem:[%s26411_s10 + $0x820] ss:$16 sps:$4 sm:$0xff]  }
 0x127   : > { %v22911_v8 = vld [vmem:[%s26411_s10 + $0x808] ss:$16 sps:$4 sm:$0xff]  }
 0x128   : > { %15297 = vmatmul.mubr.bf16.gmra.mrb[12].mxu0 %v19696_v14  ;;  %17133 = vmatmul.mubr.bf16.gmra.mrb[12].mxu1 %v19696_v14  ;;  %v19699_v14 = vcombine.high %v683_v7, %v683_v7 }
 0x129   : > { %15310 = vmatpush1.bf16.msra.mxu0 %v22824_v12  ;;  %17146 = vmatpush1.bf16.msra.mxu1 %v22827_v13  ;;  %v22916_v12 = vld [vmem:[%s26411_s10 + $0x824] ss:$16 sps:$4 sm:$0xff]   ;;  %v22919_v13 = vld [vmem:[%s26411_s10 + $0x82c] ss:$16 sps:$4 sm:$0xff]  }
 0x12a   : > { %15311 = vmatprep.subr.bf16.mxu0 %v22832_v17  ;;  %17147 = vmatprep.subr.bf16.mxu1 %v22835_v18  ;;  %v22924_v17 = vld [vmem:[%s26411_s10 + $0x844] ss:$16 sps:$4 sm:$0xff]   ;;  %v22927_v18 = vld [vmem:[%s26411_s10 + $0x84c] ss:$16 sps:$4 sm:$0xff]  }
 0x12b   : > { %15337 = vmatprep.mubr.bf16.mxu0 %v19627_v19  ;;  %17173 = vmatprep.mubr.bf16.mxu1 %v19627_v19  ;;  %v22922_v19 = vld [vmem:[%s26411_s10 + $0x840] ss:$16 sps:$4 sm:$0xff]  }
 0x12d   : > { %15312 = vmatpush1.bf16.msra.mxu0 %v22830_v20  ;;  %17148 = vmatpush1.bf16.msra.mxu1 %v22833_v21  ;;  %v26720_v20 = vld [vmem:[%s26413_s15 + $0x20] sm:$0xff]  ;;  %v19698_v21 = vcombine.low %v683_v7, %v683_v7  ;;  %v22993_v7 = vld [vmem:[%s26411_s10 + $0x9ac] ss:$16 sps:$4 sm:$0xff]  }
 0x12e   : > { %15313 = vmatprep.subr.bf16.mxu0 %v22838_v22  ;;  %17149 = vmatprep.subr.bf16.mxu1 %v22841_v23  ;;  %v26723_v22 = vld [vmem:[%s26413_s15 + $0x140] sm:$0xff] }
 0x12f   : > { %v22925_v23 = vld [vmem:[%s26411_s10 + $0x848] ss:$16 sps:$4 sm:$0xff]  }
 0x131   : > { %15314 = vmatpush1.bf16.msra.mxu0 %v22836_v24  ;;  %17150 = vmatpush1.bf16.msra.mxu1 %v22839_v25  ;;  %v22930_v24 = vld [vmem:[%s26411_s10 + $0x864] ss:$16 sps:$4 sm:$0xff]   ;;  %v22933_v25 = vld [vmem:[%s26411_s10 + $0x86c] ss:$16 sps:$4 sm:$0xff]  }
 0x132   : > { %15315 = vmatprep.subr.bf16.mxu0 %v22844_v26  ;;  %17151 = vmatprep.subr.bf16.mxu1 %v22847_v27  ;;  %v19629_v26 = vcombine.high %v26720_v20, %v26723_v22  ;;  %v22928_v27 = vld [vmem:[%s26411_s10 + $0x860] ss:$16 sps:$4 sm:$0xff]  }
 0x135   : > { %15316 = vmatpush1.bf16.msra.mxu0 %v22842_v28  ;;  %17152 = vmatpush1.bf16.msra.mxu1 %v22845_v29  ;;  %v22931_v28 = vld [vmem:[%s26411_s10 + $0x868] ss:$16 sps:$4 sm:$0xff]   ;;  %v22936_v29 = vld [vmem:[%s26411_s10 + $0x884] ss:$16 sps:$4 sm:$0xff]  }
 0x136   : > { %15317 = vmatprep.subr.bf16.mxu0 %v22850_v30  ;;  %17153 = vmatprep.subr.bf16.mxu1 %v22853_v31  ;;  %v22939_v30 = vld [vmem:[%s26411_s10 + $0x88c] ss:$16 sps:$4 sm:$0xff]   ;;  %v22934_v31 = vld [vmem:[%s26411_s10 + $0x880] ss:$16 sps:$4 sm:$0xff]  }
 0x139   : > { %15318 = vmatpush1.bf16.msra.mxu0 %v22848_v32  ;;  %17154 = vmatpush1.bf16.msra.mxu1 %v22851_v33  ;;  %v22937_v32 = vld [vmem:[%s26411_s10 + $0x888] ss:$16 sps:$4 sm:$0xff]   ;;  %v22942_v33 = vld [vmem:[%s26411_s10 + $0x8a4] ss:$16 sps:$4 sm:$0xff]  }
 0x13a   : > { %15319 = vmatprep.subr.bf16.mxu0 %v22856_v34  ;;  %17155 = vmatprep.subr.bf16.mxu1 %v22859_v35  ;;  %v22945_v34 = vld [vmem:[%s26411_s10 + $0x8ac] ss:$16 sps:$4 sm:$0xff]   ;;  %v22940_v35 = vld [vmem:[%s26411_s10 + $0x8a0] ss:$16 sps:$4 sm:$0xff]  }
 0x13d   : > { %15320 = vmatpush1.bf16.msra.mxu0 %v22854_v36  ;;  %17156 = vmatpush1.bf16.msra.mxu1 %v22857_v37  ;;  %v22943_v36 = vld [vmem:[%s26411_s10 + $0x8a8] ss:$16 sps:$4 sm:$0xff]   ;;  %v22948_v37 = vld [vmem:[%s26411_s10 + $0x8c4] ss:$16 sps:$4 sm:$0xff]  }
 0x13e   : > { %15321 = vmatprep.subr.bf16.mxu0 %v22862_v38  ;;  %17157 = vmatprep.subr.bf16.mxu1 %v22865_v39  ;;  %v22951_v38 = vld [vmem:[%s26411_s10 + $0x8cc] ss:$16 sps:$4 sm:$0xff]   ;;  %v22946_v39 = vld [vmem:[%s26411_s10 + $0x8c0] ss:$16 sps:$4 sm:$0xff]  }
 0x141   : > { %15322 = vmatpush1.bf16.msra.mxu0 %v22860_v40  ;;  %17158 = vmatpush1.bf16.msra.mxu1 %v22863_v41  ;;  %v22949_v40 = vld [vmem:[%s26411_s10 + $0x8c8] ss:$16 sps:$4 sm:$0xff]   ;;  %v22954_v41 = vld [vmem:[%s26411_s10 + $0x8e4] ss:$16 sps:$4 sm:$0xff]  }
 0x142   : > { %15323 = vmatprep.subr.bf16.mxu0 %v22868_v42  ;;  %17159 = vmatprep.subr.bf16.mxu1 %v22871_v43  ;;  %v22957_v42 = vld [vmem:[%s26411_s10 + $0x8ec] ss:$16 sps:$4 sm:$0xff]   ;;  %v22952_v43 = vld [vmem:[%s26411_s10 + $0x8e0] ss:$16 sps:$4 sm:$0xff]  }
 0x145   : > { %15324 = vmatpush1.bf16.msra.mxu0 %v22866_v44  ;;  %17160 = vmatpush1.bf16.msra.mxu1 %v22869_v45  ;;  %v22955_v44 = vld [vmem:[%s26411_s10 + $0x8e8] ss:$16 sps:$4 sm:$0xff]   ;;  %v22960_v45 = vld [vmem:[%s26411_s10 + $0x904] ss:$16 sps:$4 sm:$0xff]  }
 0x146   : > { %15325 = vmatprep.subr.bf16.mxu0 %v22874_v46  ;;  %17161 = vmatprep.subr.bf16.mxu1 %v22877_v47  ;;  %v22963_v46 = vld [vmem:[%s26411_s10 + $0x90c] ss:$16 sps:$4 sm:$0xff]   ;;  %v22958_v47 = vld [vmem:[%s26411_s10 + $0x900] ss:$16 sps:$4 sm:$0xff]  }
 0x149   : > { %15326 = vmatpush1.bf16.msra.mxu0 %v22872_v48  ;;  %17162 = vmatpush1.bf16.msra.mxu1 %v22875_v49  ;;  %v22961_v48 = vld [vmem:[%s26411_s10 + $0x908] ss:$16 sps:$4 sm:$0xff]   ;;  %v22966_v49 = vld [vmem:[%s26411_s10 + $0x924] ss:$16 sps:$4 sm:$0xff]  }
 0x14a   : > { %15327 = vmatprep.subr.bf16.mxu0 %v22880_v50  ;;  %17163 = vmatprep.subr.bf16.mxu1 %v22883_v51  ;;  %v22969_v50 = vld [vmem:[%s26411_s10 + $0x92c] ss:$16 sps:$4 sm:$0xff]   ;;  %v22964_v51 = vld [vmem:[%s26411_s10 + $0x920] ss:$16 sps:$4 sm:$0xff]  }
 0x14d   : > { %15328 = vmatpush1.bf16.msra.mxu0 %v22878_v52  ;;  %17164 = vmatpush1.bf16.msra.mxu1 %v22881_v53  ;;  %v22967_v52 = vld [vmem:[%s26411_s10 + $0x928] ss:$16 sps:$4 sm:$0xff]   ;;  %v22972_v53 = vld [vmem:[%s26411_s10 + $0x944] ss:$16 sps:$4 sm:$0xff]  }
 0x14e   : > { %15329 = vmatprep.subr.bf16.mxu0 %v22886_v54  ;;  %17165 = vmatprep.subr.bf16.mxu1 %v22889_v55  ;;  %v22975_v54 = vld [vmem:[%s26411_s10 + $0x94c] ss:$16 sps:$4 sm:$0xff]   ;;  %v22970_v55 = vld [vmem:[%s26411_s10 + $0x940] ss:$16 sps:$4 sm:$0xff]  }
 0x151   : > { %15330 = vmatpush1.bf16.msra.mxu0 %v22884_v56  ;;  %17166 = vmatpush1.bf16.msra.mxu1 %v22887_v57  ;;  %v22973_v56 = vld [vmem:[%s26411_s10 + $0x948] ss:$16 sps:$4 sm:$0xff]   ;;  %v22978_v57 = vld [vmem:[%s26411_s10 + $0x964] ss:$16 sps:$4 sm:$0xff]  }
 0x152   : > { %15331 = vmatprep.subr.bf16.mxu0 %v22892_v58  ;;  %17167 = vmatprep.subr.bf16.mxu1 %v22895_v59  ;;  %v22981_v58 = vld [vmem:[%s26411_s10 + $0x96c] ss:$16 sps:$4 sm:$0xff]  }
 0x155   : > { %15332 = vmatpush1.bf16.msra.mxu0 %v22890_v60  ;;  %17168 = vmatpush1.bf16.msra.mxu1 %v22893_v61 }
 0x156   : > { %15333 = vmatprep.subr.bf16.mxu0 %v22898_v62  ;;  %17169 = vmatprep.subr.bf16.mxu1 %v22901_v63 }
 0x159   : > { %15334 = vmatpush1.bf16.msra.mxu0 %v22896_v0  ;;  %17170 = vmatpush1.bf16.msra.mxu1 %v22899_v1  ;;  %v22976_v1 = vld [vmem:[%s26411_s10 + $0x960] ss:$16 sps:$4 sm:$0xff]  }
 0x15a   : > { %15335 = vmatprep.subr.bf16.mxu0 %v22904_v2  ;;  %17171 = vmatprep.subr.bf16.mxu1 %v22907_v3  ;;  %v22979_v2 = vld [vmem:[%s26411_s10 + $0x968] ss:$16 sps:$4 sm:$0xff]  }
 0x15d   : > { %15336 = vmatpush1.bf16.msra.mxu0 %v22902_v4  ;;  %17172 = vmatpush1.bf16.msra.mxu1 %v22905_v5  ;;  %v22984_v5 = vld [vmem:[%s26411_s10 + $0x984] ss:$16 sps:$4 sm:$0xff]  }
 0x15e   : > { %15356 = vmatprep.subr.bf16.mxu0 %v22910_v6  ;;  %17192 = vmatprep.subr.bf16.mxu1 %v22913_v9  ;;  %v22987_v6 = vld [vmem:[%s26411_s10 + $0x98c] ss:$16 sps:$4 sm:$0xff]   ;;  %v22982_v9 = vld [vmem:[%s26411_s10 + $0x980] ss:$16 sps:$4 sm:$0xff]  }
 0x160   : > { %15338 = vmatmul.mubr.bf16.vlgmr.msra.gmra.mrb[0].mxu0 %v19626_v10  ;;  %17174 = vmatmul.mubr.bf16.vlgmr.msra.gmra.mrb[0].mxu1 %v19626_v10  ;;  %v22985_v10 = vld [vmem:[%s26411_s10 + $0x988] ss:$16 sps:$4 sm:$0xff]  }
 0x161   : > { %15357 = vmatpush1.bf16.msra.mxu0 %v22908_v11  ;;  %17193 = vmatpush1.bf16.msra.mxu1 %v22911_v8  ;;  %v22990_v11 = vld [vmem:[%s26411_s10 + $0x9a4] ss:$16 sps:$4 sm:$0xff]   ;;  %v22988_v8 = vld [vmem:[%s26411_s10 + $0x9a0] ss:$16 sps:$4 sm:$0xff]  }
 0x162   : > { %15358 = vmatprep.subr.bf16.mxu0 %v22916_v12  ;;  %17194 = vmatprep.subr.bf16.mxu1 %v22919_v13  ;;  %v22991_v12 = vld [vmem:[%s26411_s10 + $0x9a8] ss:$16 sps:$4 sm:$0xff]   ;;  %v22996_v13 = vld [vmem:[%s26411_s10 + $0x9c4] ss:$16 sps:$4 sm:$0xff]  }
 0x163   : > { %15347 = vmatprep.mubr.bf16.mxu0 %v19699_v14  ;;  %17183 = vmatprep.mubr.bf16.mxu1 %v19699_v14  ;;  %v22999_v14 = vld [vmem:[%s26411_s10 + $0x9cc] ss:$16 sps:$4 sm:$0xff]  }
 0x165   : > { %15359 = vmatpush1.bf16.msra.mxu0 %v22914_v15  ;;  %17195 = vmatpush1.bf16.msra.mxu1 %v22917_v16  ;;  %v22994_v15 = vld [vmem:[%s26411_s10 + $0x9c0] ss:$16 sps:$4 sm:$0xff]   ;;  %v22997_v16 = vld [vmem:[%s26411_s10 + $0x9c8] ss:$16 sps:$4 sm:$0xff]  }
 0x166   : > { %15360 = vmatprep.subr.bf16.mxu0 %v22924_v17  ;;  %17196 = vmatprep.subr.bf16.mxu1 %v22927_v18  ;;  %v23002_v17 = vld [vmem:[%s26411_s10 + $0x9e4] ss:$16 sps:$4 sm:$0xff]   ;;  %v23005_v18 = vld [vmem:[%s26411_s10 + $0x9ec] ss:$16 sps:$4 sm:$0xff]  }
 0x168   : > { %15348 = vmatmul.mubr.bf16.gmra.mrb[16].mxu0 %v19698_v21  ;;  %17184 = vmatmul.mubr.bf16.gmra.mrb[16].mxu1 %v19698_v21  ;;  %v23003_v21 = vld [vmem:[%s26411_s10 + $0x9e8] ss:$16 sps:$4 sm:$0xff]  }
 0x169   : > { %15361 = vmatpush1.bf16.msra.mxu0 %v22922_v19  ;;  %17197 = vmatpush1.bf16.msra.mxu1 %v22925_v23  ;;  %v23000_v19 = vld [vmem:[%s26411_s10 + $0x9e0] ss:$16 sps:$4 sm:$0xff]   ;;  %v23008_v23 = vld [vmem:[%s26411_s10 + $0xa04] ss:$16 sps:$4 sm:$0xff]  }
 0x16a   : > { %15362 = vmatprep.subr.bf16.mxu0 %v22930_v24  ;;  %17198 = vmatprep.subr.bf16.mxu1 %v22933_v25  ;;  %v23011_v24 = vld [vmem:[%s26411_s10 + $0xa0c] ss:$16 sps:$4 sm:$0xff]   ;;  %v23006_v25 = vld [vmem:[%s26411_s10 + $0xa00] ss:$16 sps:$4 sm:$0xff]  }
 0x16b   : > { %15388 = vmatprep.mubr.bf16.mxu0 %v19629_v26  ;;  %17224 = vmatprep.mubr.bf16.mxu1 %v19629_v26  ;;  %v19628_v26 = vcombine.low %v26720_v20, %v26723_v22  ;;  %v23015_v20 = vld [vmem:[%s26411_s10 + $0xa28] ss:$16 sps:$4 sm:$0xff]   ;;  %v23022_v22 = vld [vmem:[%s26411_s10 + $0xa44] ss:$16 sps:$4 sm:$0xff]  }
 0x16d   : > { %15363 = vmatpush1.bf16.msra.mxu0 %v22928_v27  ;;  %17199 = vmatpush1.bf16.msra.mxu1 %v22931_v28  ;;  %v23009_v27 = vld [vmem:[%s26411_s10 + $0xa08] ss:$16 sps:$4 sm:$0xff]   ;;  %v684_v28 = vld [vmem:[%s26413_s15 + $0x260] sm:$0x11] }
 0x16e   : > { %15364 = vmatprep.subr.bf16.mxu0 %v22936_v29  ;;  %17200 = vmatprep.subr.bf16.mxu1 %v22939_v30  ;;  %v23014_v29 = vld [vmem:[%s26411_s10 + $0xa24] ss:$16 sps:$4 sm:$0xff]   ;;  %v23017_v30 = vld [vmem:[%s26411_s10 + $0xa2c] ss:$16 sps:$4 sm:$0xff]  }
 0x171   : > { %15365 = vmatpush1.bf16.msra.mxu0 %v22934_v31  ;;  %17201 = vmatpush1.bf16.msra.mxu1 %v22937_v32  ;;  %v23012_v31 = vld [vmem:[%s26411_s10 + $0xa20] ss:$16 sps:$4 sm:$0xff]   ;;  %v19701_v32 = vcombine.high %v684_v28, %v684_v28 }
 0x172   : > { %15366 = vmatprep.subr.bf16.mxu0 %v22942_v33  ;;  %17202 = vmatprep.subr.bf16.mxu1 %v22945_v34  ;;  %v23025_v33 = vld [vmem:[%s26411_s10 + $0xa4c] ss:$16 sps:$4 sm:$0xff]  }
 0x173   : > { %v26802_v34 = vld [vmem:[%s26413_s15 + $0x28] sm:$0xff] }
 0x175   : > { %15367 = vmatpush1.bf16.msra.mxu0 %v22940_v35  ;;  %17203 = vmatpush1.bf16.msra.mxu1 %v22943_v36  ;;  %v23020_v35 = vld [vmem:[%s26411_s10 + $0xa40] ss:$16 sps:$4 sm:$0xff]   ;;  %v23023_v36 = vld [vmem:[%s26411_s10 + $0xa48] ss:$16 sps:$4 sm:$0xff]  }
 0x176   : > { %15368 = vmatprep.subr.bf16.mxu0 %v22948_v37  ;;  %17204 = vmatprep.subr.bf16.mxu1 %v22951_v38  ;;  %v19700_v37 = vcombine.low %v684_v28, %v684_v28  ;;  %v26807_v38 = vld [vmem:[%s26413_s15 + $0x148] sm:$0xff] }
 0x177   : > { %v23080_v28 = vld [vmem:[%s26411_s10 + $0xb80] ss:$16 sps:$4 sm:$0xff]  }
 0x179   : > { %15369 = vmatpush1.bf16.msra.mxu0 %v22946_v39  ;;  %17205 = vmatpush1.bf16.msra.mxu1 %v22949_v40  ;;  %v23028_v39 = vld [vmem:[%s26411_s10 + $0xa64] ss:$16 sps:$4 sm:$0xff]   ;;  %v23031_v40 = vld [vmem:[%s26411_s10 + $0xa6c] ss:$16 sps:$4 sm:$0xff]  }
 0x17a   : > { %15370 = vmatprep.subr.bf16.mxu0 %v22954_v41  ;;  %17206 = vmatprep.subr.bf16.mxu1 %v22957_v42  ;;  %v19631_v41 = vcombine.high %v26802_v34, %v26807_v38  ;;  %v23026_v42 = vld [vmem:[%s26411_s10 + $0xa60] ss:$16 sps:$4 sm:$0xff]  }
 0x17b   : > { %v26762_v59 = vpop.f32.mrb[4].mxu0  ;;  %v26764_v60 = vpop.f32.mrb[4].mxu1 }
 0x17c   : > { %v26766_v61 = vpop.f32.mrb[5].mxu0  ;;  %v26768_v62 = vpop.f32.mrb[5].mxu1 }
 0x17d   : > { %15371 = vmatpush1.bf16.msra.mxu0 %v22952_v43  ;;  %17207 = vmatpush1.bf16.msra.mxu1 %v22955_v44  ;;  %v15200_v63 = vpop.f32.mrb[6].mxu0  ;;  %v17036_v0 = vpop.f32.mrb[6].mxu1  ;;  %v23029_v43 = vld [vmem:[%s26411_s10 + $0xa68] ss:$16 sps:$4 sm:$0xff]   ;;  %v23034_v44 = vld [vmem:[%s26411_s10 + $0xa84] ss:$16 sps:$4 sm:$0xff]  }
 0x17e   : > { %15372 = vmatprep.subr.bf16.mxu0 %v22960_v45  ;;  %17208 = vmatprep.subr.bf16.mxu1 %v22963_v46  ;;  %v15201_v3 = vpop.f32.mrb[7].mxu0  ;;  %v17037_v4 = vpop.f32.mrb[7].mxu1  ;;  %v23037_v45 = vld [vmem:[%s26411_s10 + $0xa8c] ss:$16 sps:$4 sm:$0xff]   ;;  %v23032_v46 = vld [vmem:[%s26411_s10 + $0xa80] ss:$16 sps:$4 sm:$0xff]  }
 0x17f   : > { %v23053_v63 = vld [vmem:[%s26411_s10 + $0xae8] ss:$16 sps:$4 sm:$0xff]   ;;  %v23058_v0 = vld [vmem:[%s26411_s10 + $0xb04] ss:$16 sps:$4 sm:$0xff]  }
 0x181   : > { %15373 = vmatpush1.bf16.msra.mxu0 %v22958_v47  ;;  %17209 = vmatpush1.bf16.msra.mxu1 %v22961_v48  ;;  %v23035_v47 = vld [vmem:[%s26411_s10 + $0xa88] ss:$16 sps:$4 sm:$0xff]   ;;  %v23040_v48 = vld [vmem:[%s26411_s10 + $0xaa4] ss:$16 sps:$4 sm:$0xff]  }
 0x182   : > { %15374 = vmatprep.subr.bf16.mxu0 %v22966_v49  ;;  %17210 = vmatprep.subr.bf16.mxu1 %v22969_v50  ;;  %v23043_v49 = vld [vmem:[%s26411_s10 + $0xaac] ss:$16 sps:$4 sm:$0xff]   ;;  %v23038_v50 = vld [vmem:[%s26411_s10 + $0xaa0] ss:$16 sps:$4 sm:$0xff]  }
 0x185   : > { %15375 = vmatpush1.bf16.msra.mxu0 %v22964_v51  ;;  %17211 = vmatpush1.bf16.msra.mxu1 %v22967_v52  ;;  %v23041_v51 = vld [vmem:[%s26411_s10 + $0xaa8] ss:$16 sps:$4 sm:$0xff]   ;;  %v23046_v52 = vld [vmem:[%s26411_s10 + $0xac4] ss:$16 sps:$4 sm:$0xff]  }
 0x186   : > { %15376 = vmatprep.subr.bf16.mxu0 %v22972_v53  ;;  %17212 = vmatprep.subr.bf16.mxu1 %v22975_v54  ;;  %v23049_v53 = vld [vmem:[%s26411_s10 + $0xacc] ss:$16 sps:$4 sm:$0xff]   ;;  %v23044_v54 = vld [vmem:[%s26411_s10 + $0xac0] ss:$16 sps:$4 sm:$0xff]  }
 0x189   : > { %15377 = vmatpush1.bf16.msra.mxu0 %v22970_v55  ;;  %17213 = vmatpush1.bf16.msra.mxu1 %v22973_v56  ;;  %v23047_v55 = vld [vmem:[%s26411_s10 + $0xac8] ss:$16 sps:$4 sm:$0xff]   ;;  %v23052_v56 = vld [vmem:[%s26411_s10 + $0xae4] ss:$16 sps:$4 sm:$0xff]  }
 0x18a   : > { %15378 = vmatprep.subr.bf16.mxu0 %v22978_v57  ;;  %17214 = vmatprep.subr.bf16.mxu1 %v22981_v58  ;;  %v23055_v57 = vld [vmem:[%s26411_s10 + $0xaec] ss:$16 sps:$4 sm:$0xff]   ;;  %v23050_v58 = vld [vmem:[%s26411_s10 + $0xae0] ss:$16 sps:$4 sm:$0xff]  }
 0x18d   : > { %15379 = vmatpush1.bf16.msra.mxu0 %v22976_v1  ;;  %17215 = vmatpush1.bf16.msra.mxu1 %v22979_v2  ;;  %v23061_v1 = vld [vmem:[%s26411_s10 + $0xb0c] ss:$16 sps:$4 sm:$0xff]  }
 0x18e   : > { %15380 = vmatprep.subr.bf16.mxu0 %v22984_v5  ;;  %17216 = vmatprep.subr.bf16.mxu1 %v22987_v6 }
 0x191   : > { %15381 = vmatpush1.bf16.msra.mxu0 %v22982_v9  ;;  %17217 = vmatpush1.bf16.msra.mxu1 %v22985_v10 }
 0x192   : > { %15382 = vmatprep.subr.bf16.mxu0 %v22990_v11  ;;  %17218 = vmatprep.subr.bf16.mxu1 %v22993_v7  ;;  %v23056_v7 = vld [vmem:[%s26411_s10 + $0xb00] ss:$16 sps:$4 sm:$0xff]  }
 0x195   : > { %15383 = vmatpush1.bf16.msra.mxu0 %v22988_v8  ;;  %17219 = vmatpush1.bf16.msra.mxu1 %v22991_v12  ;;  %v23059_v8 = vld [vmem:[%s26411_s10 + $0xb08] ss:$16 sps:$4 sm:$0xff]  }
 0x196   : > { %15384 = vmatprep.subr.bf16.mxu0 %v22996_v13  ;;  %17220 = vmatprep.subr.bf16.mxu1 %v22999_v14 }
 0x199   : > { %15385 = vmatpush1.bf16.msra.mxu0 %v22994_v15  ;;  %17221 = vmatpush1.bf16.msra.mxu1 %v22997_v16  ;;  %v23065_v15 = vld [vmem:[%s26411_s10 + $0xb28] ss:$16 sps:$4 sm:$0xff]   ;;  %v23070_v16 = vld [vmem:[%s26411_s10 + $0xb44] ss:$16 sps:$4 sm:$0xff]  }
 0x19a   : > { %15386 = vmatprep.subr.bf16.mxu0 %v23002_v17  ;;  %17222 = vmatprep.subr.bf16.mxu1 %v23005_v18  ;;  %v23073_v17 = vld [vmem:[%s26411_s10 + $0xb4c] ss:$16 sps:$4 sm:$0xff]   ;;  %v23068_v18 = vld [vmem:[%s26411_s10 + $0xb40] ss:$16 sps:$4 sm:$0xff]  }
 0x19d   : > { %15387 = vmatpush1.bf16.msra.mxu0 %v23000_v19  ;;  %17223 = vmatpush1.bf16.msra.mxu1 %v23003_v21  ;;  %v23071_v19 = vld [vmem:[%s26411_s10 + $0xb48] ss:$16 sps:$4 sm:$0xff]   ;;  %v23076_v21 = vld [vmem:[%s26411_s10 + $0xb64] ss:$16 sps:$4 sm:$0xff]  }
 0x19e   : > { %15407 = vmatprep.subr.bf16.mxu0 %v23008_v23  ;;  %17243 = vmatprep.subr.bf16.mxu1 %v23011_v24  ;;  %v23079_v23 = vld [vmem:[%s26411_s10 + $0xb6c] ss:$16 sps:$4 sm:$0xff]   ;;  %v23074_v24 = vld [vmem:[%s26411_s10 + $0xb60] ss:$16 sps:$4 sm:$0xff]  }
 0x1a0   : > { %15389 = vmatmul.mubr.bf16.vlgmr.msra.gmra.mrb[0].mxu0 %v19628_v26  ;;  %17225 = vmatmul.mubr.bf16.vlgmr.msra.gmra.mrb[0].mxu1 %v19628_v26  ;;  %v23082_v26 = vld [vmem:[%s26411_s10 + $0xb84] ss:$16 sps:$4 sm:$0xff]  }
 0x1a1   : > { %15408 = vmatpush1.bf16.msra.mxu0 %v23006_v25  ;;  %17244 = vmatpush1.bf16.msra.mxu1 %v23009_v27  ;;  %v23077_v25 = vld [vmem:[%s26411_s10 + $0xb68] ss:$16 sps:$4 sm:$0xff]   ;;  %v23085_v27 = vld [vmem:[%s26411_s10 + $0xb8c] ss:$16 sps:$4 sm:$0xff]  }
 0x1a2   : > { %15409 = vmatprep.subr.bf16.mxu0 %v23014_v29  ;;  %17245 = vmatprep.subr.bf16.mxu1 %v23017_v30  ;;  %v23083_v29 = vld [vmem:[%s26411_s10 + $0xb88] ss:$16 sps:$4 sm:$0xff]   ;;  %v23088_v30 = vld [vmem:[%s26411_s10 + $0xba4] ss:$16 sps:$4 sm:$0xff]  }
 0x1a3   : > { %15398 = vmatprep.mubr.bf16.mxu0 %v19701_v32  ;;  %17234 = vmatprep.mubr.bf16.mxu1 %v19701_v32  ;;  %v23086_v32 = vld [vmem:[%s26411_s10 + $0xba0] ss:$16 sps:$4 sm:$0xff]  }
 0x1a5   : > { %15410 = vmatpush1.bf16.msra.mxu0 %v23012_v31  ;;  %17246 = vmatpush1.bf16.msra.mxu1 %v23015_v20  ;;  %v23091_v31 = vld [vmem:[%s26411_s10 + $0xbac] ss:$16 sps:$4 sm:$0xff]   ;;  %v23089_v20 = vld [vmem:[%s26411_s10 + $0xba8] ss:$16 sps:$4 sm:$0xff]  }
 0x1a6   : > { %15411 = vmatprep.subr.bf16.mxu0 %v23022_v22  ;;  %17247 = vmatprep.subr.bf16.mxu1 %v23025_v33  ;;  %v23094_v22 = vld [vmem:[%s26411_s10 + $0xbc4] ss:$16 sps:$4 sm:$0xff]   ;;  %v23097_v33 = vld [vmem:[%s26411_s10 + $0xbcc] ss:$16 sps:$4 sm:$0xff]  }
 0x1a8   : > { %15399 = vmatmul.mubr.bf16.gmra.mrb[20].mxu0 %v19700_v37  ;;  %17235 = vmatmul.mubr.bf16.gmra.mrb[20].mxu1 %v19700_v37  ;;  %v23100_v37 = vld [vmem:[%s26411_s10 + $0xbe4] ss:$16 sps:$4 sm:$0xff]  }
 0x1a9   : > { %15412 = vmatpush1.bf16.msra.mxu0 %v23020_v35  ;;  %17248 = vmatpush1.bf16.msra.mxu1 %v23023_v36  ;;  %v23092_v35 = vld [vmem:[%s26411_s10 + $0xbc0] ss:$16 sps:$4 sm:$0xff]   ;;  %v23095_v36 = vld [vmem:[%s26411_s10 + $0xbc8] ss:$16 sps:$4 sm:$0xff]  }
 0x1aa   : > { %15413 = vmatprep.subr.bf16.mxu0 %v23028_v39  ;;  %17249 = vmatprep.subr.bf16.mxu1 %v23031_v40  ;;  %v23103_v39 = vld [vmem:[%s26411_s10 + $0xbec] ss:$16 sps:$4 sm:$0xff]   ;;  %v23098_v40 = vld [vmem:[%s26411_s10 + $0xbe0] ss:$16 sps:$4 sm:$0xff]  }
 0x1ab   : > { %15439 = vmatprep.mubr.bf16.mxu0 %v19631_v41  ;;  %17275 = vmatprep.mubr.bf16.mxu1 %v19631_v41  ;;  %v23101_v41 = vld [vmem:[%s26411_s10 + $0xbe8] ss:$16 sps:$4 sm:$0xff]  }
 0x1ad   : > { %15414 = vmatpush1.bf16.msra.mxu0 %v23026_v42  ;;  %17250 = vmatpush1.bf16.msra.mxu1 %v23029_v43  ;;  %v23106_v42 = vld [vmem:[%s26411_s10 + $0xc04] ss:$16 sps:$4 sm:$0xff]   ;;  %v23109_v43 = vld [vmem:[%s26411_s10 + $0xc0c] ss:$16 sps:$4 sm:$0xff]  }
 0x1ae   : > { %15415 = vmatprep.subr.bf16.mxu0 %v23034_v44  ;;  %17251 = vmatprep.subr.bf16.mxu1 %v23037_v45  ;;  %v23104_v44 = vld [vmem:[%s26411_s10 + $0xc00] ss:$16 sps:$4 sm:$0xff]   ;;  %v19630_v45 = vcombine.low %v26802_v34, %v26807_v38  ;;  %v23113_v34 = vld [vmem:[%s26411_s10 + $0xc28] ss:$16 sps:$4 sm:$0xff]   ;;  %v23120_v38 = vld [vmem:[%s26411_s10 + $0xc44] ss:$16 sps:$4 sm:$0xff]  }
 0x1b1   : > { %15416 = vmatpush1.bf16.msra.mxu0 %v23032_v46  ;;  %17252 = vmatpush1.bf16.msra.mxu1 %v23035_v47  ;;  %v23107_v46 = vld [vmem:[%s26411_s10 + $0xc08] ss:$16 sps:$4 sm:$0xff]  }
 0x1b2   : > { %15417 = vmatprep.subr.bf16.mxu0 %v23040_v48  ;;  %17253 = vmatprep.subr.bf16.mxu1 %v23043_v49  ;;  %v685_v47 = vld [vmem:[%s26413_s15 + $0x268] sm:$0x11]  ;;  %v23112_v48 = vld [vmem:[%s26411_s10 + $0xc24] ss:$16 sps:$4 sm:$0xff]  }
 0x1b3   : > { %v23115_v49 = vld [vmem:[%s26411_s10 + $0xc2c] ss:$16 sps:$4 sm:$0xff]  }
 0x1b5   : > { %15418 = vmatpush1.bf16.msra.mxu0 %v23038_v50  ;;  %17254 = vmatpush1.bf16.msra.mxu1 %v23041_v51  ;;  %v23110_v50 = vld [vmem:[%s26411_s10 + $0xc20] ss:$16 sps:$4 sm:$0xff]   ;;  %v19703_v51 = vcombine.high %v685_v47, %v685_v47 }
 0x1b6   : > { %15419 = vmatprep.subr.bf16.mxu0 %v23046_v52  ;;  %17255 = vmatprep.subr.bf16.mxu1 %v23049_v53  ;;  %v23123_v52 = vld [vmem:[%s26411_s10 + $0xc4c] ss:$16 sps:$4 sm:$0xff]   ;;  %v26889_v53 = vld [vmem:[%s26413_s15 + $0x30] sm:$0xff] }
 0x1b9   : > { %15420 = vmatpush1.bf16.msra.mxu0 %v23044_v54  ;;  %17256 = vmatpush1.bf16.msra.mxu1 %v23047_v55  ;;  %v23118_v54 = vld [vmem:[%s26411_s10 + $0xc40] ss:$16 sps:$4 sm:$0xff]   ;;  %v23121_v55 = vld [vmem:[%s26411_s10 + $0xc48] ss:$16 sps:$4 sm:$0xff]  }
 0x1ba   : > { %15421 = vmatprep.subr.bf16.mxu0 %v23052_v56  ;;  %17257 = vmatprep.subr.bf16.mxu1 %v23055_v57  ;;  %v19702_v56 = vcombine.low %v685_v47, %v685_v47  ;;  %v26894_v57 = vld [vmem:[%s26413_s15 + $0x150] sm:$0xff] }
 0x1bb   : > { %v15247_v2 = vpop.f32.mrb[8].mxu0  ;;  %v17083_v3 = vpop.f32.mrb[8].mxu1  ;;  %v23178_v47 = vld [vmem:[%s26411_s10 + $0xd80] ss:$16 sps:$4 sm:$0xff]  }
 0x1bc   : > { %v26834_v4 = vadd.f32 %v15247_v2, %v26762_v59  ;;  %v26837_v5 = vadd.f32 %v17083_v3, %v26764_v60  ;;  %v15249_v6 = vpop.f32.mrb[9].mxu0  ;;  %v17085_v9 = vpop.f32.mrb[9].mxu1  ;;  %v23064_v60 = vld [vmem:[%s26411_s10 + $0xb24] ss:$16 sps:$4 sm:$0xff]   ;;  %v23127_v2 = vld [vmem:[%s26411_s10 + $0xc68] ss:$16 sps:$4 sm:$0xff]  }
 0x1bd   : > { %v26840_v10 = vadd.f32 %v15249_v6, %v26766_v61  ;;  %v26843_v11 = vadd.f32 %v17085_v9, %v26768_v62  ;;  %15422 = vmatpush1.bf16.msra.mxu0 %v23050_v58  ;;  %17258 = vmatpush1.bf16.msra.mxu1 %v23053_v63  ;;  %v15251_v59 = vpop.f32.mrb[10].mxu0  ;;  %v17087_v12 = vpop.f32.mrb[10].mxu1  ;;  %v23067_v61 = vld [vmem:[%s26411_s10 + $0xb2c] ss:$16 sps:$4 sm:$0xff]   ;;  %v23062_v62 = vld [vmem:[%s26411_s10 + $0xb20] ss:$16 sps:$4 sm:$0xff]  }
 0x1be   : > { %15423 = vmatprep.subr.bf16.mxu0 %v23058_v0  ;;  %17259 = vmatprep.subr.bf16.mxu1 %v23061_v1  ;;  %v15252_v13 = vpop.f32.mrb[11].mxu0  ;;  %v17088_v14 = vpop.f32.mrb[11].mxu1  ;;  %v23126_v58 = vld [vmem:[%s26411_s10 + $0xc64] ss:$16 sps:$4 sm:$0xff]   ;;  %v23129_v63 = vld [vmem:[%s26411_s10 + $0xc6c] ss:$16 sps:$4 sm:$0xff]   ;;  %v19633_v0 = vcombine.high %v26889_v53, %v26894_v57 }
 0x1bf   : > { %v23124_v1 = vld [vmem:[%s26411_s10 + $0xc60] ss:$16 sps:$4 sm:$0xff]   ;;  %v23132_v3 = vld [vmem:[%s26411_s10 + $0xc84] ss:$16 sps:$4 sm:$0xff]   ;;  %v23135_v6 = vld [vmem:[%s26411_s10 + $0xc8c] ss:$16 sps:$4 sm:$0xff]  }
 0x1c0   : > { %v23130_v9 = vld [vmem:[%s26411_s10 + $0xc80] ss:$16 sps:$4 sm:$0xff]   ;;  %v23141_v59 = vld [vmem:[%s26411_s10 + $0xcac] ss:$16 sps:$4 sm:$0xff]  }
 0x1c1   : > { %15424 = vmatpush1.bf16.msra.mxu0 %v23056_v7  ;;  %17260 = vmatpush1.bf16.msra.mxu1 %v23059_v8  ;;  %v23133_v7 = vld [vmem:[%s26411_s10 + $0xc88] ss:$16 sps:$4 sm:$0xff]   ;;  %v23138_v8 = vld [vmem:[%s26411_s10 + $0xca4] ss:$16 sps:$4 sm:$0xff]   ;;  %v23136_v12 = vld [vmem:[%s26411_s10 + $0xca0] ss:$16 sps:$4 sm:$0xff]  }
 0x1c2   : > { %15425 = vmatprep.subr.bf16.mxu0 %v23064_v60  ;;  %17261 = vmatprep.subr.bf16.mxu1 %v23067_v61  ;;  %v23139_v60 = vld [vmem:[%s26411_s10 + $0xca8] ss:$16 sps:$4 sm:$0xff]   ;;  %v23144_v61 = vld [vmem:[%s26411_s10 + $0xcc4] ss:$16 sps:$4 sm:$0xff]   ;;  %v23147_v13 = vld [vmem:[%s26411_s10 + $0xccc] ss:$16 sps:$4 sm:$0xff]  }
 0x1c3   : > { %v23142_v14 = vld [vmem:[%s26411_s10 + $0xcc0] ss:$16 sps:$4 sm:$0xff]  }
 0x1c5   : > { %15426 = vmatpush1.bf16.msra.mxu0 %v23062_v62  ;;  %17262 = vmatpush1.bf16.msra.mxu1 %v23065_v15  ;;  %v23145_v62 = vld [vmem:[%s26411_s10 + $0xcc8] ss:$16 sps:$4 sm:$0xff]   ;;  %v23150_v15 = vld [vmem:[%s26411_s10 + $0xce4] ss:$16 sps:$4 sm:$0xff]  }
 0x1c6   : > { %15427 = vmatprep.subr.bf16.mxu0 %v23070_v16  ;;  %17263 = vmatprep.subr.bf16.mxu1 %v23073_v17  ;;  %v23153_v16 = vld [vmem:[%s26411_s10 + $0xcec] ss:$16 sps:$4 sm:$0xff]   ;;  %v23148_v17 = vld [vmem:[%s26411_s10 + $0xce0] ss:$16 sps:$4 sm:$0xff]  }
 0x1c9   : > { %15428 = vmatpush1.bf16.msra.mxu0 %v23068_v18  ;;  %17264 = vmatpush1.bf16.msra.mxu1 %v23071_v19  ;;  %v23151_v18 = vld [vmem:[%s26411_s10 + $0xce8] ss:$16 sps:$4 sm:$0xff]   ;;  %v23156_v19 = vld [vmem:[%s26411_s10 + $0xd04] ss:$16 sps:$4 sm:$0xff]  }
 0x1ca   : > { %15429 = vmatprep.subr.bf16.mxu0 %v23076_v21  ;;  %17265 = vmatprep.subr.bf16.mxu1 %v23079_v23  ;;  %v23159_v21 = vld [vmem:[%s26411_s10 + $0xd0c] ss:$16 sps:$4 sm:$0xff]  }
 0x1cd   : > { %15430 = vmatpush1.bf16.msra.mxu0 %v23074_v24  ;;  %17266 = vmatpush1.bf16.msra.mxu1 %v23077_v25 }
 0x1ce   : > { %15431 = vmatprep.subr.bf16.mxu0 %v23082_v26  ;;  %17267 = vmatprep.subr.bf16.mxu1 %v23085_v27 }
 0x1d1   : > { %15432 = vmatpush1.bf16.msra.mxu0 %v23080_v28  ;;  %17268 = vmatpush1.bf16.msra.mxu1 %v23083_v29 }
 0x1d2   : > { %15433 = vmatprep.subr.bf16.mxu0 %v23088_v30  ;;  %17269 = vmatprep.subr.bf16.mxu1 %v23091_v31  ;;  %v23154_v31 = vld [vmem:[%s26411_s10 + $0xd00] ss:$16 sps:$4 sm:$0xff]  }
 0x1d5   : > { %15434 = vmatpush1.bf16.msra.mxu0 %v23086_v32  ;;  %17270 = vmatpush1.bf16.msra.mxu1 %v23089_v20  ;;  %v23157_v32 = vld [vmem:[%s26411_s10 + $0xd08] ss:$16 sps:$4 sm:$0xff]  }
 0x1d6   : > { %15435 = vmatprep.subr.bf16.mxu0 %v23094_v22  ;;  %17271 = vmatprep.subr.bf16.mxu1 %v23097_v33 }
 0x1d9   : > { %15436 = vmatpush1.bf16.msra.mxu0 %v23092_v35  ;;  %17272 = vmatpush1.bf16.msra.mxu1 %v23095_v36  ;;  %v23163_v35 = vld [vmem:[%s26411_s10 + $0xd28] ss:$16 sps:$4 sm:$0xff]   ;;  %v23168_v36 = vld [vmem:[%s26411_s10 + $0xd44] ss:$16 sps:$4 sm:$0xff]  }
 0x1da   : > { %15437 = vmatprep.subr.bf16.mxu0 %v23100_v37  ;;  %17273 = vmatprep.subr.bf16.mxu1 %v23103_v39  ;;  %v23171_v37 = vld [vmem:[%s26411_s10 + $0xd4c] ss:$16 sps:$4 sm:$0xff]   ;;  %v23166_v39 = vld [vmem:[%s26411_s10 + $0xd40] ss:$16 sps:$4 sm:$0xff]  }
 0x1dd   : > { %15438 = vmatpush1.bf16.msra.mxu0 %v23098_v40  ;;  %17274 = vmatpush1.bf16.msra.mxu1 %v23101_v41  ;;  %v23169_v40 = vld [vmem:[%s26411_s10 + $0xd48] ss:$16 sps:$4 sm:$0xff]   ;;  %v23174_v41 = vld [vmem:[%s26411_s10 + $0xd64] ss:$16 sps:$4 sm:$0xff]  }
 0x1de   : > { %15458 = vmatprep.subr.bf16.mxu0 %v23106_v42  ;;  %17294 = vmatprep.subr.bf16.mxu1 %v23109_v43  ;;  %v23177_v42 = vld [vmem:[%s26411_s10 + $0xd6c] ss:$16 sps:$4 sm:$0xff]   ;;  %v23172_v43 = vld [vmem:[%s26411_s10 + $0xd60] ss:$16 sps:$4 sm:$0xff]  }
 0x1e0   : > { %15440 = vmatmul.mubr.bf16.vlgmr.msra.gmra.mrb[0].mxu0 %v19630_v45  ;;  %17276 = vmatmul.mubr.bf16.vlgmr.msra.gmra.mrb[0].mxu1 %v19630_v45  ;;  %v23180_v45 = vld [vmem:[%s26411_s10 + $0xd84] ss:$16 sps:$4 sm:$0xff]  }
 0x1e1   : > { %15459 = vmatpush1.bf16.msra.mxu0 %v23104_v44  ;;  %17295 = vmatpush1.bf16.msra.mxu1 %v23107_v46  ;;  %v23175_v44 = vld [vmem:[%s26411_s10 + $0xd68] ss:$16 sps:$4 sm:$0xff]   ;;  %v23183_v46 = vld [vmem:[%s26411_s10 + $0xd8c] ss:$16 sps:$4 sm:$0xff]  }
 0x1e2   : > { %15460 = vmatprep.subr.bf16.mxu0 %v23112_v48  ;;  %17296 = vmatprep.subr.bf16.mxu1 %v23115_v49  ;;  %v23181_v48 = vld [vmem:[%s26411_s10 + $0xd88] ss:$16 sps:$4 sm:$0xff]   ;;  %v23186_v49 = vld [vmem:[%s26411_s10 + $0xda4] ss:$16 sps:$4 sm:$0xff]  }
 0x1e3   : > { %15449 = vmatprep.mubr.bf16.mxu0 %v19703_v51  ;;  %17285 = vmatprep.mubr.bf16.mxu1 %v19703_v51  ;;  %v23184_v51 = vld [vmem:[%s26411_s10 + $0xda0] ss:$16 sps:$4 sm:$0xff]  }
 0x1e5   : > { %15461 = vmatpush1.bf16.msra.mxu0 %v23110_v50  ;;  %17297 = vmatpush1.bf16.msra.mxu1 %v23113_v34  ;;  %v23189_v50 = vld [vmem:[%s26411_s10 + $0xdac] ss:$16 sps:$4 sm:$0xff]   ;;  %v23187_v34 = vld [vmem:[%s26411_s10 + $0xda8] ss:$16 sps:$4 sm:$0xff]  }
 0x1e6   : > { %15462 = vmatprep.subr.bf16.mxu0 %v23120_v38  ;;  %17298 = vmatprep.subr.bf16.mxu1 %v23123_v52  ;;  %v23192_v38 = vld [vmem:[%s26411_s10 + $0xdc4] ss:$16 sps:$4 sm:$0xff]   ;;  %v23195_v52 = vld [vmem:[%s26411_s10 + $0xdcc] ss:$16 sps:$4 sm:$0xff]  }
 0x1e8   : > { %15450 = vmatmul.mubr.bf16.gmra.mrb[24].mxu0 %v19702_v56  ;;  %17286 = vmatmul.mubr.bf16.gmra.mrb[24].mxu1 %v19702_v56  ;;  %v23198_v56 = vld [vmem:[%s26411_s10 + $0xde4] ss:$16 sps:$4 sm:$0xff]  }
 0x1e9   : > { %15463 = vmatpush1.bf16.msra.mxu0 %v23118_v54  ;;  %17299 = vmatpush1.bf16.msra.mxu1 %v23121_v55  ;;  %v23190_v54 = vld [vmem:[%s26411_s10 + $0xdc0] ss:$16 sps:$4 sm:$0xff]   ;;  %v23193_v55 = vld [vmem:[%s26411_s10 + $0xdc8] ss:$16 sps:$4 sm:$0xff]  }
 0x1ea   : > { %15464 = vmatprep.subr.bf16.mxu0 %v23126_v58  ;;  %17300 = vmatprep.subr.bf16.mxu1 %v23129_v63  ;;  %v23201_v58 = vld [vmem:[%s26411_s10 + $0xdec] ss:$16 sps:$4 sm:$0xff]   ;;  %v23196_v63 = vld [vmem:[%s26411_s10 + $0xde0] ss:$16 sps:$4 sm:$0xff]  }
 0x1eb   : > { %15490 = vmatprep.mubr.bf16.mxu0 %v19633_v0  ;;  %17326 = vmatprep.mubr.bf16.mxu1 %v19633_v0  ;;  %v23199_v0 = vld [vmem:[%s26411_s10 + $0xde8] ss:$16 sps:$4 sm:$0xff]  }
 0x1ed   : > { %15465 = vmatpush1.bf16.msra.mxu0 %v23124_v1  ;;  %17301 = vmatpush1.bf16.msra.mxu1 %v23127_v2  ;;  %v23204_v1 = vld [vmem:[%s26411_s10 + $0xe04] ss:$16 sps:$4 sm:$0xff]   ;;  %v23207_v2 = vld [vmem:[%s26411_s10 + $0xe0c] ss:$16 sps:$4 sm:$0xff]  }
 0x1ee   : > { %15466 = vmatprep.subr.bf16.mxu0 %v23132_v3  ;;  %17302 = vmatprep.subr.bf16.mxu1 %v23135_v6  ;;  %v23202_v3 = vld [vmem:[%s26411_s10 + $0xe00] ss:$16 sps:$4 sm:$0xff]   ;;  %v19632_v6 = vcombine.low %v26889_v53, %v26894_v57  ;;  %v23211_v53 = vld [vmem:[%s26411_s10 + $0xe28] ss:$16 sps:$4 sm:$0xff]   ;;  %v23218_v57 = vld [vmem:[%s26411_s10 + $0xe44] ss:$16 sps:$4 sm:$0xff]  }
 0x1f1   : > { %15467 = vmatpush1.bf16.msra.mxu0 %v23130_v9  ;;  %17303 = vmatpush1.bf16.msra.mxu1 %v23133_v7  ;;  %v23205_v9 = vld [vmem:[%s26411_s10 + $0xe08] ss:$16 sps:$4 sm:$0xff]   ;;  %v686_v7 = vld [vmem:[%s26413_s15 + $0x270] sm:$0x11] }
 0x1f2   : > { %15468 = vmatprep.subr.bf16.mxu0 %v23138_v8  ;;  %17304 = vmatprep.subr.bf16.mxu1 %v23141_v59  ;;  %v23210_v8 = vld [vmem:[%s26411_s10 + $0xe24] ss:$16 sps:$4 sm:$0xff]   ;;  %v23213_v59 = vld [vmem:[%s26411_s10 + $0xe2c] ss:$16 sps:$4 sm:$0xff]  }
 0x1f5   : > { %15469 = vmatpush1.bf16.msra.mxu0 %v23136_v12  ;;  %17305 = vmatpush1.bf16.msra.mxu1 %v23139_v60  ;;  %v23208_v12 = vld [vmem:[%s26411_s10 + $0xe20] ss:$16 sps:$4 sm:$0xff]   ;;  %v19705_v60 = vcombine.high %v686_v7, %v686_v7 }
 0x1f6   : > { %15470 = vmatprep.subr.bf16.mxu0 %v23144_v61  ;;  %17306 = vmatprep.subr.bf16.mxu1 %v23147_v13  ;;  %v23221_v61 = vld [vmem:[%s26411_s10 + $0xe4c] ss:$16 sps:$4 sm:$0xff]  }
 0x1f7   : > { %v26976_v13 = vld [vmem:[%s26413_s15 + $0x38] sm:$0xff] }
 0x1f9   : > { %15471 = vmatpush1.bf16.msra.mxu0 %v23142_v14  ;;  %17307 = vmatpush1.bf16.msra.mxu1 %v23145_v62  ;;  %v23216_v14 = vld [vmem:[%s26411_s10 + $0xe40] ss:$16 sps:$4 sm:$0xff]   ;;  %v23219_v62 = vld [vmem:[%s26411_s10 + $0xe48] ss:$16 sps:$4 sm:$0xff]  }
 0x1fa   : > { %15472 = vmatprep.subr.bf16.mxu0 %v23150_v15  ;;  %17308 = vmatprep.subr.bf16.mxu1 %v23153_v16  ;;  %v19704_v15 = vcombine.low %v686_v7, %v686_v7  ;;  %v26981_v16 = vld [vmem:[%s26413_s15 + $0x158] sm:$0xff] }
 0x1fb   : > { %v15298_v23 = vpop.f32.mrb[12].mxu0  ;;  %v17134_v24 = vpop.f32.mrb[12].mxu1  ;;  %v23276_v7 = vld [vmem:[%s26411_s10 + $0xf80] ss:$16 sps:$4 sm:$0xff]  }
 0x1fc   : > { %v26921_v25 = vadd.f32 %v15298_v23, %v26834_v4  ;;  %v26924_v26 = vadd.f32 %v17134_v24, %v26837_v5  ;;  %v15300_v27 = vpop.f32.mrb[13].mxu0  ;;  %v17136_v28 = vpop.f32.mrb[13].mxu1  ;;  %v23162_v5 = vld [vmem:[%s26411_s10 + $0xd24] ss:$16 sps:$4 sm:$0xff]   ;;  %v23225_v23 = vld [vmem:[%s26411_s10 + $0xe68] ss:$16 sps:$4 sm:$0xff]  }
 0x1fd   : > { %v26927_v29 = vadd.f32 %v15300_v27, %v26840_v10  ;;  %v26930_v30 = vadd.f32 %v17136_v28, %v26843_v11  ;;  %15473 = vmatpush1.bf16.msra.mxu0 %v23148_v17  ;;  %17309 = vmatpush1.bf16.msra.mxu1 %v23151_v18  ;;  %v15302_v4 = vpop.f32.mrb[14].mxu0  ;;  %v17138_v20 = vpop.f32.mrb[14].mxu1  ;;  %v23165_v10 = vld [vmem:[%s26411_s10 + $0xd2c] ss:$16 sps:$4 sm:$0xff]   ;;  %v23160_v11 = vld [vmem:[%s26411_s10 + $0xd20] ss:$16 sps:$4 sm:$0xff]  }
 0x1fe   : > { %15474 = vmatprep.subr.bf16.mxu0 %v23156_v19  ;;  %17310 = vmatprep.subr.bf16.mxu1 %v23159_v21  ;;  %v15303_v22 = vpop.f32.mrb[15].mxu0  ;;  %v17139_v33 = vpop.f32.mrb[15].mxu1  ;;  %v23224_v17 = vld [vmem:[%s26411_s10 + $0xe64] ss:$16 sps:$4 sm:$0xff]   ;;  %v23227_v18 = vld [vmem:[%s26411_s10 + $0xe6c] ss:$16 sps:$4 sm:$0xff]   ;;  %v19635_v19 = vcombine.high %v26976_v13, %v26981_v16 }
 0x1ff   : > { %v23222_v21 = vld [vmem:[%s26411_s10 + $0xe60] ss:$16 sps:$4 sm:$0xff]   ;;  %v23230_v24 = vld [vmem:[%s26411_s10 + $0xe84] ss:$16 sps:$4 sm:$0xff]   ;;  %v23233_v27 = vld [vmem:[%s26411_s10 + $0xe8c] ss:$16 sps:$4 sm:$0xff]  }
 0x200   : > { %v23228_v28 = vld [vmem:[%s26411_s10 + $0xe80] ss:$16 sps:$4 sm:$0xff]   ;;  %v23239_v4 = vld [vmem:[%s26411_s10 + $0xeac] ss:$16 sps:$4 sm:$0xff]  }
 0x201   : > { %15475 = vmatpush1.bf16.msra.mxu0 %v23154_v31  ;;  %17311 = vmatpush1.bf16.msra.mxu1 %v23157_v32  ;;  %v23231_v31 = vld [vmem:[%s26411_s10 + $0xe88] ss:$16 sps:$4 sm:$0xff]   ;;  %v23236_v32 = vld [vmem:[%s26411_s10 + $0xea4] ss:$16 sps:$4 sm:$0xff]   ;;  %v23234_v20 = vld [vmem:[%s26411_s10 + $0xea0] ss:$16 sps:$4 sm:$0xff]  }
 0x202   : > { %15476 = vmatprep.subr.bf16.mxu0 %v23162_v5  ;;  %17312 = vmatprep.subr.bf16.mxu1 %v23165_v10  ;;  %v23237_v5 = vld [vmem:[%s26411_s10 + $0xea8] ss:$16 sps:$4 sm:$0xff]   ;;  %v23242_v10 = vld [vmem:[%s26411_s10 + $0xec4] ss:$16 sps:$4 sm:$0xff]   ;;  %v23245_v22 = vld [vmem:[%s26411_s10 + $0xecc] ss:$16 sps:$4 sm:$0xff]  }
 0x203   : > { %v23240_v33 = vld [vmem:[%s26411_s10 + $0xec0] ss:$16 sps:$4 sm:$0xff]  }
 0x205   : > { %15477 = vmatpush1.bf16.msra.mxu0 %v23160_v11  ;;  %17313 = vmatpush1.bf16.msra.mxu1 %v23163_v35  ;;  %v23243_v11 = vld [vmem:[%s26411_s10 + $0xec8] ss:$16 sps:$4 sm:$0xff]   ;;  %v23248_v35 = vld [vmem:[%s26411_s10 + $0xee4] ss:$16 sps:$4 sm:$0xff]  }
 0x206   : > { %15478 = vmatprep.subr.bf16.mxu0 %v23168_v36  ;;  %17314 = vmatprep.subr.bf16.mxu1 %v23171_v37  ;;  %v23251_v36 = vld [vmem:[%s26411_s10 + $0xeec] ss:$16 sps:$4 sm:$0xff]   ;;  %v23246_v37 = vld [vmem:[%s26411_s10 + $0xee0] ss:$16 sps:$4 sm:$0xff]  }
 0x209   : > { %15479 = vmatpush1.bf16.msra.mxu0 %v23166_v39  ;;  %17315 = vmatpush1.bf16.msra.mxu1 %v23169_v40  ;;  %v23249_v39 = vld [vmem:[%s26411_s10 + $0xee8] ss:$16 sps:$4 sm:$0xff]   ;;  %v23254_v40 = vld [vmem:[%s26411_s10 + $0xf04] ss:$16 sps:$4 sm:$0xff]  }
 0x20a   : > { %15480 = vmatprep.subr.bf16.mxu0 %v23174_v41  ;;  %17316 = vmatprep.subr.bf16.mxu1 %v23177_v42  ;;  %v23257_v41 = vld [vmem:[%s26411_s10 + $0xf0c] ss:$16 sps:$4 sm:$0xff]  }
 0x20d   : > { %15481 = vmatpush1.bf16.msra.mxu0 %v23172_v43  ;;  %17317 = vmatpush1.bf16.msra.mxu1 %v23175_v44 }
 0x20e   : > { %15482 = vmatprep.subr.bf16.mxu0 %v23180_v45  ;;  %17318 = vmatprep.subr.bf16.mxu1 %v23183_v46 }
 0x211   : > { %15483 = vmatpush1.bf16.msra.mxu0 %v23178_v47  ;;  %17319 = vmatpush1.bf16.msra.mxu1 %v23181_v48 }
 0x212   : > { %15484 = vmatprep.subr.bf16.mxu0 %v23186_v49  ;;  %17320 = vmatprep.subr.bf16.mxu1 %v23189_v50  ;;  %v23252_v50 = vld [vmem:[%s26411_s10 + $0xf00] ss:$16 sps:$4 sm:$0xff]  }
 0x215   : > { %15485 = vmatpush1.bf16.msra.mxu0 %v23184_v51  ;;  %17321 = vmatpush1.bf16.msra.mxu1 %v23187_v34  ;;  %v23255_v51 = vld [vmem:[%s26411_s10 + $0xf08] ss:$16 sps:$4 sm:$0xff]  }
 0x216   : > { %15486 = vmatprep.subr.bf16.mxu0 %v23192_v38  ;;  %17322 = vmatprep.subr.bf16.mxu1 %v23195_v52 }
 0x219   : > { %15487 = vmatpush1.bf16.msra.mxu0 %v23190_v54  ;;  %17323 = vmatpush1.bf16.msra.mxu1 %v23193_v55  ;;  %v23261_v54 = vld [vmem:[%s26411_s10 + $0xf28] ss:$16 sps:$4 sm:$0xff]   ;;  %v23266_v55 = vld [vmem:[%s26411_s10 + $0xf44] ss:$16 sps:$4 sm:$0xff]  }
 0x21a   : > { %15488 = vmatprep.subr.bf16.mxu0 %v23198_v56  ;;  %17324 = vmatprep.subr.bf16.mxu1 %v23201_v58  ;;  %v23269_v56 = vld [vmem:[%s26411_s10 + $0xf4c] ss:$16 sps:$4 sm:$0xff]   ;;  %v23264_v58 = vld [vmem:[%s26411_s10 + $0xf40] ss:$16 sps:$4 sm:$0xff]  }
 0x21d   : > { %15489 = vmatpush1.bf16.msra.mxu0 %v23196_v63  ;;  %17325 = vmatpush1.bf16.msra.mxu1 %v23199_v0  ;;  %v23267_v63 = vld [vmem:[%s26411_s10 + $0xf48] ss:$16 sps:$4 sm:$0xff]   ;;  %v23272_v0 = vld [vmem:[%s26411_s10 + $0xf64] ss:$16 sps:$4 sm:$0xff]  }
 0x21e   : > { %15509 = vmatprep.subr.bf16.mxu0 %v23204_v1  ;;  %17345 = vmatprep.subr.bf16.mxu1 %v23207_v2  ;;  %v23275_v1 = vld [vmem:[%s26411_s10 + $0xf6c] ss:$16 sps:$4 sm:$0xff]   ;;  %v23270_v2 = vld [vmem:[%s26411_s10 + $0xf60] ss:$16 sps:$4 sm:$0xff]  }
 0x220   : > { %15491 = vmatmul.mubr.bf16.vlgmr.msra.gmra.mrb[0].mxu0 %v19632_v6  ;;  %17327 = vmatmul.mubr.bf16.vlgmr.msra.gmra.mrb[0].mxu1 %v19632_v6  ;;  %v23278_v6 = vld [vmem:[%s26411_s10 + $0xf84] ss:$16 sps:$4 sm:$0xff]  }
 0x221   : > { %15510 = vmatpush1.bf16.msra.mxu0 %v23202_v3  ;;  %17346 = vmatpush1.bf16.msra.mxu1 %v23205_v9  ;;  %v23273_v3 = vld [vmem:[%s26411_s10 + $0xf68] ss:$16 sps:$4 sm:$0xff]   ;;  %v23281_v9 = vld [vmem:[%s26411_s10 + $0xf8c] ss:$16 sps:$4 sm:$0xff]  }
 0x222   : > { %15511 = vmatprep.subr.bf16.mxu0 %v23210_v8  ;;  %17347 = vmatprep.subr.bf16.mxu1 %v23213_v59  ;;  %v23279_v8 = vld [vmem:[%s26411_s10 + $0xf88] ss:$16 sps:$4 sm:$0xff]   ;;  %v23284_v59 = vld [vmem:[%s26411_s10 + $0xfa4] ss:$16 sps:$4 sm:$0xff]  }
 0x223   : > { %15500 = vmatprep.mubr.bf16.mxu0 %v19705_v60  ;;  %17336 = vmatprep.mubr.bf16.mxu1 %v19705_v60  ;;  %v23282_v60 = vld [vmem:[%s26411_s10 + $0xfa0] ss:$16 sps:$4 sm:$0xff]  }
 0x225   : > { %15512 = vmatpush1.bf16.msra.mxu0 %v23208_v12  ;;  %17348 = vmatpush1.bf16.msra.mxu1 %v23211_v53  ;;  %v23287_v12 = vld [vmem:[%s26411_s10 + $0xfac] ss:$16 sps:$4 sm:$0xff]   ;;  %v23285_v53 = vld [vmem:[%s26411_s10 + $0xfa8] ss:$16 sps:$4 sm:$0xff]  }
 0x226   : > { %15513 = vmatprep.subr.bf16.mxu0 %v23218_v57  ;;  %17349 = vmatprep.subr.bf16.mxu1 %v23221_v61  ;;  %v23290_v57 = vld [vmem:[%s26411_s10 + $0xfc4] ss:$16 sps:$4 sm:$0xff]   ;;  %v23293_v61 = vld [vmem:[%s26411_s10 + $0xfcc] ss:$16 sps:$4 sm:$0xff]  }
 0x228   : > { %15501 = vmatmul.mubr.bf16.gmra.mrb[28].mxu0 %v19704_v15  ;;  %17337 = vmatmul.mubr.bf16.gmra.mrb[28].mxu1 %v19704_v15  ;;  %v23296_v15 = vld [vmem:[%s26411_s10 + $0xfe4] ss:$16 sps:$4 sm:$0xff]  }
 0x229   : > { %15514 = vmatpush1.bf16.msra.mxu0 %v23216_v14  ;;  %17350 = vmatpush1.bf16.msra.mxu1 %v23219_v62  ;;  %v23288_v14 = vld [vmem:[%s26411_s10 + $0xfc0] ss:$16 sps:$4 sm:$0xff]   ;;  %v23291_v62 = vld [vmem:[%s26411_s10 + $0xfc8] ss:$16 sps:$4 sm:$0xff]  }
 0x22a   : > { %15515 = vmatprep.subr.bf16.mxu0 %v23224_v17  ;;  %17351 = vmatprep.subr.bf16.mxu1 %v23227_v18  ;;  %v23299_v17 = vld [vmem:[%s26411_s10 + $0xfec] ss:$16 sps:$4 sm:$0xff]   ;;  %v23294_v18 = vld [vmem:[%s26411_s10 + $0xfe0] ss:$16 sps:$4 sm:$0xff]  }
 0x22b   : > { %15541 = vmatprep.mubr.bf16.mxu0 %v19635_v19  ;;  %17377 = vmatprep.mubr.bf16.mxu1 %v19635_v19  ;;  %v23297_v19 = vld [vmem:[%s26411_s10 + $0xfe8] ss:$16 sps:$4 sm:$0xff]  }
 0x22d   : > { %15516 = vmatpush1.bf16.msra.mxu0 %v23222_v21  ;;  %17352 = vmatpush1.bf16.msra.mxu1 %v23225_v23  ;;  %v23302_v21 = vld [vmem:[%s26411_s10 + $0x1004] ss:$16 sps:$4 sm:$0xff]   ;;  %v23305_v23 = vld [vmem:[%s26411_s10 + $0x100c] ss:$16 sps:$4 sm:$0xff]  }
 0x22e   : > { %15517 = vmatprep.subr.bf16.mxu0 %v23230_v24  ;;  %17353 = vmatprep.subr.bf16.mxu1 %v23233_v27  ;;  %v23300_v24 = vld [vmem:[%s26411_s10 + $0x1000] ss:$16 sps:$4 sm:$0xff]   ;;  %v19634_v27 = vcombine.low %v26976_v13, %v26981_v16  ;;  %v23309_v13 = vld [vmem:[%s26411_s10 + $0x1028] ss:$16 sps:$4 sm:$0xff]   ;;  %v23316_v16 = vld [vmem:[%s26411_s10 + $0x1044] ss:$16 sps:$4 sm:$0xff]  }
 0x231   : > { %15518 = vmatpush1.bf16.msra.mxu0 %v23228_v28  ;;  %17354 = vmatpush1.bf16.msra.mxu1 %v23231_v31  ;;  %v23303_v28 = vld [vmem:[%s26411_s10 + $0x1008] ss:$16 sps:$4 sm:$0xff]  }
 0x232   : > { %15519 = vmatprep.subr.bf16.mxu0 %v23236_v32  ;;  %17355 = vmatprep.subr.bf16.mxu1 %v23239_v4  ;;  %v687_v31 = vld [vmem:[%s26413_s15 + $0x278] sm:$0x11]  ;;  %v23308_v32 = vld [vmem:[%s26411_s10 + $0x1024] ss:$16 sps:$4 sm:$0xff]  }
 0x233   : > { %v23311_v4 = vld [vmem:[%s26411_s10 + $0x102c] ss:$16 sps:$4 sm:$0xff]  }
 0x235   : > { %15520 = vmatpush1.bf16.msra.mxu0 %v23234_v20  ;;  %17356 = vmatpush1.bf16.msra.mxu1 %v23237_v5  ;;  %v23306_v20 = vld [vmem:[%s26411_s10 + $0x1020] ss:$16 sps:$4 sm:$0xff]   ;;  %v19707_v5 = vcombine.high %v687_v31, %v687_v31 }
 0x236   : > { %15521 = vmatprep.subr.bf16.mxu0 %v23242_v10  ;;  %17357 = vmatprep.subr.bf16.mxu1 %v23245_v22  ;;  %v23319_v10 = vld [vmem:[%s26411_s10 + $0x104c] ss:$16 sps:$4 sm:$0xff]   ;;  %v27063_v22 = vld [vmem:[%s26413_s15 + $0x40] sm:$0xff] }
 0x239   : > { %15522 = vmatpush1.bf16.msra.mxu0 %v23240_v33  ;;  %17358 = vmatpush1.bf16.msra.mxu1 %v23243_v11  ;;  %v23314_v33 = vld [vmem:[%s26411_s10 + $0x1040] ss:$16 sps:$4 sm:$0xff]   ;;  %v23317_v11 = vld [vmem:[%s26411_s10 + $0x1048] ss:$16 sps:$4 sm:$0xff]  }
 0x23a   : > { %15523 = vmatprep.subr.bf16.mxu0 %v23248_v35  ;;  %17359 = vmatprep.subr.bf16.mxu1 %v23251_v36  ;;  %v19706_v35 = vcombine.low %v687_v31, %v687_v31  ;;  %v27068_v36 = vld [vmem:[%s26413_s15 + $0x160] sm:$0xff] }
 0x23b   : > { %v15349_v42 = vpop.f32.mrb[16].mxu0  ;;  %v17185_v43 = vpop.f32.mrb[16].mxu1  ;;  %v23374_v31 = vld [vmem:[%s26411_s10 + $0x1180] ss:$16 sps:$4 sm:$0xff]  }
 0x23c   : > { %v27008_v44 = vadd.f32 %v15349_v42, %v26921_v25  ;;  %v27011_v45 = vadd.f32 %v17185_v43, %v26924_v26  ;;  %v15351_v46 = vpop.f32.mrb[17].mxu0  ;;  %v17187_v47 = vpop.f32.mrb[17].mxu1  ;;  %v23260_v26 = vld [vmem:[%s26411_s10 + $0xf24] ss:$16 sps:$4 sm:$0xff]   ;;  %v23323_v42 = vld [vmem:[%s26411_s10 + $0x1068] ss:$16 sps:$4 sm:$0xff]  }
 0x23d   : > { %v27014_v48 = vadd.f32 %v15351_v46, %v26927_v29  ;;  %v27017_v49 = vadd.f32 %v17187_v47, %v26930_v30  ;;  %15524 = vmatpush1.bf16.msra.mxu0 %v23246_v37  ;;  %17360 = vmatpush1.bf16.msra.mxu1 %v23249_v39  ;;  %v15353_v25 = vpop.f32.mrb[18].mxu0  ;;  %v17189_v34 = vpop.f32.mrb[18].mxu1  ;;  %v23263_v29 = vld [vmem:[%s26411_s10 + $0xf2c] ss:$16 sps:$4 sm:$0xff]   ;;  %v23258_v30 = vld [vmem:[%s26411_s10 + $0xf20] ss:$16 sps:$4 sm:$0xff]  }
 0x23e   : > { %15525 = vmatprep.subr.bf16.mxu0 %v23254_v40  ;;  %17361 = vmatprep.subr.bf16.mxu1 %v23257_v41  ;;  %v15354_v38 = vpop.f32.mrb[19].mxu0  ;;  %v17190_v52 = vpop.f32.mrb[19].mxu1  ;;  %v23322_v37 = vld [vmem:[%s26411_s10 + $0x1064] ss:$16 sps:$4 sm:$0xff]   ;;  %v23325_v39 = vld [vmem:[%s26411_s10 + $0x106c] ss:$16 sps:$4 sm:$0xff]   ;;  %v19637_v40 = vcombine.high %v27063_v22, %v27068_v36 }
 0x23f   : > { %v23320_v41 = vld [vmem:[%s26411_s10 + $0x1060] ss:$16 sps:$4 sm:$0xff]   ;;  %v23328_v43 = vld [vmem:[%s26411_s10 + $0x1084] ss:$16 sps:$4 sm:$0xff]   ;;  %v23331_v46 = vld [vmem:[%s26411_s10 + $0x108c] ss:$16 sps:$4 sm:$0xff]  }
 0x240   : > { %v23326_v47 = vld [vmem:[%s26411_s10 + $0x1080] ss:$16 sps:$4 sm:$0xff]   ;;  %v23337_v25 = vld [vmem:[%s26411_s10 + $0x10ac] ss:$16 sps:$4 sm:$0xff]  }
 0x241   : > { %15526 = vmatpush1.bf16.msra.mxu0 %v23252_v50  ;;  %17362 = vmatpush1.bf16.msra.mxu1 %v23255_v51  ;;  %v23329_v50 = vld [vmem:[%s26411_s10 + $0x1088] ss:$16 sps:$4 sm:$0xff]   ;;  %v23334_v51 = vld [vmem:[%s26411_s10 + $0x10a4] ss:$16 sps:$4 sm:$0xff]   ;;  %v23332_v34 = vld [vmem:[%s26411_s10 + $0x10a0] ss:$16 sps:$4 sm:$0xff]  }
 0x242   : > { %15527 = vmatprep.subr.bf16.mxu0 %v23260_v26  ;;  %17363 = vmatprep.subr.bf16.mxu1 %v23263_v29  ;;  %v23335_v26 = vld [vmem:[%s26411_s10 + $0x10a8] ss:$16 sps:$4 sm:$0xff]   ;;  %v23340_v29 = vld [vmem:[%s26411_s10 + $0x10c4] ss:$16 sps:$4 sm:$0xff]   ;;  %v23343_v38 = vld [vmem:[%s26411_s10 + $0x10cc] ss:$16 sps:$4 sm:$0xff]  }
 0x243   : > { %v23338_v52 = vld [vmem:[%s26411_s10 + $0x10c0] ss:$16 sps:$4 sm:$0xff]  }
 0x245   : > { %15528 = vmatpush1.bf16.msra.mxu0 %v23258_v30  ;;  %17364 = vmatpush1.bf16.msra.mxu1 %v23261_v54  ;;  %v23341_v30 = vld [vmem:[%s26411_s10 + $0x10c8] ss:$16 sps:$4 sm:$0xff]   ;;  %v23346_v54 = vld [vmem:[%s26411_s10 + $0x10e4] ss:$16 sps:$4 sm:$0xff]  }
 0x246   : > { %15529 = vmatprep.subr.bf16.mxu0 %v23266_v55  ;;  %17365 = vmatprep.subr.bf16.mxu1 %v23269_v56  ;;  %v23349_v55 = vld [vmem:[%s26411_s10 + $0x10ec] ss:$16 sps:$4 sm:$0xff]   ;;  %v23344_v56 = vld [vmem:[%s26411_s10 + $0x10e0] ss:$16 sps:$4 sm:$0xff]  }
 0x249   : > { %15530 = vmatpush1.bf16.msra.mxu0 %v23264_v58  ;;  %17366 = vmatpush1.bf16.msra.mxu1 %v23267_v63  ;;  %v23347_v58 = vld [vmem:[%s26411_s10 + $0x10e8] ss:$16 sps:$4 sm:$0xff]   ;;  %v23352_v63 = vld [vmem:[%s26411_s10 + $0x1104] ss:$16 sps:$4 sm:$0xff]  }
 0x24a   : > { %15531 = vmatprep.subr.bf16.mxu0 %v23272_v0  ;;  %17367 = vmatprep.subr.bf16.mxu1 %v23275_v1  ;;  %v23355_v0 = vld [vmem:[%s26411_s10 + $0x110c] ss:$16 sps:$4 sm:$0xff]  }
 0x24d   : > { %15532 = vmatpush1.bf16.msra.mxu0 %v23270_v2  ;;  %17368 = vmatpush1.bf16.msra.mxu1 %v23273_v3 }
 0x24e   : > { %15533 = vmatprep.subr.bf16.mxu0 %v23278_v6  ;;  %17369 = vmatprep.subr.bf16.mxu1 %v23281_v9 }
 0x251   : > { %15534 = vmatpush1.bf16.msra.mxu0 %v23276_v7  ;;  %17370 = vmatpush1.bf16.msra.mxu1 %v23279_v8 }
 0x252   : > { %15535 = vmatprep.subr.bf16.mxu0 %v23284_v59  ;;  %17371 = vmatprep.subr.bf16.mxu1 %v23287_v12  ;;  %v23350_v12 = vld [vmem:[%s26411_s10 + $0x1100] ss:$16 sps:$4 sm:$0xff]  }
 0x255   : > { %15536 = vmatpush1.bf16.msra.mxu0 %v23282_v60  ;;  %17372 = vmatpush1.bf16.msra.mxu1 %v23285_v53  ;;  %v23353_v60 = vld [vmem:[%s26411_s10 + $0x1108] ss:$16 sps:$4 sm:$0xff]  }
 0x256   : > { %15537 = vmatprep.subr.bf16.mxu0 %v23290_v57  ;;  %17373 = vmatprep.subr.bf16.mxu1 %v23293_v61 }
 0x259   : > { %15538 = vmatpush1.bf16.msra.mxu0 %v23288_v14  ;;  %17374 = vmatpush1.bf16.msra.mxu1 %v23291_v62  ;;  %v23359_v14 = vld [vmem:[%s26411_s10 + $0x1128] ss:$16 sps:$4 sm:$0xff]   ;;  %v23364_v62 = vld [vmem:[%s26411_s10 + $0x1144] ss:$16 sps:$4 sm:$0xff]  }
 0x25a   : > { %15539 = vmatprep.subr.bf16.mxu0 %v23296_v15  ;;  %17375 = vmatprep.subr.bf16.mxu1 %v23299_v17  ;;  %v23367_v15 = vld [vmem:[%s26411_s10 + $0x114c] ss:$16 sps:$4 sm:$0xff]   ;;  %v23362_v17 = vld [vmem:[%s26411_s10 + $0x1140] ss:$16 sps:$4 sm:$0xff]  }
 0x25d   : > { %15540 = vmatpush1.bf16.msra.mxu0 %v23294_v18  ;;  %17376 = vmatpush1.bf16.msra.mxu1 %v23297_v19  ;;  %v23365_v18 = vld [vmem:[%s26411_s10 + $0x1148] ss:$16 sps:$4 sm:$0xff]   ;;  %v23370_v19 = vld [vmem:[%s26411_s10 + $0x1164] ss:$16 sps:$4 sm:$0xff]  }
 0x25e   : > { %15560 = vmatprep.subr.bf16.mxu0 %v23302_v21  ;;  %17396 = vmatprep.subr.bf16.mxu1 %v23305_v23  ;;  %v23373_v21 = vld [vmem:[%s26411_s10 + $0x116c] ss:$16 sps:$4 sm:$0xff]   ;;  %v23368_v23 = vld [vmem:[%s26411_s10 + $0x1160] ss:$16 sps:$4 sm:$0xff]  }
 0x260   : > { %15542 = vmatmul.mubr.bf16.vlgmr.msra.gmra.mrb[0].mxu0 %v19634_v27  ;;  %17378 = vmatmul.mubr.bf16.vlgmr.msra.gmra.mrb[0].mxu1 %v19634_v27  ;;  %v23376_v27 = vld [vmem:[%s26411_s10 + $0x1184] ss:$16 sps:$4 sm:$0xff]  }
 0x261   : > { %15561 = vmatpush1.bf16.msra.mxu0 %v23300_v24  ;;  %17397 = vmatpush1.bf16.msra.mxu1 %v23303_v28  ;;  %v23371_v24 = vld [vmem:[%s26411_s10 + $0x1168] ss:$16 sps:$4 sm:$0xff]   ;;  %v23379_v28 = vld [vmem:[%s26411_s10 + $0x118c] ss:$16 sps:$4 sm:$0xff]  }
 0x262   : > { %15562 = vmatprep.subr.bf16.mxu0 %v23308_v32  ;;  %17398 = vmatprep.subr.bf16.mxu1 %v23311_v4  ;;  %v23377_v32 = vld [vmem:[%s26411_s10 + $0x1188] ss:$16 sps:$4 sm:$0xff]   ;;  %v23382_v4 = vld [vmem:[%s26411_s10 + $0x11a4] ss:$16 sps:$4 sm:$0xff]  }
 0x263   : > { %15551 = vmatprep.mubr.bf16.mxu0 %v19707_v5  ;;  %17387 = vmatprep.mubr.bf16.mxu1 %v19707_v5  ;;  %v23380_v5 = vld [vmem:[%s26411_s10 + $0x11a0] ss:$16 sps:$4 sm:$0xff]  }
 0x265   : > { %15563 = vmatpush1.bf16.msra.mxu0 %v23306_v20  ;;  %17399 = vmatpush1.bf16.msra.mxu1 %v23309_v13  ;;  %v23385_v20 = vld [vmem:[%s26411_s10 + $0x11ac] ss:$16 sps:$4 sm:$0xff]   ;;  %v23383_v13 = vld [vmem:[%s26411_s10 + $0x11a8] ss:$16 sps:$4 sm:$0xff]  }
 0x266   : > { %15564 = vmatprep.subr.bf16.mxu0 %v23316_v16  ;;  %17400 = vmatprep.subr.bf16.mxu1 %v23319_v10  ;;  %v23388_v16 = vld [vmem:[%s26411_s10 + $0x11c4] ss:$16 sps:$4 sm:$0xff]   ;;  %v23391_v10 = vld [vmem:[%s26411_s10 + $0x11cc] ss:$16 sps:$4 sm:$0xff]  }
 0x268   : > { %15552 = vmatmul.mubr.bf16.gmra.mrb[32].mxu0 %v19706_v35  ;;  %17388 = vmatmul.mubr.bf16.gmra.mrb[32].mxu1 %v19706_v35  ;;  %v23394_v35 = vld [vmem:[%s26411_s10 + $0x11e4] ss:$16 sps:$4 sm:$0xff]  }
 0x269   : > { %15565 = vmatpush1.bf16.msra.mxu0 %v23314_v33  ;;  %17401 = vmatpush1.bf16.msra.mxu1 %v23317_v11  ;;  %v23386_v33 = vld [vmem:[%s26411_s10 + $0x11c0] ss:$16 sps:$4 sm:$0xff]   ;;  %v23389_v11 = vld [vmem:[%s26411_s10 + $0x11c8] ss:$16 sps:$4 sm:$0xff]  }
 0x26a   : > { %15566 = vmatprep.subr.bf16.mxu0 %v23322_v37  ;;  %17402 = vmatprep.subr.bf16.mxu1 %v23325_v39  ;;  %v23397_v37 = vld [vmem:[%s26411_s10 + $0x11ec] ss:$16 sps:$4 sm:$0xff]   ;;  %v23392_v39 = vld [vmem:[%s26411_s10 + $0x11e0] ss:$16 sps:$4 sm:$0xff]  }
 0x26b   : > { %15592 = vmatprep.mubr.bf16.mxu0 %v19637_v40  ;;  %17428 = vmatprep.mubr.bf16.mxu1 %v19637_v40  ;;  %v23395_v40 = vld [vmem:[%s26411_s10 + $0x11e8] ss:$16 sps:$4 sm:$0xff]  }
 0x26d   : > { %15567 = vmatpush1.bf16.msra.mxu0 %v23320_v41  ;;  %17403 = vmatpush1.bf16.msra.mxu1 %v23323_v42  ;;  %v23400_v41 = vld [vmem:[%s26411_s10 + $0x1204] ss:$16 sps:$4 sm:$0xff]   ;;  %v23403_v42 = vld [vmem:[%s26411_s10 + $0x120c] ss:$16 sps:$4 sm:$0xff]  }
 0x26e   : > { %15568 = vmatprep.subr.bf16.mxu0 %v23328_v43  ;;  %17404 = vmatprep.subr.bf16.mxu1 %v23331_v46  ;;  %v23398_v43 = vld [vmem:[%s26411_s10 + $0x1200] ss:$16 sps:$4 sm:$0xff]   ;;  %v19636_v46 = vcombine.low %v27063_v22, %v27068_v36  ;;  %v23407_v22 = vld [vmem:[%s26411_s10 + $0x1228] ss:$16 sps:$4 sm:$0xff]   ;;  %v23414_v36 = vld [vmem:[%s26411_s10 + $0x1244] ss:$16 sps:$4 sm:$0xff]  }
 0x271   : > { %15569 = vmatpush1.bf16.msra.mxu0 %v23326_v47  ;;  %17405 = vmatpush1.bf16.msra.mxu1 %v23329_v50  ;;  %v23401_v47 = vld [vmem:[%s26411_s10 + $0x1208] ss:$16 sps:$4 sm:$0xff]   ;;  %v688_v50 = vld [vmem:[%s26413_s15 + $0x280] sm:$0x11] }
 0x272   : > { %15570 = vmatprep.subr.bf16.mxu0 %v23334_v51  ;;  %17406 = vmatprep.subr.bf16.mxu1 %v23337_v25  ;;  %v23406_v51 = vld [vmem:[%s26411_s10 + $0x1224] ss:$16 sps:$4 sm:$0xff]   ;;  %v23409_v25 = vld [vmem:[%s26411_s10 + $0x122c] ss:$16 sps:$4 sm:$0xff]  }
 0x275   : > { %15571 = vmatpush1.bf16.msra.mxu0 %v23332_v34  ;;  %17407 = vmatpush1.bf16.msra.mxu1 %v23335_v26  ;;  %v23404_v34 = vld [vmem:[%s26411_s10 + $0x1220] ss:$16 sps:$4 sm:$0xff]   ;;  %v19709_v26 = vcombine.high %v688_v50, %v688_v50 }
 0x276   : > { %15572 = vmatprep.subr.bf16.mxu0 %v23340_v29  ;;  %17408 = vmatprep.subr.bf16.mxu1 %v23343_v38  ;;  %v23417_v29 = vld [vmem:[%s26411_s10 + $0x124c] ss:$16 sps:$4 sm:$0xff]  }
 0x277   : > { %v27150_v38 = vld [vmem:[%s26413_s15 + $0x48] sm:$0xff] }
 0x279   : > { %15573 = vmatpush1.bf16.msra.mxu0 %v23338_v52  ;;  %17409 = vmatpush1.bf16.msra.mxu1 %v23341_v30  ;;  %v23412_v52 = vld [vmem:[%s26411_s10 + $0x1240] ss:$16 sps:$4 sm:$0xff]   ;;  %v23415_v30 = vld [vmem:[%s26411_s10 + $0x1248] ss:$16 sps:$4 sm:$0xff]  }
 0x27a   : > { %15574 = vmatprep.subr.bf16.mxu0 %v23346_v54  ;;  %17410 = vmatprep.subr.bf16.mxu1 %v23349_v55  ;;  %v19708_v54 = vcombine.low %v688_v50, %v688_v50  ;;  %v27155_v55 = vld [vmem:[%s26413_s15 + $0x168] sm:$0xff] }
 0x27b   : > { %v15400_v1 = vpop.f32.mrb[20].mxu0  ;;  %v17236_v2 = vpop.f32.mrb[20].mxu1  ;;  %v23472_v50 = vld [vmem:[%s26411_s10 + $0x1380] ss:$16 sps:$4 sm:$0xff]  }
 0x27c   : > { %v27095_v3 = vadd.f32 %v15400_v1, %v27008_v44  ;;  %v27098_v6 = vadd.f32 %v17236_v2, %v27011_v45  ;;  %v15402_v9 = vpop.f32.mrb[21].mxu0  ;;  %v17238_v7 = vpop.f32.mrb[21].mxu1  ;;  %v23358_v45 = vld [vmem:[%s26411_s10 + $0x1124] ss:$16 sps:$4 sm:$0xff]   ;;  %v23421_v1 = vld [vmem:[%s26411_s10 + $0x1268] ss:$16 sps:$4 sm:$0xff]  }
 0x27d   : > { %v27101_v8 = vadd.f32 %v15402_v9, %v27014_v48  ;;  %v27104_v59 = vadd.f32 %v17238_v7, %v27017_v49  ;;  %15575 = vmatpush1.bf16.msra.mxu0 %v23344_v56  ;;  %17411 = vmatpush1.bf16.msra.mxu1 %v23347_v58  ;;  %v15404_v44 = vpop.f32.mrb[22].mxu0  ;;  %v17240_v53 = vpop.f32.mrb[22].mxu1  ;;  %v23361_v48 = vld [vmem:[%s26411_s10 + $0x112c] ss:$16 sps:$4 sm:$0xff]   ;;  %v23356_v49 = vld [vmem:[%s26411_s10 + $0x1120] ss:$16 sps:$4 sm:$0xff]  }
 0x27e   : > { %15576 = vmatprep.subr.bf16.mxu0 %v23352_v63  ;;  %17412 = vmatprep.subr.bf16.mxu1 %v23355_v0  ;;  %v15405_v57 = vpop.f32.mrb[23].mxu0  ;;  %v17241_v61 = vpop.f32.mrb[23].mxu1  ;;  %v23420_v56 = vld [vmem:[%s26411_s10 + $0x1264] ss:$16 sps:$4 sm:$0xff]   ;;  %v23423_v58 = vld [vmem:[%s26411_s10 + $0x126c] ss:$16 sps:$4 sm:$0xff]   ;;  %v19639_v63 = vcombine.high %v27150_v38, %v27155_v55 }
 0x27f   : > { %v23418_v0 = vld [vmem:[%s26411_s10 + $0x1260] ss:$16 sps:$4 sm:$0xff]   ;;  %v23426_v2 = vld [vmem:[%s26411_s10 + $0x1284] ss:$16 sps:$4 sm:$0xff]   ;;  %v23429_v9 = vld [vmem:[%s26411_s10 + $0x128c] ss:$16 sps:$4 sm:$0xff]  }
 0x280   : > { %v23424_v7 = vld [vmem:[%s26411_s10 + $0x1280] ss:$16 sps:$4 sm:$0xff]   ;;  %v23435_v44 = vld [vmem:[%s26411_s10 + $0x12ac] ss:$16 sps:$4 sm:$0xff]  }
 0x281   : > { %15577 = vmatpush1.bf16.msra.mxu0 %v23350_v12  ;;  %17413 = vmatpush1.bf16.msra.mxu1 %v23353_v60  ;;  %v23427_v12 = vld [vmem:[%s26411_s10 + $0x1288] ss:$16 sps:$4 sm:$0xff]   ;;  %v23432_v60 = vld [vmem:[%s26411_s10 + $0x12a4] ss:$16 sps:$4 sm:$0xff]   ;;  %v23430_v53 = vld [vmem:[%s26411_s10 + $0x12a0] ss:$16 sps:$4 sm:$0xff]  }
 0x282   : > { %15578 = vmatprep.subr.bf16.mxu0 %v23358_v45  ;;  %17414 = vmatprep.subr.bf16.mxu1 %v23361_v48  ;;  %v23433_v45 = vld [vmem:[%s26411_s10 + $0x12a8] ss:$16 sps:$4 sm:$0xff]   ;;  %v23438_v48 = vld [vmem:[%s26411_s10 + $0x12c4] ss:$16 sps:$4 sm:$0xff]   ;;  %v23441_v57 = vld [vmem:[%s26411_s10 + $0x12cc] ss:$16 sps:$4 sm:$0xff]  }
 0x283   : > { %v23436_v61 = vld [vmem:[%s26411_s10 + $0x12c0] ss:$16 sps:$4 sm:$0xff]  }
 0x285   : > { %15579 = vmatpush1.bf16.msra.mxu0 %v23356_v49  ;;  %17415 = vmatpush1.bf16.msra.mxu1 %v23359_v14  ;;  %v23439_v49 = vld [vmem:[%s26411_s10 + $0x12c8] ss:$16 sps:$4 sm:$0xff]   ;;  %v23444_v14 = vld [vmem:[%s26411_s10 + $0x12e4] ss:$16 sps:$4 sm:$0xff]  }
 0x286   : > { %15580 = vmatprep.subr.bf16.mxu0 %v23364_v62  ;;  %17416 = vmatprep.subr.bf16.mxu1 %v23367_v15  ;;  %v23447_v62 = vld [vmem:[%s26411_s10 + $0x12ec] ss:$16 sps:$4 sm:$0xff]   ;;  %v23442_v15 = vld [vmem:[%s26411_s10 + $0x12e0] ss:$16 sps:$4 sm:$0xff]  }
 0x289   : > { %15581 = vmatpush1.bf16.msra.mxu0 %v23362_v17  ;;  %17417 = vmatpush1.bf16.msra.mxu1 %v23365_v18  ;;  %v23445_v17 = vld [vmem:[%s26411_s10 + $0x12e8] ss:$16 sps:$4 sm:$0xff]   ;;  %v23450_v18 = vld [vmem:[%s26411_s10 + $0x1304] ss:$16 sps:$4 sm:$0xff]  }
 0x28a   : > { %15582 = vmatprep.subr.bf16.mxu0 %v23370_v19  ;;  %17418 = vmatprep.subr.bf16.mxu1 %v23373_v21  ;;  %v23453_v19 = vld [vmem:[%s26411_s10 + $0x130c] ss:$16 sps:$4 sm:$0xff]  }
 0x28d   : > { %15583 = vmatpush1.bf16.msra.mxu0 %v23368_v23  ;;  %17419 = vmatpush1.bf16.msra.mxu1 %v23371_v24 }
 0x28e   : > { %15584 = vmatprep.subr.bf16.mxu0 %v23376_v27  ;;  %17420 = vmatprep.subr.bf16.mxu1 %v23379_v28 }
 0x291   : > { %15585 = vmatpush1.bf16.msra.mxu0 %v23374_v31  ;;  %17421 = vmatpush1.bf16.msra.mxu1 %v23377_v32 }
 0x292   : > { %15586 = vmatprep.subr.bf16.mxu0 %v23382_v4  ;;  %17422 = vmatprep.subr.bf16.mxu1 %v23385_v20  ;;  %v23448_v20 = vld [vmem:[%s26411_s10 + $0x1300] ss:$16 sps:$4 sm:$0xff]  }
 0x295   : > { %15587 = vmatpush1.bf16.msra.mxu0 %v23380_v5  ;;  %17423 = vmatpush1.bf16.msra.mxu1 %v23383_v13  ;;  %v23451_v5 = vld [vmem:[%s26411_s10 + $0x1308] ss:$16 sps:$4 sm:$0xff]  }
 0x296   : > { %15588 = vmatprep.subr.bf16.mxu0 %v23388_v16  ;;  %17424 = vmatprep.subr.bf16.mxu1 %v23391_v10 }
 0x299   : > { %15589 = vmatpush1.bf16.msra.mxu0 %v23386_v33  ;;  %17425 = vmatpush1.bf16.msra.mxu1 %v23389_v11  ;;  %v23457_v33 = vld [vmem:[%s26411_s10 + $0x1328] ss:$16 sps:$4 sm:$0xff]   ;;  %v23462_v11 = vld [vmem:[%s26411_s10 + $0x1344] ss:$16 sps:$4 sm:$0xff]  }
 0x29a   : > { %15590 = vmatprep.subr.bf16.mxu0 %v23394_v35  ;;  %17426 = vmatprep.subr.bf16.mxu1 %v23397_v37  ;;  %v23465_v35 = vld [vmem:[%s26411_s10 + $0x134c] ss:$16 sps:$4 sm:$0xff]   ;;  %v23460_v37 = vld [vmem:[%s26411_s10 + $0x1340] ss:$16 sps:$4 sm:$0xff]  }
 0x29d   : > { %15591 = vmatpush1.bf16.msra.mxu0 %v23392_v39  ;;  %17427 = vmatpush1.bf16.msra.mxu1 %v23395_v40  ;;  %v23463_v39 = vld [vmem:[%s26411_s10 + $0x1348] ss:$16 sps:$4 sm:$0xff]   ;;  %v23468_v40 = vld [vmem:[%s26411_s10 + $0x1364] ss:$16 sps:$4 sm:$0xff]  }
 0x29e   : > { %15611 = vmatprep.subr.bf16.mxu0 %v23400_v41  ;;  %17447 = vmatprep.subr.bf16.mxu1 %v23403_v42  ;;  %v23471_v41 = vld [vmem:[%s26411_s10 + $0x136c] ss:$16 sps:$4 sm:$0xff]   ;;  %v23466_v42 = vld [vmem:[%s26411_s10 + $0x1360] ss:$16 sps:$4 sm:$0xff]  }
 0x2a0   : > { %15593 = vmatmul.mubr.bf16.vlgmr.msra.gmra.mrb[0].mxu0 %v19636_v46  ;;  %17429 = vmatmul.mubr.bf16.vlgmr.msra.gmra.mrb[0].mxu1 %v19636_v46  ;;  %v23474_v46 = vld [vmem:[%s26411_s10 + $0x1384] ss:$16 sps:$4 sm:$0xff]  }
 0x2a1   : > { %15612 = vmatpush1.bf16.msra.mxu0 %v23398_v43  ;;  %17448 = vmatpush1.bf16.msra.mxu1 %v23401_v47  ;;  %v23469_v43 = vld [vmem:[%s26411_s10 + $0x1368] ss:$16 sps:$4 sm:$0xff]   ;;  %v23477_v47 = vld [vmem:[%s26411_s10 + $0x138c] ss:$16 sps:$4 sm:$0xff]  }
 0x2a2   : > { %15613 = vmatprep.subr.bf16.mxu0 %v23406_v51  ;;  %17449 = vmatprep.subr.bf16.mxu1 %v23409_v25  ;;  %v23475_v51 = vld [vmem:[%s26411_s10 + $0x1388] ss:$16 sps:$4 sm:$0xff]   ;;  %v23480_v25 = vld [vmem:[%s26411_s10 + $0x13a4] ss:$16 sps:$4 sm:$0xff]  }
 0x2a3   : > { %15602 = vmatprep.mubr.bf16.mxu0 %v19709_v26  ;;  %17438 = vmatprep.mubr.bf16.mxu1 %v19709_v26  ;;  %v23478_v26 = vld [vmem:[%s26411_s10 + $0x13a0] ss:$16 sps:$4 sm:$0xff]  }
 0x2a5   : > { %15614 = vmatpush1.bf16.msra.mxu0 %v23404_v34  ;;  %17450 = vmatpush1.bf16.msra.mxu1 %v23407_v22  ;;  %v23483_v34 = vld [vmem:[%s26411_s10 + $0x13ac] ss:$16 sps:$4 sm:$0xff]   ;;  %v23481_v22 = vld [vmem:[%s26411_s10 + $0x13a8] ss:$16 sps:$4 sm:$0xff]  }
 0x2a6   : > { %15615 = vmatprep.subr.bf16.mxu0 %v23414_v36  ;;  %17451 = vmatprep.subr.bf16.mxu1 %v23417_v29  ;;  %v23486_v36 = vld [vmem:[%s26411_s10 + $0x13c4] ss:$16 sps:$4 sm:$0xff]   ;;  %v23489_v29 = vld [vmem:[%s26411_s10 + $0x13cc] ss:$16 sps:$4 sm:$0xff]  }
 0x2a8   : > { %15603 = vmatmul.mubr.bf16.gmra.mrb[36].mxu0 %v19708_v54  ;;  %17439 = vmatmul.mubr.bf16.gmra.mrb[36].mxu1 %v19708_v54  ;;  %v23492_v54 = vld [vmem:[%s26411_s10 + $0x13e4] ss:$16 sps:$4 sm:$0xff]  }
 0x2a9   : > { %15616 = vmatpush1.bf16.msra.mxu0 %v23412_v52  ;;  %17452 = vmatpush1.bf16.msra.mxu1 %v23415_v30  ;;  %v23484_v52 = vld [vmem:[%s26411_s10 + $0x13c0] ss:$16 sps:$4 sm:$0xff]   ;;  %v23487_v30 = vld [vmem:[%s26411_s10 + $0x13c8] ss:$16 sps:$4 sm:$0xff]  }
 0x2aa   : > { %15617 = vmatprep.subr.bf16.mxu0 %v23420_v56  ;;  %17453 = vmatprep.subr.bf16.mxu1 %v23423_v58  ;;  %v23495_v56 = vld [vmem:[%s26411_s10 + $0x13ec] ss:$16 sps:$4 sm:$0xff]   ;;  %v23490_v58 = vld [vmem:[%s26411_s10 + $0x13e0] ss:$16 sps:$4 sm:$0xff]  }
 0x2ab   : > { %15643 = vmatprep.mubr.bf16.mxu0 %v19639_v63  ;;  %17479 = vmatprep.mubr.bf16.mxu1 %v19639_v63  ;;  %v23493_v63 = vld [vmem:[%s26411_s10 + $0x13e8] ss:$16 sps:$4 sm:$0xff]  }
 0x2ad   : > { %15618 = vmatpush1.bf16.msra.mxu0 %v23418_v0  ;;  %17454 = vmatpush1.bf16.msra.mxu1 %v23421_v1  ;;  %v23498_v0 = vld [vmem:[%s26411_s10 + $0x1404] ss:$16 sps:$4 sm:$0xff]   ;;  %v23501_v1 = vld [vmem:[%s26411_s10 + $0x140c] ss:$16 sps:$4 sm:$0xff]  }
 0x2ae   : > { %15619 = vmatprep.subr.bf16.mxu0 %v23426_v2  ;;  %17455 = vmatprep.subr.bf16.mxu1 %v23429_v9  ;;  %v23496_v2 = vld [vmem:[%s26411_s10 + $0x1400] ss:$16 sps:$4 sm:$0xff]   ;;  %v19638_v9 = vcombine.low %v27150_v38, %v27155_v55  ;;  %v23505_v38 = vld [vmem:[%s26411_s10 + $0x1428] ss:$16 sps:$4 sm:$0xff]   ;;  %v23512_v55 = vld [vmem:[%s26411_s10 + $0x1444] ss:$16 sps:$4 sm:$0xff]  }
 0x2b1   : > { %15620 = vmatpush1.bf16.msra.mxu0 %v23424_v7  ;;  %17456 = vmatpush1.bf16.msra.mxu1 %v23427_v12  ;;  %v23499_v7 = vld [vmem:[%s26411_s10 + $0x1408] ss:$16 sps:$4 sm:$0xff]  }
 0x2b2   : > { %15621 = vmatprep.subr.bf16.mxu0 %v23432_v60  ;;  %17457 = vmatprep.subr.bf16.mxu1 %v23435_v44  ;;  %v689_v12 = vld [vmem:[%s26413_s15 + $0x288] sm:$0x11]  ;;  %v23504_v60 = vld [vmem:[%s26411_s10 + $0x1424] ss:$16 sps:$4 sm:$0xff]  }
 0x2b3   : > { %v23507_v44 = vld [vmem:[%s26411_s10 + $0x142c] ss:$16 sps:$4 sm:$0xff]  }
 0x2b5   : > { %15622 = vmatpush1.bf16.msra.mxu0 %v23430_v53  ;;  %17458 = vmatpush1.bf16.msra.mxu1 %v23433_v45  ;;  %v23502_v53 = vld [vmem:[%s26411_s10 + $0x1420] ss:$16 sps:$4 sm:$0xff]   ;;  %v19711_v45 = vcombine.high %v689_v12, %v689_v12 }
 0x2b6   : > { %15623 = vmatprep.subr.bf16.mxu0 %v23438_v48  ;;  %17459 = vmatprep.subr.bf16.mxu1 %v23441_v57  ;;  %v23515_v48 = vld [vmem:[%s26411_s10 + $0x144c] ss:$16 sps:$4 sm:$0xff]   ;;  %v27237_v57 = vld [vmem:[%s26413_s15 + $0x50] sm:$0xff] }
 0x2b9   : > { %15624 = vmatpush1.bf16.msra.mxu0 %v23436_v61  ;;  %17460 = vmatpush1.bf16.msra.mxu1 %v23439_v49  ;;  %v23510_v61 = vld [vmem:[%s26411_s10 + $0x1440] ss:$16 sps:$4 sm:$0xff]   ;;  %v23513_v49 = vld [vmem:[%s26411_s10 + $0x1448] ss:$16 sps:$4 sm:$0xff]  }
 0x2ba   : > { %15625 = vmatprep.subr.bf16.mxu0 %v23444_v14  ;;  %17461 = vmatprep.subr.bf16.mxu1 %v23447_v62  ;;  %v19710_v14 = vcombine.low %v689_v12, %v689_v12  ;;  %v27242_v62 = vld [vmem:[%s26413_s15 + $0x170] sm:$0xff] }
 0x2bb   : > { %v15451_v21 = vpop.f32.mrb[24].mxu0  ;;  %v17287_v23 = vpop.f32.mrb[24].mxu1  ;;  %v23570_v12 = vld [vmem:[%s26411_s10 + $0x1580] ss:$16 sps:$4 sm:$0xff]  }
 0x2bc   : > { %v27182_v24 = vadd.f32 %v15451_v21, %v27095_v3  ;;  %v27185_v27 = vadd.f32 %v17287_v23, %v27098_v6  ;;  %v15453_v28 = vpop.f32.mrb[25].mxu0  ;;  %v17289_v31 = vpop.f32.mrb[25].mxu1  ;;  %v23456_v6 = vld [vmem:[%s26411_s10 + $0x1324] ss:$16 sps:$4 sm:$0xff]   ;;  %v23519_v21 = vld [vmem:[%s26411_s10 + $0x1468] ss:$16 sps:$4 sm:$0xff]  }
 0x2bd   : > { %v27188_v32 = vadd.f32 %v15453_v28, %v27101_v8  ;;  %v27191_v4 = vadd.f32 %v17289_v31, %v27104_v59  ;;  %15626 = vmatpush1.bf16.msra.mxu0 %v23442_v15  ;;  %17462 = vmatpush1.bf16.msra.mxu1 %v23445_v17  ;;  %v15455_v3 = vpop.f32.mrb[26].mxu0  ;;  %v17291_v13 = vpop.f32.mrb[26].mxu1  ;;  %v23459_v8 = vld [vmem:[%s26411_s10 + $0x132c] ss:$16 sps:$4 sm:$0xff]   ;;  %v23454_v59 = vld [vmem:[%s26411_s10 + $0x1320] ss:$16 sps:$4 sm:$0xff]  }
 0x2be   : > { %15627 = vmatprep.subr.bf16.mxu0 %v23450_v18  ;;  %17463 = vmatprep.subr.bf16.mxu1 %v23453_v19  ;;  %v15456_v16 = vpop.f32.mrb[27].mxu0  ;;  %v17292_v10 = vpop.f32.mrb[27].mxu1  ;;  %v23518_v15 = vld [vmem:[%s26411_s10 + $0x1464] ss:$16 sps:$4 sm:$0xff]   ;;  %v23521_v17 = vld [vmem:[%s26411_s10 + $0x146c] ss:$16 sps:$4 sm:$0xff]   ;;  %v19641_v18 = vcombine.high %v27237_v57, %v27242_v62 }
 0x2bf   : > { %v23516_v19 = vld [vmem:[%s26411_s10 + $0x1460] ss:$16 sps:$4 sm:$0xff]   ;;  %v23524_v23 = vld [vmem:[%s26411_s10 + $0x1484] ss:$16 sps:$4 sm:$0xff]   ;;  %v23527_v28 = vld [vmem:[%s26411_s10 + $0x148c] ss:$16 sps:$4 sm:$0xff]  }
 0x2c0   : > { %v23522_v31 = vld [vmem:[%s26411_s10 + $0x1480] ss:$16 sps:$4 sm:$0xff]   ;;  %v23533_v3 = vld [vmem:[%s26411_s10 + $0x14ac] ss:$16 sps:$4 sm:$0xff]  }
 0x2c1   : > { %15628 = vmatpush1.bf16.msra.mxu0 %v23448_v20  ;;  %17464 = vmatpush1.bf16.msra.mxu1 %v23451_v5  ;;  %v23525_v20 = vld [vmem:[%s26411_s10 + $0x1488] ss:$16 sps:$4 sm:$0xff]   ;;  %v23530_v5 = vld [vmem:[%s26411_s10 + $0x14a4] ss:$16 sps:$4 sm:$0xff]   ;;  %v23528_v13 = vld [vmem:[%s26411_s10 + $0x14a0] ss:$16 sps:$4 sm:$0xff]  }
 0x2c2   : > { %15629 = vmatprep.subr.bf16.mxu0 %v23456_v6  ;;  %17465 = vmatprep.subr.bf16.mxu1 %v23459_v8  ;;  %v23531_v6 = vld [vmem:[%s26411_s10 + $0x14a8] ss:$16 sps:$4 sm:$0xff]   ;;  %v23536_v8 = vld [vmem:[%s26411_s10 + $0x14c4] ss:$16 sps:$4 sm:$0xff]   ;;  %v23539_v16 = vld [vmem:[%s26411_s10 + $0x14cc] ss:$16 sps:$4 sm:$0xff]  }
 0x2c3   : > { %v23534_v10 = vld [vmem:[%s26411_s10 + $0x14c0] ss:$16 sps:$4 sm:$0xff]  }
 0x2c5   : > { %15630 = vmatpush1.bf16.msra.mxu0 %v23454_v59  ;;  %17466 = vmatpush1.bf16.msra.mxu1 %v23457_v33  ;;  %v23537_v59 = vld [vmem:[%s26411_s10 + $0x14c8] ss:$16 sps:$4 sm:$0xff]   ;;  %v23542_v33 = vld [vmem:[%s26411_s10 + $0x14e4] ss:$16 sps:$4 sm:$0xff]  }
 0x2c6   : > { %15631 = vmatprep.subr.bf16.mxu0 %v23462_v11  ;;  %17467 = vmatprep.subr.bf16.mxu1 %v23465_v35  ;;  %v23545_v11 = vld [vmem:[%s26411_s10 + $0x14ec] ss:$16 sps:$4 sm:$0xff]   ;;  %v23540_v35 = vld [vmem:[%s26411_s10 + $0x14e0] ss:$16 sps:$4 sm:$0xff]  }
 0x2c9   : > { %15632 = vmatpush1.bf16.msra.mxu0 %v23460_v37  ;;  %17468 = vmatpush1.bf16.msra.mxu1 %v23463_v39  ;;  %v23543_v37 = vld [vmem:[%s26411_s10 + $0x14e8] ss:$16 sps:$4 sm:$0xff]   ;;  %v23548_v39 = vld [vmem:[%s26411_s10 + $0x1504] ss:$16 sps:$4 sm:$0xff]  }
 0x2ca   : > { %15633 = vmatprep.subr.bf16.mxu0 %v23468_v40  ;;  %17469 = vmatprep.subr.bf16.mxu1 %v23471_v41  ;;  %v23551_v40 = vld [vmem:[%s26411_s10 + $0x150c] ss:$16 sps:$4 sm:$0xff]  }
 0x2cd   : > { %15634 = vmatpush1.bf16.msra.mxu0 %v23466_v42  ;;  %17470 = vmatpush1.bf16.msra.mxu1 %v23469_v43 }
 0x2ce   : > { %15635 = vmatprep.subr.bf16.mxu0 %v23474_v46  ;;  %17471 = vmatprep.subr.bf16.mxu1 %v23477_v47 }
 0x2d1   : > { %15636 = vmatpush1.bf16.msra.mxu0 %v23472_v50  ;;  %17472 = vmatpush1.bf16.msra.mxu1 %v23475_v51 }
 0x2d2   : > { %15637 = vmatprep.subr.bf16.mxu0 %v23480_v25  ;;  %17473 = vmatprep.subr.bf16.mxu1 %v23483_v34  ;;  %v23546_v34 = vld [vmem:[%s26411_s10 + $0x1500] ss:$16 sps:$4 sm:$0xff]  }
 0x2d5   : > { %15638 = vmatpush1.bf16.msra.mxu0 %v23478_v26  ;;  %17474 = vmatpush1.bf16.msra.mxu1 %v23481_v22  ;;  %v23549_v26 = vld [vmem:[%s26411_s10 + $0x1508] ss:$16 sps:$4 sm:$0xff]  }
 0x2d6   : > { %15639 = vmatprep.subr.bf16.mxu0 %v23486_v36  ;;  %17475 = vmatprep.subr.bf16.mxu1 %v23489_v29 }
 0x2d9   : > { %15640 = vmatpush1.bf16.msra.mxu0 %v23484_v52  ;;  %17476 = vmatpush1.bf16.msra.mxu1 %v23487_v30  ;;  %v23555_v52 = vld [vmem:[%s26411_s10 + $0x1528] ss:$16 sps:$4 sm:$0xff]   ;;  %v23560_v30 = vld [vmem:[%s26411_s10 + $0x1544] ss:$16 sps:$4 sm:$0xff]  }
 0x2da   : > { %15641 = vmatprep.subr.bf16.mxu0 %v23492_v54  ;;  %17477 = vmatprep.subr.bf16.mxu1 %v23495_v56  ;;  %v23563_v54 = vld [vmem:[%s26411_s10 + $0x154c] ss:$16 sps:$4 sm:$0xff]   ;;  %v23558_v56 = vld [vmem:[%s26411_s10 + $0x1540] ss:$16 sps:$4 sm:$0xff]  }
 0x2dd   : > { %15642 = vmatpush1.bf16.msra.mxu0 %v23490_v58  ;;  %17478 = vmatpush1.bf16.msra.mxu1 %v23493_v63  ;;  %v23561_v58 = vld [vmem:[%s26411_s10 + $0x1548] ss:$16 sps:$4 sm:$0xff]   ;;  %v23566_v63 = vld [vmem:[%s26411_s10 + $0x1564] ss:$16 sps:$4 sm:$0xff]  }
 0x2de   : > { %15662 = vmatprep.subr.bf16.mxu0 %v23498_v0  ;;  %17498 = vmatprep.subr.bf16.mxu1 %v23501_v1  ;;  %v23569_v0 = vld [vmem:[%s26411_s10 + $0x156c] ss:$16 sps:$4 sm:$0xff]   ;;  %v23564_v1 = vld [vmem:[%s26411_s10 + $0x1560] ss:$16 sps:$4 sm:$0xff]  }
 0x2e0   : > { %15644 = vmatmul.mubr.bf16.vlgmr.msra.gmra.mrb[0].mxu0 %v19638_v9  ;;  %17480 = vmatmul.mubr.bf16.vlgmr.msra.gmra.mrb[0].mxu1 %v19638_v9  ;;  %v23572_v9 = vld [vmem:[%s26411_s10 + $0x1584] ss:$16 sps:$4 sm:$0xff]  }
 0x2e1   : > { %15663 = vmatpush1.bf16.msra.mxu0 %v23496_v2  ;;  %17499 = vmatpush1.bf16.msra.mxu1 %v23499_v7  ;;  %v23567_v2 = vld [vmem:[%s26411_s10 + $0x1568] ss:$16 sps:$4 sm:$0xff]   ;;  %v23575_v7 = vld [vmem:[%s26411_s10 + $0x158c] ss:$16 sps:$4 sm:$0xff]  }
 0x2e2   : > { %15664 = vmatprep.subr.bf16.mxu0 %v23504_v60  ;;  %17500 = vmatprep.subr.bf16.mxu1 %v23507_v44  ;;  %v23573_v60 = vld [vmem:[%s26411_s10 + $0x1588] ss:$16 sps:$4 sm:$0xff]   ;;  %v23578_v44 = vld [vmem:[%s26411_s10 + $0x15a4] ss:$16 sps:$4 sm:$0xff]  }
 0x2e3   : > { %15653 = vmatprep.mubr.bf16.mxu0 %v19711_v45  ;;  %17489 = vmatprep.mubr.bf16.mxu1 %v19711_v45  ;;  %v23576_v45 = vld [vmem:[%s26411_s10 + $0x15a0] ss:$16 sps:$4 sm:$0xff]  }
 0x2e5   : > { %15665 = vmatpush1.bf16.msra.mxu0 %v23502_v53  ;;  %17501 = vmatpush1.bf16.msra.mxu1 %v23505_v38  ;;  %v23581_v53 = vld [vmem:[%s26411_s10 + $0x15ac] ss:$16 sps:$4 sm:$0xff]   ;;  %v23579_v38 = vld [vmem:[%s26411_s10 + $0x15a8] ss:$16 sps:$4 sm:$0xff]  }
 0x2e6   : > { %15666 = vmatprep.subr.bf16.mxu0 %v23512_v55  ;;  %17502 = vmatprep.subr.bf16.mxu1 %v23515_v48  ;;  %v23584_v55 = vld [vmem:[%s26411_s10 + $0x15c4] ss:$16 sps:$4 sm:$0xff]   ;;  %v23587_v48 = vld [vmem:[%s26411_s10 + $0x15cc] ss:$16 sps:$4 sm:$0xff]  }
 0x2e8   : > { %15654 = vmatmul.mubr.bf16.gmra.mrb[40].mxu0 %v19710_v14  ;;  %17490 = vmatmul.mubr.bf16.gmra.mrb[40].mxu1 %v19710_v14  ;;  %v23590_v14 = vld [vmem:[%s26411_s10 + $0x15e4] ss:$16 sps:$4 sm:$0xff]  }
 0x2e9   : > { %15667 = vmatpush1.bf16.msra.mxu0 %v23510_v61  ;;  %17503 = vmatpush1.bf16.msra.mxu1 %v23513_v49  ;;  %v23582_v61 = vld [vmem:[%s26411_s10 + $0x15c0] ss:$16 sps:$4 sm:$0xff]   ;;  %v23585_v49 = vld [vmem:[%s26411_s10 + $0x15c8] ss:$16 sps:$4 sm:$0xff]  }
 0x2ea   : > { %15668 = vmatprep.subr.bf16.mxu0 %v23518_v15  ;;  %17504 = vmatprep.subr.bf16.mxu1 %v23521_v17  ;;  %v23593_v15 = vld [vmem:[%s26411_s10 + $0x15ec] ss:$16 sps:$4 sm:$0xff]   ;;  %v23588_v17 = vld [vmem:[%s26411_s10 + $0x15e0] ss:$16 sps:$4 sm:$0xff]  }
 0x2eb   : > { %15694 = vmatprep.mubr.bf16.mxu0 %v19641_v18  ;;  %17530 = vmatprep.mubr.bf16.mxu1 %v19641_v18  ;;  %v23591_v18 = vld [vmem:[%s26411_s10 + $0x15e8] ss:$16 sps:$4 sm:$0xff]  }
 0x2ed   : > { %15669 = vmatpush1.bf16.msra.mxu0 %v23516_v19  ;;  %17505 = vmatpush1.bf16.msra.mxu1 %v23519_v21  ;;  %v23596_v19 = vld [vmem:[%s26411_s10 + $0x1604] ss:$16 sps:$4 sm:$0xff]   ;;  %v23599_v21 = vld [vmem:[%s26411_s10 + $0x160c] ss:$16 sps:$4 sm:$0xff]  }
 0x2ee   : > { %15670 = vmatprep.subr.bf16.mxu0 %v23524_v23  ;;  %17506 = vmatprep.subr.bf16.mxu1 %v23527_v28  ;;  %v23594_v23 = vld [vmem:[%s26411_s10 + $0x1600] ss:$16 sps:$4 sm:$0xff]   ;;  %v19640_v28 = vcombine.low %v27237_v57, %v27242_v62  ;;  %v23603_v57 = vld [vmem:[%s26411_s10 + $0x1628] ss:$16 sps:$4 sm:$0xff]   ;;  %v23610_v62 = vld [vmem:[%s26411_s10 + $0x1644] ss:$16 sps:$4 sm:$0xff]  }
 0x2f1   : > { %15671 = vmatpush1.bf16.msra.mxu0 %v23522_v31  ;;  %17507 = vmatpush1.bf16.msra.mxu1 %v23525_v20  ;;  %v23597_v31 = vld [vmem:[%s26411_s10 + $0x1608] ss:$16 sps:$4 sm:$0xff]   ;;  %v690_v20 = vld [vmem:[%s26413_s15 + $0x290] sm:$0x11] }
 0x2f2   : > { %15672 = vmatprep.subr.bf16.mxu0 %v23530_v5  ;;  %17508 = vmatprep.subr.bf16.mxu1 %v23533_v3  ;;  %v23602_v5 = vld [vmem:[%s26411_s10 + $0x1624] ss:$16 sps:$4 sm:$0xff]   ;;  %v23605_v3 = vld [vmem:[%s26411_s10 + $0x162c] ss:$16 sps:$4 sm:$0xff]  }
 0x2f5   : > { %15673 = vmatpush1.bf16.msra.mxu0 %v23528_v13  ;;  %17509 = vmatpush1.bf16.msra.mxu1 %v23531_v6  ;;  %v23600_v13 = vld [vmem:[%s26411_s10 + $0x1620] ss:$16 sps:$4 sm:$0xff]   ;;  %v19713_v6 = vcombine.high %v690_v20, %v690_v20 }
 0x2f6   : > { %15674 = vmatprep.subr.bf16.mxu0 %v23536_v8  ;;  %17510 = vmatprep.subr.bf16.mxu1 %v23539_v16  ;;  %v23613_v8 = vld [vmem:[%s26411_s10 + $0x164c] ss:$16 sps:$4 sm:$0xff]  }
 0x2f7   : > { %v27324_v16 = vld [vmem:[%s26413_s15 + $0x58] sm:$0xff] }
 0x2f9   : > { %15675 = vmatpush1.bf16.msra.mxu0 %v23534_v10  ;;  %17511 = vmatpush1.bf16.msra.mxu1 %v23537_v59  ;;  %v23608_v10 = vld [vmem:[%s26411_s10 + $0x1640] ss:$16 sps:$4 sm:$0xff]   ;;  %v23611_v59 = vld [vmem:[%s26411_s10 + $0x1648] ss:$16 sps:$4 sm:$0xff]  }
 0x2fa   : > { %15676 = vmatprep.subr.bf16.mxu0 %v23542_v33  ;;  %17512 = vmatprep.subr.bf16.mxu1 %v23545_v11  ;;  %v19712_v33 = vcombine.low %v690_v20, %v690_v20  ;;  %v27329_v11 = vld [vmem:[%s26413_s15 + $0x178] sm:$0xff] }
 0x2fb   : > { %v15502_v41 = vpop.f32.mrb[28].mxu0  ;;  %v17338_v42 = vpop.f32.mrb[28].mxu1  ;;  %v23668_v20 = vld [vmem:[%s26411_s10 + $0x1780] ss:$16 sps:$4 sm:$0xff]  }
 0x2fc   : > { %v27269_v43 = vadd.f32 %v15502_v41, %v27182_v24  ;;  %v27272_v46 = vadd.f32 %v17338_v42, %v27185_v27  ;;  %v15504_v47 = vpop.f32.mrb[29].mxu0  ;;  %v17340_v50 = vpop.f32.mrb[29].mxu1  ;;  %v23554_v27 = vld [vmem:[%s26411_s10 + $0x1524] ss:$16 sps:$4 sm:$0xff]   ;;  %v23617_v41 = vld [vmem:[%s26411_s10 + $0x1668] ss:$16 sps:$4 sm:$0xff]  }
 0x2fd   : > { %v27275_v51 = vadd.f32 %v15504_v47, %v27188_v32  ;;  %v27278_v25 = vadd.f32 %v17340_v50, %v27191_v4  ;;  %15677 = vmatpush1.bf16.msra.mxu0 %v23540_v35  ;;  %17513 = vmatpush1.bf16.msra.mxu1 %v23543_v37  ;;  %v15506_v24 = vpop.f32.mrb[30].mxu0  ;;  %v17342_v22 = vpop.f32.mrb[30].mxu1  ;;  %v23557_v32 = vld [vmem:[%s26411_s10 + $0x152c] ss:$16 sps:$4 sm:$0xff]   ;;  %v23552_v4 = vld [vmem:[%s26411_s10 + $0x1520] ss:$16 sps:$4 sm:$0xff]  }
 0x2fe   : > { %15678 = vmatprep.subr.bf16.mxu0 %v23548_v39  ;;  %17514 = vmatprep.subr.bf16.mxu1 %v23551_v40  ;;  %v15507_v36 = vpop.f32.mrb[31].mxu0  ;;  %v17343_v29 = vpop.f32.mrb[31].mxu1  ;;  %v23616_v35 = vld [vmem:[%s26411_s10 + $0x1664] ss:$16 sps:$4 sm:$0xff]   ;;  %v23619_v37 = vld [vmem:[%s26411_s10 + $0x166c] ss:$16 sps:$4 sm:$0xff]   ;;  %v19643_v39 = vcombine.high %v27324_v16, %v27329_v11 }
 0x2ff   : > { %v23614_v40 = vld [vmem:[%s26411_s10 + $0x1660] ss:$16 sps:$4 sm:$0xff]   ;;  %v23622_v42 = vld [vmem:[%s26411_s10 + $0x1684] ss:$16 sps:$4 sm:$0xff]   ;;  %v23625_v47 = vld [vmem:[%s26411_s10 + $0x168c] ss:$16 sps:$4 sm:$0xff]  }
 0x300   : > { %v23620_v50 = vld [vmem:[%s26411_s10 + $0x1680] ss:$16 sps:$4 sm:$0xff]   ;;  %v23631_v24 = vld [vmem:[%s26411_s10 + $0x16ac] ss:$16 sps:$4 sm:$0xff]  }
 0x301   : > { %15679 = vmatpush1.bf16.msra.mxu0 %v23546_v34  ;;  %17515 = vmatpush1.bf16.msra.mxu1 %v23549_v26  ;;  %v23623_v34 = vld [vmem:[%s26411_s10 + $0x1688] ss:$16 sps:$4 sm:$0xff]   ;;  %v23628_v26 = vld [vmem:[%s26411_s10 + $0x16a4] ss:$16 sps:$4 sm:$0xff]   ;;  %v23626_v22 = vld [vmem:[%s26411_s10 + $0x16a0] ss:$16 sps:$4 sm:$0xff]  }
 0x302   : > { %15680 = vmatprep.subr.bf16.mxu0 %v23554_v27  ;;  %17516 = vmatprep.subr.bf16.mxu1 %v23557_v32  ;;  %v23629_v27 = vld [vmem:[%s26411_s10 + $0x16a8] ss:$16 sps:$4 sm:$0xff]   ;;  %v23634_v32 = vld [vmem:[%s26411_s10 + $0x16c4] ss:$16 sps:$4 sm:$0xff]   ;;  %v23637_v36 = vld [vmem:[%s26411_s10 + $0x16cc] ss:$16 sps:$4 sm:$0xff]  }
 0x303   : > { %v23632_v29 = vld [vmem:[%s26411_s10 + $0x16c0] ss:$16 sps:$4 sm:$0xff]  }
 0x305   : > { %15681 = vmatpush1.bf16.msra.mxu0 %v23552_v4  ;;  %17517 = vmatpush1.bf16.msra.mxu1 %v23555_v52  ;;  %v23635_v4 = vld [vmem:[%s26411_s10 + $0x16c8] ss:$16 sps:$4 sm:$0xff]   ;;  %v23640_v52 = vld [vmem:[%s26411_s10 + $0x16e4] ss:$16 sps:$4 sm:$0xff]  }
 0x306   : > { %15682 = vmatprep.subr.bf16.mxu0 %v23560_v30  ;;  %17518 = vmatprep.subr.bf16.mxu1 %v23563_v54  ;;  %v23643_v30 = vld [vmem:[%s26411_s10 + $0x16ec] ss:$16 sps:$4 sm:$0xff]   ;;  %v23638_v54 = vld [vmem:[%s26411_s10 + $0x16e0] ss:$16 sps:$4 sm:$0xff]  }
 0x309   : > { %15683 = vmatpush1.bf16.msra.mxu0 %v23558_v56  ;;  %17519 = vmatpush1.bf16.msra.mxu1 %v23561_v58  ;;  %v23641_v56 = vld [vmem:[%s26411_s10 + $0x16e8] ss:$16 sps:$4 sm:$0xff]   ;;  %v23646_v58 = vld [vmem:[%s26411_s10 + $0x1704] ss:$16 sps:$4 sm:$0xff]  }
 0x30a   : > { %15684 = vmatprep.subr.bf16.mxu0 %v23566_v63  ;;  %17520 = vmatprep.subr.bf16.mxu1 %v23569_v0  ;;  %v23649_v63 = vld [vmem:[%s26411_s10 + $0x170c] ss:$16 sps:$4 sm:$0xff]  }
 0x30d   : > { %15685 = vmatpush1.bf16.msra.mxu0 %v23564_v1  ;;  %17521 = vmatpush1.bf16.msra.mxu1 %v23567_v2 }
 0x30e   : > { %15686 = vmatprep.subr.bf16.mxu0 %v23572_v9  ;;  %17522 = vmatprep.subr.bf16.mxu1 %v23575_v7 }
 0x311   : > { %15687 = vmatpush1.bf16.msra.mxu0 %v23570_v12  ;;  %17523 = vmatpush1.bf16.msra.mxu1 %v23573_v60 }
 0x312   : > { %15688 = vmatprep.subr.bf16.mxu0 %v23578_v44  ;;  %17524 = vmatprep.subr.bf16.mxu1 %v23581_v53  ;;  %v23644_v53 = vld [vmem:[%s26411_s10 + $0x1700] ss:$16 sps:$4 sm:$0xff]  }
 0x315   : > { %15689 = vmatpush1.bf16.msra.mxu0 %v23576_v45  ;;  %17525 = vmatpush1.bf16.msra.mxu1 %v23579_v38  ;;  %v23647_v45 = vld [vmem:[%s26411_s10 + $0x1708] ss:$16 sps:$4 sm:$0xff]  }
 0x316   : > { %15690 = vmatprep.subr.bf16.mxu0 %v23584_v55  ;;  %17526 = vmatprep.subr.bf16.mxu1 %v23587_v48 }
 0x319   : > { %15691 = vmatpush1.bf16.msra.mxu0 %v23582_v61  ;;  %17527 = vmatpush1.bf16.msra.mxu1 %v23585_v49  ;;  %v23653_v61 = vld [vmem:[%s26411_s10 + $0x1728] ss:$16 sps:$4 sm:$0xff]   ;;  %v23658_v49 = vld [vmem:[%s26411_s10 + $0x1744] ss:$16 sps:$4 sm:$0xff]  }
 0x31a   : > { %15692 = vmatprep.subr.bf16.mxu0 %v23590_v14  ;;  %17528 = vmatprep.subr.bf16.mxu1 %v23593_v15  ;;  %v23661_v14 = vld [vmem:[%s26411_s10 + $0x174c] ss:$16 sps:$4 sm:$0xff]   ;;  %v23656_v15 = vld [vmem:[%s26411_s10 + $0x1740] ss:$16 sps:$4 sm:$0xff]  }
 0x31d   : > { %15693 = vmatpush1.bf16.msra.mxu0 %v23588_v17  ;;  %17529 = vmatpush1.bf16.msra.mxu1 %v23591_v18  ;;  %v23659_v17 = vld [vmem:[%s26411_s10 + $0x1748] ss:$16 sps:$4 sm:$0xff]   ;;  %v23664_v18 = vld [vmem:[%s26411_s10 + $0x1764] ss:$16 sps:$4 sm:$0xff]  }
 0x31e   : > { %15713 = vmatprep.subr.bf16.mxu0 %v23596_v19  ;;  %17549 = vmatprep.subr.bf16.mxu1 %v23599_v21  ;;  %v23667_v19 = vld [vmem:[%s26411_s10 + $0x176c] ss:$16 sps:$4 sm:$0xff]   ;;  %v23662_v21 = vld [vmem:[%s26411_s10 + $0x1760] ss:$16 sps:$4 sm:$0xff]  }
 0x320   : > { %15695 = vmatmul.mubr.bf16.vlgmr.msra.gmra.mrb[0].mxu0 %v19640_v28  ;;  %17531 = vmatmul.mubr.bf16.vlgmr.msra.gmra.mrb[0].mxu1 %v19640_v28  ;;  %v23670_v28 = vld [vmem:[%s26411_s10 + $0x1784] ss:$16 sps:$4 sm:$0xff]  }
 0x321   : > { %15714 = vmatpush1.bf16.msra.mxu0 %v23594_v23  ;;  %17550 = vmatpush1.bf16.msra.mxu1 %v23597_v31  ;;  %v23665_v23 = vld [vmem:[%s26411_s10 + $0x1768] ss:$16 sps:$4 sm:$0xff]   ;;  %v23673_v31 = vld [vmem:[%s26411_s10 + $0x178c] ss:$16 sps:$4 sm:$0xff]  }
 0x322   : > { %15715 = vmatprep.subr.bf16.mxu0 %v23602_v5  ;;  %17551 = vmatprep.subr.bf16.mxu1 %v23605_v3  ;;  %v23671_v5 = vld [vmem:[%s26411_s10 + $0x1788] ss:$16 sps:$4 sm:$0xff]   ;;  %v23676_v3 = vld [vmem:[%s26411_s10 + $0x17a4] ss:$16 sps:$4 sm:$0xff]  }
 0x323   : > { %15704 = vmatprep.mubr.bf16.mxu0 %v19713_v6  ;;  %17540 = vmatprep.mubr.bf16.mxu1 %v19713_v6  ;;  %v23674_v6 = vld [vmem:[%s26411_s10 + $0x17a0] ss:$16 sps:$4 sm:$0xff]  }
 0x325   : > { %15716 = vmatpush1.bf16.msra.mxu0 %v23600_v13  ;;  %17552 = vmatpush1.bf16.msra.mxu1 %v23603_v57  ;;  %v23679_v13 = vld [vmem:[%s26411_s10 + $0x17ac] ss:$16 sps:$4 sm:$0xff]   ;;  %v23677_v57 = vld [vmem:[%s26411_s10 + $0x17a8] ss:$16 sps:$4 sm:$0xff]  }
 0x326   : > { %15717 = vmatprep.subr.bf16.mxu0 %v23610_v62  ;;  %17553 = vmatprep.subr.bf16.mxu1 %v23613_v8  ;;  %v23682_v62 = vld [vmem:[%s26411_s10 + $0x17c4] ss:$16 sps:$4 sm:$0xff]   ;;  %v23685_v8 = vld [vmem:[%s26411_s10 + $0x17cc] ss:$16 sps:$4 sm:$0xff]  }
 0x328   : > { %15705 = vmatmul.mubr.bf16.gmra.mrb[44].mxu0 %v19712_v33  ;;  %17541 = vmatmul.mubr.bf16.gmra.mrb[44].mxu1 %v19712_v33  ;;  %v23688_v33 = vld [vmem:[%s26411_s10 + $0x17e4] ss:$16 sps:$4 sm:$0xff]  }
 0x329   : > { %15718 = vmatpush1.bf16.msra.mxu0 %v23608_v10  ;;  %17554 = vmatpush1.bf16.msra.mxu1 %v23611_v59  ;;  %v23680_v10 = vld [vmem:[%s26411_s10 + $0x17c0] ss:$16 sps:$4 sm:$0xff]   ;;  %v23683_v59 = vld [vmem:[%s26411_s10 + $0x17c8] ss:$16 sps:$4 sm:$0xff]  }
 0x32a   : > { %15719 = vmatprep.subr.bf16.mxu0 %v23616_v35  ;;  %17555 = vmatprep.subr.bf16.mxu1 %v23619_v37  ;;  %v23691_v35 = vld [vmem:[%s26411_s10 + $0x17ec] ss:$16 sps:$4 sm:$0xff]   ;;  %v23686_v37 = vld [vmem:[%s26411_s10 + $0x17e0] ss:$16 sps:$4 sm:$0xff]  }
 0x32b   : > { %15745 = vmatprep.mubr.bf16.mxu0 %v19643_v39  ;;  %17581 = vmatprep.mubr.bf16.mxu1 %v19643_v39  ;;  %v23689_v39 = vld [vmem:[%s26411_s10 + $0x17e8] ss:$16 sps:$4 sm:$0xff]  }
 0x32d   : > { %15720 = vmatpush1.bf16.msra.mxu0 %v23614_v40  ;;  %17556 = vmatpush1.bf16.msra.mxu1 %v23617_v41  ;;  %v23694_v40 = vld [vmem:[%s26411_s10 + $0x1804] ss:$16 sps:$4 sm:$0xff]   ;;  %v23697_v41 = vld [vmem:[%s26411_s10 + $0x180c] ss:$16 sps:$4 sm:$0xff]  }
 0x32e   : > { %15721 = vmatprep.subr.bf16.mxu0 %v23622_v42  ;;  %17557 = vmatprep.subr.bf16.mxu1 %v23625_v47  ;;  %v23692_v42 = vld [vmem:[%s26411_s10 + $0x1800] ss:$16 sps:$4 sm:$0xff]   ;;  %v19642_v47 = vcombine.low %v27324_v16, %v27329_v11  ;;  %v23701_v16 = vld [vmem:[%s26411_s10 + $0x1828] ss:$16 sps:$4 sm:$0xff]   ;;  %v23708_v11 = vld [vmem:[%s26411_s10 + $0x1844] ss:$16 sps:$4 sm:$0xff]  }
 0x331   : > { %15722 = vmatpush1.bf16.msra.mxu0 %v23620_v50  ;;  %17558 = vmatpush1.bf16.msra.mxu1 %v23623_v34  ;;  %v23695_v50 = vld [vmem:[%s26411_s10 + $0x1808] ss:$16 sps:$4 sm:$0xff]  }
 0x332   : > { %15723 = vmatprep.subr.bf16.mxu0 %v23628_v26  ;;  %17559 = vmatprep.subr.bf16.mxu1 %v23631_v24  ;;  %v691_v34 = vld [vmem:[%s26413_s15 + $0x298] sm:$0x11]  ;;  %v23700_v26 = vld [vmem:[%s26411_s10 + $0x1824] ss:$16 sps:$4 sm:$0xff]  }
 0x333   : > { %v23703_v24 = vld [vmem:[%s26411_s10 + $0x182c] ss:$16 sps:$4 sm:$0xff]  }
 0x335   : > { %15724 = vmatpush1.bf16.msra.mxu0 %v23626_v22  ;;  %17560 = vmatpush1.bf16.msra.mxu1 %v23629_v27  ;;  %v23698_v22 = vld [vmem:[%s26411_s10 + $0x1820] ss:$16 sps:$4 sm:$0xff]   ;;  %v19715_v27 = vcombine.high %v691_v34, %v691_v34 }
 0x336   : > { %15725 = vmatprep.subr.bf16.mxu0 %v23634_v32  ;;  %17561 = vmatprep.subr.bf16.mxu1 %v23637_v36  ;;  %v23711_v32 = vld [vmem:[%s26411_s10 + $0x184c] ss:$16 sps:$4 sm:$0xff]   ;;  %v27411_v36 = vld [vmem:[%s26413_s15 + $0x60] sm:$0xff] }
 0x339   : > { %15726 = vmatpush1.bf16.msra.mxu0 %v23632_v29  ;;  %17562 = vmatpush1.bf16.msra.mxu1 %v23635_v4  ;;  %v23706_v29 = vld [vmem:[%s26411_s10 + $0x1840] ss:$16 sps:$4 sm:$0xff]   ;;  %v23709_v4 = vld [vmem:[%s26411_s10 + $0x1848] ss:$16 sps:$4 sm:$0xff]  }
 0x33a   : > { %15727 = vmatprep.subr.bf16.mxu0 %v23640_v52  ;;  %17563 = vmatprep.subr.bf16.mxu1 %v23643_v30  ;;  %v19714_v52 = vcombine.low %v691_v34, %v691_v34  ;;  %v27416_v30 = vld [vmem:[%s26413_s15 + $0x180] sm:$0xff] }
 0x33b   : > { %v15553_v0 = vpop.f32.mrb[32].mxu0  ;;  %v17389_v1 = vpop.f32.mrb[32].mxu1  ;;  %v23766_v34 = vld [vmem:[%s26411_s10 + $0x1980] ss:$16 sps:$4 sm:$0xff]  }
 0x33c   : > { %v27356_v2 = vadd.f32 %v15553_v0, %v27269_v43  ;;  %v27359_v9 = vadd.f32 %v17389_v1, %v27272_v46  ;;  %v15555_v7 = vpop.f32.mrb[33].mxu0  ;;  %v17391_v12 = vpop.f32.mrb[33].mxu1  ;;  %v23652_v46 = vld [vmem:[%s26411_s10 + $0x1724] ss:$16 sps:$4 sm:$0xff]   ;;  %v23715_v0 = vld [vmem:[%s26411_s10 + $0x1868] ss:$16 sps:$4 sm:$0xff]  }
 0x33d   : > { %v27362_v60 = vadd.f32 %v15555_v7, %v27275_v51  ;;  %v27365_v44 = vadd.f32 %v17391_v12, %v27278_v25  ;;  %15728 = vmatpush1.bf16.msra.mxu0 %v23638_v54  ;;  %17564 = vmatpush1.bf16.msra.mxu1 %v23641_v56  ;;  %v15557_v43 = vpop.f32.mrb[34].mxu0  ;;  %v17393_v38 = vpop.f32.mrb[34].mxu1  ;;  %v23655_v51 = vld [vmem:[%s26411_s10 + $0x172c] ss:$16 sps:$4 sm:$0xff]   ;;  %v23650_v25 = vld [vmem:[%s26411_s10 + $0x1720] ss:$16 sps:$4 sm:$0xff]  }
 0x33e   : > { %15729 = vmatprep.subr.bf16.mxu0 %v23646_v58  ;;  %17565 = vmatprep.subr.bf16.mxu1 %v23649_v63  ;;  %v15558_v55 = vpop.f32.mrb[35].mxu0  ;;  %v17394_v48 = vpop.f32.mrb[35].mxu1  ;;  %v23714_v54 = vld [vmem:[%s26411_s10 + $0x1864] ss:$16 sps:$4 sm:$0xff]   ;;  %v23717_v56 = vld [vmem:[%s26411_s10 + $0x186c] ss:$16 sps:$4 sm:$0xff]   ;;  %v19645_v58 = vcombine.high %v27411_v36, %v27416_v30 }
 0x33f   : > { %v23712_v63 = vld [vmem:[%s26411_s10 + $0x1860] ss:$16 sps:$4 sm:$0xff]   ;;  %v23720_v1 = vld [vmem:[%s26411_s10 + $0x1884] ss:$16 sps:$4 sm:$0xff]   ;;  %v23723_v7 = vld [vmem:[%s26411_s10 + $0x188c] ss:$16 sps:$4 sm:$0xff]  }
 0x340   : > { %v23718_v12 = vld [vmem:[%s26411_s10 + $0x1880] ss:$16 sps:$4 sm:$0xff]   ;;  %v23729_v43 = vld [vmem:[%s26411_s10 + $0x18ac] ss:$16 sps:$4 sm:$0xff]  }
 0x341   : > { %15730 = vmatpush1.bf16.msra.mxu0 %v23644_v53  ;;  %17566 = vmatpush1.bf16.msra.mxu1 %v23647_v45  ;;  %v23721_v53 = vld [vmem:[%s26411_s10 + $0x1888] ss:$16 sps:$4 sm:$0xff]   ;;  %v23726_v45 = vld [vmem:[%s26411_s10 + $0x18a4] ss:$16 sps:$4 sm:$0xff]   ;;  %v23724_v38 = vld [vmem:[%s26411_s10 + $0x18a0] ss:$16 sps:$4 sm:$0xff]  }
 0x342   : > { %15731 = vmatprep.subr.bf16.mxu0 %v23652_v46  ;;  %17567 = vmatprep.subr.bf16.mxu1 %v23655_v51  ;;  %v23727_v46 = vld [vmem:[%s26411_s10 + $0x18a8] ss:$16 sps:$4 sm:$0xff]   ;;  %v23732_v51 = vld [vmem:[%s26411_s10 + $0x18c4] ss:$16 sps:$4 sm:$0xff]   ;;  %v23735_v55 = vld [vmem:[%s26411_s10 + $0x18cc] ss:$16 sps:$4 sm:$0xff]  }
 0x343   : > { %v23730_v48 = vld [vmem:[%s26411_s10 + $0x18c0] ss:$16 sps:$4 sm:$0xff]  }
 0x345   : > { %15732 = vmatpush1.bf16.msra.mxu0 %v23650_v25  ;;  %17568 = vmatpush1.bf16.msra.mxu1 %v23653_v61  ;;  %v23733_v25 = vld [vmem:[%s26411_s10 + $0x18c8] ss:$16 sps:$4 sm:$0xff]   ;;  %v23738_v61 = vld [vmem:[%s26411_s10 + $0x18e4] ss:$16 sps:$4 sm:$0xff]  }
 0x346   : > { %15733 = vmatprep.subr.bf16.mxu0 %v23658_v49  ;;  %17569 = vmatprep.subr.bf16.mxu1 %v23661_v14  ;;  %v23741_v49 = vld [vmem:[%s26411_s10 + $0x18ec] ss:$16 sps:$4 sm:$0xff]   ;;  %v23736_v14 = vld [vmem:[%s26411_s10 + $0x18e0] ss:$16 sps:$4 sm:$0xff]  }
 0x349   : > { %15734 = vmatpush1.bf16.msra.mxu0 %v23656_v15  ;;  %17570 = vmatpush1.bf16.msra.mxu1 %v23659_v17  ;;  %v23739_v15 = vld [vmem:[%s26411_s10 + $0x18e8] ss:$16 sps:$4 sm:$0xff]   ;;  %v23744_v17 = vld [vmem:[%s26411_s10 + $0x1904] ss:$16 sps:$4 sm:$0xff]  }
 0x34a   : > { %15735 = vmatprep.subr.bf16.mxu0 %v23664_v18  ;;  %17571 = vmatprep.subr.bf16.mxu1 %v23667_v19  ;;  %v23747_v18 = vld [vmem:[%s26411_s10 + $0x190c] ss:$16 sps:$4 sm:$0xff]  }
 0x34d   : > { %15736 = vmatpush1.bf16.msra.mxu0 %v23662_v21  ;;  %17572 = vmatpush1.bf16.msra.mxu1 %v23665_v23 }
 0x34e   : > { %15737 = vmatprep.subr.bf16.mxu0 %v23670_v28  ;;  %17573 = vmatprep.subr.bf16.mxu1 %v23673_v31 }
 0x351   : > { %15738 = vmatpush1.bf16.msra.mxu0 %v23668_v20  ;;  %17574 = vmatpush1.bf16.msra.mxu1 %v23671_v5 }
 0x352   : > { %15739 = vmatprep.subr.bf16.mxu0 %v23676_v3  ;;  %17575 = vmatprep.subr.bf16.mxu1 %v23679_v13  ;;  %v23742_v13 = vld [vmem:[%s26411_s10 + $0x1900] ss:$16 sps:$4 sm:$0xff]  }
 0x355   : > { %15740 = vmatpush1.bf16.msra.mxu0 %v23674_v6  ;;  %17576 = vmatpush1.bf16.msra.mxu1 %v23677_v57  ;;  %v23745_v6 = vld [vmem:[%s26411_s10 + $0x1908] ss:$16 sps:$4 sm:$0xff]  }
 0x356   : > { %15741 = vmatprep.subr.bf16.mxu0 %v23682_v62  ;;  %17577 = vmatprep.subr.bf16.mxu1 %v23685_v8 }
 0x359   : > { %15742 = vmatpush1.bf16.msra.mxu0 %v23680_v10  ;;  %17578 = vmatpush1.bf16.msra.mxu1 %v23683_v59  ;;  %v23751_v10 = vld [vmem:[%s26411_s10 + $0x1928] ss:$16 sps:$4 sm:$0xff]   ;;  %v23756_v59 = vld [vmem:[%s26411_s10 + $0x1944] ss:$16 sps:$4 sm:$0xff]  }
 0x35a   : > { %15743 = vmatprep.subr.bf16.mxu0 %v23688_v33  ;;  %17579 = vmatprep.subr.bf16.mxu1 %v23691_v35  ;;  %v23759_v33 = vld [vmem:[%s26411_s10 + $0x194c] ss:$16 sps:$4 sm:$0xff]   ;;  %v23754_v35 = vld [vmem:[%s26411_s10 + $0x1940] ss:$16 sps:$4 sm:$0xff]  }
 0x35d   : > { %15744 = vmatpush1.bf16.msra.mxu0 %v23686_v37  ;;  %17580 = vmatpush1.bf16.msra.mxu1 %v23689_v39  ;;  %v23757_v37 = vld [vmem:[%s26411_s10 + $0x1948] ss:$16 sps:$4 sm:$0xff]   ;;  %v23762_v39 = vld [vmem:[%s26411_s10 + $0x1964] ss:$16 sps:$4 sm:$0xff]  }
 0x35e   : > { %15764 = vmatprep.subr.bf16.mxu0 %v23694_v40  ;;  %17600 = vmatprep.subr.bf16.mxu1 %v23697_v41  ;;  %v23765_v40 = vld [vmem:[%s26411_s10 + $0x196c] ss:$16 sps:$4 sm:$0xff]   ;;  %v23760_v41 = vld [vmem:[%s26411_s10 + $0x1960] ss:$16 sps:$4 sm:$0xff]  }
 0x360   : > { %15746 = vmatmul.mubr.bf16.vlgmr.msra.gmra.mrb[0].mxu0 %v19642_v47  ;;  %17582 = vmatmul.mubr.bf16.vlgmr.msra.gmra.mrb[0].mxu1 %v19642_v47  ;;  %v23768_v47 = vld [vmem:[%s26411_s10 + $0x1984] ss:$16 sps:$4 sm:$0xff]  }
 0x361   : > { %15765 = vmatpush1.bf16.msra.mxu0 %v23692_v42  ;;  %17601 = vmatpush1.bf16.msra.mxu1 %v23695_v50  ;;  %v23763_v42 = vld [vmem:[%s26411_s10 + $0x1968] ss:$16 sps:$4 sm:$0xff]   ;;  %v23771_v50 = vld [vmem:[%s26411_s10 + $0x198c] ss:$16 sps:$4 sm:$0xff]  }
 0x362   : > { %15766 = vmatprep.subr.bf16.mxu0 %v23700_v26  ;;  %17602 = vmatprep.subr.bf16.mxu1 %v23703_v24  ;;  %v23769_v26 = vld [vmem:[%s26411_s10 + $0x1988] ss:$16 sps:$4 sm:$0xff]   ;;  %v23774_v24 = vld [vmem:[%s26411_s10 + $0x19a4] ss:$16 sps:$4 sm:$0xff]  }
 0x363   : > { %15755 = vmatprep.mubr.bf16.mxu0 %v19715_v27  ;;  %17591 = vmatprep.mubr.bf16.mxu1 %v19715_v27  ;;  %v23772_v27 = vld [vmem:[%s26411_s10 + $0x19a0] ss:$16 sps:$4 sm:$0xff]  }
 0x365   : > { %15767 = vmatpush1.bf16.msra.mxu0 %v23698_v22  ;;  %17603 = vmatpush1.bf16.msra.mxu1 %v23701_v16  ;;  %v23777_v22 = vld [vmem:[%s26411_s10 + $0x19ac] ss:$16 sps:$4 sm:$0xff]   ;;  %v23775_v16 = vld [vmem:[%s26411_s10 + $0x19a8] ss:$16 sps:$4 sm:$0xff]  }
 0x366   : > { %15768 = vmatprep.subr.bf16.mxu0 %v23708_v11  ;;  %17604 = vmatprep.subr.bf16.mxu1 %v23711_v32  ;;  %v23780_v11 = vld [vmem:[%s26411_s10 + $0x19c4] ss:$16 sps:$4 sm:$0xff]   ;;  %v23783_v32 = vld [vmem:[%s26411_s10 + $0x19cc] ss:$16 sps:$4 sm:$0xff]  }
 0x368   : > { %15756 = vmatmul.mubr.bf16.gmra.mrb[48].mxu0 %v19714_v52  ;;  %17592 = vmatmul.mubr.bf16.gmra.mrb[48].mxu1 %v19714_v52  ;;  %v23786_v52 = vld [vmem:[%s26411_s10 + $0x19e4] ss:$16 sps:$4 sm:$0xff]  }
 0x369   : > { %15769 = vmatpush1.bf16.msra.mxu0 %v23706_v29  ;;  %17605 = vmatpush1.bf16.msra.mxu1 %v23709_v4  ;;  %v23778_v29 = vld [vmem:[%s26411_s10 + $0x19c0] ss:$16 sps:$4 sm:$0xff]   ;;  %v23781_v4 = vld [vmem:[%s26411_s10 + $0x19c8] ss:$16 sps:$4 sm:$0xff]  }
 0x36a   : > { %15770 = vmatprep.subr.bf16.mxu0 %v23714_v54  ;;  %17606 = vmatprep.subr.bf16.mxu1 %v23717_v56  ;;  %v23789_v54 = vld [vmem:[%s26411_s10 + $0x19ec] ss:$16 sps:$4 sm:$0xff]   ;;  %v23784_v56 = vld [vmem:[%s26411_s10 + $0x19e0] ss:$16 sps:$4 sm:$0xff]  }
 0x36b   : > { %15796 = vmatprep.mubr.bf16.mxu0 %v19645_v58  ;;  %17632 = vmatprep.mubr.bf16.mxu1 %v19645_v58  ;;  %v23787_v58 = vld [vmem:[%s26411_s10 + $0x19e8] ss:$16 sps:$4 sm:$0xff]  }
 0x36d   : > { %15771 = vmatpush1.bf16.msra.mxu0 %v23712_v63  ;;  %17607 = vmatpush1.bf16.msra.mxu1 %v23715_v0  ;;  %v23792_v63 = vld [vmem:[%s26411_s10 + $0x1a04] ss:$16 sps:$4 sm:$0xff]   ;;  %v23795_v0 = vld [vmem:[%s26411_s10 + $0x1a0c] ss:$16 sps:$4 sm:$0xff]  }
 0x36e   : > { %15772 = vmatprep.subr.bf16.mxu0 %v23720_v1  ;;  %17608 = vmatprep.subr.bf16.mxu1 %v23723_v7  ;;  %v23790_v1 = vld [vmem:[%s26411_s10 + $0x1a00] ss:$16 sps:$4 sm:$0xff]   ;;  %v19644_v7 = vcombine.low %v27411_v36, %v27416_v30  ;;  %v23799_v36 = vld [vmem:[%s26411_s10 + $0x1a28] ss:$16 sps:$4 sm:$0xff]   ;;  %v23806_v30 = vld [vmem:[%s26411_s10 + $0x1a44] ss:$16 sps:$4 sm:$0xff]  }
 0x371   : > { %15773 = vmatpush1.bf16.msra.mxu0 %v23718_v12  ;;  %17609 = vmatpush1.bf16.msra.mxu1 %v23721_v53  ;;  %v23793_v12 = vld [vmem:[%s26411_s10 + $0x1a08] ss:$16 sps:$4 sm:$0xff]   ;;  %v692_v53 = vld [vmem:[%s26413_s15 + $0x2a0] sm:$0x11] }
 0x372   : > { %15774 = vmatprep.subr.bf16.mxu0 %v23726_v45  ;;  %17610 = vmatprep.subr.bf16.mxu1 %v23729_v43  ;;  %v23798_v45 = vld [vmem:[%s26411_s10 + $0x1a24] ss:$16 sps:$4 sm:$0xff]   ;;  %v23801_v43 = vld [vmem:[%s26411_s10 + $0x1a2c] ss:$16 sps:$4 sm:$0xff]  }
 0x375   : > { %15775 = vmatpush1.bf16.msra.mxu0 %v23724_v38  ;;  %17611 = vmatpush1.bf16.msra.mxu1 %v23727_v46  ;;  %v23796_v38 = vld [vmem:[%s26411_s10 + $0x1a20] ss:$16 sps:$4 sm:$0xff]   ;;  %v19717_v46 = vcombine.high %v692_v53, %v692_v53 }
 0x376   : > { %15776 = vmatprep.subr.bf16.mxu0 %v23732_v51  ;;  %17612 = vmatprep.subr.bf16.mxu1 %v23735_v55  ;;  %v23809_v51 = vld [vmem:[%s26411_s10 + $0x1a4c] ss:$16 sps:$4 sm:$0xff]  }
 0x377   : > { %v27498_v55 = vld [vmem:[%s26413_s15 + $0x68] sm:$0xff] }
 0x379   : > { %15777 = vmatpush1.bf16.msra.mxu0 %v23730_v48  ;;  %17613 = vmatpush1.bf16.msra.mxu1 %v23733_v25  ;;  %v23804_v48 = vld [vmem:[%s26411_s10 + $0x1a40] ss:$16 sps:$4 sm:$0xff]   ;;  %v23807_v25 = vld [vmem:[%s26411_s10 + $0x1a48] ss:$16 sps:$4 sm:$0xff]  }
 0x37a   : > { %15778 = vmatprep.subr.bf16.mxu0 %v23738_v61  ;;  %17614 = vmatprep.subr.bf16.mxu1 %v23741_v49  ;;  %v19716_v61 = vcombine.low %v692_v53, %v692_v53  ;;  %v27503_v49 = vld [vmem:[%s26413_s15 + $0x188] sm:$0xff] }
 0x37b   : > { %v15604_v19 = vpop.f32.mrb[36].mxu0  ;;  %v17440_v21 = vpop.f32.mrb[36].mxu1  ;;  %v23864_v53 = vld [vmem:[%s26411_s10 + $0x1b80] ss:$16 sps:$4 sm:$0xff]  }
 0x37c   : > { %v27443_v23 = vadd.f32 %v15604_v19, %v27356_v2  ;;  %v27446_v28 = vadd.f32 %v17440_v21, %v27359_v9  ;;  %v15606_v31 = vpop.f32.mrb[37].mxu0  ;;  %v17442_v20 = vpop.f32.mrb[37].mxu1  ;;  %v23750_v9 = vld [vmem:[%s26411_s10 + $0x1924] ss:$16 sps:$4 sm:$0xff]   ;;  %v23813_v19 = vld [vmem:[%s26411_s10 + $0x1a68] ss:$16 sps:$4 sm:$0xff]  }
 0x37d   : > { %v27449_v5 = vadd.f32 %v15606_v31, %v27362_v60  ;;  %v27452_v3 = vadd.f32 %v17442_v20, %v27365_v44  ;;  %15779 = vmatpush1.bf16.msra.mxu0 %v23736_v14  ;;  %17615 = vmatpush1.bf16.msra.mxu1 %v23739_v15  ;;  %v15608_v2 = vpop.f32.mrb[38].mxu0  ;;  %v17444_v57 = vpop.f32.mrb[38].mxu1  ;;  %v23753_v60 = vld [vmem:[%s26411_s10 + $0x192c] ss:$16 sps:$4 sm:$0xff]   ;;  %v23748_v44 = vld [vmem:[%s26411_s10 + $0x1920] ss:$16 sps:$4 sm:$0xff]  }
 0x37e   : > { %15780 = vmatprep.subr.bf16.mxu0 %v23744_v17  ;;  %17616 = vmatprep.subr.bf16.mxu1 %v23747_v18  ;;  %v15609_v62 = vpop.f32.mrb[39].mxu0  ;;  %v17445_v8 = vpop.f32.mrb[39].mxu1  ;;  %v23812_v14 = vld [vmem:[%s26411_s10 + $0x1a64] ss:$16 sps:$4 sm:$0xff]   ;;  %v23815_v15 = vld [vmem:[%s26411_s10 + $0x1a6c] ss:$16 sps:$4 sm:$0xff]   ;;  %v19647_v17 = vcombine.high %v27498_v55, %v27503_v49 }
 0x37f   : > { %v23810_v18 = vld [vmem:[%s26411_s10 + $0x1a60] ss:$16 sps:$4 sm:$0xff]   ;;  %v23818_v21 = vld [vmem:[%s26411_s10 + $0x1a84] ss:$16 sps:$4 sm:$0xff]   ;;  %v23821_v31 = vld [vmem:[%s26411_s10 + $0x1a8c] ss:$16 sps:$4 sm:$0xff]  }
 0x380   : > { %v23816_v20 = vld [vmem:[%s26411_s10 + $0x1a80] ss:$16 sps:$4 sm:$0xff]   ;;  %v23827_v2 = vld [vmem:[%s26411_s10 + $0x1aac] ss:$16 sps:$4 sm:$0xff]  }
 0x381   : > { %15781 = vmatpush1.bf16.msra.mxu0 %v23742_v13  ;;  %17617 = vmatpush1.bf16.msra.mxu1 %v23745_v6  ;;  %v23819_v13 = vld [vmem:[%s26411_s10 + $0x1a88] ss:$16 sps:$4 sm:$0xff]   ;;  %v23824_v6 = vld [vmem:[%s26411_s10 + $0x1aa4] ss:$16 sps:$4 sm:$0xff]   ;;  %v23822_v57 = vld [vmem:[%s26411_s10 + $0x1aa0] ss:$16 sps:$4 sm:$0xff]  }
 0x382   : > { %15782 = vmatprep.subr.bf16.mxu0 %v23750_v9  ;;  %17618 = vmatprep.subr.bf16.mxu1 %v23753_v60  ;;  %v23825_v9 = vld [vmem:[%s26411_s10 + $0x1aa8] ss:$16 sps:$4 sm:$0xff]   ;;  %v23830_v60 = vld [vmem:[%s26411_s10 + $0x1ac4] ss:$16 sps:$4 sm:$0xff]   ;;  %v23833_v62 = vld [vmem:[%s26411_s10 + $0x1acc] ss:$16 sps:$4 sm:$0xff]  }
 0x383   : > { %v23828_v8 = vld [vmem:[%s26411_s10 + $0x1ac0] ss:$16 sps:$4 sm:$0xff]  }
 0x385   : > { %15783 = vmatpush1.bf16.msra.mxu0 %v23748_v44  ;;  %17619 = vmatpush1.bf16.msra.mxu1 %v23751_v10  ;;  %v23831_v44 = vld [vmem:[%s26411_s10 + $0x1ac8] ss:$16 sps:$4 sm:$0xff]   ;;  %v23836_v10 = vld [vmem:[%s26411_s10 + $0x1ae4] ss:$16 sps:$4 sm:$0xff]  }
 0x386   : > { %15784 = vmatprep.subr.bf16.mxu0 %v23756_v59  ;;  %17620 = vmatprep.subr.bf16.mxu1 %v23759_v33  ;;  %v23839_v59 = vld [vmem:[%s26411_s10 + $0x1aec] ss:$16 sps:$4 sm:$0xff]   ;;  %v23834_v33 = vld [vmem:[%s26411_s10 + $0x1ae0] ss:$16 sps:$4 sm:$0xff]  }
 0x389   : > { %15785 = vmatpush1.bf16.msra.mxu0 %v23754_v35  ;;  %17621 = vmatpush1.bf16.msra.mxu1 %v23757_v37  ;;  %v23837_v35 = vld [vmem:[%s26411_s10 + $0x1ae8] ss:$16 sps:$4 sm:$0xff]   ;;  %v23842_v37 = vld [vmem:[%s26411_s10 + $0x1b04] ss:$16 sps:$4 sm:$0xff]  }
 0x38a   : > { %15786 = vmatprep.subr.bf16.mxu0 %v23762_v39  ;;  %17622 = vmatprep.subr.bf16.mxu1 %v23765_v40  ;;  %v23845_v39 = vld [vmem:[%s26411_s10 + $0x1b0c] ss:$16 sps:$4 sm:$0xff]  }
 0x38d   : > { %15787 = vmatpush1.bf16.msra.mxu0 %v23760_v41  ;;  %17623 = vmatpush1.bf16.msra.mxu1 %v23763_v42 }
 0x38e   : > { %15788 = vmatprep.subr.bf16.mxu0 %v23768_v47  ;;  %17624 = vmatprep.subr.bf16.mxu1 %v23771_v50 }
 0x391   : > { %15789 = vmatpush1.bf16.msra.mxu0 %v23766_v34  ;;  %17625 = vmatpush1.bf16.msra.mxu1 %v23769_v26 }
 0x392   : > { %15790 = vmatprep.subr.bf16.mxu0 %v23774_v24  ;;  %17626 = vmatprep.subr.bf16.mxu1 %v23777_v22  ;;  %v23840_v22 = vld [vmem:[%s26411_s10 + $0x1b00] ss:$16 sps:$4 sm:$0xff]  }
 0x395   : > { %15791 = vmatpush1.bf16.msra.mxu0 %v23772_v27  ;;  %17627 = vmatpush1.bf16.msra.mxu1 %v23775_v16  ;;  %v23843_v27 = vld [vmem:[%s26411_s10 + $0x1b08] ss:$16 sps:$4 sm:$0xff]  }
 0x396   : > { %15792 = vmatprep.subr.bf16.mxu0 %v23780_v11  ;;  %17628 = vmatprep.subr.bf16.mxu1 %v23783_v32 }
 0x399   : > { %15793 = vmatpush1.bf16.msra.mxu0 %v23778_v29  ;;  %17629 = vmatpush1.bf16.msra.mxu1 %v23781_v4  ;;  %v23849_v29 = vld [vmem:[%s26411_s10 + $0x1b28] ss:$16 sps:$4 sm:$0xff]   ;;  %v23854_v4 = vld [vmem:[%s26411_s10 + $0x1b44] ss:$16 sps:$4 sm:$0xff]  }
 0x39a   : > { %15794 = vmatprep.subr.bf16.mxu0 %v23786_v52  ;;  %17630 = vmatprep.subr.bf16.mxu1 %v23789_v54  ;;  %v23857_v52 = vld [vmem:[%s26411_s10 + $0x1b4c] ss:$16 sps:$4 sm:$0xff]   ;;  %v23852_v54 = vld [vmem:[%s26411_s10 + $0x1b40] ss:$16 sps:$4 sm:$0xff]  }
 0x39d   : > { %15795 = vmatpush1.bf16.msra.mxu0 %v23784_v56  ;;  %17631 = vmatpush1.bf16.msra.mxu1 %v23787_v58  ;;  %v23855_v56 = vld [vmem:[%s26411_s10 + $0x1b48] ss:$16 sps:$4 sm:$0xff]   ;;  %v23860_v58 = vld [vmem:[%s26411_s10 + $0x1b64] ss:$16 sps:$4 sm:$0xff]  }
 0x39e   : > { %15815 = vmatprep.subr.bf16.mxu0 %v23792_v63  ;;  %17651 = vmatprep.subr.bf16.mxu1 %v23795_v0  ;;  %v23863_v63 = vld [vmem:[%s26411_s10 + $0x1b6c] ss:$16 sps:$4 sm:$0xff]   ;;  %v23858_v0 = vld [vmem:[%s26411_s10 + $0x1b60] ss:$16 sps:$4 sm:$0xff]  }
 0x3a0   : > { %15797 = vmatmul.mubr.bf16.vlgmr.msra.gmra.mrb[0].mxu0 %v19644_v7  ;;  %17633 = vmatmul.mubr.bf16.vlgmr.msra.gmra.mrb[0].mxu1 %v19644_v7  ;;  %v23866_v7 = vld [vmem:[%s26411_s10 + $0x1b84] ss:$16 sps:$4 sm:$0xff]  }
 0x3a1   : > { %15816 = vmatpush1.bf16.msra.mxu0 %v23790_v1  ;;  %17652 = vmatpush1.bf16.msra.mxu1 %v23793_v12  ;;  %v23861_v1 = vld [vmem:[%s26411_s10 + $0x1b68] ss:$16 sps:$4 sm:$0xff]   ;;  %v23869_v12 = vld [vmem:[%s26411_s10 + $0x1b8c] ss:$16 sps:$4 sm:$0xff]  }
 0x3a2   : > { %15817 = vmatprep.subr.bf16.mxu0 %v23798_v45  ;;  %17653 = vmatprep.subr.bf16.mxu1 %v23801_v43  ;;  %v23867_v45 = vld [vmem:[%s26411_s10 + $0x1b88] ss:$16 sps:$4 sm:$0xff]   ;;  %v23872_v43 = vld [vmem:[%s26411_s10 + $0x1ba4] ss:$16 sps:$4 sm:$0xff]  }
 0x3a3   : > { %15806 = vmatprep.mubr.bf16.mxu0 %v19717_v46  ;;  %17642 = vmatprep.mubr.bf16.mxu1 %v19717_v46  ;;  %v23870_v46 = vld [vmem:[%s26411_s10 + $0x1ba0] ss:$16 sps:$4 sm:$0xff]  }
 0x3a5   : > { %15818 = vmatpush1.bf16.msra.mxu0 %v23796_v38  ;;  %17654 = vmatpush1.bf16.msra.mxu1 %v23799_v36  ;;  %v23875_v38 = vld [vmem:[%s26411_s10 + $0x1bac] ss:$16 sps:$4 sm:$0xff]   ;;  %v23873_v36 = vld [vmem:[%s26411_s10 + $0x1ba8] ss:$16 sps:$4 sm:$0xff]  }
 0x3a6   : > { %15819 = vmatprep.subr.bf16.mxu0 %v23806_v30  ;;  %17655 = vmatprep.subr.bf16.mxu1 %v23809_v51  ;;  %v23878_v30 = vld [vmem:[%s26411_s10 + $0x1bc4] ss:$16 sps:$4 sm:$0xff]   ;;  %v23881_v51 = vld [vmem:[%s26411_s10 + $0x1bcc] ss:$16 sps:$4 sm:$0xff]  }
 0x3a8   : > { %15807 = vmatmul.mubr.bf16.gmra.mrb[52].mxu0 %v19716_v61  ;;  %17643 = vmatmul.mubr.bf16.gmra.mrb[52].mxu1 %v19716_v61  ;;  %v23884_v61 = vld [vmem:[%s26411_s10 + $0x1be4] ss:$16 sps:$4 sm:$0xff]  }
 0x3a9   : > { %15820 = vmatpush1.bf16.msra.mxu0 %v23804_v48  ;;  %17656 = vmatpush1.bf16.msra.mxu1 %v23807_v25  ;;  %v23876_v48 = vld [vmem:[%s26411_s10 + $0x1bc0] ss:$16 sps:$4 sm:$0xff]   ;;  %v23879_v25 = vld [vmem:[%s26411_s10 + $0x1bc8] ss:$16 sps:$4 sm:$0xff]  }
 0x3aa   : > { %15821 = vmatprep.subr.bf16.mxu0 %v23812_v14  ;;  %17657 = vmatprep.subr.bf16.mxu1 %v23815_v15  ;;  %v23887_v14 = vld [vmem:[%s26411_s10 + $0x1bec] ss:$16 sps:$4 sm:$0xff]   ;;  %v23882_v15 = vld [vmem:[%s26411_s10 + $0x1be0] ss:$16 sps:$4 sm:$0xff]  }
 0x3ab   : > { %15847 = vmatprep.mubr.bf16.mxu0 %v19647_v17  ;;  %17683 = vmatprep.mubr.bf16.mxu1 %v19647_v17  ;;  %v23885_v17 = vld [vmem:[%s26411_s10 + $0x1be8] ss:$16 sps:$4 sm:$0xff]  }
 0x3ad   : > { %15822 = vmatpush1.bf16.msra.mxu0 %v23810_v18  ;;  %17658 = vmatpush1.bf16.msra.mxu1 %v23813_v19  ;;  %v23890_v18 = vld [vmem:[%s26411_s10 + $0x1c04] ss:$16 sps:$4 sm:$0xff]   ;;  %v23893_v19 = vld [vmem:[%s26411_s10 + $0x1c0c] ss:$16 sps:$4 sm:$0xff]  }
 0x3ae   : > { %15823 = vmatprep.subr.bf16.mxu0 %v23818_v21  ;;  %17659 = vmatprep.subr.bf16.mxu1 %v23821_v31  ;;  %v23888_v21 = vld [vmem:[%s26411_s10 + $0x1c00] ss:$16 sps:$4 sm:$0xff]   ;;  %v19646_v31 = vcombine.low %v27498_v55, %v27503_v49  ;;  %v23897_v55 = vld [vmem:[%s26411_s10 + $0x1c28] ss:$16 sps:$4 sm:$0xff]   ;;  %v23904_v49 = vld [vmem:[%s26411_s10 + $0x1c44] ss:$16 sps:$4 sm:$0xff]  }
 0x3b1   : > { %15824 = vmatpush1.bf16.msra.mxu0 %v23816_v20  ;;  %17660 = vmatpush1.bf16.msra.mxu1 %v23819_v13  ;;  %v23891_v20 = vld [vmem:[%s26411_s10 + $0x1c08] ss:$16 sps:$4 sm:$0xff]  }
 0x3b2   : > { %15825 = vmatprep.subr.bf16.mxu0 %v23824_v6  ;;  %17661 = vmatprep.subr.bf16.mxu1 %v23827_v2  ;;  %v693_v13 = vld [vmem:[%s26413_s15 + $0x2a8] sm:$0x11]  ;;  %v23896_v6 = vld [vmem:[%s26411_s10 + $0x1c24] ss:$16 sps:$4 sm:$0xff]  }
 0x3b3   : > { %v23899_v2 = vld [vmem:[%s26411_s10 + $0x1c2c] ss:$16 sps:$4 sm:$0xff]  }
 0x3b5   : > { %15826 = vmatpush1.bf16.msra.mxu0 %v23822_v57  ;;  %17662 = vmatpush1.bf16.msra.mxu1 %v23825_v9  ;;  %v23894_v57 = vld [vmem:[%s26411_s10 + $0x1c20] ss:$16 sps:$4 sm:$0xff]   ;;  %v19719_v9 = vcombine.high %v693_v13, %v693_v13 }
 0x3b6   : > { %15827 = vmatprep.subr.bf16.mxu0 %v23830_v60  ;;  %17663 = vmatprep.subr.bf16.mxu1 %v23833_v62  ;;  %v23907_v60 = vld [vmem:[%s26411_s10 + $0x1c4c] ss:$16 sps:$4 sm:$0xff]   ;;  %v27585_v62 = vld [vmem:[%s26413_s15 + $0x70] sm:$0xff] }
 0x3b9   : > { %15828 = vmatpush1.bf16.msra.mxu0 %v23828_v8  ;;  %17664 = vmatpush1.bf16.msra.mxu1 %v23831_v44  ;;  %v23902_v8 = vld [vmem:[%s26411_s10 + $0x1c40] ss:$16 sps:$4 sm:$0xff]   ;;  %v23905_v44 = vld [vmem:[%s26411_s10 + $0x1c48] ss:$16 sps:$4 sm:$0xff]  }
 0x3ba   : > { %15829 = vmatprep.subr.bf16.mxu0 %v23836_v10  ;;  %17665 = vmatprep.subr.bf16.mxu1 %v23839_v59  ;;  %v19718_v10 = vcombine.low %v693_v13, %v693_v13  ;;  %v27590_v59 = vld [vmem:[%s26413_s15 + $0x190] sm:$0xff] }
 0x3bb   : > { %v15655_v40 = vpop.f32.mrb[40].mxu0  ;;  %v17491_v41 = vpop.f32.mrb[40].mxu1  ;;  %v23962_v13 = vld [vmem:[%s26411_s10 + $0x1d80] ss:$16 sps:$4 sm:$0xff]  }
 0x3bc   : > { %v27530_v42 = vadd.f32 %v15655_v40, %v27443_v23  ;;  %v27533_v47 = vadd.f32 %v17491_v41, %v27446_v28  ;;  %v15657_v50 = vpop.f32.mrb[41].mxu0  ;;  %v17493_v34 = vpop.f32.mrb[41].mxu1  ;;  %v23848_v28 = vld [vmem:[%s26411_s10 + $0x1b24] ss:$16 sps:$4 sm:$0xff]   ;;  %v23911_v40 = vld [vmem:[%s26411_s10 + $0x1c68] ss:$16 sps:$4 sm:$0xff]  }
 0x3bd   : > { %v27536_v26 = vadd.f32 %v15657_v50, %v27449_v5  ;;  %v27539_v24 = vadd.f32 %v17493_v34, %v27452_v3  ;;  %15830 = vmatpush1.bf16.msra.mxu0 %v23834_v33  ;;  %17666 = vmatpush1.bf16.msra.mxu1 %v23837_v35  ;;  %v15659_v23 = vpop.f32.mrb[42].mxu0  ;;  %v17495_v16 = vpop.f32.mrb[42].mxu1  ;;  %v23851_v5 = vld [vmem:[%s26411_s10 + $0x1b2c] ss:$16 sps:$4 sm:$0xff]   ;;  %v23846_v3 = vld [vmem:[%s26411_s10 + $0x1b20] ss:$16 sps:$4 sm:$0xff]  }
 0x3be   : > { %15831 = vmatprep.subr.bf16.mxu0 %v23842_v37  ;;  %17667 = vmatprep.subr.bf16.mxu1 %v23845_v39  ;;  %v15660_v11 = vpop.f32.mrb[43].mxu0  ;;  %v17496_v32 = vpop.f32.mrb[43].mxu1  ;;  %v23910_v33 = vld [vmem:[%s26411_s10 + $0x1c64] ss:$16 sps:$4 sm:$0xff]   ;;  %v23913_v35 = vld [vmem:[%s26411_s10 + $0x1c6c] ss:$16 sps:$4 sm:$0xff]   ;;  %v19649_v37 = vcombine.high %v27585_v62, %v27590_v59 }
 0x3bf   : > { %v23908_v39 = vld [vmem:[%s26411_s10 + $0x1c60] ss:$16 sps:$4 sm:$0xff]   ;;  %v23916_v41 = vld [vmem:[%s26411_s10 + $0x1c84] ss:$16 sps:$4 sm:$0xff]   ;;  %v23919_v50 = vld [vmem:[%s26411_s10 + $0x1c8c] ss:$16 sps:$4 sm:$0xff]  }
 0x3c0   : > { %v23914_v34 = vld [vmem:[%s26411_s10 + $0x1c80] ss:$16 sps:$4 sm:$0xff]   ;;  %v23925_v23 = vld [vmem:[%s26411_s10 + $0x1cac] ss:$16 sps:$4 sm:$0xff]  }
 0x3c1   : > { %15832 = vmatpush1.bf16.msra.mxu0 %v23840_v22  ;;  %17668 = vmatpush1.bf16.msra.mxu1 %v23843_v27  ;;  %v23917_v22 = vld [vmem:[%s26411_s10 + $0x1c88] ss:$16 sps:$4 sm:$0xff]   ;;  %v23922_v27 = vld [vmem:[%s26411_s10 + $0x1ca4] ss:$16 sps:$4 sm:$0xff]   ;;  %v23920_v16 = vld [vmem:[%s26411_s10 + $0x1ca0] ss:$16 sps:$4 sm:$0xff]  }
 0x3c2   : > { %15833 = vmatprep.subr.bf16.mxu0 %v23848_v28  ;;  %17669 = vmatprep.subr.bf16.mxu1 %v23851_v5  ;;  %v23923_v28 = vld [vmem:[%s26411_s10 + $0x1ca8] ss:$16 sps:$4 sm:$0xff]   ;;  %v23928_v5 = vld [vmem:[%s26411_s10 + $0x1cc4] ss:$16 sps:$4 sm:$0xff]   ;;  %v23931_v11 = vld [vmem:[%s26411_s10 + $0x1ccc] ss:$16 sps:$4 sm:$0xff]  }
 0x3c3   : > { %v23926_v32 = vld [vmem:[%s26411_s10 + $0x1cc0] ss:$16 sps:$4 sm:$0xff]  }
 0x3c5   : > { %15834 = vmatpush1.bf16.msra.mxu0 %v23846_v3  ;;  %17670 = vmatpush1.bf16.msra.mxu1 %v23849_v29  ;;  %v23929_v3 = vld [vmem:[%s26411_s10 + $0x1cc8] ss:$16 sps:$4 sm:$0xff]   ;;  %v23934_v29 = vld [vmem:[%s26411_s10 + $0x1ce4] ss:$16 sps:$4 sm:$0xff]  }
 0x3c6   : > { %15835 = vmatprep.subr.bf16.mxu0 %v23854_v4  ;;  %17671 = vmatprep.subr.bf16.mxu1 %v23857_v52  ;;  %v23937_v4 = vld [vmem:[%s26411_s10 + $0x1cec] ss:$16 sps:$4 sm:$0xff]   ;;  %v23932_v52 = vld [vmem:[%s26411_s10 + $0x1ce0] ss:$16 sps:$4 sm:$0xff]  }
 0x3c9   : > { %15836 = vmatpush1.bf16.msra.mxu0 %v23852_v54  ;;  %17672 = vmatpush1.bf16.msra.mxu1 %v23855_v56  ;;  %v23935_v54 = vld [vmem:[%s26411_s10 + $0x1ce8] ss:$16 sps:$4 sm:$0xff]   ;;  %v23940_v56 = vld [vmem:[%s26411_s10 + $0x1d04] ss:$16 sps:$4 sm:$0xff]  }
 0x3ca   : > { %15837 = vmatprep.subr.bf16.mxu0 %v23860_v58  ;;  %17673 = vmatprep.subr.bf16.mxu1 %v23863_v63  ;;  %v23943_v58 = vld [vmem:[%s26411_s10 + $0x1d0c] ss:$16 sps:$4 sm:$0xff]  }
 0x3cd   : > { %15838 = vmatpush1.bf16.msra.mxu0 %v23858_v0  ;;  %17674 = vmatpush1.bf16.msra.mxu1 %v23861_v1 }
 0x3ce   : > { %15839 = vmatprep.subr.bf16.mxu0 %v23866_v7  ;;  %17675 = vmatprep.subr.bf16.mxu1 %v23869_v12 }
 0x3d1   : > { %15840 = vmatpush1.bf16.msra.mxu0 %v23864_v53  ;;  %17676 = vmatpush1.bf16.msra.mxu1 %v23867_v45 }
 0x3d2   : > { %15841 = vmatprep.subr.bf16.mxu0 %v23872_v43  ;;  %17677 = vmatprep.subr.bf16.mxu1 %v23875_v38  ;;  %v23938_v38 = vld [vmem:[%s26411_s10 + $0x1d00] ss:$16 sps:$4 sm:$0xff]  }
 0x3d5   : > { %15842 = vmatpush1.bf16.msra.mxu0 %v23870_v46  ;;  %17678 = vmatpush1.bf16.msra.mxu1 %v23873_v36  ;;  %v23941_v46 = vld [vmem:[%s26411_s10 + $0x1d08] ss:$16 sps:$4 sm:$0xff]  }
 0x3d6   : > { %15843 = vmatprep.subr.bf16.mxu0 %v23878_v30  ;;  %17679 = vmatprep.subr.bf16.mxu1 %v23881_v51 }
 0x3d9   : > { %15844 = vmatpush1.bf16.msra.mxu0 %v23876_v48  ;;  %17680 = vmatpush1.bf16.msra.mxu1 %v23879_v25  ;;  %v23947_v48 = vld [vmem:[%s26411_s10 + $0x1d28] ss:$16 sps:$4 sm:$0xff]   ;;  %v23952_v25 = vld [vmem:[%s26411_s10 + $0x1d44] ss:$16 sps:$4 sm:$0xff]  }
 0x3da   : > { %15845 = vmatprep.subr.bf16.mxu0 %v23884_v61  ;;  %17681 = vmatprep.subr.bf16.mxu1 %v23887_v14  ;;  %v23955_v61 = vld [vmem:[%s26411_s10 + $0x1d4c] ss:$16 sps:$4 sm:$0xff]   ;;  %v23950_v14 = vld [vmem:[%s26411_s10 + $0x1d40] ss:$16 sps:$4 sm:$0xff]  }
 0x3dd   : > { %15846 = vmatpush1.bf16.msra.mxu0 %v23882_v15  ;;  %17682 = vmatpush1.bf16.msra.mxu1 %v23885_v17  ;;  %v23953_v15 = vld [vmem:[%s26411_s10 + $0x1d48] ss:$16 sps:$4 sm:$0xff]   ;;  %v23958_v17 = vld [vmem:[%s26411_s10 + $0x1d64] ss:$16 sps:$4 sm:$0xff]  }
 0x3de   : > { %15866 = vmatprep.subr.bf16.mxu0 %v23890_v18  ;;  %17702 = vmatprep.subr.bf16.mxu1 %v23893_v19  ;;  %v23961_v18 = vld [vmem:[%s26411_s10 + $0x1d6c] ss:$16 sps:$4 sm:$0xff]   ;;  %v23956_v19 = vld [vmem:[%s26411_s10 + $0x1d60] ss:$16 sps:$4 sm:$0xff]  }
 0x3e0   : > { %15848 = vmatmul.mubr.bf16.vlgmr.msra.gmra.mrb[0].mxu0 %v19646_v31  ;;  %17684 = vmatmul.mubr.bf16.vlgmr.msra.gmra.mrb[0].mxu1 %v19646_v31  ;;  %v23964_v31 = vld [vmem:[%s26411_s10 + $0x1d84] ss:$16 sps:$4 sm:$0xff]  }
 0x3e1   : > { %15867 = vmatpush1.bf16.msra.mxu0 %v23888_v21  ;;  %17703 = vmatpush1.bf16.msra.mxu1 %v23891_v20  ;;  %v23959_v21 = vld [vmem:[%s26411_s10 + $0x1d68] ss:$16 sps:$4 sm:$0xff]   ;;  %v23967_v20 = vld [vmem:[%s26411_s10 + $0x1d8c] ss:$16 sps:$4 sm:$0xff]  }
 0x3e2   : > { %15868 = vmatprep.subr.bf16.mxu0 %v23896_v6  ;;  %17704 = vmatprep.subr.bf16.mxu1 %v23899_v2  ;;  %v23965_v6 = vld [vmem:[%s26411_s10 + $0x1d88] ss:$16 sps:$4 sm:$0xff]   ;;  %v23970_v2 = vld [vmem:[%s26411_s10 + $0x1da4] ss:$16 sps:$4 sm:$0xff]  }
 0x3e3   : > { %15857 = vmatprep.mubr.bf16.mxu0 %v19719_v9  ;;  %17693 = vmatprep.mubr.bf16.mxu1 %v19719_v9  ;;  %v23968_v9 = vld [vmem:[%s26411_s10 + $0x1da0] ss:$16 sps:$4 sm:$0xff]  }
 0x3e5   : > { %15869 = vmatpush1.bf16.msra.mxu0 %v23894_v57  ;;  %17705 = vmatpush1.bf16.msra.mxu1 %v23897_v55  ;;  %v23973_v57 = vld [vmem:[%s26411_s10 + $0x1dac] ss:$16 sps:$4 sm:$0xff]   ;;  %v23971_v55 = vld [vmem:[%s26411_s10 + $0x1da8] ss:$16 sps:$4 sm:$0xff]  }
 0x3e6   : > { %15870 = vmatprep.subr.bf16.mxu0 %v23904_v49  ;;  %17706 = vmatprep.subr.bf16.mxu1 %v23907_v60  ;;  %v23976_v49 = vld [vmem:[%s26411_s10 + $0x1dc4] ss:$16 sps:$4 sm:$0xff]   ;;  %v23979_v60 = vld [vmem:[%s26411_s10 + $0x1dcc] ss:$16 sps:$4 sm:$0xff]  }
 0x3e8   : > { %15858 = vmatmul.mubr.bf16.gmra.mrb[56].mxu0 %v19718_v10  ;;  %17694 = vmatmul.mubr.bf16.gmra.mrb[56].mxu1 %v19718_v10  ;;  %v23982_v10 = vld [vmem:[%s26411_s10 + $0x1de4] ss:$16 sps:$4 sm:$0xff]  }
 0x3e9   : > { %15871 = vmatpush1.bf16.msra.mxu0 %v23902_v8  ;;  %17707 = vmatpush1.bf16.msra.mxu1 %v23905_v44  ;;  %v23974_v8 = vld [vmem:[%s26411_s10 + $0x1dc0] ss:$16 sps:$4 sm:$0xff]   ;;  %v23977_v44 = vld [vmem:[%s26411_s10 + $0x1dc8] ss:$16 sps:$4 sm:$0xff]  }
 0x3ea   : > { %15872 = vmatprep.subr.bf16.mxu0 %v23910_v33  ;;  %17708 = vmatprep.subr.bf16.mxu1 %v23913_v35  ;;  %v23985_v33 = vld [vmem:[%s26411_s10 + $0x1dec] ss:$16 sps:$4 sm:$0xff]   ;;  %v23980_v35 = vld [vmem:[%s26411_s10 + $0x1de0] ss:$16 sps:$4 sm:$0xff]  }
 0x3eb   : > { %15898 = vmatprep.mubr.bf16.mxu0 %v19649_v37  ;;  %17734 = vmatprep.mubr.bf16.mxu1 %v19649_v37  ;;  %v23983_v37 = vld [vmem:[%s26411_s10 + $0x1de8] ss:$16 sps:$4 sm:$0xff]  }
 0x3ed   : > { %15873 = vmatpush1.bf16.msra.mxu0 %v23908_v39  ;;  %17709 = vmatpush1.bf16.msra.mxu1 %v23911_v40  ;;  %v23988_v39 = vld [vmem:[%s26411_s10 + $0x1e04] ss:$16 sps:$4 sm:$0xff]   ;;  %v23991_v40 = vld [vmem:[%s26411_s10 + $0x1e0c] ss:$16 sps:$4 sm:$0xff]  }
 0x3ee   : > { %15874 = vmatprep.subr.bf16.mxu0 %v23916_v41  ;;  %17710 = vmatprep.subr.bf16.mxu1 %v23919_v50  ;;  %v23986_v41 = vld [vmem:[%s26411_s10 + $0x1e00] ss:$16 sps:$4 sm:$0xff]   ;;  %v19648_v50 = vcombine.low %v27585_v62, %v27590_v59  ;;  %v23995_v62 = vld [vmem:[%s26411_s10 + $0x1e28] ss:$16 sps:$4 sm:$0xff]   ;;  %v24002_v59 = vld [vmem:[%s26411_s10 + $0x1e44] ss:$16 sps:$4 sm:$0xff]  }
 0x3f1   : > { %15875 = vmatpush1.bf16.msra.mxu0 %v23914_v34  ;;  %17711 = vmatpush1.bf16.msra.mxu1 %v23917_v22  ;;  %v23989_v34 = vld [vmem:[%s26411_s10 + $0x1e08] ss:$16 sps:$4 sm:$0xff]   ;;  %v694_v22 = vld [vmem:[%s26413_s15 + $0x2b0] sm:$0x11] }
 0x3f2   : > { %15876 = vmatprep.subr.bf16.mxu0 %v23922_v27  ;;  %17712 = vmatprep.subr.bf16.mxu1 %v23925_v23  ;;  %v23994_v27 = vld [vmem:[%s26411_s10 + $0x1e24] ss:$16 sps:$4 sm:$0xff]   ;;  %v23997_v23 = vld [vmem:[%s26411_s10 + $0x1e2c] ss:$16 sps:$4 sm:$0xff]  }
 0x3f5   : > { %15877 = vmatpush1.bf16.msra.mxu0 %v23920_v16  ;;  %17713 = vmatpush1.bf16.msra.mxu1 %v23923_v28  ;;  %v23992_v16 = vld [vmem:[%s26411_s10 + $0x1e20] ss:$16 sps:$4 sm:$0xff]   ;;  %v19721_v28 = vcombine.high %v694_v22, %v694_v22 }
 0x3f6   : > { %15878 = vmatprep.subr.bf16.mxu0 %v23928_v5  ;;  %17714 = vmatprep.subr.bf16.mxu1 %v23931_v11  ;;  %v24005_v5 = vld [vmem:[%s26411_s10 + $0x1e4c] ss:$16 sps:$4 sm:$0xff]  }
 0x3f7   : > { %v27672_v11 = vld [vmem:[%s26413_s15 + $0x78] sm:$0xff] }
 0x3f9   : > { %15879 = vmatpush1.bf16.msra.mxu0 %v23926_v32  ;;  %17715 = vmatpush1.bf16.msra.mxu1 %v23929_v3  ;;  %v24000_v32 = vld [vmem:[%s26411_s10 + $0x1e40] ss:$16 sps:$4 sm:$0xff]   ;;  %v24003_v3 = vld [vmem:[%s26411_s10 + $0x1e48] ss:$16 sps:$4 sm:$0xff]  }
 0x3fa   : > { %15880 = vmatprep.subr.bf16.mxu0 %v23934_v29  ;;  %17716 = vmatprep.subr.bf16.mxu1 %v23937_v4  ;;  %v19720_v29 = vcombine.low %v694_v22, %v694_v22  ;;  %v27677_v4 = vld [vmem:[%s26413_s15 + $0x198] sm:$0xff] }
 0x3fb   : > { %v15706_v63 = vpop.f32.mrb[44].mxu0  ;;  %v17542_v0 = vpop.f32.mrb[44].mxu1  ;;  %v24060_v22 = vld [vmem:[%s26411_s10 + $0x1f80] ss:$16 sps:$4 sm:$0xff]  }
 0x3fc   : > { %v27617_v1 = vadd.f32 %v15706_v63, %v27530_v42  ;;  %v27620_v7 = vadd.f32 %v17542_v0, %v27533_v47  ;;  %v15708_v12 = vpop.f32.mrb[45].mxu0  ;;  %v17544_v53 = vpop.f32.mrb[45].mxu1  ;;  %v23946_v47 = vld [vmem:[%s26411_s10 + $0x1d24] ss:$16 sps:$4 sm:$0xff]   ;;  %v24009_v63 = vld [vmem:[%s26411_s10 + $0x1e68] ss:$16 sps:$4 sm:$0xff]  }
 0x3fd   : > { %v27623_v45 = vadd.f32 %v15708_v12, %v27536_v26  ;;  %v27626_v43 = vadd.f32 %v17544_v53, %v27539_v24  ;;  %15881 = vmatpush1.bf16.msra.mxu0 %v23932_v52  ;;  %17717 = vmatpush1.bf16.msra.mxu1 %v23935_v54  ;;  %v15710_v42 = vpop.f32.mrb[46].mxu0  ;;  %v17546_v36 = vpop.f32.mrb[46].mxu1  ;;  %v23949_v26 = vld [vmem:[%s26411_s10 + $0x1d2c] ss:$16 sps:$4 sm:$0xff]   ;;  %v23944_v24 = vld [vmem:[%s26411_s10 + $0x1d20] ss:$16 sps:$4 sm:$0xff]  }
 0x3fe   : > { %15882 = vmatprep.subr.bf16.mxu0 %v23940_v56  ;;  %17718 = vmatprep.subr.bf16.mxu1 %v23943_v58  ;;  %v15711_v30 = vpop.f32.mrb[47].mxu0  ;;  %v17547_v51 = vpop.f32.mrb[47].mxu1  ;;  %v24008_v52 = vld [vmem:[%s26411_s10 + $0x1e64] ss:$16 sps:$4 sm:$0xff]   ;;  %v24011_v54 = vld [vmem:[%s26411_s10 + $0x1e6c] ss:$16 sps:$4 sm:$0xff]   ;;  %v19651_v56 = vcombine.high %v27672_v11, %v27677_v4 }
 0x3ff   : > { %v24006_v58 = vld [vmem:[%s26411_s10 + $0x1e60] ss:$16 sps:$4 sm:$0xff]   ;;  %v24014_v0 = vld [vmem:[%s26411_s10 + $0x1e84] ss:$16 sps:$4 sm:$0xff]   ;;  %v24017_v12 = vld [vmem:[%s26411_s10 + $0x1e8c] ss:$16 sps:$4 sm:$0xff]  }
 0x400   : > { %v24012_v53 = vld [vmem:[%s26411_s10 + $0x1e80] ss:$16 sps:$4 sm:$0xff]   ;;  %v24023_v42 = vld [vmem:[%s26411_s10 + $0x1eac] ss:$16 sps:$4 sm:$0xff]  }
 0x401   : > { %15883 = vmatpush1.bf16.msra.mxu0 %v23938_v38  ;;  %17719 = vmatpush1.bf16.msra.mxu1 %v23941_v46  ;;  %v24015_v38 = vld [vmem:[%s26411_s10 + $0x1e88] ss:$16 sps:$4 sm:$0xff]   ;;  %v24020_v46 = vld [vmem:[%s26411_s10 + $0x1ea4] ss:$16 sps:$4 sm:$0xff]   ;;  %v24018_v36 = vld [vmem:[%s26411_s10 + $0x1ea0] ss:$16 sps:$4 sm:$0xff]  }
 0x402   : > { %15884 = vmatprep.subr.bf16.mxu0 %v23946_v47  ;;  %17720 = vmatprep.subr.bf16.mxu1 %v23949_v26  ;;  %v24021_v47 = vld [vmem:[%s26411_s10 + $0x1ea8] ss:$16 sps:$4 sm:$0xff]   ;;  %v24026_v26 = vld [vmem:[%s26411_s10 + $0x1ec4] ss:$16 sps:$4 sm:$0xff]   ;;  %v24029_v30 = vld [vmem:[%s26411_s10 + $0x1ecc] ss:$16 sps:$4 sm:$0xff]  }
 0x403   : > { %v24024_v51 = vld [vmem:[%s26411_s10 + $0x1ec0] ss:$16 sps:$4 sm:$0xff]  }
 0x405   : > { %15885 = vmatpush1.bf16.msra.mxu0 %v23944_v24  ;;  %17721 = vmatpush1.bf16.msra.mxu1 %v23947_v48  ;;  %v24027_v24 = vld [vmem:[%s26411_s10 + $0x1ec8] ss:$16 sps:$4 sm:$0xff]   ;;  %v24032_v48 = vld [vmem:[%s26411_s10 + $0x1ee4] ss:$16 sps:$4 sm:$0xff]  }
 0x406   : > { %15886 = vmatprep.subr.bf16.mxu0 %v23952_v25  ;;  %17722 = vmatprep.subr.bf16.mxu1 %v23955_v61  ;;  %v24035_v25 = vld [vmem:[%s26411_s10 + $0x1eec] ss:$16 sps:$4 sm:$0xff]   ;;  %v24030_v61 = vld [vmem:[%s26411_s10 + $0x1ee0] ss:$16 sps:$4 sm:$0xff]  }
 0x409   : > { %15887 = vmatpush1.bf16.msra.mxu0 %v23950_v14  ;;  %17723 = vmatpush1.bf16.msra.mxu1 %v23953_v15  ;;  %v24033_v14 = vld [vmem:[%s26411_s10 + $0x1ee8] ss:$16 sps:$4 sm:$0xff]   ;;  %v24038_v15 = vld [vmem:[%s26411_s10 + $0x1f04] ss:$16 sps:$4 sm:$0xff]  }
 0x40a   : > { %15888 = vmatprep.subr.bf16.mxu0 %v23958_v17  ;;  %17724 = vmatprep.subr.bf16.mxu1 %v23961_v18  ;;  %v24041_v17 = vld [vmem:[%s26411_s10 + $0x1f0c] ss:$16 sps:$4 sm:$0xff]  }
 0x40d   : > { %15889 = vmatpush1.bf16.msra.mxu0 %v23956_v19  ;;  %17725 = vmatpush1.bf16.msra.mxu1 %v23959_v21 }
 0x40e   : > { %15890 = vmatprep.subr.bf16.mxu0 %v23964_v31  ;;  %17726 = vmatprep.subr.bf16.mxu1 %v23967_v20 }
 0x411   : > { %15891 = vmatpush1.bf16.msra.mxu0 %v23962_v13  ;;  %17727 = vmatpush1.bf16.msra.mxu1 %v23965_v6 }
 0x412   : > { %15892 = vmatprep.subr.bf16.mxu0 %v23970_v2  ;;  %17728 = vmatprep.subr.bf16.mxu1 %v23973_v57  ;;  %v24036_v57 = vld [vmem:[%s26411_s10 + $0x1f00] ss:$16 sps:$4 sm:$0xff]  }
 0x415   : > { %15893 = vmatpush1.bf16.msra.mxu0 %v23968_v9  ;;  %17729 = vmatpush1.bf16.msra.mxu1 %v23971_v55  ;;  %v24039_v9 = vld [vmem:[%s26411_s10 + $0x1f08] ss:$16 sps:$4 sm:$0xff]  }
 0x416   : > { %15894 = vmatprep.subr.bf16.mxu0 %v23976_v49  ;;  %17730 = vmatprep.subr.bf16.mxu1 %v23979_v60 }
 0x419   : > { %15895 = vmatpush1.bf16.msra.mxu0 %v23974_v8  ;;  %17731 = vmatpush1.bf16.msra.mxu1 %v23977_v44  ;;  %v24045_v8 = vld [vmem:[%s26411_s10 + $0x1f28] ss:$16 sps:$4 sm:$0xff]   ;;  %v24050_v44 = vld [vmem:[%s26411_s10 + $0x1f44] ss:$16 sps:$4 sm:$0xff]  }
 0x41a   : > { %15896 = vmatprep.subr.bf16.mxu0 %v23982_v10  ;;  %17732 = vmatprep.subr.bf16.mxu1 %v23985_v33  ;;  %v24053_v10 = vld [vmem:[%s26411_s10 + $0x1f4c] ss:$16 sps:$4 sm:$0xff]   ;;  %v24048_v33 = vld [vmem:[%s26411_s10 + $0x1f40] ss:$16 sps:$4 sm:$0xff]  }
 0x41d   : > { %15897 = vmatpush1.bf16.msra.mxu0 %v23980_v35  ;;  %17733 = vmatpush1.bf16.msra.mxu1 %v23983_v37  ;;  %v24051_v35 = vld [vmem:[%s26411_s10 + $0x1f48] ss:$16 sps:$4 sm:$0xff]   ;;  %v24056_v37 = vld [vmem:[%s26411_s10 + $0x1f64] ss:$16 sps:$4 sm:$0xff]  }
 0x41e   : > { %15917 = vmatprep.subr.bf16.mxu0 %v23988_v39  ;;  %17753 = vmatprep.subr.bf16.mxu1 %v23991_v40  ;;  %v24059_v39 = vld [vmem:[%s26411_s10 + $0x1f6c] ss:$16 sps:$4 sm:$0xff]   ;;  %v24054_v40 = vld [vmem:[%s26411_s10 + $0x1f60] ss:$16 sps:$4 sm:$0xff]  }
 0x420   : > { %15899 = vmatmul.mubr.bf16.vlgmr.msra.gmra.mrb[0].mxu0 %v19648_v50  ;;  %17735 = vmatmul.mubr.bf16.vlgmr.msra.gmra.mrb[0].mxu1 %v19648_v50  ;;  %v24062_v50 = vld [vmem:[%s26411_s10 + $0x1f84] ss:$16 sps:$4 sm:$0xff]  }
 0x421   : > { %15918 = vmatpush1.bf16.msra.mxu0 %v23986_v41  ;;  %17754 = vmatpush1.bf16.msra.mxu1 %v23989_v34  ;;  %v24057_v41 = vld [vmem:[%s26411_s10 + $0x1f68] ss:$16 sps:$4 sm:$0xff]   ;;  %v24065_v34 = vld [vmem:[%s26411_s10 + $0x1f8c] ss:$16 sps:$4 sm:$0xff]  }
 0x422   : > { %15919 = vmatprep.subr.bf16.mxu0 %v23994_v27  ;;  %17755 = vmatprep.subr.bf16.mxu1 %v23997_v23  ;;  %v24063_v27 = vld [vmem:[%s26411_s10 + $0x1f88] ss:$16 sps:$4 sm:$0xff]   ;;  %v24068_v23 = vld [vmem:[%s26411_s10 + $0x1fa4] ss:$16 sps:$4 sm:$0xff]  }
 0x423   : > { %15908 = vmatprep.mubr.bf16.mxu0 %v19721_v28  ;;  %17744 = vmatprep.mubr.bf16.mxu1 %v19721_v28  ;;  %v24066_v28 = vld [vmem:[%s26411_s10 + $0x1fa0] ss:$16 sps:$4 sm:$0xff]  }
 0x425   : > { %15920 = vmatpush1.bf16.msra.mxu0 %v23992_v16  ;;  %17756 = vmatpush1.bf16.msra.mxu1 %v23995_v62  ;;  %v24071_v16 = vld [vmem:[%s26411_s10 + $0x1fac] ss:$16 sps:$4 sm:$0xff]   ;;  %v24069_v62 = vld [vmem:[%s26411_s10 + $0x1fa8] ss:$16 sps:$4 sm:$0xff]  }
 0x426   : > { %15921 = vmatprep.subr.bf16.mxu0 %v24002_v59  ;;  %17757 = vmatprep.subr.bf16.mxu1 %v24005_v5  ;;  %v24074_v59 = vld [vmem:[%s26411_s10 + $0x1fc4] ss:$16 sps:$4 sm:$0xff]   ;;  %v24077_v5 = vld [vmem:[%s26411_s10 + $0x1fcc] ss:$16 sps:$4 sm:$0xff]  }
 0x428   : > { %15909 = vmatmul.mubr.bf16.gmra.mrb[60].mxu0 %v19720_v29  ;;  %17745 = vmatmul.mubr.bf16.gmra.mrb[60].mxu1 %v19720_v29  ;;  %v24080_v29 = vld [vmem:[%s26411_s10 + $0x1fe4] ss:$16 sps:$4 sm:$0xff]  }
 0x429   : > { %15922 = vmatpush1.bf16.msra.mxu0 %v24000_v32  ;;  %17758 = vmatpush1.bf16.msra.mxu1 %v24003_v3  ;;  %v24072_v32 = vld [vmem:[%s26411_s10 + $0x1fc0] ss:$16 sps:$4 sm:$0xff]   ;;  %v24075_v3 = vld [vmem:[%s26411_s10 + $0x1fc8] ss:$16 sps:$4 sm:$0xff]  }
 0x42a   : > { %15923 = vmatprep.subr.bf16.mxu0 %v24008_v52  ;;  %17759 = vmatprep.subr.bf16.mxu1 %v24011_v54  ;;  %v24083_v52 = vld [vmem:[%s26411_s10 + $0x1fec] ss:$16 sps:$4 sm:$0xff]   ;;  %v24078_v54 = vld [vmem:[%s26411_s10 + $0x1fe0] ss:$16 sps:$4 sm:$0xff]  }
 0x42b   : > { %15949 = vmatprep.mubr.bf16.mxu0 %v19651_v56  ;;  %17785 = vmatprep.mubr.bf16.mxu1 %v19651_v56  ;;  %v24081_v56 = vld [vmem:[%s26411_s10 + $0x1fe8] ss:$16 sps:$4 sm:$0xff]  }
 0x42d   : > { %15924 = vmatpush1.bf16.msra.mxu0 %v24006_v58  ;;  %17760 = vmatpush1.bf16.msra.mxu1 %v24009_v63  ;;  %v24086_v58 = vld [vmem:[%s26411_s10 + $0x2004] ss:$16 sps:$4 sm:$0xff]   ;;  %v24089_v63 = vld [vmem:[%s26411_s10 + $0x200c] ss:$16 sps:$4 sm:$0xff]  }
 0x42e   : > { %15925 = vmatprep.subr.bf16.mxu0 %v24014_v0  ;;  %17761 = vmatprep.subr.bf16.mxu1 %v24017_v12  ;;  %v24084_v0 = vld [vmem:[%s26411_s10 + $0x2000] ss:$16 sps:$4 sm:$0xff]   ;;  %v19650_v12 = vcombine.low %v27672_v11, %v27677_v4  ;;  %v24093_v11 = vld [vmem:[%s26411_s10 + $0x2028] ss:$16 sps:$4 sm:$0xff]   ;;  %v24100_v4 = vld [vmem:[%s26411_s10 + $0x2044] ss:$16 sps:$4 sm:$0xff]  }
 0x431   : > { %15926 = vmatpush1.bf16.msra.mxu0 %v24012_v53  ;;  %17762 = vmatpush1.bf16.msra.mxu1 %v24015_v38  ;;  %v24087_v53 = vld [vmem:[%s26411_s10 + $0x2008] ss:$16 sps:$4 sm:$0xff]  }
 0x432   : > { %15927 = vmatprep.subr.bf16.mxu0 %v24020_v46  ;;  %17763 = vmatprep.subr.bf16.mxu1 %v24023_v42  ;;  %v695_v38 = vld [vmem:[%s26413_s15 + $0x2b8] sm:$0x11]  ;;  %v24092_v46 = vld [vmem:[%s26411_s10 + $0x2024] ss:$16 sps:$4 sm:$0xff]  }
 0x433   : > { %v24095_v42 = vld [vmem:[%s26411_s10 + $0x202c] ss:$16 sps:$4 sm:$0xff]  }
 0x435   : > { %15928 = vmatpush1.bf16.msra.mxu0 %v24018_v36  ;;  %17764 = vmatpush1.bf16.msra.mxu1 %v24021_v47  ;;  %v24090_v36 = vld [vmem:[%s26411_s10 + $0x2020] ss:$16 sps:$4 sm:$0xff]   ;;  %v19723_v47 = vcombine.high %v695_v38, %v695_v38 }
 0x436   : > { %15929 = vmatprep.subr.bf16.mxu0 %v24026_v26  ;;  %17765 = vmatprep.subr.bf16.mxu1 %v24029_v30  ;;  %v24103_v26 = vld [vmem:[%s26411_s10 + $0x204c] ss:$16 sps:$4 sm:$0xff]   ;;  %v27759_v30 = vld [vmem:[%s26413_s15 + $0x80] sm:$0xff] }
 0x439   : > { %15930 = vmatpush1.bf16.msra.mxu0 %v24024_v51  ;;  %17766 = vmatpush1.bf16.msra.mxu1 %v24027_v24  ;;  %v24098_v51 = vld [vmem:[%s26411_s10 + $0x2040] ss:$16 sps:$4 sm:$0xff]   ;;  %v24101_v24 = vld [vmem:[%s26411_s10 + $0x2048] ss:$16 sps:$4 sm:$0xff]  }
 0x43a   : > { %15931 = vmatprep.subr.bf16.mxu0 %v24032_v48  ;;  %17767 = vmatprep.subr.bf16.mxu1 %v24035_v25  ;;  %v19722_v48 = vcombine.low %v695_v38, %v695_v38  ;;  %v27764_v25 = vld [vmem:[%s26413_s15 + $0x1a0] sm:$0xff] }
 0x43b   : > { %v15757_v18 = vpop.f32.mrb[48].mxu0  ;;  %v17593_v19 = vpop.f32.mrb[48].mxu1  ;;  %v24158_v38 = vld [vmem:[%s26411_s10 + $0x2180] ss:$16 sps:$4 sm:$0xff]  }
 0x43c   : > { %v27704_v21 = vadd.f32 %v15757_v18, %v27617_v1  ;;  %v27707_v31 = vadd.f32 %v17593_v19, %v27620_v7  ;;  %v15759_v20 = vpop.f32.mrb[49].mxu0  ;;  %v17595_v13 = vpop.f32.mrb[49].mxu1  ;;  %v24044_v7 = vld [vmem:[%s26411_s10 + $0x1f24] ss:$16 sps:$4 sm:$0xff]   ;;  %v24107_v18 = vld [vmem:[%s26411_s10 + $0x2068] ss:$16 sps:$4 sm:$0xff]  }
 0x43d   : > { %v27710_v6 = vadd.f32 %v15759_v20, %v27623_v45  ;;  %v27713_v2 = vadd.f32 %v17595_v13, %v27626_v43  ;;  %15932 = vmatpush1.bf16.msra.mxu0 %v24030_v61  ;;  %17768 = vmatpush1.bf16.msra.mxu1 %v24033_v14  ;;  %v15761_v1 = vpop.f32.mrb[50].mxu0  ;;  %v17597_v55 = vpop.f32.mrb[50].mxu1  ;;  %v24047_v45 = vld [vmem:[%s26411_s10 + $0x1f2c] ss:$16 sps:$4 sm:$0xff]   ;;  %v24042_v43 = vld [vmem:[%s26411_s10 + $0x1f20] ss:$16 sps:$4 sm:$0xff]  }
 0x43e   : > { %15933 = vmatprep.subr.bf16.mxu0 %v24038_v15  ;;  %17769 = vmatprep.subr.bf16.mxu1 %v24041_v17  ;;  %v15762_v49 = vpop.f32.mrb[51].mxu0  ;;  %v17598_v60 = vpop.f32.mrb[51].mxu1  ;;  %v24106_v61 = vld [vmem:[%s26411_s10 + $0x2064] ss:$16 sps:$4 sm:$0xff]   ;;  %v24109_v14 = vld [vmem:[%s26411_s10 + $0x206c] ss:$16 sps:$4 sm:$0xff]   ;;  %v19653_v15 = vcombine.high %v27759_v30, %v27764_v25 }
 0x43f   : > { %v24104_v17 = vld [vmem:[%s26411_s10 + $0x2060] ss:$16 sps:$4 sm:$0xff]   ;;  %v24112_v19 = vld [vmem:[%s26411_s10 + $0x2084] ss:$16 sps:$4 sm:$0xff]   ;;  %v24115_v20 = vld [vmem:[%s26411_s10 + $0x208c] ss:$16 sps:$4 sm:$0xff]  }
 0x440   : > { %v24110_v13 = vld [vmem:[%s26411_s10 + $0x2080] ss:$16 sps:$4 sm:$0xff]   ;;  %v24121_v1 = vld [vmem:[%s26411_s10 + $0x20ac] ss:$16 sps:$4 sm:$0xff]  }
 0x441   : > { %15934 = vmatpush1.bf16.msra.mxu0 %v24036_v57  ;;  %17770 = vmatpush1.bf16.msra.mxu1 %v24039_v9  ;;  %v24113_v57 = vld [vmem:[%s26411_s10 + $0x2088] ss:$16 sps:$4 sm:$0xff]   ;;  %v24118_v9 = vld [vmem:[%s26411_s10 + $0x20a4] ss:$16 sps:$4 sm:$0xff]   ;;  %v24116_v55 = vld [vmem:[%s26411_s10 + $0x20a0] ss:$16 sps:$4 sm:$0xff]  }
 0x442   : > { %15935 = vmatprep.subr.bf16.mxu0 %v24044_v7  ;;  %17771 = vmatprep.subr.bf16.mxu1 %v24047_v45  ;;  %v24119_v7 = vld [vmem:[%s26411_s10 + $0x20a8] ss:$16 sps:$4 sm:$0xff]   ;;  %v24124_v45 = vld [vmem:[%s26411_s10 + $0x20c4] ss:$16 sps:$4 sm:$0xff]   ;;  %v24127_v49 = vld [vmem:[%s26411_s10 + $0x20cc] ss:$16 sps:$4 sm:$0xff]  }
 0x443   : > { %v24122_v60 = vld [vmem:[%s26411_s10 + $0x20c0] ss:$16 sps:$4 sm:$0xff]  }
 0x445   : > { %15936 = vmatpush1.bf16.msra.mxu0 %v24042_v43  ;;  %17772 = vmatpush1.bf16.msra.mxu1 %v24045_v8  ;;  %v24125_v43 = vld [vmem:[%s26411_s10 + $0x20c8] ss:$16 sps:$4 sm:$0xff]   ;;  %v24130_v8 = vld [vmem:[%s26411_s10 + $0x20e4] ss:$16 sps:$4 sm:$0xff]  }
 0x446   : > { %15937 = vmatprep.subr.bf16.mxu0 %v24050_v44  ;;  %17773 = vmatprep.subr.bf16.mxu1 %v24053_v10  ;;  %v24133_v44 = vld [vmem:[%s26411_s10 + $0x20ec] ss:$16 sps:$4 sm:$0xff]   ;;  %v24128_v10 = vld [vmem:[%s26411_s10 + $0x20e0] ss:$16 sps:$4 sm:$0xff]  }
 0x449   : > { %15938 = vmatpush1.bf16.msra.mxu0 %v24048_v33  ;;  %17774 = vmatpush1.bf16.msra.mxu1 %v24051_v35  ;;  %v24131_v33 = vld [vmem:[%s26411_s10 + $0x20e8] ss:$16 sps:$4 sm:$0xff]   ;;  %v24136_v35 = vld [vmem:[%s26411_s10 + $0x2104] ss:$16 sps:$4 sm:$0xff]  }
 0x44a   : > { %15939 = vmatprep.subr.bf16.mxu0 %v24056_v37  ;;  %17775 = vmatprep.subr.bf16.mxu1 %v24059_v39  ;;  %v24139_v37 = vld [vmem:[%s26411_s10 + $0x210c] ss:$16 sps:$4 sm:$0xff]  }
 0x44d   : > { %15940 = vmatpush1.bf16.msra.mxu0 %v24054_v40  ;;  %17776 = vmatpush1.bf16.msra.mxu1 %v24057_v41 }
 0x44e   : > { %15941 = vmatprep.subr.bf16.mxu0 %v24062_v50  ;;  %17777 = vmatprep.subr.bf16.mxu1 %v24065_v34 }
 0x451   : > { %15942 = vmatpush1.bf16.msra.mxu0 %v24060_v22  ;;  %17778 = vmatpush1.bf16.msra.mxu1 %v24063_v27 }
 0x452   : > { %15943 = vmatprep.subr.bf16.mxu0 %v24068_v23  ;;  %17779 = vmatprep.subr.bf16.mxu1 %v24071_v16  ;;  %v24134_v16 = vld [vmem:[%s26411_s10 + $0x2100] ss:$16 sps:$4 sm:$0xff]  }
 0x455   : > { %15944 = vmatpush1.bf16.msra.mxu0 %v24066_v28  ;;  %17780 = vmatpush1.bf16.msra.mxu1 %v24069_v62  ;;  %v24137_v28 = vld [vmem:[%s26411_s10 + $0x2108] ss:$16 sps:$4 sm:$0xff]  }
 0x456   : > { %15945 = vmatprep.subr.bf16.mxu0 %v24074_v59  ;;  %17781 = vmatprep.subr.bf16.mxu1 %v24077_v5 }
 0x459   : > { %15946 = vmatpush1.bf16.msra.mxu0 %v24072_v32  ;;  %17782 = vmatpush1.bf16.msra.mxu1 %v24075_v3  ;;  %v24143_v32 = vld [vmem:[%s26411_s10 + $0x2128] ss:$16 sps:$4 sm:$0xff]   ;;  %v24148_v3 = vld [vmem:[%s26411_s10 + $0x2144] ss:$16 sps:$4 sm:$0xff]  }
 0x45a   : > { %15947 = vmatprep.subr.bf16.mxu0 %v24080_v29  ;;  %17783 = vmatprep.subr.bf16.mxu1 %v24083_v52  ;;  %v24151_v29 = vld [vmem:[%s26411_s10 + $0x214c] ss:$16 sps:$4 sm:$0xff]   ;;  %v24146_v52 = vld [vmem:[%s26411_s10 + $0x2140] ss:$16 sps:$4 sm:$0xff]  }
 0x45d   : > { %15948 = vmatpush1.bf16.msra.mxu0 %v24078_v54  ;;  %17784 = vmatpush1.bf16.msra.mxu1 %v24081_v56  ;;  %v24149_v54 = vld [vmem:[%s26411_s10 + $0x2148] ss:$16 sps:$4 sm:$0xff]   ;;  %v24154_v56 = vld [vmem:[%s26411_s10 + $0x2164] ss:$16 sps:$4 sm:$0xff]  }
 0x45e   : > { %15968 = vmatprep.subr.bf16.mxu0 %v24086_v58  ;;  %17804 = vmatprep.subr.bf16.mxu1 %v24089_v63  ;;  %v24157_v58 = vld [vmem:[%s26411_s10 + $0x216c] ss:$16 sps:$4 sm:$0xff]   ;;  %v24152_v63 = vld [vmem:[%s26411_s10 + $0x2160] ss:$16 sps:$4 sm:$0xff]  }
 0x460   : > { %15950 = vmatmul.mubr.bf16.vlgmr.msra.gmra.mrb[0].mxu0 %v19650_v12  ;;  %17786 = vmatmul.mubr.bf16.vlgmr.msra.gmra.mrb[0].mxu1 %v19650_v12  ;;  %v24160_v12 = vld [vmem:[%s26411_s10 + $0x2184] ss:$16 sps:$4 sm:$0xff]  }
 0x461   : > { %15969 = vmatpush1.bf16.msra.mxu0 %v24084_v0  ;;  %17805 = vmatpush1.bf16.msra.mxu1 %v24087_v53  ;;  %v24155_v0 = vld [vmem:[%s26411_s10 + $0x2168] ss:$16 sps:$4 sm:$0xff]   ;;  %v24163_v53 = vld [vmem:[%s26411_s10 + $0x218c] ss:$16 sps:$4 sm:$0xff]  }
 0x462   : > { %15970 = vmatprep.subr.bf16.mxu0 %v24092_v46  ;;  %17806 = vmatprep.subr.bf16.mxu1 %v24095_v42  ;;  %v24161_v46 = vld [vmem:[%s26411_s10 + $0x2188] ss:$16 sps:$4 sm:$0xff]   ;;  %v24166_v42 = vld [vmem:[%s26411_s10 + $0x21a4] ss:$16 sps:$4 sm:$0xff]  }
 0x463   : > { %15959 = vmatprep.mubr.bf16.mxu0 %v19723_v47  ;;  %17795 = vmatprep.mubr.bf16.mxu1 %v19723_v47  ;;  %v24164_v47 = vld [vmem:[%s26411_s10 + $0x21a0] ss:$16 sps:$4 sm:$0xff]  }
 0x465   : > { %15971 = vmatpush1.bf16.msra.mxu0 %v24090_v36  ;;  %17807 = vmatpush1.bf16.msra.mxu1 %v24093_v11  ;;  %v24169_v36 = vld [vmem:[%s26411_s10 + $0x21ac] ss:$16 sps:$4 sm:$0xff]   ;;  %v24167_v11 = vld [vmem:[%s26411_s10 + $0x21a8] ss:$16 sps:$4 sm:$0xff]  }
 0x466   : > { %15972 = vmatprep.subr.bf16.mxu0 %v24100_v4  ;;  %17808 = vmatprep.subr.bf16.mxu1 %v24103_v26  ;;  %v24172_v4 = vld [vmem:[%s26411_s10 + $0x21c4] ss:$16 sps:$4 sm:$0xff]   ;;  %v24175_v26 = vld [vmem:[%s26411_s10 + $0x21cc] ss:$16 sps:$4 sm:$0xff]  }
 0x468   : > { %15960 = vmatmul.mubr.bf16.gmra.mrb[64].mxu0 %v19722_v48  ;;  %17796 = vmatmul.mubr.bf16.gmra.mrb[64].mxu1 %v19722_v48  ;;  %v24178_v48 = vld [vmem:[%s26411_s10 + $0x21e4] ss:$16 sps:$4 sm:$0xff]  }
 0x469   : > { %15973 = vmatpush1.bf16.msra.mxu0 %v24098_v51  ;;  %17809 = vmatpush1.bf16.msra.mxu1 %v24101_v24  ;;  %v24170_v51 = vld [vmem:[%s26411_s10 + $0x21c0] ss:$16 sps:$4 sm:$0xff]   ;;  %v24173_v24 = vld [vmem:[%s26411_s10 + $0x21c8] ss:$16 sps:$4 sm:$0xff]  }
 0x46a   : > { %15974 = vmatprep.subr.bf16.mxu0 %v24106_v61  ;;  %17810 = vmatprep.subr.bf16.mxu1 %v24109_v14  ;;  %v24181_v61 = vld [vmem:[%s26411_s10 + $0x21ec] ss:$16 sps:$4 sm:$0xff]   ;;  %v24176_v14 = vld [vmem:[%s26411_s10 + $0x21e0] ss:$16 sps:$4 sm:$0xff]  }
 0x46b   : > { %16000 = vmatprep.mubr.bf16.mxu0 %v19653_v15  ;;  %17836 = vmatprep.mubr.bf16.mxu1 %v19653_v15  ;;  %v24179_v15 = vld [vmem:[%s26411_s10 + $0x21e8] ss:$16 sps:$4 sm:$0xff]  }
 0x46d   : > { %15975 = vmatpush1.bf16.msra.mxu0 %v24104_v17  ;;  %17811 = vmatpush1.bf16.msra.mxu1 %v24107_v18  ;;  %v24184_v17 = vld [vmem:[%s26411_s10 + $0x2204] ss:$16 sps:$4 sm:$0xff]   ;;  %v24187_v18 = vld [vmem:[%s26411_s10 + $0x220c] ss:$16 sps:$4 sm:$0xff]  }
 0x46e   : > { %15976 = vmatprep.subr.bf16.mxu0 %v24112_v19  ;;  %17812 = vmatprep.subr.bf16.mxu1 %v24115_v20  ;;  %v24182_v19 = vld [vmem:[%s26411_s10 + $0x2200] ss:$16 sps:$4 sm:$0xff]   ;;  %v19652_v20 = vcombine.low %v27759_v30, %v27764_v25  ;;  %v24191_v30 = vld [vmem:[%s26411_s10 + $0x2228] ss:$16 sps:$4 sm:$0xff]   ;;  %v24198_v25 = vld [vmem:[%s26411_s10 + $0x2244] ss:$16 sps:$4 sm:$0xff]  }
 0x471   : > { %15977 = vmatpush1.bf16.msra.mxu0 %v24110_v13  ;;  %17813 = vmatpush1.bf16.msra.mxu1 %v24113_v57  ;;  %v24185_v13 = vld [vmem:[%s26411_s10 + $0x2208] ss:$16 sps:$4 sm:$0xff]   ;;  %v696_v57 = vld [vmem:[%s26413_s15 + $0x2c0] sm:$0x11] }
 0x472   : > { %15978 = vmatprep.subr.bf16.mxu0 %v24118_v9  ;;  %17814 = vmatprep.subr.bf16.mxu1 %v24121_v1  ;;  %v24190_v9 = vld [vmem:[%s26411_s10 + $0x2224] ss:$16 sps:$4 sm:$0xff]   ;;  %v24193_v1 = vld [vmem:[%s26411_s10 + $0x222c] ss:$16 sps:$4 sm:$0xff]  }
 0x475   : > { %15979 = vmatpush1.bf16.msra.mxu0 %v24116_v55  ;;  %17815 = vmatpush1.bf16.msra.mxu1 %v24119_v7  ;;  %v24188_v55 = vld [vmem:[%s26411_s10 + $0x2220] ss:$16 sps:$4 sm:$0xff]   ;;  %v19725_v7 = vcombine.high %v696_v57, %v696_v57 }
 0x476   : > { %15980 = vmatprep.subr.bf16.mxu0 %v24124_v45  ;;  %17816 = vmatprep.subr.bf16.mxu1 %v24127_v49  ;;  %v24201_v45 = vld [vmem:[%s26411_s10 + $0x224c] ss:$16 sps:$4 sm:$0xff]  }
 0x477   : > { %v27846_v49 = vld [vmem:[%s26413_s15 + $0x88] sm:$0xff] }
 0x479   : > { %15981 = vmatpush1.bf16.msra.mxu0 %v24122_v60  ;;  %17817 = vmatpush1.bf16.msra.mxu1 %v24125_v43  ;;  %v24196_v60 = vld [vmem:[%s26411_s10 + $0x2240] ss:$16 sps:$4 sm:$0xff]   ;;  %v24199_v43 = vld [vmem:[%s26411_s10 + $0x2248] ss:$16 sps:$4 sm:$0xff]  }
 0x47a   : > { %15982 = vmatprep.subr.bf16.mxu0 %v24130_v8  ;;  %17818 = vmatprep.subr.bf16.mxu1 %v24133_v44  ;;  %v19724_v8 = vcombine.low %v696_v57, %v696_v57  ;;  %v27851_v44 = vld [vmem:[%s26413_s15 + $0x1a8] sm:$0xff] }
 0x47b   : > { %v15808_v39 = vpop.f32.mrb[52].mxu0  ;;  %v17644_v40 = vpop.f32.mrb[52].mxu1  ;;  %v24256_v57 = vld [vmem:[%s26411_s10 + $0x2380] ss:$16 sps:$4 sm:$0xff]  }
 0x47c   : > { %v27791_v41 = vadd.f32 %v15808_v39, %v27704_v21  ;;  %v27794_v50 = vadd.f32 %v17644_v40, %v27707_v31  ;;  %v15810_v34 = vpop.f32.mrb[53].mxu0  ;;  %v17646_v22 = vpop.f32.mrb[53].mxu1  ;;  %v24142_v31 = vld [vmem:[%s26411_s10 + $0x2124] ss:$16 sps:$4 sm:$0xff]   ;;  %v24205_v39 = vld [vmem:[%s26411_s10 + $0x2268] ss:$16 sps:$4 sm:$0xff]  }
 0x47d   : > { %v27797_v27 = vadd.f32 %v15810_v34, %v27710_v6  ;;  %v27800_v23 = vadd.f32 %v17646_v22, %v27713_v2  ;;  %15983 = vmatpush1.bf16.msra.mxu0 %v24128_v10  ;;  %17819 = vmatpush1.bf16.msra.mxu1 %v24131_v33  ;;  %v15812_v21 = vpop.f32.mrb[54].mxu0  ;;  %v17648_v62 = vpop.f32.mrb[54].mxu1  ;;  %v24145_v6 = vld [vmem:[%s26411_s10 + $0x212c] ss:$16 sps:$4 sm:$0xff]   ;;  %v24140_v2 = vld [vmem:[%s26411_s10 + $0x2120] ss:$16 sps:$4 sm:$0xff]  }
 0x47e   : > { %15984 = vmatprep.subr.bf16.mxu0 %v24136_v35  ;;  %17820 = vmatprep.subr.bf16.mxu1 %v24139_v37  ;;  %v15813_v59 = vpop.f32.mrb[55].mxu0  ;;  %v17649_v5 = vpop.f32.mrb[55].mxu1  ;;  %v24204_v10 = vld [vmem:[%s26411_s10 + $0x2264] ss:$16 sps:$4 sm:$0xff]   ;;  %v24207_v33 = vld [vmem:[%s26411_s10 + $0x226c] ss:$16 sps:$4 sm:$0xff]   ;;  %v19655_v35 = vcombine.high %v27846_v49, %v27851_v44 }
 0x47f   : > { %v24202_v37 = vld [vmem:[%s26411_s10 + $0x2260] ss:$16 sps:$4 sm:$0xff]   ;;  %v24210_v40 = vld [vmem:[%s26411_s10 + $0x2284] ss:$16 sps:$4 sm:$0xff]   ;;  %v24213_v34 = vld [vmem:[%s26411_s10 + $0x228c] ss:$16 sps:$4 sm:$0xff]  }
 0x480   : > { %v24208_v22 = vld [vmem:[%s26411_s10 + $0x2280] ss:$16 sps:$4 sm:$0xff]   ;;  %v24219_v21 = vld [vmem:[%s26411_s10 + $0x22ac] ss:$16 sps:$4 sm:$0xff]  }
 0x481   : > { %15985 = vmatpush1.bf16.msra.mxu0 %v24134_v16  ;;  %17821 = vmatpush1.bf16.msra.mxu1 %v24137_v28  ;;  %v24211_v16 = vld [vmem:[%s26411_s10 + $0x2288] ss:$16 sps:$4 sm:$0xff]   ;;  %v24216_v28 = vld [vmem:[%s26411_s10 + $0x22a4] ss:$16 sps:$4 sm:$0xff]   ;;  %v24214_v62 = vld [vmem:[%s26411_s10 + $0x22a0] ss:$16 sps:$4 sm:$0xff]  }
 0x482   : > { %15986 = vmatprep.subr.bf16.mxu0 %v24142_v31  ;;  %17822 = vmatprep.subr.bf16.mxu1 %v24145_v6  ;;  %v24217_v31 = vld [vmem:[%s26411_s10 + $0x22a8] ss:$16 sps:$4 sm:$0xff]   ;;  %v24222_v6 = vld [vmem:[%s26411_s10 + $0x22c4] ss:$16 sps:$4 sm:$0xff]   ;;  %v24225_v59 = vld [vmem:[%s26411_s10 + $0x22cc] ss:$16 sps:$4 sm:$0xff]  }
 0x483   : > { %v24220_v5 = vld [vmem:[%s26411_s10 + $0x22c0] ss:$16 sps:$4 sm:$0xff]  }
 0x485   : > { %15987 = vmatpush1.bf16.msra.mxu0 %v24140_v2  ;;  %17823 = vmatpush1.bf16.msra.mxu1 %v24143_v32  ;;  %v24223_v2 = vld [vmem:[%s26411_s10 + $0x22c8] ss:$16 sps:$4 sm:$0xff]   ;;  %v24228_v32 = vld [vmem:[%s26411_s10 + $0x22e4] ss:$16 sps:$4 sm:$0xff]  }
 0x486   : > { %15988 = vmatprep.subr.bf16.mxu0 %v24148_v3  ;;  %17824 = vmatprep.subr.bf16.mxu1 %v24151_v29  ;;  %v24231_v3 = vld [vmem:[%s26411_s10 + $0x22ec] ss:$16 sps:$4 sm:$0xff]   ;;  %v24226_v29 = vld [vmem:[%s26411_s10 + $0x22e0] ss:$16 sps:$4 sm:$0xff]  }
 0x489   : > { %15989 = vmatpush1.bf16.msra.mxu0 %v24146_v52  ;;  %17825 = vmatpush1.bf16.msra.mxu1 %v24149_v54  ;;  %v24229_v52 = vld [vmem:[%s26411_s10 + $0x22e8] ss:$16 sps:$4 sm:$0xff]   ;;  %v24234_v54 = vld [vmem:[%s26411_s10 + $0x2304] ss:$16 sps:$4 sm:$0xff]  }
 0x48a   : > { %15990 = vmatprep.subr.bf16.mxu0 %v24154_v56  ;;  %17826 = vmatprep.subr.bf16.mxu1 %v24157_v58  ;;  %v24237_v56 = vld [vmem:[%s26411_s10 + $0x230c] ss:$16 sps:$4 sm:$0xff]  }
 0x48d   : > { %15991 = vmatpush1.bf16.msra.mxu0 %v24152_v63  ;;  %17827 = vmatpush1.bf16.msra.mxu1 %v24155_v0 }
 0x48e   : > { %15992 = vmatprep.subr.bf16.mxu0 %v24160_v12  ;;  %17828 = vmatprep.subr.bf16.mxu1 %v24163_v53 }
 0x491   : > { %15993 = vmatpush1.bf16.msra.mxu0 %v24158_v38  ;;  %17829 = vmatpush1.bf16.msra.mxu1 %v24161_v46 }
 0x492   : > { %15994 = vmatprep.subr.bf16.mxu0 %v24166_v42  ;;  %17830 = vmatprep.subr.bf16.mxu1 %v24169_v36  ;;  %v24232_v36 = vld [vmem:[%s26411_s10 + $0x2300] ss:$16 sps:$4 sm:$0xff]  }
 0x495   : > { %15995 = vmatpush1.bf16.msra.mxu0 %v24164_v47  ;;  %17831 = vmatpush1.bf16.msra.mxu1 %v24167_v11  ;;  %v24235_v47 = vld [vmem:[%s26411_s10 + $0x2308] ss:$16 sps:$4 sm:$0xff]  }
 0x496   : > { %15996 = vmatprep.subr.bf16.mxu0 %v24172_v4  ;;  %17832 = vmatprep.subr.bf16.mxu1 %v24175_v26 }
 0x499   : > { %15997 = vmatpush1.bf16.msra.mxu0 %v24170_v51  ;;  %17833 = vmatpush1.bf16.msra.mxu1 %v24173_v24  ;;  %v24241_v51 = vld [vmem:[%s26411_s10 + $0x2328] ss:$16 sps:$4 sm:$0xff]   ;;  %v24246_v24 = vld [vmem:[%s26411_s10 + $0x2344] ss:$16 sps:$4 sm:$0xff]  }
 0x49a   : > { %15998 = vmatprep.subr.bf16.mxu0 %v24178_v48  ;;  %17834 = vmatprep.subr.bf16.mxu1 %v24181_v61  ;;  %v24249_v48 = vld [vmem:[%s26411_s10 + $0x234c] ss:$16 sps:$4 sm:$0xff]   ;;  %v24244_v61 = vld [vmem:[%s26411_s10 + $0x2340] ss:$16 sps:$4 sm:$0xff]  }
 0x49d   : > { %15999 = vmatpush1.bf16.msra.mxu0 %v24176_v14  ;;  %17835 = vmatpush1.bf16.msra.mxu1 %v24179_v15  ;;  %v24247_v14 = vld [vmem:[%s26411_s10 + $0x2348] ss:$16 sps:$4 sm:$0xff]   ;;  %v24252_v15 = vld [vmem:[%s26411_s10 + $0x2364] ss:$16 sps:$4 sm:$0xff]  }
 0x49e   : > { %16019 = vmatprep.subr.bf16.mxu0 %v24184_v17  ;;  %17855 = vmatprep.subr.bf16.mxu1 %v24187_v18  ;;  %v24255_v17 = vld [vmem:[%s26411_s10 + $0x236c] ss:$16 sps:$4 sm:$0xff]   ;;  %v24250_v18 = vld [vmem:[%s26411_s10 + $0x2360] ss:$16 sps:$4 sm:$0xff]  }
 0x4a0   : > { %16001 = vmatmul.mubr.bf16.vlgmr.msra.gmra.mrb[0].mxu0 %v19652_v20  ;;  %17837 = vmatmul.mubr.bf16.vlgmr.msra.gmra.mrb[0].mxu1 %v19652_v20  ;;  %v24258_v20 = vld [vmem:[%s26411_s10 + $0x2384] ss:$16 sps:$4 sm:$0xff]  }
 0x4a1   : > { %16020 = vmatpush1.bf16.msra.mxu0 %v24182_v19  ;;  %17856 = vmatpush1.bf16.msra.mxu1 %v24185_v13  ;;  %v24253_v19 = vld [vmem:[%s26411_s10 + $0x2368] ss:$16 sps:$4 sm:$0xff]   ;;  %v24261_v13 = vld [vmem:[%s26411_s10 + $0x238c] ss:$16 sps:$4 sm:$0xff]  }
 0x4a2   : > { %16021 = vmatprep.subr.bf16.mxu0 %v24190_v9  ;;  %17857 = vmatprep.subr.bf16.mxu1 %v24193_v1  ;;  %v24259_v9 = vld [vmem:[%s26411_s10 + $0x2388] ss:$16 sps:$4 sm:$0xff]   ;;  %v24264_v1 = vld [vmem:[%s26411_s10 + $0x23a4] ss:$16 sps:$4 sm:$0xff]  }
 0x4a3   : > { %16010 = vmatprep.mubr.bf16.mxu0 %v19725_v7  ;;  %17846 = vmatprep.mubr.bf16.mxu1 %v19725_v7  ;;  %v24262_v7 = vld [vmem:[%s26411_s10 + $0x23a0] ss:$16 sps:$4 sm:$0xff]  }
 0x4a5   : > { %16022 = vmatpush1.bf16.msra.mxu0 %v24188_v55  ;;  %17858 = vmatpush1.bf16.msra.mxu1 %v24191_v30  ;;  %v24267_v55 = vld [vmem:[%s26411_s10 + $0x23ac] ss:$16 sps:$4 sm:$0xff]   ;;  %v24265_v30 = vld [vmem:[%s26411_s10 + $0x23a8] ss:$16 sps:$4 sm:$0xff]  }
 0x4a6   : > { %16023 = vmatprep.subr.bf16.mxu0 %v24198_v25  ;;  %17859 = vmatprep.subr.bf16.mxu1 %v24201_v45  ;;  %v24270_v25 = vld [vmem:[%s26411_s10 + $0x23c4] ss:$16 sps:$4 sm:$0xff]   ;;  %v24273_v45 = vld [vmem:[%s26411_s10 + $0x23cc] ss:$16 sps:$4 sm:$0xff]  }
 0x4a8   : > { %16011 = vmatmul.mubr.bf16.gmra.mrb[68].mxu0 %v19724_v8  ;;  %17847 = vmatmul.mubr.bf16.gmra.mrb[68].mxu1 %v19724_v8  ;;  %v24276_v8 = vld [vmem:[%s26411_s10 + $0x23e4] ss:$16 sps:$4 sm:$0xff]  }
 0x4a9   : > { %16024 = vmatpush1.bf16.msra.mxu0 %v24196_v60  ;;  %17860 = vmatpush1.bf16.msra.mxu1 %v24199_v43  ;;  %v24268_v60 = vld [vmem:[%s26411_s10 + $0x23c0] ss:$16 sps:$4 sm:$0xff]   ;;  %v24271_v43 = vld [vmem:[%s26411_s10 + $0x23c8] ss:$16 sps:$4 sm:$0xff]  }
 0x4aa   : > { %16025 = vmatprep.subr.bf16.mxu0 %v24204_v10  ;;  %17861 = vmatprep.subr.bf16.mxu1 %v24207_v33  ;;  %v24279_v10 = vld [vmem:[%s26411_s10 + $0x23ec] ss:$16 sps:$4 sm:$0xff]   ;;  %v24274_v33 = vld [vmem:[%s26411_s10 + $0x23e0] ss:$16 sps:$4 sm:$0xff]  }
 0x4ab   : > { %16051 = vmatprep.mubr.bf16.mxu0 %v19655_v35  ;;  %17887 = vmatprep.mubr.bf16.mxu1 %v19655_v35  ;;  %v24277_v35 = vld [vmem:[%s26411_s10 + $0x23e8] ss:$16 sps:$4 sm:$0xff]  }
 0x4ad   : > { %16026 = vmatpush1.bf16.msra.mxu0 %v24202_v37  ;;  %17862 = vmatpush1.bf16.msra.mxu1 %v24205_v39  ;;  %v24282_v37 = vld [vmem:[%s26411_s10 + $0x2404] ss:$16 sps:$4 sm:$0xff]   ;;  %v24285_v39 = vld [vmem:[%s26411_s10 + $0x240c] ss:$16 sps:$4 sm:$0xff]  }
 0x4ae   : > { %16027 = vmatprep.subr.bf16.mxu0 %v24210_v40  ;;  %17863 = vmatprep.subr.bf16.mxu1 %v24213_v34  ;;  %v24280_v40 = vld [vmem:[%s26411_s10 + $0x2400] ss:$16 sps:$4 sm:$0xff]   ;;  %v19654_v34 = vcombine.low %v27846_v49, %v27851_v44  ;;  %v24289_v49 = vld [vmem:[%s26411_s10 + $0x2428] ss:$16 sps:$4 sm:$0xff]   ;;  %v24296_v44 = vld [vmem:[%s26411_s10 + $0x2444] ss:$16 sps:$4 sm:$0xff]  }
 0x4b1   : > { %16028 = vmatpush1.bf16.msra.mxu0 %v24208_v22  ;;  %17864 = vmatpush1.bf16.msra.mxu1 %v24211_v16  ;;  %v24283_v22 = vld [vmem:[%s26411_s10 + $0x2408] ss:$16 sps:$4 sm:$0xff]  }
 0x4b2   : > { %16029 = vmatprep.subr.bf16.mxu0 %v24216_v28  ;;  %17865 = vmatprep.subr.bf16.mxu1 %v24219_v21  ;;  %v697_v16 = vld [vmem:[%s26413_s15 + $0x2c8] sm:$0x11]  ;;  %v24288_v28 = vld [vmem:[%s26411_s10 + $0x2424] ss:$16 sps:$4 sm:$0xff]  }
 0x4b3   : > { %v24291_v21 = vld [vmem:[%s26411_s10 + $0x242c] ss:$16 sps:$4 sm:$0xff]  }
 0x4b5   : > { %16030 = vmatpush1.bf16.msra.mxu0 %v24214_v62  ;;  %17866 = vmatpush1.bf16.msra.mxu1 %v24217_v31  ;;  %v24286_v62 = vld [vmem:[%s26411_s10 + $0x2420] ss:$16 sps:$4 sm:$0xff]   ;;  %v19727_v31 = vcombine.high %v697_v16, %v697_v16 }
 0x4b6   : > { %16031 = vmatprep.subr.bf16.mxu0 %v24222_v6  ;;  %17867 = vmatprep.subr.bf16.mxu1 %v24225_v59  ;;  %v24299_v6 = vld [vmem:[%s26411_s10 + $0x244c] ss:$16 sps:$4 sm:$0xff]   ;;  %v27933_v59 = vld [vmem:[%s26413_s15 + $0x90] sm:$0xff] }
 0x4b9   : > { %16032 = vmatpush1.bf16.msra.mxu0 %v24220_v5  ;;  %17868 = vmatpush1.bf16.msra.mxu1 %v24223_v2  ;;  %v24294_v5 = vld [vmem:[%s26411_s10 + $0x2440] ss:$16 sps:$4 sm:$0xff]   ;;  %v24297_v2 = vld [vmem:[%s26411_s10 + $0x2448] ss:$16 sps:$4 sm:$0xff]  }
 0x4ba   : > { %16033 = vmatprep.subr.bf16.mxu0 %v24228_v32  ;;  %17869 = vmatprep.subr.bf16.mxu1 %v24231_v3  ;;  %v19726_v32 = vcombine.low %v697_v16, %v697_v16  ;;  %v27938_v3 = vld [vmem:[%s26413_s15 + $0x1b0] sm:$0xff] }
 0x4bb   : > { %v15859_v58 = vpop.f32.mrb[56].mxu0  ;;  %v17695_v63 = vpop.f32.mrb[56].mxu1  ;;  %v24354_v16 = vld [vmem:[%s26411_s10 + $0x2580] ss:$16 sps:$4 sm:$0xff]  }
 0x4bc   : > { %v27878_v0 = vadd.f32 %v15859_v58, %v27791_v41  ;;  %v27881_v12 = vadd.f32 %v17695_v63, %v27794_v50  ;;  %v15861_v53 = vpop.f32.mrb[57].mxu0  ;;  %v17697_v38 = vpop.f32.mrb[57].mxu1  ;;  %v24240_v50 = vld [vmem:[%s26411_s10 + $0x2324] ss:$16 sps:$4 sm:$0xff]   ;;  %v24303_v58 = vld [vmem:[%s26411_s10 + $0x2468] ss:$16 sps:$4 sm:$0xff]  }
 0x4bd   : > { %v27884_v46 = vadd.f32 %v15861_v53, %v27797_v27  ;;  %v27887_v42 = vadd.f32 %v17697_v38, %v27800_v23  ;;  %16034 = vmatpush1.bf16.msra.mxu0 %v24226_v29  ;;  %17870 = vmatpush1.bf16.msra.mxu1 %v24229_v52  ;;  %v15863_v41 = vpop.f32.mrb[58].mxu0  ;;  %v17699_v11 = vpop.f32.mrb[58].mxu1  ;;  %v24243_v27 = vld [vmem:[%s26411_s10 + $0x232c] ss:$16 sps:$4 sm:$0xff]   ;;  %v24238_v23 = vld [vmem:[%s26411_s10 + $0x2320] ss:$16 sps:$4 sm:$0xff]  }
 0x4be   : > { %16035 = vmatprep.subr.bf16.mxu0 %v24234_v54  ;;  %17871 = vmatprep.subr.bf16.mxu1 %v24237_v56  ;;  %v15864_v4 = vpop.f32.mrb[59].mxu0  ;;  %v17700_v26 = vpop.f32.mrb[59].mxu1  ;;  %v24302_v29 = vld [vmem:[%s26411_s10 + $0x2464] ss:$16 sps:$4 sm:$0xff]   ;;  %v24305_v52 = vld [vmem:[%s26411_s10 + $0x246c] ss:$16 sps:$4 sm:$0xff]   ;;  %v19657_v54 = vcombine.high %v27933_v59, %v27938_v3 }
 0x4bf   : > { %v24300_v56 = vld [vmem:[%s26411_s10 + $0x2460] ss:$16 sps:$4 sm:$0xff]   ;;  %v24308_v63 = vld [vmem:[%s26411_s10 + $0x2484] ss:$16 sps:$4 sm:$0xff]   ;;  %v24311_v53 = vld [vmem:[%s26411_s10 + $0x248c] ss:$16 sps:$4 sm:$0xff]  }
 0x4c0   : > { %v24306_v38 = vld [vmem:[%s26411_s10 + $0x2480] ss:$16 sps:$4 sm:$0xff]   ;;  %v24317_v41 = vld [vmem:[%s26411_s10 + $0x24ac] ss:$16 sps:$4 sm:$0xff]  }
 0x4c1   : > { %16036 = vmatpush1.bf16.msra.mxu0 %v24232_v36  ;;  %17872 = vmatpush1.bf16.msra.mxu1 %v24235_v47  ;;  %v24309_v36 = vld [vmem:[%s26411_s10 + $0x2488] ss:$16 sps:$4 sm:$0xff]   ;;  %v24314_v47 = vld [vmem:[%s26411_s10 + $0x24a4] ss:$16 sps:$4 sm:$0xff]   ;;  %v24312_v11 = vld [vmem:[%s26411_s10 + $0x24a0] ss:$16 sps:$4 sm:$0xff]  }
 0x4c2   : > { %16037 = vmatprep.subr.bf16.mxu0 %v24240_v50  ;;  %17873 = vmatprep.subr.bf16.mxu1 %v24243_v27  ;;  %v24315_v50 = vld [vmem:[%s26411_s10 + $0x24a8] ss:$16 sps:$4 sm:$0xff]   ;;  %v24320_v27 = vld [vmem:[%s26411_s10 + $0x24c4] ss:$16 sps:$4 sm:$0xff]   ;;  %v24323_v4 = vld [vmem:[%s26411_s10 + $0x24cc] ss:$16 sps:$4 sm:$0xff]  }
 0x4c3   : > { %v24318_v26 = vld [vmem:[%s26411_s10 + $0x24c0] ss:$16 sps:$4 sm:$0xff]  }
 0x4c5   : > { %16038 = vmatpush1.bf16.msra.mxu0 %v24238_v23  ;;  %17874 = vmatpush1.bf16.msra.mxu1 %v24241_v51  ;;  %v24321_v23 = vld [vmem:[%s26411_s10 + $0x24c8] ss:$16 sps:$4 sm:$0xff]   ;;  %v24326_v51 = vld [vmem:[%s26411_s10 + $0x24e4] ss:$16 sps:$4 sm:$0xff]  }
 0x4c6   : > { %16039 = vmatprep.subr.bf16.mxu0 %v24246_v24  ;;  %17875 = vmatprep.subr.bf16.mxu1 %v24249_v48  ;;  %v24329_v24 = vld [vmem:[%s26411_s10 + $0x24ec] ss:$16 sps:$4 sm:$0xff]   ;;  %v24324_v48 = vld [vmem:[%s26411_s10 + $0x24e0] ss:$16 sps:$4 sm:$0xff]  }
 0x4c9   : > { %16040 = vmatpush1.bf16.msra.mxu0 %v24244_v61  ;;  %17876 = vmatpush1.bf16.msra.mxu1 %v24247_v14  ;;  %v24327_v61 = vld [vmem:[%s26411_s10 + $0x24e8] ss:$16 sps:$4 sm:$0xff]   ;;  %v24332_v14 = vld [vmem:[%s26411_s10 + $0x2504] ss:$16 sps:$4 sm:$0xff]  }
 0x4ca   : > { %16041 = vmatprep.subr.bf16.mxu0 %v24252_v15  ;;  %17877 = vmatprep.subr.bf16.mxu1 %v24255_v17  ;;  %v24335_v15 = vld [vmem:[%s26411_s10 + $0x250c] ss:$16 sps:$4 sm:$0xff]  }
 0x4cd   : > { %16042 = vmatpush1.bf16.msra.mxu0 %v24250_v18  ;;  %17878 = vmatpush1.bf16.msra.mxu1 %v24253_v19 }
 0x4ce   : > { %16043 = vmatprep.subr.bf16.mxu0 %v24258_v20  ;;  %17879 = vmatprep.subr.bf16.mxu1 %v24261_v13 }
 0x4d1   : > { %16044 = vmatpush1.bf16.msra.mxu0 %v24256_v57  ;;  %17880 = vmatpush1.bf16.msra.mxu1 %v24259_v9 }
 0x4d2   : > { %16045 = vmatprep.subr.bf16.mxu0 %v24264_v1  ;;  %17881 = vmatprep.subr.bf16.mxu1 %v24267_v55  ;;  %v24330_v55 = vld [vmem:[%s26411_s10 + $0x2500] ss:$16 sps:$4 sm:$0xff]  }
 0x4d5   : > { %16046 = vmatpush1.bf16.msra.mxu0 %v24262_v7  ;;  %17882 = vmatpush1.bf16.msra.mxu1 %v24265_v30  ;;  %v24333_v7 = vld [vmem:[%s26411_s10 + $0x2508] ss:$16 sps:$4 sm:$0xff]  }
 0x4d6   : > { %16047 = vmatprep.subr.bf16.mxu0 %v24270_v25  ;;  %17883 = vmatprep.subr.bf16.mxu1 %v24273_v45 }
 0x4d9   : > { %16048 = vmatpush1.bf16.msra.mxu0 %v24268_v60  ;;  %17884 = vmatpush1.bf16.msra.mxu1 %v24271_v43  ;;  %v24339_v60 = vld [vmem:[%s26411_s10 + $0x2528] ss:$16 sps:$4 sm:$0xff]   ;;  %v24344_v43 = vld [vmem:[%s26411_s10 + $0x2544] ss:$16 sps:$4 sm:$0xff]  }
 0x4da   : > { %16049 = vmatprep.subr.bf16.mxu0 %v24276_v8  ;;  %17885 = vmatprep.subr.bf16.mxu1 %v24279_v10  ;;  %v24347_v8 = vld [vmem:[%s26411_s10 + $0x254c] ss:$16 sps:$4 sm:$0xff]   ;;  %v24342_v10 = vld [vmem:[%s26411_s10 + $0x2540] ss:$16 sps:$4 sm:$0xff]  }
 0x4dd   : > { %16050 = vmatpush1.bf16.msra.mxu0 %v24274_v33  ;;  %17886 = vmatpush1.bf16.msra.mxu1 %v24277_v35  ;;  %v24345_v33 = vld [vmem:[%s26411_s10 + $0x2548] ss:$16 sps:$4 sm:$0xff]   ;;  %v24350_v35 = vld [vmem:[%s26411_s10 + $0x2564] ss:$16 sps:$4 sm:$0xff]  }
 0x4de   : > { %16070 = vmatprep.subr.bf16.mxu0 %v24282_v37  ;;  %17906 = vmatprep.subr.bf16.mxu1 %v24285_v39  ;;  %v24353_v37 = vld [vmem:[%s26411_s10 + $0x256c] ss:$16 sps:$4 sm:$0xff]   ;;  %v24348_v39 = vld [vmem:[%s26411_s10 + $0x2560] ss:$16 sps:$4 sm:$0xff]  }
 0x4e0   : > { %16052 = vmatmul.mubr.bf16.vlgmr.msra.gmra.mrb[0].mxu0 %v19654_v34  ;;  %17888 = vmatmul.mubr.bf16.vlgmr.msra.gmra.mrb[0].mxu1 %v19654_v34  ;;  %v24356_v34 = vld [vmem:[%s26411_s10 + $0x2584] ss:$16 sps:$4 sm:$0xff]  }
 0x4e1   : > { %16071 = vmatpush1.bf16.msra.mxu0 %v24280_v40  ;;  %17907 = vmatpush1.bf16.msra.mxu1 %v24283_v22  ;;  %v24351_v40 = vld [vmem:[%s26411_s10 + $0x2568] ss:$16 sps:$4 sm:$0xff]   ;;  %v24359_v22 = vld [vmem:[%s26411_s10 + $0x258c] ss:$16 sps:$4 sm:$0xff]  }
 0x4e2   : > { %16072 = vmatprep.subr.bf16.mxu0 %v24288_v28  ;;  %17908 = vmatprep.subr.bf16.mxu1 %v24291_v21  ;;  %v24357_v28 = vld [vmem:[%s26411_s10 + $0x2588] ss:$16 sps:$4 sm:$0xff]   ;;  %v24362_v21 = vld [vmem:[%s26411_s10 + $0x25a4] ss:$16 sps:$4 sm:$0xff]  }
 0x4e3   : > { %16061 = vmatprep.mubr.bf16.mxu0 %v19727_v31  ;;  %17897 = vmatprep.mubr.bf16.mxu1 %v19727_v31  ;;  %v24360_v31 = vld [vmem:[%s26411_s10 + $0x25a0] ss:$16 sps:$4 sm:$0xff]  }
 0x4e5   : > { %16073 = vmatpush1.bf16.msra.mxu0 %v24286_v62  ;;  %17909 = vmatpush1.bf16.msra.mxu1 %v24289_v49  ;;  %v24365_v62 = vld [vmem:[%s26411_s10 + $0x25ac] ss:$16 sps:$4 sm:$0xff]   ;;  %v24363_v49 = vld [vmem:[%s26411_s10 + $0x25a8] ss:$16 sps:$4 sm:$0xff]  }
 0x4e6   : > { %16074 = vmatprep.subr.bf16.mxu0 %v24296_v44  ;;  %17910 = vmatprep.subr.bf16.mxu1 %v24299_v6  ;;  %v24368_v44 = vld [vmem:[%s26411_s10 + $0x25c4] ss:$16 sps:$4 sm:$0xff]   ;;  %v24371_v6 = vld [vmem:[%s26411_s10 + $0x25cc] ss:$16 sps:$4 sm:$0xff]  }
 0x4e8   : > { %16062 = vmatmul.mubr.bf16.gmra.mrb[72].mxu0 %v19726_v32  ;;  %17898 = vmatmul.mubr.bf16.gmra.mrb[72].mxu1 %v19726_v32  ;;  %v24374_v32 = vld [vmem:[%s26411_s10 + $0x25e4] ss:$16 sps:$4 sm:$0xff]  }
 0x4e9   : > { %16075 = vmatpush1.bf16.msra.mxu0 %v24294_v5  ;;  %17911 = vmatpush1.bf16.msra.mxu1 %v24297_v2  ;;  %v24366_v5 = vld [vmem:[%s26411_s10 + $0x25c0] ss:$16 sps:$4 sm:$0xff]   ;;  %v24369_v2 = vld [vmem:[%s26411_s10 + $0x25c8] ss:$16 sps:$4 sm:$0xff]  }
 0x4ea   : > { %16076 = vmatprep.subr.bf16.mxu0 %v24302_v29  ;;  %17912 = vmatprep.subr.bf16.mxu1 %v24305_v52  ;;  %v24377_v29 = vld [vmem:[%s26411_s10 + $0x25ec] ss:$16 sps:$4 sm:$0xff]   ;;  %v24372_v52 = vld [vmem:[%s26411_s10 + $0x25e0] ss:$16 sps:$4 sm:$0xff]  }
 0x4eb   : > { %16102 = vmatprep.mubr.bf16.mxu0 %v19657_v54  ;;  %17938 = vmatprep.mubr.bf16.mxu1 %v19657_v54  ;;  %v24375_v54 = vld [vmem:[%s26411_s10 + $0x25e8] ss:$16 sps:$4 sm:$0xff]  }
 0x4ed   : > { %16077 = vmatpush1.bf16.msra.mxu0 %v24300_v56  ;;  %17913 = vmatpush1.bf16.msra.mxu1 %v24303_v58  ;;  %v24380_v56 = vld [vmem:[%s26411_s10 + $0x2604] ss:$16 sps:$4 sm:$0xff]   ;;  %v24383_v58 = vld [vmem:[%s26411_s10 + $0x260c] ss:$16 sps:$4 sm:$0xff]  }
 0x4ee   : > { %16078 = vmatprep.subr.bf16.mxu0 %v24308_v63  ;;  %17914 = vmatprep.subr.bf16.mxu1 %v24311_v53  ;;  %v24378_v63 = vld [vmem:[%s26411_s10 + $0x2600] ss:$16 sps:$4 sm:$0xff]   ;;  %v19656_v53 = vcombine.low %v27933_v59, %v27938_v3  ;;  %v24387_v59 = vld [vmem:[%s26411_s10 + $0x2628] ss:$16 sps:$4 sm:$0xff]   ;;  %v24394_v3 = vld [vmem:[%s26411_s10 + $0x2644] ss:$16 sps:$4 sm:$0xff]  }
 0x4f1   : > { %16079 = vmatpush1.bf16.msra.mxu0 %v24306_v38  ;;  %17915 = vmatpush1.bf16.msra.mxu1 %v24309_v36  ;;  %v24381_v38 = vld [vmem:[%s26411_s10 + $0x2608] ss:$16 sps:$4 sm:$0xff]   ;;  %v698_v36 = vld [vmem:[%s26413_s15 + $0x2d0] sm:$0x11] }
 0x4f2   : > { %16080 = vmatprep.subr.bf16.mxu0 %v24314_v47  ;;  %17916 = vmatprep.subr.bf16.mxu1 %v24317_v41  ;;  %v24386_v47 = vld [vmem:[%s26411_s10 + $0x2624] ss:$16 sps:$4 sm:$0xff]   ;;  %v24389_v41 = vld [vmem:[%s26411_s10 + $0x262c] ss:$16 sps:$4 sm:$0xff]  }
 0x4f5   : > { %16081 = vmatpush1.bf16.msra.mxu0 %v24312_v11  ;;  %17917 = vmatpush1.bf16.msra.mxu1 %v24315_v50  ;;  %v24384_v11 = vld [vmem:[%s26411_s10 + $0x2620] ss:$16 sps:$4 sm:$0xff]   ;;  %v19729_v50 = vcombine.high %v698_v36, %v698_v36 }
 0x4f6   : > { %16082 = vmatprep.subr.bf16.mxu0 %v24320_v27  ;;  %17918 = vmatprep.subr.bf16.mxu1 %v24323_v4  ;;  %v24397_v27 = vld [vmem:[%s26411_s10 + $0x264c] ss:$16 sps:$4 sm:$0xff]  }
 0x4f7   : > { %v28020_v4 = vld [vmem:[%s26413_s15 + $0x98] sm:$0xff] }
 0x4f9   : > { %16083 = vmatpush1.bf16.msra.mxu0 %v24318_v26  ;;  %17919 = vmatpush1.bf16.msra.mxu1 %v24321_v23  ;;  %v24392_v26 = vld [vmem:[%s26411_s10 + $0x2640] ss:$16 sps:$4 sm:$0xff]   ;;  %v24395_v23 = vld [vmem:[%s26411_s10 + $0x2648] ss:$16 sps:$4 sm:$0xff]  }
 0x4fa   : > { %16084 = vmatprep.subr.bf16.mxu0 %v24326_v51  ;;  %17920 = vmatprep.subr.bf16.mxu1 %v24329_v24  ;;  %v19728_v51 = vcombine.low %v698_v36, %v698_v36  ;;  %v28025_v24 = vld [vmem:[%s26413_s15 + $0x1b8] sm:$0xff] }
 0x4fb   : > { %v15910_v17 = vpop.f32.mrb[60].mxu0  ;;  %v17746_v18 = vpop.f32.mrb[60].mxu1  ;;  %v24452_v36 = vld [vmem:[%s26411_s10 + $0x2780] ss:$16 sps:$4 sm:$0xff]  }
 0x4fc   : > { %v27965_v19 = vadd.f32 %v15910_v17, %v27878_v0  ;;  %v27968_v20 = vadd.f32 %v17746_v18, %v27881_v12  ;;  %v15912_v13 = vpop.f32.mrb[61].mxu0  ;;  %v17748_v57 = vpop.f32.mrb[61].mxu1  ;;  %v24338_v12 = vld [vmem:[%s26411_s10 + $0x2524] ss:$16 sps:$4 sm:$0xff]   ;;  %v24401_v17 = vld [vmem:[%s26411_s10 + $0x2668] ss:$16 sps:$4 sm:$0xff]  }
 0x4fd   : > { %v27971_v9 = vadd.f32 %v15912_v13, %v27884_v46  ;;  %v27974_v1 = vadd.f32 %v17748_v57, %v27887_v42  ;;  %16085 = vmatpush1.bf16.msra.mxu0 %v24324_v48  ;;  %17921 = vmatpush1.bf16.msra.mxu1 %v24327_v61  ;;  %v15914_v0 = vpop.f32.mrb[62].mxu0  ;;  %v17750_v30 = vpop.f32.mrb[62].mxu1  ;;  %v24341_v46 = vld [vmem:[%s26411_s10 + $0x252c] ss:$16 sps:$4 sm:$0xff]   ;;  %v24336_v42 = vld [vmem:[%s26411_s10 + $0x2520] ss:$16 sps:$4 sm:$0xff]  }
 0x4fe   : > { %16086 = vmatprep.subr.bf16.mxu0 %v24332_v14  ;;  %17922 = vmatprep.subr.bf16.mxu1 %v24335_v15  ;;  %v15915_v25 = vpop.f32.mrb[63].mxu0  ;;  %v17751_v45 = vpop.f32.mrb[63].mxu1  ;;  %v24400_v48 = vld [vmem:[%s26411_s10 + $0x2664] ss:$16 sps:$4 sm:$0xff]   ;;  %v24403_v61 = vld [vmem:[%s26411_s10 + $0x266c] ss:$16 sps:$4 sm:$0xff]   ;;  %v19659_v14 = vcombine.high %v28020_v4, %v28025_v24 }
 0x4ff   : > { %v24398_v15 = vld [vmem:[%s26411_s10 + $0x2660] ss:$16 sps:$4 sm:$0xff]   ;;  %v24406_v18 = vld [vmem:[%s26411_s10 + $0x2684] ss:$16 sps:$4 sm:$0xff]   ;;  %v24409_v13 = vld [vmem:[%s26411_s10 + $0x268c] ss:$16 sps:$4 sm:$0xff]  }
 0x500   : > { %v24404_v57 = vld [vmem:[%s26411_s10 + $0x2680] ss:$16 sps:$4 sm:$0xff]   ;;  %v24415_v0 = vld [vmem:[%s26411_s10 + $0x26ac] ss:$16 sps:$4 sm:$0xff]  }
 0x501   : > { %16087 = vmatpush1.bf16.msra.mxu0 %v24330_v55  ;;  %17923 = vmatpush1.bf16.msra.mxu1 %v24333_v7  ;;  %v24407_v55 = vld [vmem:[%s26411_s10 + $0x2688] ss:$16 sps:$4 sm:$0xff]   ;;  %v24412_v7 = vld [vmem:[%s26411_s10 + $0x26a4] ss:$16 sps:$4 sm:$0xff]   ;;  %v24410_v30 = vld [vmem:[%s26411_s10 + $0x26a0] ss:$16 sps:$4 sm:$0xff]  }
 0x502   : > { %16088 = vmatprep.subr.bf16.mxu0 %v24338_v12  ;;  %17924 = vmatprep.subr.bf16.mxu1 %v24341_v46  ;;  %v24413_v12 = vld [vmem:[%s26411_s10 + $0x26a8] ss:$16 sps:$4 sm:$0xff]   ;;  %v24418_v46 = vld [vmem:[%s26411_s10 + $0x26c4] ss:$16 sps:$4 sm:$0xff]   ;;  %v24421_v25 = vld [vmem:[%s26411_s10 + $0x26cc] ss:$16 sps:$4 sm:$0xff]  }
 0x503   : > { %v24416_v45 = vld [vmem:[%s26411_s10 + $0x26c0] ss:$16 sps:$4 sm:$0xff]  }
 0x505   : > { %16089 = vmatpush1.bf16.msra.mxu0 %v24336_v42  ;;  %17925 = vmatpush1.bf16.msra.mxu1 %v24339_v60  ;;  %v24419_v42 = vld [vmem:[%s26411_s10 + $0x26c8] ss:$16 sps:$4 sm:$0xff]   ;;  %v24424_v60 = vld [vmem:[%s26411_s10 + $0x26e4] ss:$16 sps:$4 sm:$0xff]  }
 0x506   : > { %16090 = vmatprep.subr.bf16.mxu0 %v24344_v43  ;;  %17926 = vmatprep.subr.bf16.mxu1 %v24347_v8  ;;  %v24427_v43 = vld [vmem:[%s26411_s10 + $0x26ec] ss:$16 sps:$4 sm:$0xff]   ;;  %v24422_v8 = vld [vmem:[%s26411_s10 + $0x26e0] ss:$16 sps:$4 sm:$0xff]  }
 0x509   : > { %16091 = vmatpush1.bf16.msra.mxu0 %v24342_v10  ;;  %17927 = vmatpush1.bf16.msra.mxu1 %v24345_v33  ;;  %v24425_v10 = vld [vmem:[%s26411_s10 + $0x26e8] ss:$16 sps:$4 sm:$0xff]   ;;  %v24430_v33 = vld [vmem:[%s26411_s10 + $0x2704] ss:$16 sps:$4 sm:$0xff]  }
 0x50a   : > { %16092 = vmatprep.subr.bf16.mxu0 %v24350_v35  ;;  %17928 = vmatprep.subr.bf16.mxu1 %v24353_v37  ;;  %v24433_v35 = vld [vmem:[%s26411_s10 + $0x270c] ss:$16 sps:$4 sm:$0xff]  }
 0x50d   : > { %16093 = vmatpush1.bf16.msra.mxu0 %v24348_v39  ;;  %17929 = vmatpush1.bf16.msra.mxu1 %v24351_v40 }
 0x50e   : > { %16094 = vmatprep.subr.bf16.mxu0 %v24356_v34  ;;  %17930 = vmatprep.subr.bf16.mxu1 %v24359_v22 }
 0x511   : > { %16095 = vmatpush1.bf16.msra.mxu0 %v24354_v16  ;;  %17931 = vmatpush1.bf16.msra.mxu1 %v24357_v28 }
 0x512   : > { %16096 = vmatprep.subr.bf16.mxu0 %v24362_v21  ;;  %17932 = vmatprep.subr.bf16.mxu1 %v24365_v62  ;;  %v24428_v62 = vld [vmem:[%s26411_s10 + $0x2700] ss:$16 sps:$4 sm:$0xff]  }
 0x515   : > { %16097 = vmatpush1.bf16.msra.mxu0 %v24360_v31  ;;  %17933 = vmatpush1.bf16.msra.mxu1 %v24363_v49  ;;  %v24431_v31 = vld [vmem:[%s26411_s10 + $0x2708] ss:$16 sps:$4 sm:$0xff]  }
 0x516   : > { %16098 = vmatprep.subr.bf16.mxu0 %v24368_v44  ;;  %17934 = vmatprep.subr.bf16.mxu1 %v24371_v6 }
 0x519   : > { %16099 = vmatpush1.bf16.msra.mxu0 %v24366_v5  ;;  %17935 = vmatpush1.bf16.msra.mxu1 %v24369_v2  ;;  %v24437_v5 = vld [vmem:[%s26411_s10 + $0x2728] ss:$16 sps:$4 sm:$0xff]   ;;  %v24442_v2 = vld [vmem:[%s26411_s10 + $0x2744] ss:$16 sps:$4 sm:$0xff]  }
 0x51a   : > { %16100 = vmatprep.subr.bf16.mxu0 %v24374_v32  ;;  %17936 = vmatprep.subr.bf16.mxu1 %v24377_v29  ;;  %v24445_v32 = vld [vmem:[%s26411_s10 + $0x274c] ss:$16 sps:$4 sm:$0xff]   ;;  %v24440_v29 = vld [vmem:[%s26411_s10 + $0x2740] ss:$16 sps:$4 sm:$0xff]  }
 0x51d   : > { %16101 = vmatpush1.bf16.msra.mxu0 %v24372_v52  ;;  %17937 = vmatpush1.bf16.msra.mxu1 %v24375_v54  ;;  %v24443_v52 = vld [vmem:[%s26411_s10 + $0x2748] ss:$16 sps:$4 sm:$0xff]   ;;  %v24448_v54 = vld [vmem:[%s26411_s10 + $0x2764] ss:$16 sps:$4 sm:$0xff]  }
 0x51e   : > { %16121 = vmatprep.subr.bf16.mxu0 %v24380_v56  ;;  %17957 = vmatprep.subr.bf16.mxu1 %v24383_v58  ;;  %v24451_v56 = vld [vmem:[%s26411_s10 + $0x276c] ss:$16 sps:$4 sm:$0xff]   ;;  %v24446_v58 = vld [vmem:[%s26411_s10 + $0x2760] ss:$16 sps:$4 sm:$0xff]  }
 0x520   : > { %16103 = vmatmul.mubr.bf16.vlgmr.msra.gmra.mrb[0].mxu0 %v19656_v53  ;;  %17939 = vmatmul.mubr.bf16.vlgmr.msra.gmra.mrb[0].mxu1 %v19656_v53  ;;  %v24454_v53 = vld [vmem:[%s26411_s10 + $0x2784] ss:$16 sps:$4 sm:$0xff]  }
 0x521   : > { %16122 = vmatpush1.bf16.msra.mxu0 %v24378_v63  ;;  %17958 = vmatpush1.bf16.msra.mxu1 %v24381_v38  ;;  %v24449_v63 = vld [vmem:[%s26411_s10 + $0x2768] ss:$16 sps:$4 sm:$0xff]   ;;  %v24457_v38 = vld [vmem:[%s26411_s10 + $0x278c] ss:$16 sps:$4 sm:$0xff]  }
 0x522   : > { %16123 = vmatprep.subr.bf16.mxu0 %v24386_v47  ;;  %17959 = vmatprep.subr.bf16.mxu1 %v24389_v41  ;;  %v24455_v47 = vld [vmem:[%s26411_s10 + $0x2788] ss:$16 sps:$4 sm:$0xff]   ;;  %v24460_v41 = vld [vmem:[%s26411_s10 + $0x27a4] ss:$16 sps:$4 sm:$0xff]  }
 0x523   : > { %16112 = vmatprep.mubr.bf16.mxu0 %v19729_v50  ;;  %17948 = vmatprep.mubr.bf16.mxu1 %v19729_v50  ;;  %v24458_v50 = vld [vmem:[%s26411_s10 + $0x27a0] ss:$16 sps:$4 sm:$0xff]  }
 0x525   : > { %16124 = vmatpush1.bf16.msra.mxu0 %v24384_v11  ;;  %17960 = vmatpush1.bf16.msra.mxu1 %v24387_v59  ;;  %v24463_v11 = vld [vmem:[%s26411_s10 + $0x27ac] ss:$16 sps:$4 sm:$0xff]   ;;  %v24461_v59 = vld [vmem:[%s26411_s10 + $0x27a8] ss:$16 sps:$4 sm:$0xff]  }
 0x526   : > { %16125 = vmatprep.subr.bf16.mxu0 %v24394_v3  ;;  %17961 = vmatprep.subr.bf16.mxu1 %v24397_v27  ;;  %v24466_v3 = vld [vmem:[%s26411_s10 + $0x27c4] ss:$16 sps:$4 sm:$0xff]   ;;  %v24469_v27 = vld [vmem:[%s26411_s10 + $0x27cc] ss:$16 sps:$4 sm:$0xff]  }
 0x528   : > { %16113 = vmatmul.mubr.bf16.gmra.mrb[76].mxu0 %v19728_v51  ;;  %17949 = vmatmul.mubr.bf16.gmra.mrb[76].mxu1 %v19728_v51  ;;  %v24472_v51 = vld [vmem:[%s26411_s10 + $0x27e4] ss:$16 sps:$4 sm:$0xff]  }
 0x529   : > { %16126 = vmatpush1.bf16.msra.mxu0 %v24392_v26  ;;  %17962 = vmatpush1.bf16.msra.mxu1 %v24395_v23  ;;  %v24464_v26 = vld [vmem:[%s26411_s10 + $0x27c0] ss:$16 sps:$4 sm:$0xff]   ;;  %v24467_v23 = vld [vmem:[%s26411_s10 + $0x27c8] ss:$16 sps:$4 sm:$0xff]  }
 0x52a   : > { %16127 = vmatprep.subr.bf16.mxu0 %v24400_v48  ;;  %17963 = vmatprep.subr.bf16.mxu1 %v24403_v61  ;;  %v24475_v48 = vld [vmem:[%s26411_s10 + $0x27ec] ss:$16 sps:$4 sm:$0xff]   ;;  %v24470_v61 = vld [vmem:[%s26411_s10 + $0x27e0] ss:$16 sps:$4 sm:$0xff]  }
 0x52b   : > { %16153 = vmatprep.mubr.bf16.mxu0 %v19659_v14  ;;  %17989 = vmatprep.mubr.bf16.mxu1 %v19659_v14  ;;  %v24473_v14 = vld [vmem:[%s26411_s10 + $0x27e8] ss:$16 sps:$4 sm:$0xff]  }
 0x52d   : > { %16128 = vmatpush1.bf16.msra.mxu0 %v24398_v15  ;;  %17964 = vmatpush1.bf16.msra.mxu1 %v24401_v17  ;;  %v24478_v15 = vld [vmem:[%s26411_s10 + $0x2804] ss:$16 sps:$4 sm:$0xff]   ;;  %v24481_v17 = vld [vmem:[%s26411_s10 + $0x280c] ss:$16 sps:$4 sm:$0xff]  }
 0x52e   : > { %16129 = vmatprep.subr.bf16.mxu0 %v24406_v18  ;;  %17965 = vmatprep.subr.bf16.mxu1 %v24409_v13  ;;  %v19658_v18 = vcombine.low %v28020_v4, %v28025_v24  ;;  %v699_v13 = vld [vmem:[%s26413_s15 + $0x2d8] sm:$0x11]  ;;  %v24482_v4 = vld [vmem:[%s26411_s10 + $0x2820] ss:$16 sps:$4 sm:$0xff]  }
 0x52f   : > { %v24485_v24 = vld [vmem:[%s26411_s10 + $0x2828] ss:$16 sps:$4 sm:$0xff]  }
 0x531   : > { %16130 = vmatpush1.bf16.msra.mxu0 %v24404_v57  ;;  %17966 = vmatpush1.bf16.msra.mxu1 %v24407_v55  ;;  %v24476_v57 = vld [vmem:[%s26411_s10 + $0x2800] ss:$16 sps:$4 sm:$0xff]   ;;  %v24479_v55 = vld [vmem:[%s26411_s10 + $0x2808] ss:$16 sps:$4 sm:$0xff]  }
 0x532   : > { %16131 = vmatprep.subr.bf16.mxu0 %v24412_v7  ;;  %17967 = vmatprep.subr.bf16.mxu1 %v24415_v0  ;;  %v24484_v7 = vld [vmem:[%s26411_s10 + $0x2824] ss:$16 sps:$4 sm:$0xff]   ;;  %v24487_v0 = vld [vmem:[%s26411_s10 + $0x282c] ss:$16 sps:$4 sm:$0xff]  }
 0x535   : > { %16132 = vmatpush1.bf16.msra.mxu0 %v24410_v30  ;;  %17968 = vmatpush1.bf16.msra.mxu1 %v24413_v12  ;;  %v19731_v30 = vcombine.high %v699_v13, %v699_v13  ;;  %v24492_v12 = vld [vmem:[%s26411_s10 + $0x2844] ss:$16 sps:$4 sm:$0xff]  }
 0x536   : > { %16133 = vmatprep.subr.bf16.mxu0 %v24418_v46  ;;  %17969 = vmatprep.subr.bf16.mxu1 %v24421_v25  ;;  %v24495_v46 = vld [vmem:[%s26411_s10 + $0x284c] ss:$16 sps:$4 sm:$0xff]   ;;  %v19730_v25 = vcombine.low %v699_v13, %v699_v13  ;;  %v24552_v13 = vld [vmem:[%s26411_s10 + $0x2984] ss:$16 sps:$4 sm:$0xff]  }
 0x539   : > { %16134 = vmatpush1.bf16.msra.mxu0 %v24416_v45  ;;  %17970 = vmatpush1.bf16.msra.mxu1 %v24419_v42  ;;  %v28107_v45 = vld [vmem:[%s26413_s15 + $0xa0] sm:$0xff] }
 0x53a   : > { %16135 = vmatprep.subr.bf16.mxu0 %v24424_v60  ;;  %17971 = vmatprep.subr.bf16.mxu1 %v24427_v43  ;;  %v28110_v42 = vld [vmem:[%s26413_s15 + $0x1c0] sm:$0xff] }
 0x53b   : > { %v15961_v37 = vpop.f32.mrb[64].mxu0  ;;  %v17797_v39 = vpop.f32.mrb[64].mxu1  ;;  %v24490_v60 = vld [vmem:[%s26411_s10 + $0x2840] ss:$16 sps:$4 sm:$0xff]   ;;  %v24493_v43 = vld [vmem:[%s26411_s10 + $0x2848] ss:$16 sps:$4 sm:$0xff]  }
 0x53c   : > { %v28052_v40 = vadd.f32 %v15961_v37, %v27965_v19  ;;  %v28055_v34 = vadd.f32 %v17797_v39, %v27968_v20  ;;  %v15963_v22 = vpop.f32.mrb[65].mxu0  ;;  %v17799_v16 = vpop.f32.mrb[65].mxu1  ;;  %v24436_v20 = vld [vmem:[%s26411_s10 + $0x2724] ss:$16 sps:$4 sm:$0xff]   ;;  %v24499_v37 = vld [vmem:[%s26411_s10 + $0x2868] ss:$16 sps:$4 sm:$0xff]  }
 0x53d   : > { %v28058_v28 = vadd.f32 %v15963_v22, %v27971_v9  ;;  %v28061_v21 = vadd.f32 %v17799_v16, %v27974_v1  ;;  %16136 = vmatpush1.bf16.msra.mxu0 %v24422_v8  ;;  %17972 = vmatpush1.bf16.msra.mxu1 %v24425_v10  ;;  %v15965_v19 = vpop.f32.mrb[66].mxu0  ;;  %v17801_v49 = vpop.f32.mrb[66].mxu1  ;;  %v24439_v9 = vld [vmem:[%s26411_s10 + $0x272c] ss:$16 sps:$4 sm:$0xff]   ;;  %v24434_v1 = vld [vmem:[%s26411_s10 + $0x2720] ss:$16 sps:$4 sm:$0xff]  }
 0x53e   : > { %16137 = vmatprep.subr.bf16.mxu0 %v24430_v33  ;;  %17973 = vmatprep.subr.bf16.mxu1 %v24433_v35  ;;  %v15966_v44 = vpop.f32.mrb[67].mxu0  ;;  %v17802_v6 = vpop.f32.mrb[67].mxu1  ;;  %v24498_v8 = vld [vmem:[%s26411_s10 + $0x2864] ss:$16 sps:$4 sm:$0xff]   ;;  %v24501_v10 = vld [vmem:[%s26411_s10 + $0x286c] ss:$16 sps:$4 sm:$0xff]   ;;  %v19661_v33 = vcombine.high %v28107_v45, %v28110_v42 }
 0x53f   : > { %v24496_v35 = vld [vmem:[%s26411_s10 + $0x2860] ss:$16 sps:$4 sm:$0xff]   ;;  %v24504_v39 = vld [vmem:[%s26411_s10 + $0x2884] ss:$16 sps:$4 sm:$0xff]   ;;  %v24507_v22 = vld [vmem:[%s26411_s10 + $0x288c] ss:$16 sps:$4 sm:$0xff]  }
 0x540   : > { %v24502_v16 = vld [vmem:[%s26411_s10 + $0x2880] ss:$16 sps:$4 sm:$0xff]   ;;  %v24513_v19 = vld [vmem:[%s26411_s10 + $0x28ac] ss:$16 sps:$4 sm:$0xff]  }
 0x541   : > { %16138 = vmatpush1.bf16.msra.mxu0 %v24428_v62  ;;  %17974 = vmatpush1.bf16.msra.mxu1 %v24431_v31  ;;  %v24505_v62 = vld [vmem:[%s26411_s10 + $0x2888] ss:$16 sps:$4 sm:$0xff]   ;;  %v24510_v31 = vld [vmem:[%s26411_s10 + $0x28a4] ss:$16 sps:$4 sm:$0xff]   ;;  %v24508_v49 = vld [vmem:[%s26411_s10 + $0x28a0] ss:$16 sps:$4 sm:$0xff]  }
 0x542   : > { %16139 = vmatprep.subr.bf16.mxu0 %v24436_v20  ;;  %17975 = vmatprep.subr.bf16.mxu1 %v24439_v9  ;;  %v24511_v20 = vld [vmem:[%s26411_s10 + $0x28a8] ss:$16 sps:$4 sm:$0xff]   ;;  %v24516_v9 = vld [vmem:[%s26411_s10 + $0x28c4] ss:$16 sps:$4 sm:$0xff]   ;;  %v24519_v44 = vld [vmem:[%s26411_s10 + $0x28cc] ss:$16 sps:$4 sm:$0xff]  }
 0x543   : > { %v24514_v6 = vld [vmem:[%s26411_s10 + $0x28c0] ss:$16 sps:$4 sm:$0xff]  }
 0x545   : > { %16140 = vmatpush1.bf16.msra.mxu0 %v24434_v1  ;;  %17976 = vmatpush1.bf16.msra.mxu1 %v24437_v5  ;;  %v24517_v1 = vld [vmem:[%s26411_s10 + $0x28c8] ss:$16 sps:$4 sm:$0xff]   ;;  %v24522_v5 = vld [vmem:[%s26411_s10 + $0x28e4] ss:$16 sps:$4 sm:$0xff]  }
 0x546   : > { %16141 = vmatprep.subr.bf16.mxu0 %v24442_v2  ;;  %17977 = vmatprep.subr.bf16.mxu1 %v24445_v32  ;;  %v24525_v2 = vld [vmem:[%s26411_s10 + $0x28ec] ss:$16 sps:$4 sm:$0xff]   ;;  %v24520_v32 = vld [vmem:[%s26411_s10 + $0x28e0] ss:$16 sps:$4 sm:$0xff]  }
 0x549   : > { %16142 = vmatpush1.bf16.msra.mxu0 %v24440_v29  ;;  %17978 = vmatpush1.bf16.msra.mxu1 %v24443_v52  ;;  %v24523_v29 = vld [vmem:[%s26411_s10 + $0x28e8] ss:$16 sps:$4 sm:$0xff]   ;;  %v24528_v52 = vld [vmem:[%s26411_s10 + $0x2904] ss:$16 sps:$4 sm:$0xff]  }
 0x54a   : > { %16143 = vmatprep.subr.bf16.mxu0 %v24448_v54  ;;  %17979 = vmatprep.subr.bf16.mxu1 %v24451_v56  ;;  %v24531_v54 = vld [vmem:[%s26411_s10 + $0x290c] ss:$16 sps:$4 sm:$0xff]  }
 0x54d   : > { %16144 = vmatpush1.bf16.msra.mxu0 %v24446_v58  ;;  %17980 = vmatpush1.bf16.msra.mxu1 %v24449_v63 }
 0x54e   : > { %16145 = vmatprep.subr.bf16.mxu0 %v24454_v53  ;;  %17981 = vmatprep.subr.bf16.mxu1 %v24457_v38 }
 0x551   : > { %16146 = vmatpush1.bf16.msra.mxu0 %v24452_v36  ;;  %17982 = vmatpush1.bf16.msra.mxu1 %v24455_v47 }
 0x552   : > { %16147 = vmatprep.subr.bf16.mxu0 %v24460_v41  ;;  %17983 = vmatprep.subr.bf16.mxu1 %v24463_v11  ;;  %v24526_v11 = vld [vmem:[%s26411_s10 + $0x2900] ss:$16 sps:$4 sm:$0xff]  }
 0x555   : > { %16148 = vmatpush1.bf16.msra.mxu0 %v24458_v50  ;;  %17984 = vmatpush1.bf16.msra.mxu1 %v24461_v59  ;;  %v24529_v50 = vld [vmem:[%s26411_s10 + $0x2908] ss:$16 sps:$4 sm:$0xff]  }
 0x556   : > { %16149 = vmatprep.subr.bf16.mxu0 %v24466_v3  ;;  %17985 = vmatprep.subr.bf16.mxu1 %v24469_v27 }
 0x559   : > { %16150 = vmatpush1.bf16.msra.mxu0 %v24464_v26  ;;  %17986 = vmatpush1.bf16.msra.mxu1 %v24467_v23  ;;  %v24535_v26 = vld [vmem:[%s26411_s10 + $0x2928] ss:$16 sps:$4 sm:$0xff]   ;;  %v24540_v23 = vld [vmem:[%s26411_s10 + $0x2944] ss:$16 sps:$4 sm:$0xff]  }
 0x55a   : > { %16151 = vmatprep.subr.bf16.mxu0 %v24472_v51  ;;  %17987 = vmatprep.subr.bf16.mxu1 %v24475_v48  ;;  %v24543_v51 = vld [vmem:[%s26411_s10 + $0x294c] ss:$16 sps:$4 sm:$0xff]   ;;  %v24538_v48 = vld [vmem:[%s26411_s10 + $0x2940] ss:$16 sps:$4 sm:$0xff]  }
 0x55d   : > { %16152 = vmatpush1.bf16.msra.mxu0 %v24470_v61  ;;  %17988 = vmatpush1.bf16.msra.mxu1 %v24473_v14  ;;  %v24541_v61 = vld [vmem:[%s26411_s10 + $0x2948] ss:$16 sps:$4 sm:$0xff]   ;;  %v24546_v14 = vld [vmem:[%s26411_s10 + $0x2964] ss:$16 sps:$4 sm:$0xff]  }
 0x55e   : > { %16172 = vmatprep.subr.bf16.mxu0 %v24478_v15  ;;  %18008 = vmatprep.subr.bf16.mxu1 %v24481_v17  ;;  %v24549_v15 = vld [vmem:[%s26411_s10 + $0x296c] ss:$16 sps:$4 sm:$0xff]   ;;  %v24544_v17 = vld [vmem:[%s26411_s10 + $0x2960] ss:$16 sps:$4 sm:$0xff]  }
 0x560   : > { %16154 = vmatmul.mubr.bf16.vlgmr.msra.gmra.mrb[0].mxu0 %v19658_v18  ;;  %17990 = vmatmul.mubr.bf16.vlgmr.msra.gmra.mrb[0].mxu1 %v19658_v18  ;;  %v24547_v18 = vld [vmem:[%s26411_s10 + $0x2968] ss:$16 sps:$4 sm:$0xff]  }
 0x561   : > { %16173 = vmatpush1.bf16.msra.mxu0 %v24476_v57  ;;  %18009 = vmatpush1.bf16.msra.mxu1 %v24479_v55  ;;  %v24555_v57 = vld [vmem:[%s26411_s10 + $0x298c] ss:$16 sps:$4 sm:$0xff]   ;;  %v24550_v55 = vld [vmem:[%s26411_s10 + $0x2980] ss:$16 sps:$4 sm:$0xff]  }
 0x562   : > { %16174 = vmatprep.subr.bf16.mxu0 %v24484_v7  ;;  %18010 = vmatprep.subr.bf16.mxu1 %v24487_v0  ;;  %v24553_v7 = vld [vmem:[%s26411_s10 + $0x2988] ss:$16 sps:$4 sm:$0xff]   ;;  %v24558_v0 = vld [vmem:[%s26411_s10 + $0x29a4] ss:$16 sps:$4 sm:$0xff]  }
 0x563   : > { %16163 = vmatprep.mubr.bf16.mxu0 %v19731_v30  ;;  %17999 = vmatprep.mubr.bf16.mxu1 %v19731_v30  ;;  %v24561_v30 = vld [vmem:[%s26411_s10 + $0x29ac] ss:$16 sps:$4 sm:$0xff]  }
 0x565   : > { %16175 = vmatpush1.bf16.msra.mxu0 %v24482_v4  ;;  %18011 = vmatpush1.bf16.msra.mxu1 %v24485_v24  ;;  %v24556_v4 = vld [vmem:[%s26411_s10 + $0x29a0] ss:$16 sps:$4 sm:$0xff]   ;;  %v24559_v24 = vld [vmem:[%s26411_s10 + $0x29a8] ss:$16 sps:$4 sm:$0xff]  }
 0x566   : > { %16176 = vmatprep.subr.bf16.mxu0 %v24492_v12  ;;  %18012 = vmatprep.subr.bf16.mxu1 %v24495_v46  ;;  %v24564_v12 = vld [vmem:[%s26411_s10 + $0x29c4] ss:$16 sps:$4 sm:$0xff]   ;;  %v24567_v46 = vld [vmem:[%s26411_s10 + $0x29cc] ss:$16 sps:$4 sm:$0xff]  }
 0x568   : > { %16164 = vmatmul.mubr.bf16.gmra.mrb[80].mxu0 %v19730_v25  ;;  %18000 = vmatmul.mubr.bf16.gmra.mrb[80].mxu1 %v19730_v25  ;;  %v24562_v25 = vld [vmem:[%s26411_s10 + $0x29c0] ss:$16 sps:$4 sm:$0xff]  }
 0x569   : > { %16177 = vmatpush1.bf16.msra.mxu0 %v24490_v60  ;;  %18013 = vmatpush1.bf16.msra.mxu1 %v24493_v43  ;;  %v24565_v60 = vld [vmem:[%s26411_s10 + $0x29c8] ss:$16 sps:$4 sm:$0xff]   ;;  %v24570_v43 = vld [vmem:[%s26411_s10 + $0x29e4] ss:$16 sps:$4 sm:$0xff]  }
 0x56a   : > { %16178 = vmatprep.subr.bf16.mxu0 %v24498_v8  ;;  %18014 = vmatprep.subr.bf16.mxu1 %v24501_v10  ;;  %v24573_v8 = vld [vmem:[%s26411_s10 + $0x29ec] ss:$16 sps:$4 sm:$0xff]   ;;  %v24568_v10 = vld [vmem:[%s26411_s10 + $0x29e0] ss:$16 sps:$4 sm:$0xff]  }
 0x56b   : > { %16204 = vmatprep.mubr.bf16.mxu0 %v19661_v33  ;;  %18040 = vmatprep.mubr.bf16.mxu1 %v19661_v33  ;;  %v24571_v33 = vld [vmem:[%s26411_s10 + $0x29e8] ss:$16 sps:$4 sm:$0xff]  }
 0x56d   : > { %16179 = vmatpush1.bf16.msra.mxu0 %v24496_v35  ;;  %18015 = vmatpush1.bf16.msra.mxu1 %v24499_v37  ;;  %v24576_v35 = vld [vmem:[%s26411_s10 + $0x2a04] ss:$16 sps:$4 sm:$0xff]   ;;  %v24579_v37 = vld [vmem:[%s26411_s10 + $0x2a0c] ss:$16 sps:$4 sm:$0xff]  }
 0x56e   : > { %16180 = vmatprep.subr.bf16.mxu0 %v24504_v39  ;;  %18016 = vmatprep.subr.bf16.mxu1 %v24507_v22  ;;  %v19660_v39 = vcombine.low %v28107_v45, %v28110_v42  ;;  %v700_v22 = vld [vmem:[%s26413_s15 + $0x2e0] sm:$0x11]  ;;  %v24583_v42 = vld [vmem:[%s26411_s10 + $0x2a28] ss:$16 sps:$4 sm:$0xff]  }
 0x56f   : > { %v24580_v45 = vld [vmem:[%s26411_s10 + $0x2a20] ss:$16 sps:$4 sm:$0xff]  }
 0x571   : > { %16181 = vmatpush1.bf16.msra.mxu0 %v24502_v16  ;;  %18017 = vmatpush1.bf16.msra.mxu1 %v24505_v62  ;;  %v24574_v16 = vld [vmem:[%s26411_s10 + $0x2a00] ss:$16 sps:$4 sm:$0xff]   ;;  %v24577_v62 = vld [vmem:[%s26411_s10 + $0x2a08] ss:$16 sps:$4 sm:$0xff]  }
 0x572   : > { %16182 = vmatprep.subr.bf16.mxu0 %v24510_v31  ;;  %18018 = vmatprep.subr.bf16.mxu1 %v24513_v19  ;;  %v24582_v31 = vld [vmem:[%s26411_s10 + $0x2a24] ss:$16 sps:$4 sm:$0xff]   ;;  %v24585_v19 = vld [vmem:[%s26411_s10 + $0x2a2c] ss:$16 sps:$4 sm:$0xff]  }
 0x575   : > { %16183 = vmatpush1.bf16.msra.mxu0 %v24508_v49  ;;  %18019 = vmatpush1.bf16.msra.mxu1 %v24511_v20  ;;  %v19733_v49 = vcombine.high %v700_v22, %v700_v22  ;;  %v24590_v20 = vld [vmem:[%s26411_s10 + $0x2a44] ss:$16 sps:$4 sm:$0xff]  }
 0x576   : > { %16184 = vmatprep.subr.bf16.mxu0 %v24516_v9  ;;  %18020 = vmatprep.subr.bf16.mxu1 %v24519_v44  ;;  %v24593_v9 = vld [vmem:[%s26411_s10 + $0x2a4c] ss:$16 sps:$4 sm:$0xff]   ;;  %v19732_v44 = vcombine.low %v700_v22, %v700_v22  ;;  %v24650_v22 = vld [vmem:[%s26411_s10 + $0x2b84] ss:$16 sps:$4 sm:$0xff]  }
 0x579   : > { %16185 = vmatpush1.bf16.msra.mxu0 %v24514_v6  ;;  %18021 = vmatpush1.bf16.msra.mxu1 %v24517_v1  ;;  %v28194_v6 = vld [vmem:[%s26413_s15 + $0xa8] sm:$0xff] }
 0x57a   : > { %16186 = vmatprep.subr.bf16.mxu0 %v24522_v5  ;;  %18022 = vmatprep.subr.bf16.mxu1 %v24525_v2  ;;  %v28197_v1 = vld [vmem:[%s26413_s15 + $0x1c8] sm:$0xff] }
 0x57b   : > { %v16012_v56 = vpop.f32.mrb[68].mxu0  ;;  %v17848_v58 = vpop.f32.mrb[68].mxu1  ;;  %v24588_v5 = vld [vmem:[%s26411_s10 + $0x2a40] ss:$16 sps:$4 sm:$0xff]   ;;  %v24591_v2 = vld [vmem:[%s26411_s10 + $0x2a48] ss:$16 sps:$4 sm:$0xff]  }
 0x57c   : > { %v28139_v63 = vadd.f32 %v16012_v56, %v28052_v40  ;;  %v28142_v53 = vadd.f32 %v17848_v58, %v28055_v34  ;;  %v16014_v38 = vpop.f32.mrb[69].mxu0  ;;  %v17850_v36 = vpop.f32.mrb[69].mxu1  ;;  %v24534_v34 = vld [vmem:[%s26411_s10 + $0x2924] ss:$16 sps:$4 sm:$0xff]   ;;  %v24597_v56 = vld [vmem:[%s26411_s10 + $0x2a68] ss:$16 sps:$4 sm:$0xff]  }
 0x57d   : > { %v28145_v47 = vadd.f32 %v16014_v38, %v28058_v28  ;;  %v28148_v41 = vadd.f32 %v17850_v36, %v28061_v21  ;;  %16187 = vmatpush1.bf16.msra.mxu0 %v24520_v32  ;;  %18023 = vmatpush1.bf16.msra.mxu1 %v24523_v29  ;;  %v16016_v40 = vpop.f32.mrb[70].mxu0  ;;  %v17852_v59 = vpop.f32.mrb[70].mxu1  ;;  %v24537_v28 = vld [vmem:[%s26411_s10 + $0x292c] ss:$16 sps:$4 sm:$0xff]   ;;  %v24532_v21 = vld [vmem:[%s26411_s10 + $0x2920] ss:$16 sps:$4 sm:$0xff]  }
 0x57e   : > { %16188 = vmatprep.subr.bf16.mxu0 %v24528_v52  ;;  %18024 = vmatprep.subr.bf16.mxu1 %v24531_v54  ;;  %v16017_v3 = vpop.f32.mrb[71].mxu0  ;;  %v17853_v27 = vpop.f32.mrb[71].mxu1  ;;  %v24596_v32 = vld [vmem:[%s26411_s10 + $0x2a64] ss:$16 sps:$4 sm:$0xff]   ;;  %v24599_v29 = vld [vmem:[%s26411_s10 + $0x2a6c] ss:$16 sps:$4 sm:$0xff]   ;;  %v19663_v52 = vcombine.high %v28194_v6, %v28197_v1 }
 0x57f   : > { %v24594_v54 = vld [vmem:[%s26411_s10 + $0x2a60] ss:$16 sps:$4 sm:$0xff]   ;;  %v24602_v58 = vld [vmem:[%s26411_s10 + $0x2a84] ss:$16 sps:$4 sm:$0xff]   ;;  %v24605_v38 = vld [vmem:[%s26411_s10 + $0x2a8c] ss:$16 sps:$4 sm:$0xff]  }
 0x580   : > { %v24600_v36 = vld [vmem:[%s26411_s10 + $0x2a80] ss:$16 sps:$4 sm:$0xff]   ;;  %v24611_v40 = vld [vmem:[%s26411_s10 + $0x2aac] ss:$16 sps:$4 sm:$0xff]  }
 0x581   : > { %16189 = vmatpush1.bf16.msra.mxu0 %v24526_v11  ;;  %18025 = vmatpush1.bf16.msra.mxu1 %v24529_v50  ;;  %v24603_v11 = vld [vmem:[%s26411_s10 + $0x2a88] ss:$16 sps:$4 sm:$0xff]   ;;  %v24608_v50 = vld [vmem:[%s26411_s10 + $0x2aa4] ss:$16 sps:$4 sm:$0xff]   ;;  %v24606_v59 = vld [vmem:[%s26411_s10 + $0x2aa0] ss:$16 sps:$4 sm:$0xff]  }
 0x582   : > { %16190 = vmatprep.subr.bf16.mxu0 %v24534_v34  ;;  %18026 = vmatprep.subr.bf16.mxu1 %v24537_v28  ;;  %v24609_v34 = vld [vmem:[%s26411_s10 + $0x2aa8] ss:$16 sps:$4 sm:$0xff]   ;;  %v24614_v28 = vld [vmem:[%s26411_s10 + $0x2ac4] ss:$16 sps:$4 sm:$0xff]   ;;  %v24617_v3 = vld [vmem:[%s26411_s10 + $0x2acc] ss:$16 sps:$4 sm:$0xff]  }
 0x583   : > { %v24612_v27 = vld [vmem:[%s26411_s10 + $0x2ac0] ss:$16 sps:$4 sm:$0xff]  }
 0x585   : > { %16191 = vmatpush1.bf16.msra.mxu0 %v24532_v21  ;;  %18027 = vmatpush1.bf16.msra.mxu1 %v24535_v26  ;;  %v24615_v21 = vld [vmem:[%s26411_s10 + $0x2ac8] ss:$16 sps:$4 sm:$0xff]   ;;  %v24620_v26 = vld [vmem:[%s26411_s10 + $0x2ae4] ss:$16 sps:$4 sm:$0xff]  }
 0x586   : > { %16192 = vmatprep.subr.bf16.mxu0 %v24540_v23  ;;  %18028 = vmatprep.subr.bf16.mxu1 %v24543_v51  ;;  %v24623_v23 = vld [vmem:[%s26411_s10 + $0x2aec] ss:$16 sps:$4 sm:$0xff]   ;;  %v24618_v51 = vld [vmem:[%s26411_s10 + $0x2ae0] ss:$16 sps:$4 sm:$0xff]  }
 0x589   : > { %16193 = vmatpush1.bf16.msra.mxu0 %v24538_v48  ;;  %18029 = vmatpush1.bf16.msra.mxu1 %v24541_v61  ;;  %v24621_v48 = vld [vmem:[%s26411_s10 + $0x2ae8] ss:$16 sps:$4 sm:$0xff]   ;;  %v24626_v61 = vld [vmem:[%s26411_s10 + $0x2b04] ss:$16 sps:$4 sm:$0xff]  }
 0x58a   : > { %16194 = vmatprep.subr.bf16.mxu0 %v24546_v14  ;;  %18030 = vmatprep.subr.bf16.mxu1 %v24549_v15  ;;  %v24629_v14 = vld [vmem:[%s26411_s10 + $0x2b0c] ss:$16 sps:$4 sm:$0xff]  }
 0x58d   : > { %16195 = vmatpush1.bf16.msra.mxu0 %v24544_v17  ;;  %18031 = vmatpush1.bf16.msra.mxu1 %v24547_v18 }
 0x58e   : > { %16196 = vmatprep.subr.bf16.mxu0 %v24552_v13  ;;  %18032 = vmatprep.subr.bf16.mxu1 %v24555_v57 }
 0x591   : > { %16197 = vmatpush1.bf16.msra.mxu0 %v24550_v55  ;;  %18033 = vmatpush1.bf16.msra.mxu1 %v24553_v7 }
 0x592   : > { %16198 = vmatprep.subr.bf16.mxu0 %v24558_v0  ;;  %18034 = vmatprep.subr.bf16.mxu1 %v24561_v30  ;;  %v24624_v30 = vld [vmem:[%s26411_s10 + $0x2b00] ss:$16 sps:$4 sm:$0xff]  }
 0x595   : > { %16199 = vmatpush1.bf16.msra.mxu0 %v24556_v4  ;;  %18035 = vmatpush1.bf16.msra.mxu1 %v24559_v24  ;;  %v24627_v4 = vld [vmem:[%s26411_s10 + $0x2b08] ss:$16 sps:$4 sm:$0xff]  }
 0x596   : > { %16200 = vmatprep.subr.bf16.mxu0 %v24564_v12  ;;  %18036 = vmatprep.subr.bf16.mxu1 %v24567_v46 }
 0x599   : > { %16201 = vmatpush1.bf16.msra.mxu0 %v24562_v25  ;;  %18037 = vmatpush1.bf16.msra.mxu1 %v24565_v60  ;;  %v24633_v25 = vld [vmem:[%s26411_s10 + $0x2b28] ss:$16 sps:$4 sm:$0xff]   ;;  %v24638_v60 = vld [vmem:[%s26411_s10 + $0x2b44] ss:$16 sps:$4 sm:$0xff]  }
 0x59a   : > { %16202 = vmatprep.subr.bf16.mxu0 %v24570_v43  ;;  %18038 = vmatprep.subr.bf16.mxu1 %v24573_v8  ;;  %v24641_v43 = vld [vmem:[%s26411_s10 + $0x2b4c] ss:$16 sps:$4 sm:$0xff]   ;;  %v24636_v8 = vld [vmem:[%s26411_s10 + $0x2b40] ss:$16 sps:$4 sm:$0xff]  }
 0x59d   : > { %16203 = vmatpush1.bf16.msra.mxu0 %v24568_v10  ;;  %18039 = vmatpush1.bf16.msra.mxu1 %v24571_v33  ;;  %v24639_v10 = vld [vmem:[%s26411_s10 + $0x2b48] ss:$16 sps:$4 sm:$0xff]   ;;  %v24644_v33 = vld [vmem:[%s26411_s10 + $0x2b64] ss:$16 sps:$4 sm:$0xff]  }
 0x59e   : > { %16223 = vmatprep.subr.bf16.mxu0 %v24576_v35  ;;  %18059 = vmatprep.subr.bf16.mxu1 %v24579_v37  ;;  %v24647_v35 = vld [vmem:[%s26411_s10 + $0x2b6c] ss:$16 sps:$4 sm:$0xff]   ;;  %v24642_v37 = vld [vmem:[%s26411_s10 + $0x2b60] ss:$16 sps:$4 sm:$0xff]  }
 0x5a0   : > { %16205 = vmatmul.mubr.bf16.vlgmr.msra.gmra.mrb[0].mxu0 %v19660_v39  ;;  %18041 = vmatmul.mubr.bf16.vlgmr.msra.gmra.mrb[0].mxu1 %v19660_v39  ;;  %v24645_v39 = vld [vmem:[%s26411_s10 + $0x2b68] ss:$16 sps:$4 sm:$0xff]  }
 0x5a1   : > { %16224 = vmatpush1.bf16.msra.mxu0 %v24574_v16  ;;  %18060 = vmatpush1.bf16.msra.mxu1 %v24577_v62  ;;  %v24653_v16 = vld [vmem:[%s26411_s10 + $0x2b8c] ss:$16 sps:$4 sm:$0xff]   ;;  %v24648_v62 = vld [vmem:[%s26411_s10 + $0x2b80] ss:$16 sps:$4 sm:$0xff]  }
 0x5a2   : > { %16225 = vmatprep.subr.bf16.mxu0 %v24582_v31  ;;  %18061 = vmatprep.subr.bf16.mxu1 %v24585_v19  ;;  %v24651_v31 = vld [vmem:[%s26411_s10 + $0x2b88] ss:$16 sps:$4 sm:$0xff]   ;;  %v24656_v19 = vld [vmem:[%s26411_s10 + $0x2ba4] ss:$16 sps:$4 sm:$0xff]  }
 0x5a3   : > { %16214 = vmatprep.mubr.bf16.mxu0 %v19733_v49  ;;  %18050 = vmatprep.mubr.bf16.mxu1 %v19733_v49  ;;  %v24659_v49 = vld [vmem:[%s26411_s10 + $0x2bac] ss:$16 sps:$4 sm:$0xff]  }
 0x5a5   : > { %16226 = vmatpush1.bf16.msra.mxu0 %v24580_v45  ;;  %18062 = vmatpush1.bf16.msra.mxu1 %v24583_v42  ;;  %v24654_v45 = vld [vmem:[%s26411_s10 + $0x2ba0] ss:$16 sps:$4 sm:$0xff]   ;;  %v24657_v42 = vld [vmem:[%s26411_s10 + $0x2ba8] ss:$16 sps:$4 sm:$0xff]  }
 0x5a6   : > { %16227 = vmatprep.subr.bf16.mxu0 %v24590_v20  ;;  %18063 = vmatprep.subr.bf16.mxu1 %v24593_v9  ;;  %v24662_v20 = vld [vmem:[%s26411_s10 + $0x2bc4] ss:$16 sps:$4 sm:$0xff]   ;;  %v24665_v9 = vld [vmem:[%s26411_s10 + $0x2bcc] ss:$16 sps:$4 sm:$0xff]  }
 0x5a8   : > { %16215 = vmatmul.mubr.bf16.gmra.mrb[84].mxu0 %v19732_v44  ;;  %18051 = vmatmul.mubr.bf16.gmra.mrb[84].mxu1 %v19732_v44  ;;  %v24660_v44 = vld [vmem:[%s26411_s10 + $0x2bc0] ss:$16 sps:$4 sm:$0xff]  }
 0x5a9   : > { %16228 = vmatpush1.bf16.msra.mxu0 %v24588_v5  ;;  %18064 = vmatpush1.bf16.msra.mxu1 %v24591_v2  ;;  %v24663_v5 = vld [vmem:[%s26411_s10 + $0x2bc8] ss:$16 sps:$4 sm:$0xff]   ;;  %v24668_v2 = vld [vmem:[%s26411_s10 + $0x2be4] ss:$16 sps:$4 sm:$0xff]  }
 0x5aa   : > { %16229 = vmatprep.subr.bf16.mxu0 %v24596_v32  ;;  %18065 = vmatprep.subr.bf16.mxu1 %v24599_v29  ;;  %v24671_v32 = vld [vmem:[%s26411_s10 + $0x2bec] ss:$16 sps:$4 sm:$0xff]   ;;  %v24666_v29 = vld [vmem:[%s26411_s10 + $0x2be0] ss:$16 sps:$4 sm:$0xff]  }
 0x5ab   : > { %16255 = vmatprep.mubr.bf16.mxu0 %v19663_v52  ;;  %18091 = vmatprep.mubr.bf16.mxu1 %v19663_v52  ;;  %v24669_v52 = vld [vmem:[%s26411_s10 + $0x2be8] ss:$16 sps:$4 sm:$0xff]  }
 0x5ad   : > { %16230 = vmatpush1.bf16.msra.mxu0 %v24594_v54  ;;  %18066 = vmatpush1.bf16.msra.mxu1 %v24597_v56  ;;  %v24674_v54 = vld [vmem:[%s26411_s10 + $0x2c04] ss:$16 sps:$4 sm:$0xff]   ;;  %v24677_v56 = vld [vmem:[%s26411_s10 + $0x2c0c] ss:$16 sps:$4 sm:$0xff]  }
 0x5ae   : > { %16231 = vmatprep.subr.bf16.mxu0 %v24602_v58  ;;  %18067 = vmatprep.subr.bf16.mxu1 %v24605_v38  ;;  %v19662_v58 = vcombine.low %v28194_v6, %v28197_v1  ;;  %v701_v38 = vld [vmem:[%s26413_s15 + $0x2e8] sm:$0x11]  ;;  %v24678_v6 = vld [vmem:[%s26411_s10 + $0x2c20] ss:$16 sps:$4 sm:$0xff]  }
 0x5af   : > { %v24681_v1 = vld [vmem:[%s26411_s10 + $0x2c28] ss:$16 sps:$4 sm:$0xff]  }
 0x5b1   : > { %16232 = vmatpush1.bf16.msra.mxu0 %v24600_v36  ;;  %18068 = vmatpush1.bf16.msra.mxu1 %v24603_v11  ;;  %v24672_v36 = vld [vmem:[%s26411_s10 + $0x2c00] ss:$16 sps:$4 sm:$0xff]   ;;  %v24675_v11 = vld [vmem:[%s26411_s10 + $0x2c08] ss:$16 sps:$4 sm:$0xff]  }
 0x5b2   : > { %16233 = vmatprep.subr.bf16.mxu0 %v24608_v50  ;;  %18069 = vmatprep.subr.bf16.mxu1 %v24611_v40  ;;  %v24680_v50 = vld [vmem:[%s26411_s10 + $0x2c24] ss:$16 sps:$4 sm:$0xff]   ;;  %v24683_v40 = vld [vmem:[%s26411_s10 + $0x2c2c] ss:$16 sps:$4 sm:$0xff]  }
 0x5b5   : > { %16234 = vmatpush1.bf16.msra.mxu0 %v24606_v59  ;;  %18070 = vmatpush1.bf16.msra.mxu1 %v24609_v34  ;;  %v19735_v59 = vcombine.high %v701_v38, %v701_v38  ;;  %v24688_v34 = vld [vmem:[%s26411_s10 + $0x2c44] ss:$16 sps:$4 sm:$0xff]  }
 0x5b6   : > { %16235 = vmatprep.subr.bf16.mxu0 %v24614_v28  ;;  %18071 = vmatprep.subr.bf16.mxu1 %v24617_v3  ;;  %v24691_v28 = vld [vmem:[%s26411_s10 + $0x2c4c] ss:$16 sps:$4 sm:$0xff]   ;;  %v19734_v3 = vcombine.low %v701_v38, %v701_v38  ;;  %v24748_v38 = vld [vmem:[%s26411_s10 + $0x2d84] ss:$16 sps:$4 sm:$0xff]  }
 0x5b9   : > { %16236 = vmatpush1.bf16.msra.mxu0 %v24612_v27  ;;  %18072 = vmatpush1.bf16.msra.mxu1 %v24615_v21  ;;  %v28281_v27 = vld [vmem:[%s26413_s15 + $0xb0] sm:$0xff] }
 0x5ba   : > { %16237 = vmatprep.subr.bf16.mxu0 %v24620_v26  ;;  %18073 = vmatprep.subr.bf16.mxu1 %v24623_v23  ;;  %v28284_v21 = vld [vmem:[%s26413_s15 + $0x1d0] sm:$0xff] }
 0x5bb   : > { %v16063_v15 = vpop.f32.mrb[72].mxu0  ;;  %v17899_v17 = vpop.f32.mrb[72].mxu1  ;;  %v24686_v26 = vld [vmem:[%s26411_s10 + $0x2c40] ss:$16 sps:$4 sm:$0xff]   ;;  %v24689_v23 = vld [vmem:[%s26411_s10 + $0x2c48] ss:$16 sps:$4 sm:$0xff]  }
 0x5bc   : > { %v28226_v18 = vadd.f32 %v16063_v15, %v28139_v63  ;;  %v28229_v13 = vadd.f32 %v17899_v17, %v28142_v53  ;;  %v16065_v57 = vpop.f32.mrb[73].mxu0  ;;  %v17901_v55 = vpop.f32.mrb[73].mxu1  ;;  %v24632_v53 = vld [vmem:[%s26411_s10 + $0x2b24] ss:$16 sps:$4 sm:$0xff]   ;;  %v24695_v15 = vld [vmem:[%s26411_s10 + $0x2c68] ss:$16 sps:$4 sm:$0xff]  }
 0x5bd   : > { %v28232_v7 = vadd.f32 %v16065_v57, %v28145_v47  ;;  %v28235_v0 = vadd.f32 %v17901_v55, %v28148_v41  ;;  %16238 = vmatpush1.bf16.msra.mxu0 %v24618_v51  ;;  %18074 = vmatpush1.bf16.msra.mxu1 %v24621_v48  ;;  %v16067_v63 = vpop.f32.mrb[74].mxu0  ;;  %v17903_v24 = vpop.f32.mrb[74].mxu1  ;;  %v24635_v47 = vld [vmem:[%s26411_s10 + $0x2b2c] ss:$16 sps:$4 sm:$0xff]   ;;  %v24630_v41 = vld [vmem:[%s26411_s10 + $0x2b20] ss:$16 sps:$4 sm:$0xff]  }
 0x5be   : > { %16239 = vmatprep.subr.bf16.mxu0 %v24626_v61  ;;  %18075 = vmatprep.subr.bf16.mxu1 %v24629_v14  ;;  %v16068_v12 = vpop.f32.mrb[75].mxu0  ;;  %v17904_v46 = vpop.f32.mrb[75].mxu1  ;;  %v24694_v51 = vld [vmem:[%s26411_s10 + $0x2c64] ss:$16 sps:$4 sm:$0xff]   ;;  %v24697_v48 = vld [vmem:[%s26411_s10 + $0x2c6c] ss:$16 sps:$4 sm:$0xff]   ;;  %v19665_v61 = vcombine.high %v28281_v27, %v28284_v21 }
 0x5bf   : > { %v24692_v14 = vld [vmem:[%s26411_s10 + $0x2c60] ss:$16 sps:$4 sm:$0xff]   ;;  %v24700_v17 = vld [vmem:[%s26411_s10 + $0x2c84] ss:$16 sps:$4 sm:$0xff]   ;;  %v24703_v57 = vld [vmem:[%s26411_s10 + $0x2c8c] ss:$16 sps:$4 sm:$0xff]  }
 0x5c0   : > { %v24698_v55 = vld [vmem:[%s26411_s10 + $0x2c80] ss:$16 sps:$4 sm:$0xff]   ;;  %v24709_v63 = vld [vmem:[%s26411_s10 + $0x2cac] ss:$16 sps:$4 sm:$0xff]  }
 0x5c1   : > { %16240 = vmatpush1.bf16.msra.mxu0 %v24624_v30  ;;  %18076 = vmatpush1.bf16.msra.mxu1 %v24627_v4  ;;  %v24701_v30 = vld [vmem:[%s26411_s10 + $0x2c88] ss:$16 sps:$4 sm:$0xff]   ;;  %v24706_v4 = vld [vmem:[%s26411_s10 + $0x2ca4] ss:$16 sps:$4 sm:$0xff]   ;;  %v24704_v24 = vld [vmem:[%s26411_s10 + $0x2ca0] ss:$16 sps:$4 sm:$0xff]  }
 0x5c2   : > { %16241 = vmatprep.subr.bf16.mxu0 %v24632_v53  ;;  %18077 = vmatprep.subr.bf16.mxu1 %v24635_v47  ;;  %v24707_v53 = vld [vmem:[%s26411_s10 + $0x2ca8] ss:$16 sps:$4 sm:$0xff]   ;;  %v24712_v47 = vld [vmem:[%s26411_s10 + $0x2cc4] ss:$16 sps:$4 sm:$0xff]   ;;  %v24715_v12 = vld [vmem:[%s26411_s10 + $0x2ccc] ss:$16 sps:$4 sm:$0xff]  }
 0x5c3   : > { %v24710_v46 = vld [vmem:[%s26411_s10 + $0x2cc0] ss:$16 sps:$4 sm:$0xff]  }
 0x5c5   : > { %16242 = vmatpush1.bf16.msra.mxu0 %v24630_v41  ;;  %18078 = vmatpush1.bf16.msra.mxu1 %v24633_v25  ;;  %v24713_v41 = vld [vmem:[%s26411_s10 + $0x2cc8] ss:$16 sps:$4 sm:$0xff]   ;;  %v24718_v25 = vld [vmem:[%s26411_s10 + $0x2ce4] ss:$16 sps:$4 sm:$0xff]  }
 0x5c6   : > { %16243 = vmatprep.subr.bf16.mxu0 %v24638_v60  ;;  %18079 = vmatprep.subr.bf16.mxu1 %v24641_v43  ;;  %v24721_v60 = vld [vmem:[%s26411_s10 + $0x2cec] ss:$16 sps:$4 sm:$0xff]   ;;  %v24716_v43 = vld [vmem:[%s26411_s10 + $0x2ce0] ss:$16 sps:$4 sm:$0xff]  }
 0x5c9   : > { %16244 = vmatpush1.bf16.msra.mxu0 %v24636_v8  ;;  %18080 = vmatpush1.bf16.msra.mxu1 %v24639_v10  ;;  %v24719_v8 = vld [vmem:[%s26411_s10 + $0x2ce8] ss:$16 sps:$4 sm:$0xff]   ;;  %v24724_v10 = vld [vmem:[%s26411_s10 + $0x2d04] ss:$16 sps:$4 sm:$0xff]  }
 0x5ca   : > { %16245 = vmatprep.subr.bf16.mxu0 %v24644_v33  ;;  %18081 = vmatprep.subr.bf16.mxu1 %v24647_v35  ;;  %v24727_v33 = vld [vmem:[%s26411_s10 + $0x2d0c] ss:$16 sps:$4 sm:$0xff]  }
 0x5cd   : > { %16246 = vmatpush1.bf16.msra.mxu0 %v24642_v37  ;;  %18082 = vmatpush1.bf16.msra.mxu1 %v24645_v39 }
 0x5ce   : > { %16247 = vmatprep.subr.bf16.mxu0 %v24650_v22  ;;  %18083 = vmatprep.subr.bf16.mxu1 %v24653_v16 }
 0x5d1   : > { %16248 = vmatpush1.bf16.msra.mxu0 %v24648_v62  ;;  %18084 = vmatpush1.bf16.msra.mxu1 %v24651_v31 }
 0x5d2   : > { %16249 = vmatprep.subr.bf16.mxu0 %v24656_v19  ;;  %18085 = vmatprep.subr.bf16.mxu1 %v24659_v49  ;;  %v24722_v49 = vld [vmem:[%s26411_s10 + $0x2d00] ss:$16 sps:$4 sm:$0xff]  }
 0x5d5   : > { %16250 = vmatpush1.bf16.msra.mxu0 %v24654_v45  ;;  %18086 = vmatpush1.bf16.msra.mxu1 %v24657_v42  ;;  %v24725_v45 = vld [vmem:[%s26411_s10 + $0x2d08] ss:$16 sps:$4 sm:$0xff]  }
 0x5d6   : > { %16251 = vmatprep.subr.bf16.mxu0 %v24662_v20  ;;  %18087 = vmatprep.subr.bf16.mxu1 %v24665_v9 }
 0x5d9   : > { %16252 = vmatpush1.bf16.msra.mxu0 %v24660_v44  ;;  %18088 = vmatpush1.bf16.msra.mxu1 %v24663_v5  ;;  %v24731_v44 = vld [vmem:[%s26411_s10 + $0x2d28] ss:$16 sps:$4 sm:$0xff]   ;;  %v24736_v5 = vld [vmem:[%s26411_s10 + $0x2d44] ss:$16 sps:$4 sm:$0xff]  }
 0x5da   : > { %16253 = vmatprep.subr.bf16.mxu0 %v24668_v2  ;;  %18089 = vmatprep.subr.bf16.mxu1 %v24671_v32  ;;  %v24739_v2 = vld [vmem:[%s26411_s10 + $0x2d4c] ss:$16 sps:$4 sm:$0xff]   ;;  %v24734_v32 = vld [vmem:[%s26411_s10 + $0x2d40] ss:$16 sps:$4 sm:$0xff]  }
 0x5dd   : > { %16254 = vmatpush1.bf16.msra.mxu0 %v24666_v29  ;;  %18090 = vmatpush1.bf16.msra.mxu1 %v24669_v52  ;;  %v24737_v29 = vld [vmem:[%s26411_s10 + $0x2d48] ss:$16 sps:$4 sm:$0xff]   ;;  %v24742_v52 = vld [vmem:[%s26411_s10 + $0x2d64] ss:$16 sps:$4 sm:$0xff]  }
 0x5de   : > { %16274 = vmatprep.subr.bf16.mxu0 %v24674_v54  ;;  %18110 = vmatprep.subr.bf16.mxu1 %v24677_v56  ;;  %v24745_v54 = vld [vmem:[%s26411_s10 + $0x2d6c] ss:$16 sps:$4 sm:$0xff]   ;;  %v24740_v56 = vld [vmem:[%s26411_s10 + $0x2d60] ss:$16 sps:$4 sm:$0xff]  }
 0x5e0   : > { %16256 = vmatmul.mubr.bf16.vlgmr.msra.gmra.mrb[0].mxu0 %v19662_v58  ;;  %18092 = vmatmul.mubr.bf16.vlgmr.msra.gmra.mrb[0].mxu1 %v19662_v58  ;;  %v24743_v58 = vld [vmem:[%s26411_s10 + $0x2d68] ss:$16 sps:$4 sm:$0xff]  }
 0x5e1   : > { %16275 = vmatpush1.bf16.msra.mxu0 %v24672_v36  ;;  %18111 = vmatpush1.bf16.msra.mxu1 %v24675_v11  ;;  %v24751_v36 = vld [vmem:[%s26411_s10 + $0x2d8c] ss:$16 sps:$4 sm:$0xff]   ;;  %v24746_v11 = vld [vmem:[%s26411_s10 + $0x2d80] ss:$16 sps:$4 sm:$0xff]  }
 0x5e2   : > { %16276 = vmatprep.subr.bf16.mxu0 %v24680_v50  ;;  %18112 = vmatprep.subr.bf16.mxu1 %v24683_v40  ;;  %v24749_v50 = vld [vmem:[%s26411_s10 + $0x2d88] ss:$16 sps:$4 sm:$0xff]   ;;  %v24754_v40 = vld [vmem:[%s26411_s10 + $0x2da4] ss:$16 sps:$4 sm:$0xff]  }
 0x5e3   : > { %16265 = vmatprep.mubr.bf16.mxu0 %v19735_v59  ;;  %18101 = vmatprep.mubr.bf16.mxu1 %v19735_v59  ;;  %v24757_v59 = vld [vmem:[%s26411_s10 + $0x2dac] ss:$16 sps:$4 sm:$0xff]  }
 0x5e5   : > { %16277 = vmatpush1.bf16.msra.mxu0 %v24678_v6  ;;  %18113 = vmatpush1.bf16.msra.mxu1 %v24681_v1  ;;  %v24752_v6 = vld [vmem:[%s26411_s10 + $0x2da0] ss:$16 sps:$4 sm:$0xff]   ;;  %v24755_v1 = vld [vmem:[%s26411_s10 + $0x2da8] ss:$16 sps:$4 sm:$0xff]  }
 0x5e6   : > { %16278 = vmatprep.subr.bf16.mxu0 %v24688_v34  ;;  %18114 = vmatprep.subr.bf16.mxu1 %v24691_v28  ;;  %v24760_v34 = vld [vmem:[%s26411_s10 + $0x2dc4] ss:$16 sps:$4 sm:$0xff]   ;;  %v24763_v28 = vld [vmem:[%s26411_s10 + $0x2dcc] ss:$16 sps:$4 sm:$0xff]  }
 0x5e8   : > { %16266 = vmatmul.mubr.bf16.gmra.mrb[88].mxu0 %v19734_v3  ;;  %18102 = vmatmul.mubr.bf16.gmra.mrb[88].mxu1 %v19734_v3  ;;  %v24758_v3 = vld [vmem:[%s26411_s10 + $0x2dc0] ss:$16 sps:$4 sm:$0xff]  }
 0x5e9   : > { %16279 = vmatpush1.bf16.msra.mxu0 %v24686_v26  ;;  %18115 = vmatpush1.bf16.msra.mxu1 %v24689_v23  ;;  %v24761_v26 = vld [vmem:[%s26411_s10 + $0x2dc8] ss:$16 sps:$4 sm:$0xff]   ;;  %v24766_v23 = vld [vmem:[%s26411_s10 + $0x2de4] ss:$16 sps:$4 sm:$0xff]  }
 0x5ea   : > { %16280 = vmatprep.subr.bf16.mxu0 %v24694_v51  ;;  %18116 = vmatprep.subr.bf16.mxu1 %v24697_v48  ;;  %v24769_v51 = vld [vmem:[%s26411_s10 + $0x2dec] ss:$16 sps:$4 sm:$0xff]   ;;  %v24764_v48 = vld [vmem:[%s26411_s10 + $0x2de0] ss:$16 sps:$4 sm:$0xff]  }
 0x5eb   : > { %16306 = vmatprep.mubr.bf16.mxu0 %v19665_v61  ;;  %18142 = vmatprep.mubr.bf16.mxu1 %v19665_v61  ;;  %v24767_v61 = vld [vmem:[%s26411_s10 + $0x2de8] ss:$16 sps:$4 sm:$0xff]  }
 0x5ed   : > { %16281 = vmatpush1.bf16.msra.mxu0 %v24692_v14  ;;  %18117 = vmatpush1.bf16.msra.mxu1 %v24695_v15  ;;  %v24772_v14 = vld [vmem:[%s26411_s10 + $0x2e04] ss:$16 sps:$4 sm:$0xff]   ;;  %v24775_v15 = vld [vmem:[%s26411_s10 + $0x2e0c] ss:$16 sps:$4 sm:$0xff]  }
 0x5ee   : > { %16282 = vmatprep.subr.bf16.mxu0 %v24700_v17  ;;  %18118 = vmatprep.subr.bf16.mxu1 %v24703_v57  ;;  %v19664_v17 = vcombine.low %v28281_v27, %v28284_v21  ;;  %v702_v57 = vld [vmem:[%s26413_s15 + $0x2f0] sm:$0x11]  ;;  %v24779_v21 = vld [vmem:[%s26411_s10 + $0x2e28] ss:$16 sps:$4 sm:$0xff]  }
 0x5ef   : > { %v24776_v27 = vld [vmem:[%s26411_s10 + $0x2e20] ss:$16 sps:$4 sm:$0xff]  }
 0x5f1   : > { %16283 = vmatpush1.bf16.msra.mxu0 %v24698_v55  ;;  %18119 = vmatpush1.bf16.msra.mxu1 %v24701_v30  ;;  %v24770_v55 = vld [vmem:[%s26411_s10 + $0x2e00] ss:$16 sps:$4 sm:$0xff]   ;;  %v24773_v30 = vld [vmem:[%s26411_s10 + $0x2e08] ss:$16 sps:$4 sm:$0xff]  }
 0x5f2   : > { %16284 = vmatprep.subr.bf16.mxu0 %v24706_v4  ;;  %18120 = vmatprep.subr.bf16.mxu1 %v24709_v63  ;;  %v24778_v4 = vld [vmem:[%s26411_s10 + $0x2e24] ss:$16 sps:$4 sm:$0xff]   ;;  %v24781_v63 = vld [vmem:[%s26411_s10 + $0x2e2c] ss:$16 sps:$4 sm:$0xff]  }
 0x5f5   : > { %16285 = vmatpush1.bf16.msra.mxu0 %v24704_v24  ;;  %18121 = vmatpush1.bf16.msra.mxu1 %v24707_v53  ;;  %v19737_v24 = vcombine.high %v702_v57, %v702_v57  ;;  %v24786_v53 = vld [vmem:[%s26411_s10 + $0x2e44] ss:$16 sps:$4 sm:$0xff]  }
 0x5f6   : > { %16286 = vmatprep.subr.bf16.mxu0 %v24712_v47  ;;  %18122 = vmatprep.subr.bf16.mxu1 %v24715_v12  ;;  %v24789_v47 = vld [vmem:[%s26411_s10 + $0x2e4c] ss:$16 sps:$4 sm:$0xff]   ;;  %v19736_v12 = vcombine.low %v702_v57, %v702_v57  ;;  %v24846_v57 = vld [vmem:[%s26411_s10 + $0x2f84] ss:$16 sps:$4 sm:$0xff]  }
 0x5f9   : > { %16287 = vmatpush1.bf16.msra.mxu0 %v24710_v46  ;;  %18123 = vmatpush1.bf16.msra.mxu1 %v24713_v41  ;;  %v28368_v46 = vld [vmem:[%s26413_s15 + $0xb8] sm:$0xff] }
 0x5fa   : > { %16288 = vmatprep.subr.bf16.mxu0 %v24718_v25  ;;  %18124 = vmatprep.subr.bf16.mxu1 %v24721_v60  ;;  %v28371_v41 = vld [vmem:[%s26413_s15 + $0x1d8] sm:$0xff] }
 0x5fb   : > { %v16114_v35 = vpop.f32.mrb[76].mxu0  ;;  %v17950_v37 = vpop.f32.mrb[76].mxu1  ;;  %v24784_v25 = vld [vmem:[%s26411_s10 + $0x2e40] ss:$16 sps:$4 sm:$0xff]   ;;  %v24787_v60 = vld [vmem:[%s26411_s10 + $0x2e48] ss:$16 sps:$4 sm:$0xff]  }
 0x5fc   : > { %v28313_v39 = vadd.f32 %v16114_v35, %v28226_v18  ;;  %v28316_v22 = vadd.f32 %v17950_v37, %v28229_v13  ;;  %v16116_v16 = vpop.f32.mrb[77].mxu0  ;;  %v17952_v62 = vpop.f32.mrb[77].mxu1  ;;  %v24730_v13 = vld [vmem:[%s26411_s10 + $0x2d24] ss:$16 sps:$4 sm:$0xff]   ;;  %v24793_v35 = vld [vmem:[%s26411_s10 + $0x2e68] ss:$16 sps:$4 sm:$0xff]  }
 0x5fd   : > { %v28319_v31 = vadd.f32 %v16116_v16, %v28232_v7  ;;  %v28322_v19 = vadd.f32 %v17952_v62, %v28235_v0  ;;  %16289 = vmatpush1.bf16.msra.mxu0 %v24716_v43  ;;  %18125 = vmatpush1.bf16.msra.mxu1 %v24719_v8  ;;  %v16118_v18 = vpop.f32.mrb[78].mxu0  ;;  %v17954_v42 = vpop.f32.mrb[78].mxu1  ;;  %v24733_v7 = vld [vmem:[%s26411_s10 + $0x2d2c] ss:$16 sps:$4 sm:$0xff]   ;;  %v24728_v0 = vld [vmem:[%s26411_s10 + $0x2d20] ss:$16 sps:$4 sm:$0xff]  }
 0x5fe   : > { %16290 = vmatprep.subr.bf16.mxu0 %v24724_v10  ;;  %18126 = vmatprep.subr.bf16.mxu1 %v24727_v33  ;;  %v16119_v20 = vpop.f32.mrb[79].mxu0  ;;  %v17955_v9 = vpop.f32.mrb[79].mxu1  ;;  %v24792_v43 = vld [vmem:[%s26411_s10 + $0x2e64] ss:$16 sps:$4 sm:$0xff]   ;;  %v24795_v8 = vld [vmem:[%s26411_s10 + $0x2e6c] ss:$16 sps:$4 sm:$0xff]   ;;  %v19667_v10 = vcombine.high %v28368_v46, %v28371_v41 }
 0x5ff   : > { %v24790_v33 = vld [vmem:[%s26411_s10 + $0x2e60] ss:$16 sps:$4 sm:$0xff]   ;;  %v24798_v37 = vld [vmem:[%s26411_s10 + $0x2e84] ss:$16 sps:$4 sm:$0xff]   ;;  %v24801_v16 = vld [vmem:[%s26411_s10 + $0x2e8c] ss:$16 sps:$4 sm:$0xff]  }
 0x600   : > { %v24796_v62 = vld [vmem:[%s26411_s10 + $0x2e80] ss:$16 sps:$4 sm:$0xff]   ;;  %v24807_v18 = vld [vmem:[%s26411_s10 + $0x2eac] ss:$16 sps:$4 sm:$0xff]  }
 0x601   : > { %16291 = vmatpush1.bf16.msra.mxu0 %v24722_v49  ;;  %18127 = vmatpush1.bf16.msra.mxu1 %v24725_v45  ;;  %v24799_v49 = vld [vmem:[%s26411_s10 + $0x2e88] ss:$16 sps:$4 sm:$0xff]   ;;  %v24804_v45 = vld [vmem:[%s26411_s10 + $0x2ea4] ss:$16 sps:$4 sm:$0xff]   ;;  %v24802_v42 = vld [vmem:[%s26411_s10 + $0x2ea0] ss:$16 sps:$4 sm:$0xff]  }
 0x602   : > { %16292 = vmatprep.subr.bf16.mxu0 %v24730_v13  ;;  %18128 = vmatprep.subr.bf16.mxu1 %v24733_v7  ;;  %v24805_v13 = vld [vmem:[%s26411_s10 + $0x2ea8] ss:$16 sps:$4 sm:$0xff]   ;;  %v24810_v7 = vld [vmem:[%s26411_s10 + $0x2ec4] ss:$16 sps:$4 sm:$0xff]   ;;  %v24813_v20 = vld [vmem:[%s26411_s10 + $0x2ecc] ss:$16 sps:$4 sm:$0xff]  }
 0x603   : > { %v24808_v9 = vld [vmem:[%s26411_s10 + $0x2ec0] ss:$16 sps:$4 sm:$0xff]  }
 0x605   : > { %16293 = vmatpush1.bf16.msra.mxu0 %v24728_v0  ;;  %18129 = vmatpush1.bf16.msra.mxu1 %v24731_v44  ;;  %v24811_v0 = vld [vmem:[%s26411_s10 + $0x2ec8] ss:$16 sps:$4 sm:$0xff]   ;;  %v24816_v44 = vld [vmem:[%s26411_s10 + $0x2ee4] ss:$16 sps:$4 sm:$0xff]  }
 0x606   : > { %16294 = vmatprep.subr.bf16.mxu0 %v24736_v5  ;;  %18130 = vmatprep.subr.bf16.mxu1 %v24739_v2  ;;  %v24819_v5 = vld [vmem:[%s26411_s10 + $0x2eec] ss:$16 sps:$4 sm:$0xff]   ;;  %v24814_v2 = vld [vmem:[%s26411_s10 + $0x2ee0] ss:$16 sps:$4 sm:$0xff]  }
 0x609   : > { %16295 = vmatpush1.bf16.msra.mxu0 %v24734_v32  ;;  %18131 = vmatpush1.bf16.msra.mxu1 %v24737_v29  ;;  %v24817_v32 = vld [vmem:[%s26411_s10 + $0x2ee8] ss:$16 sps:$4 sm:$0xff]   ;;  %v24822_v29 = vld [vmem:[%s26411_s10 + $0x2f04] ss:$16 sps:$4 sm:$0xff]  }
 0x60a   : > { %16296 = vmatprep.subr.bf16.mxu0 %v24742_v52  ;;  %18132 = vmatprep.subr.bf16.mxu1 %v24745_v54  ;;  %v24825_v52 = vld [vmem:[%s26411_s10 + $0x2f0c] ss:$16 sps:$4 sm:$0xff]  }
 0x60d   : > { %16297 = vmatpush1.bf16.msra.mxu0 %v24740_v56  ;;  %18133 = vmatpush1.bf16.msra.mxu1 %v24743_v58 }
 0x60e   : > { %16298 = vmatprep.subr.bf16.mxu0 %v24748_v38  ;;  %18134 = vmatprep.subr.bf16.mxu1 %v24751_v36 }
 0x611   : > { %16299 = vmatpush1.bf16.msra.mxu0 %v24746_v11  ;;  %18135 = vmatpush1.bf16.msra.mxu1 %v24749_v50 }
 0x612   : > { %16300 = vmatprep.subr.bf16.mxu0 %v24754_v40  ;;  %18136 = vmatprep.subr.bf16.mxu1 %v24757_v59  ;;  %v24820_v59 = vld [vmem:[%s26411_s10 + $0x2f00] ss:$16 sps:$4 sm:$0xff]  }
 0x615   : > { %16301 = vmatpush1.bf16.msra.mxu0 %v24752_v6  ;;  %18137 = vmatpush1.bf16.msra.mxu1 %v24755_v1  ;;  %v24823_v6 = vld [vmem:[%s26411_s10 + $0x2f08] ss:$16 sps:$4 sm:$0xff]  }
 0x616   : > { %16302 = vmatprep.subr.bf16.mxu0 %v24760_v34  ;;  %18138 = vmatprep.subr.bf16.mxu1 %v24763_v28 }
 0x619   : > { %16303 = vmatpush1.bf16.msra.mxu0 %v24758_v3  ;;  %18139 = vmatpush1.bf16.msra.mxu1 %v24761_v26  ;;  %v24829_v3 = vld [vmem:[%s26411_s10 + $0x2f28] ss:$16 sps:$4 sm:$0xff]   ;;  %v24834_v26 = vld [vmem:[%s26411_s10 + $0x2f44] ss:$16 sps:$4 sm:$0xff]  }
 0x61a   : > { %16304 = vmatprep.subr.bf16.mxu0 %v24766_v23  ;;  %18140 = vmatprep.subr.bf16.mxu1 %v24769_v51  ;;  %v24837_v23 = vld [vmem:[%s26411_s10 + $0x2f4c] ss:$16 sps:$4 sm:$0xff]   ;;  %v24832_v51 = vld [vmem:[%s26411_s10 + $0x2f40] ss:$16 sps:$4 sm:$0xff]  }
 0x61d   : > { %16305 = vmatpush1.bf16.msra.mxu0 %v24764_v48  ;;  %18141 = vmatpush1.bf16.msra.mxu1 %v24767_v61  ;;  %v24835_v48 = vld [vmem:[%s26411_s10 + $0x2f48] ss:$16 sps:$4 sm:$0xff]   ;;  %v24840_v61 = vld [vmem:[%s26411_s10 + $0x2f64] ss:$16 sps:$4 sm:$0xff]  }
 0x61e   : > { %16325 = vmatprep.subr.bf16.mxu0 %v24772_v14  ;;  %18161 = vmatprep.subr.bf16.mxu1 %v24775_v15  ;;  %v24843_v14 = vld [vmem:[%s26411_s10 + $0x2f6c] ss:$16 sps:$4 sm:$0xff]   ;;  %v24838_v15 = vld [vmem:[%s26411_s10 + $0x2f60] ss:$16 sps:$4 sm:$0xff]  }
 0x620   : > { %16307 = vmatmul.mubr.bf16.vlgmr.msra.gmra.mrb[0].mxu0 %v19664_v17  ;;  %18143 = vmatmul.mubr.bf16.vlgmr.msra.gmra.mrb[0].mxu1 %v19664_v17  ;;  %v24841_v17 = vld [vmem:[%s26411_s10 + $0x2f68] ss:$16 sps:$4 sm:$0xff]  }
 0x621   : > { %16326 = vmatpush1.bf16.msra.mxu0 %v24770_v55  ;;  %18162 = vmatpush1.bf16.msra.mxu1 %v24773_v30  ;;  %v24849_v55 = vld [vmem:[%s26411_s10 + $0x2f8c] ss:$16 sps:$4 sm:$0xff]   ;;  %v24844_v30 = vld [vmem:[%s26411_s10 + $0x2f80] ss:$16 sps:$4 sm:$0xff]  }
 0x622   : > { %16327 = vmatprep.subr.bf16.mxu0 %v24778_v4  ;;  %18163 = vmatprep.subr.bf16.mxu1 %v24781_v63  ;;  %v24847_v4 = vld [vmem:[%s26411_s10 + $0x2f88] ss:$16 sps:$4 sm:$0xff]   ;;  %v24852_v63 = vld [vmem:[%s26411_s10 + $0x2fa4] ss:$16 sps:$4 sm:$0xff]  }
 0x623   : > { %16316 = vmatprep.mubr.bf16.mxu0 %v19737_v24  ;;  %18152 = vmatprep.mubr.bf16.mxu1 %v19737_v24  ;;  %v24855_v24 = vld [vmem:[%s26411_s10 + $0x2fac] ss:$16 sps:$4 sm:$0xff]  }
 0x625   : > { %16328 = vmatpush1.bf16.msra.mxu0 %v24776_v27  ;;  %18164 = vmatpush1.bf16.msra.mxu1 %v24779_v21  ;;  %v24850_v27 = vld [vmem:[%s26411_s10 + $0x2fa0] ss:$16 sps:$4 sm:$0xff]   ;;  %v24853_v21 = vld [vmem:[%s26411_s10 + $0x2fa8] ss:$16 sps:$4 sm:$0xff]  }
 0x626   : > { %16329 = vmatprep.subr.bf16.mxu0 %v24786_v53  ;;  %18165 = vmatprep.subr.bf16.mxu1 %v24789_v47  ;;  %v24858_v53 = vld [vmem:[%s26411_s10 + $0x2fc4] ss:$16 sps:$4 sm:$0xff]   ;;  %v24861_v47 = vld [vmem:[%s26411_s10 + $0x2fcc] ss:$16 sps:$4 sm:$0xff]  }
 0x628   : > { %16317 = vmatmul.mubr.bf16.gmra.mrb[92].mxu0 %v19736_v12  ;;  %18153 = vmatmul.mubr.bf16.gmra.mrb[92].mxu1 %v19736_v12  ;;  %v24856_v12 = vld [vmem:[%s26411_s10 + $0x2fc0] ss:$16 sps:$4 sm:$0xff]  }
 0x629   : > { %16330 = vmatpush1.bf16.msra.mxu0 %v24784_v25  ;;  %18166 = vmatpush1.bf16.msra.mxu1 %v24787_v60  ;;  %v24859_v25 = vld [vmem:[%s26411_s10 + $0x2fc8] ss:$16 sps:$4 sm:$0xff]   ;;  %v24864_v60 = vld [vmem:[%s26411_s10 + $0x2fe4] ss:$16 sps:$4 sm:$0xff]  }
 0x62a   : > { %16331 = vmatprep.subr.bf16.mxu0 %v24792_v43  ;;  %18167 = vmatprep.subr.bf16.mxu1 %v24795_v8  ;;  %v24867_v43 = vld [vmem:[%s26411_s10 + $0x2fec] ss:$16 sps:$4 sm:$0xff]   ;;  %v24862_v8 = vld [vmem:[%s26411_s10 + $0x2fe0] ss:$16 sps:$4 sm:$0xff]  }
 0x62b   : > { %16357 = vmatprep.mubr.bf16.mxu0 %v19667_v10  ;;  %18193 = vmatprep.mubr.bf16.mxu1 %v19667_v10  ;;  %v24865_v10 = vld [vmem:[%s26411_s10 + $0x2fe8] ss:$16 sps:$4 sm:$0xff]  }
 0x62d   : > { %16332 = vmatpush1.bf16.msra.mxu0 %v24790_v33  ;;  %18168 = vmatpush1.bf16.msra.mxu1 %v24793_v35  ;;  %v24870_v33 = vld [vmem:[%s26411_s10 + $0x3004] ss:$16 sps:$4 sm:$0xff]   ;;  %v24873_v35 = vld [vmem:[%s26411_s10 + $0x300c] ss:$16 sps:$4 sm:$0xff]  }
 0x62e   : > { %16333 = vmatprep.subr.bf16.mxu0 %v24798_v37  ;;  %18169 = vmatprep.subr.bf16.mxu1 %v24801_v16  ;;  %v19666_v37 = vcombine.low %v28368_v46, %v28371_v41  ;;  %v703_v16 = vld [vmem:[%s26413_s15 + $0x2f8] sm:$0x11]  ;;  %v24874_v46 = vld [vmem:[%s26411_s10 + $0x3020] ss:$16 sps:$4 sm:$0xff]  }
 0x62f   : > { %v24877_v41 = vld [vmem:[%s26411_s10 + $0x3028] ss:$16 sps:$4 sm:$0xff]  }
 0x631   : > { %16334 = vmatpush1.bf16.msra.mxu0 %v24796_v62  ;;  %18170 = vmatpush1.bf16.msra.mxu1 %v24799_v49  ;;  %v24868_v62 = vld [vmem:[%s26411_s10 + $0x3000] ss:$16 sps:$4 sm:$0xff]   ;;  %v24871_v49 = vld [vmem:[%s26411_s10 + $0x3008] ss:$16 sps:$4 sm:$0xff]  }
 0x632   : > { %16335 = vmatprep.subr.bf16.mxu0 %v24804_v45  ;;  %18171 = vmatprep.subr.bf16.mxu1 %v24807_v18  ;;  %v24876_v45 = vld [vmem:[%s26411_s10 + $0x3024] ss:$16 sps:$4 sm:$0xff]   ;;  %v24879_v18 = vld [vmem:[%s26411_s10 + $0x302c] ss:$16 sps:$4 sm:$0xff]  }
 0x635   : > { %16336 = vmatpush1.bf16.msra.mxu0 %v24802_v42  ;;  %18172 = vmatpush1.bf16.msra.mxu1 %v24805_v13  ;;  %v19739_v42 = vcombine.high %v703_v16, %v703_v16  ;;  %v24884_v13 = vld [vmem:[%s26411_s10 + $0x3044] ss:$16 sps:$4 sm:$0xff]  }
 0x636   : > { %16337 = vmatprep.subr.bf16.mxu0 %v24810_v7  ;;  %18173 = vmatprep.subr.bf16.mxu1 %v24813_v20  ;;  %v24887_v7 = vld [vmem:[%s26411_s10 + $0x304c] ss:$16 sps:$4 sm:$0xff]   ;;  %v19738_v20 = vcombine.low %v703_v16, %v703_v16  ;;  %v24944_v16 = vld [vmem:[%s26411_s10 + $0x3184] ss:$16 sps:$4 sm:$0xff]  }
 0x639   : > { %16338 = vmatpush1.bf16.msra.mxu0 %v24808_v9  ;;  %18174 = vmatpush1.bf16.msra.mxu1 %v24811_v0  ;;  %v28455_v9 = vld [vmem:[%s26413_s15 + $0xc0] sm:$0xff] }
 0x63a   : > { %16339 = vmatprep.subr.bf16.mxu0 %v24816_v44  ;;  %18175 = vmatprep.subr.bf16.mxu1 %v24819_v5  ;;  %v28458_v0 = vld [vmem:[%s26413_s15 + $0x1e0] sm:$0xff] }
 0x63b   : > { %v16165_v54 = vpop.f32.mrb[80].mxu0  ;;  %v18001_v56 = vpop.f32.mrb[80].mxu1  ;;  %v24882_v44 = vld [vmem:[%s26411_s10 + $0x3040] ss:$16 sps:$4 sm:$0xff]   ;;  %v24885_v5 = vld [vmem:[%s26411_s10 + $0x3048] ss:$16 sps:$4 sm:$0xff]  }
 0x63c   : > { %v28400_v58 = vadd.f32 %v16165_v54, %v28313_v39  ;;  %v28403_v38 = vadd.f32 %v18001_v56, %v28316_v22  ;;  %v16167_v36 = vpop.f32.mrb[81].mxu0  ;;  %v18003_v11 = vpop.f32.mrb[81].mxu1  ;;  %v24828_v22 = vld [vmem:[%s26411_s10 + $0x2f24] ss:$16 sps:$4 sm:$0xff]   ;;  %v24891_v54 = vld [vmem:[%s26411_s10 + $0x3068] ss:$16 sps:$4 sm:$0xff]  }
 0x63d   : > { %v28406_v50 = vadd.f32 %v16167_v36, %v28319_v31  ;;  %v28409_v40 = vadd.f32 %v18003_v11, %v28322_v19  ;;  %16340 = vmatpush1.bf16.msra.mxu0 %v24814_v2  ;;  %18176 = vmatpush1.bf16.msra.mxu1 %v24817_v32  ;;  %v16169_v39 = vpop.f32.mrb[82].mxu0  ;;  %v18005_v1 = vpop.f32.mrb[82].mxu1  ;;  %v24831_v31 = vld [vmem:[%s26411_s10 + $0x2f2c] ss:$16 sps:$4 sm:$0xff]   ;;  %v24826_v19 = vld [vmem:[%s26411_s10 + $0x2f20] ss:$16 sps:$4 sm:$0xff]  }
 0x63e   : > { %16341 = vmatprep.subr.bf16.mxu0 %v24822_v29  ;;  %18177 = vmatprep.subr.bf16.mxu1 %v24825_v52  ;;  %v16170_v34 = vpop.f32.mrb[83].mxu0  ;;  %v18006_v28 = vpop.f32.mrb[83].mxu1  ;;  %v24890_v2 = vld [vmem:[%s26411_s10 + $0x3064] ss:$16 sps:$4 sm:$0xff]   ;;  %v24893_v32 = vld [vmem:[%s26411_s10 + $0x306c] ss:$16 sps:$4 sm:$0xff]   ;;  %v19669_v29 = vcombine.high %v28455_v9, %v28458_v0 }
 0x63f   : > { %v24888_v52 = vld [vmem:[%s26411_s10 + $0x3060] ss:$16 sps:$4 sm:$0xff]   ;;  %v24896_v56 = vld [vmem:[%s26411_s10 + $0x3084] ss:$16 sps:$4 sm:$0xff]   ;;  %v24899_v36 = vld [vmem:[%s26411_s10 + $0x308c] ss:$16 sps:$4 sm:$0xff]  }
 0x640   : > { %v24894_v11 = vld [vmem:[%s26411_s10 + $0x3080] ss:$16 sps:$4 sm:$0xff]   ;;  %v24905_v39 = vld [vmem:[%s26411_s10 + $0x30ac] ss:$16 sps:$4 sm:$0xff]  }
 0x641   : > { %16342 = vmatpush1.bf16.msra.mxu0 %v24820_v59  ;;  %18178 = vmatpush1.bf16.msra.mxu1 %v24823_v6  ;;  %v24897_v59 = vld [vmem:[%s26411_s10 + $0x3088] ss:$16 sps:$4 sm:$0xff]   ;;  %v24902_v6 = vld [vmem:[%s26411_s10 + $0x30a4] ss:$16 sps:$4 sm:$0xff]   ;;  %v24900_v1 = vld [vmem:[%s26411_s10 + $0x30a0] ss:$16 sps:$4 sm:$0xff]  }
 0x642   : > { %16343 = vmatprep.subr.bf16.mxu0 %v24828_v22  ;;  %18179 = vmatprep.subr.bf16.mxu1 %v24831_v31  ;;  %v24903_v22 = vld [vmem:[%s26411_s10 + $0x30a8] ss:$16 sps:$4 sm:$0xff]   ;;  %v24908_v31 = vld [vmem:[%s26411_s10 + $0x30c4] ss:$16 sps:$4 sm:$0xff]   ;;  %v24911_v34 = vld [vmem:[%s26411_s10 + $0x30cc] ss:$16 sps:$4 sm:$0xff]  }
 0x643   : > { %v24906_v28 = vld [vmem:[%s26411_s10 + $0x30c0] ss:$16 sps:$4 sm:$0xff]  }
 0x645   : > { %16344 = vmatpush1.bf16.msra.mxu0 %v24826_v19  ;;  %18180 = vmatpush1.bf16.msra.mxu1 %v24829_v3  ;;  %v24909_v19 = vld [vmem:[%s26411_s10 + $0x30c8] ss:$16 sps:$4 sm:$0xff]   ;;  %v24914_v3 = vld [vmem:[%s26411_s10 + $0x30e4] ss:$16 sps:$4 sm:$0xff]  }
 0x646   : > { %16345 = vmatprep.subr.bf16.mxu0 %v24834_v26  ;;  %18181 = vmatprep.subr.bf16.mxu1 %v24837_v23  ;;  %v24917_v26 = vld [vmem:[%s26411_s10 + $0x30ec] ss:$16 sps:$4 sm:$0xff]   ;;  %v24912_v23 = vld [vmem:[%s26411_s10 + $0x30e0] ss:$16 sps:$4 sm:$0xff]  }
 0x649   : > { %16346 = vmatpush1.bf16.msra.mxu0 %v24832_v51  ;;  %18182 = vmatpush1.bf16.msra.mxu1 %v24835_v48  ;;  %v24915_v51 = vld [vmem:[%s26411_s10 + $0x30e8] ss:$16 sps:$4 sm:$0xff]   ;;  %v24920_v48 = vld [vmem:[%s26411_s10 + $0x3104] ss:$16 sps:$4 sm:$0xff]  }
 0x64a   : > { %16347 = vmatprep.subr.bf16.mxu0 %v24840_v61  ;;  %18183 = vmatprep.subr.bf16.mxu1 %v24843_v14  ;;  %v24923_v61 = vld [vmem:[%s26411_s10 + $0x310c] ss:$16 sps:$4 sm:$0xff]  }
 0x64d   : > { %16348 = vmatpush1.bf16.msra.mxu0 %v24838_v15  ;;  %18184 = vmatpush1.bf16.msra.mxu1 %v24841_v17 }
 0x64e   : > { %16349 = vmatprep.subr.bf16.mxu0 %v24846_v57  ;;  %18185 = vmatprep.subr.bf16.mxu1 %v24849_v55 }
 0x651   : > { %16350 = vmatpush1.bf16.msra.mxu0 %v24844_v30  ;;  %18186 = vmatpush1.bf16.msra.mxu1 %v24847_v4 }
 0x652   : > { %16351 = vmatprep.subr.bf16.mxu0 %v24852_v63  ;;  %18187 = vmatprep.subr.bf16.mxu1 %v24855_v24  ;;  %v24918_v24 = vld [vmem:[%s26411_s10 + $0x3100] ss:$16 sps:$4 sm:$0xff]  }
 0x655   : > { %16352 = vmatpush1.bf16.msra.mxu0 %v24850_v27  ;;  %18188 = vmatpush1.bf16.msra.mxu1 %v24853_v21  ;;  %v24921_v27 = vld [vmem:[%s26411_s10 + $0x3108] ss:$16 sps:$4 sm:$0xff]  }
 0x656   : > { %16353 = vmatprep.subr.bf16.mxu0 %v24858_v53  ;;  %18189 = vmatprep.subr.bf16.mxu1 %v24861_v47 }
 0x659   : > { %16354 = vmatpush1.bf16.msra.mxu0 %v24856_v12  ;;  %18190 = vmatpush1.bf16.msra.mxu1 %v24859_v25  ;;  %v24927_v12 = vld [vmem:[%s26411_s10 + $0x3128] ss:$16 sps:$4 sm:$0xff]   ;;  %v24932_v25 = vld [vmem:[%s26411_s10 + $0x3144] ss:$16 sps:$4 sm:$0xff]  }
 0x65a   : > { %16355 = vmatprep.subr.bf16.mxu0 %v24864_v60  ;;  %18191 = vmatprep.subr.bf16.mxu1 %v24867_v43  ;;  %v24935_v60 = vld [vmem:[%s26411_s10 + $0x314c] ss:$16 sps:$4 sm:$0xff]   ;;  %v24930_v43 = vld [vmem:[%s26411_s10 + $0x3140] ss:$16 sps:$4 sm:$0xff]  }
 0x65d   : > { %16356 = vmatpush1.bf16.msra.mxu0 %v24862_v8  ;;  %18192 = vmatpush1.bf16.msra.mxu1 %v24865_v10  ;;  %v24933_v8 = vld [vmem:[%s26411_s10 + $0x3148] ss:$16 sps:$4 sm:$0xff]   ;;  %v24938_v10 = vld [vmem:[%s26411_s10 + $0x3164] ss:$16 sps:$4 sm:$0xff]  }
 0x65e   : > { %16376 = vmatprep.subr.bf16.mxu0 %v24870_v33  ;;  %18212 = vmatprep.subr.bf16.mxu1 %v24873_v35  ;;  %v24941_v33 = vld [vmem:[%s26411_s10 + $0x316c] ss:$16 sps:$4 sm:$0xff]   ;;  %v24936_v35 = vld [vmem:[%s26411_s10 + $0x3160] ss:$16 sps:$4 sm:$0xff]  }
 0x660   : > { %16358 = vmatmul.mubr.bf16.vlgmr.msra.gmra.mrb[0].mxu0 %v19666_v37  ;;  %18194 = vmatmul.mubr.bf16.vlgmr.msra.gmra.mrb[0].mxu1 %v19666_v37  ;;  %v24939_v37 = vld [vmem:[%s26411_s10 + $0x3168] ss:$16 sps:$4 sm:$0xff]  }
 0x661   : > { %16377 = vmatpush1.bf16.msra.mxu0 %v24868_v62  ;;  %18213 = vmatpush1.bf16.msra.mxu1 %v24871_v49  ;;  %v24947_v62 = vld [vmem:[%s26411_s10 + $0x318c] ss:$16 sps:$4 sm:$0xff]   ;;  %v24942_v49 = vld [vmem:[%s26411_s10 + $0x3180] ss:$16 sps:$4 sm:$0xff]  }
 0x662   : > { %16378 = vmatprep.subr.bf16.mxu0 %v24876_v45  ;;  %18214 = vmatprep.subr.bf16.mxu1 %v24879_v18  ;;  %v24945_v45 = vld [vmem:[%s26411_s10 + $0x3188] ss:$16 sps:$4 sm:$0xff]   ;;  %v24950_v18 = vld [vmem:[%s26411_s10 + $0x31a4] ss:$16 sps:$4 sm:$0xff]  }
 0x663   : > { %16367 = vmatprep.mubr.bf16.mxu0 %v19739_v42  ;;  %18203 = vmatprep.mubr.bf16.mxu1 %v19739_v42  ;;  %v24953_v42 = vld [vmem:[%s26411_s10 + $0x31ac] ss:$16 sps:$4 sm:$0xff]  }
 0x665   : > { %16379 = vmatpush1.bf16.msra.mxu0 %v24874_v46  ;;  %18215 = vmatpush1.bf16.msra.mxu1 %v24877_v41  ;;  %v24948_v46 = vld [vmem:[%s26411_s10 + $0x31a0] ss:$16 sps:$4 sm:$0xff]   ;;  %v24951_v41 = vld [vmem:[%s26411_s10 + $0x31a8] ss:$16 sps:$4 sm:$0xff]  }
 0x666   : > { %16380 = vmatprep.subr.bf16.mxu0 %v24884_v13  ;;  %18216 = vmatprep.subr.bf16.mxu1 %v24887_v7  ;;  %v24956_v13 = vld [vmem:[%s26411_s10 + $0x31c4] ss:$16 sps:$4 sm:$0xff]   ;;  %v24959_v7 = vld [vmem:[%s26411_s10 + $0x31cc] ss:$16 sps:$4 sm:$0xff]  }
 0x668   : > { %16368 = vmatmul.mubr.bf16.gmra.mrb[96].mxu0 %v19738_v20  ;;  %18204 = vmatmul.mubr.bf16.gmra.mrb[96].mxu1 %v19738_v20  ;;  %v24954_v20 = vld [vmem:[%s26411_s10 + $0x31c0] ss:$16 sps:$4 sm:$0xff]  }
 0x669   : > { %16381 = vmatpush1.bf16.msra.mxu0 %v24882_v44  ;;  %18217 = vmatpush1.bf16.msra.mxu1 %v24885_v5  ;;  %v24957_v44 = vld [vmem:[%s26411_s10 + $0x31c8] ss:$16 sps:$4 sm:$0xff]   ;;  %v24962_v5 = vld [vmem:[%s26411_s10 + $0x31e4] ss:$16 sps:$4 sm:$0xff]  }
 0x66a   : > { %16382 = vmatprep.subr.bf16.mxu0 %v24890_v2  ;;  %18218 = vmatprep.subr.bf16.mxu1 %v24893_v32  ;;  %v24965_v2 = vld [vmem:[%s26411_s10 + $0x31ec] ss:$16 sps:$4 sm:$0xff]   ;;  %v24960_v32 = vld [vmem:[%s26411_s10 + $0x31e0] ss:$16 sps:$4 sm:$0xff]  }
 0x66b   : > { %16408 = vmatprep.mubr.bf16.mxu0 %v19669_v29  ;;  %18244 = vmatprep.mubr.bf16.mxu1 %v19669_v29  ;;  %v24963_v29 = vld [vmem:[%s26411_s10 + $0x31e8] ss:$16 sps:$4 sm:$0xff]  }
 0x66d   : > { %16383 = vmatpush1.bf16.msra.mxu0 %v24888_v52  ;;  %18219 = vmatpush1.bf16.msra.mxu1 %v24891_v54  ;;  %v24968_v52 = vld [vmem:[%s26411_s10 + $0x3204] ss:$16 sps:$4 sm:$0xff]   ;;  %v24971_v54 = vld [vmem:[%s26411_s10 + $0x320c] ss:$16 sps:$4 sm:$0xff]  }
 0x66e   : > { %16384 = vmatprep.subr.bf16.mxu0 %v24896_v56  ;;  %18220 = vmatprep.subr.bf16.mxu1 %v24899_v36  ;;  %v19668_v56 = vcombine.low %v28455_v9, %v28458_v0  ;;  %v704_v36 = vld [vmem:[%s26413_s15 + $0x300] sm:$0x11]  ;;  %v24975_v0 = vld [vmem:[%s26411_s10 + $0x3228] ss:$16 sps:$4 sm:$0xff]  }
 0x66f   : > { %v24972_v9 = vld [vmem:[%s26411_s10 + $0x3220] ss:$16 sps:$4 sm:$0xff]  }
 0x671   : > { %16385 = vmatpush1.bf16.msra.mxu0 %v24894_v11  ;;  %18221 = vmatpush1.bf16.msra.mxu1 %v24897_v59  ;;  %v24966_v11 = vld [vmem:[%s26411_s10 + $0x3200] ss:$16 sps:$4 sm:$0xff]   ;;  %v24969_v59 = vld [vmem:[%s26411_s10 + $0x3208] ss:$16 sps:$4 sm:$0xff]  }
 0x672   : > { %16386 = vmatprep.subr.bf16.mxu0 %v24902_v6  ;;  %18222 = vmatprep.subr.bf16.mxu1 %v24905_v39  ;;  %v24974_v6 = vld [vmem:[%s26411_s10 + $0x3224] ss:$16 sps:$4 sm:$0xff]   ;;  %v24977_v39 = vld [vmem:[%s26411_s10 + $0x322c] ss:$16 sps:$4 sm:$0xff]  }
 0x675   : > { %16387 = vmatpush1.bf16.msra.mxu0 %v24900_v1  ;;  %18223 = vmatpush1.bf16.msra.mxu1 %v24903_v22  ;;  %v19741_v1 = vcombine.high %v704_v36, %v704_v36  ;;  %v24982_v22 = vld [vmem:[%s26411_s10 + $0x3244] ss:$16 sps:$4 sm:$0xff]  }
 0x676   : > { %16388 = vmatprep.subr.bf16.mxu0 %v24908_v31  ;;  %18224 = vmatprep.subr.bf16.mxu1 %v24911_v34  ;;  %v24985_v31 = vld [vmem:[%s26411_s10 + $0x324c] ss:$16 sps:$4 sm:$0xff]   ;;  %v19740_v34 = vcombine.low %v704_v36, %v704_v36  ;;  %v25042_v36 = vld [vmem:[%s26411_s10 + $0x3384] ss:$16 sps:$4 sm:$0xff]  }
 0x679   : > { %16389 = vmatpush1.bf16.msra.mxu0 %v24906_v28  ;;  %18225 = vmatpush1.bf16.msra.mxu1 %v24909_v19  ;;  %v28542_v28 = vld [vmem:[%s26413_s15 + $0xc8] sm:$0xff] }
 0x67a   : > { %16390 = vmatprep.subr.bf16.mxu0 %v24914_v3  ;;  %18226 = vmatprep.subr.bf16.mxu1 %v24917_v26  ;;  %v28545_v19 = vld [vmem:[%s26413_s15 + $0x1e8] sm:$0xff] }
 0x67b   : > { %v16216_v14 = vpop.f32.mrb[84].mxu0  ;;  %v18052_v15 = vpop.f32.mrb[84].mxu1  ;;  %v24980_v3 = vld [vmem:[%s26411_s10 + $0x3240] ss:$16 sps:$4 sm:$0xff]   ;;  %v24983_v26 = vld [vmem:[%s26411_s10 + $0x3248] ss:$16 sps:$4 sm:$0xff]  }
 0x67c   : > { %v28487_v17 = vadd.f32 %v16216_v14, %v28400_v58  ;;  %v28490_v57 = vadd.f32 %v18052_v15, %v28403_v38  ;;  %v16218_v55 = vpop.f32.mrb[85].mxu0  ;;  %v18054_v30 = vpop.f32.mrb[85].mxu1  ;;  %v24926_v38 = vld [vmem:[%s26411_s10 + $0x3124] ss:$16 sps:$4 sm:$0xff]   ;;  %v24989_v14 = vld [vmem:[%s26411_s10 + $0x3268] ss:$16 sps:$4 sm:$0xff]  }
 0x67d   : > { %v28493_v4 = vadd.f32 %v16218_v55, %v28406_v50  ;;  %v28496_v63 = vadd.f32 %v18054_v30, %v28409_v40  ;;  %16391 = vmatpush1.bf16.msra.mxu0 %v24912_v23  ;;  %18227 = vmatpush1.bf16.msra.mxu1 %v24915_v51  ;;  %v16220_v58 = vpop.f32.mrb[86].mxu0  ;;  %v18056_v21 = vpop.f32.mrb[86].mxu1  ;;  %v24929_v50 = vld [vmem:[%s26411_s10 + $0x312c] ss:$16 sps:$4 sm:$0xff]   ;;  %v24924_v40 = vld [vmem:[%s26411_s10 + $0x3120] ss:$16 sps:$4 sm:$0xff]  }
 0x67e   : > { %16392 = vmatprep.subr.bf16.mxu0 %v24920_v48  ;;  %18228 = vmatprep.subr.bf16.mxu1 %v24923_v61  ;;  %v16221_v53 = vpop.f32.mrb[87].mxu0  ;;  %v18057_v47 = vpop.f32.mrb[87].mxu1  ;;  %v24988_v23 = vld [vmem:[%s26411_s10 + $0x3264] ss:$16 sps:$4 sm:$0xff]   ;;  %v24991_v51 = vld [vmem:[%s26411_s10 + $0x326c] ss:$16 sps:$4 sm:$0xff]   ;;  %v19671_v48 = vcombine.high %v28542_v28, %v28545_v19 }
 0x67f   : > { %v24986_v61 = vld [vmem:[%s26411_s10 + $0x3260] ss:$16 sps:$4 sm:$0xff]   ;;  %v24994_v15 = vld [vmem:[%s26411_s10 + $0x3284] ss:$16 sps:$4 sm:$0xff]   ;;  %v24997_v55 = vld [vmem:[%s26411_s10 + $0x328c] ss:$16 sps:$4 sm:$0xff]  }
 0x680   : > { %v24992_v30 = vld [vmem:[%s26411_s10 + $0x3280] ss:$16 sps:$4 sm:$0xff]   ;;  %v25003_v58 = vld [vmem:[%s26411_s10 + $0x32ac] ss:$16 sps:$4 sm:$0xff]  }
 0x681   : > { %16393 = vmatpush1.bf16.msra.mxu0 %v24918_v24  ;;  %18229 = vmatpush1.bf16.msra.mxu1 %v24921_v27  ;;  %v24995_v24 = vld [vmem:[%s26411_s10 + $0x3288] ss:$16 sps:$4 sm:$0xff]   ;;  %v25000_v27 = vld [vmem:[%s26411_s10 + $0x32a4] ss:$16 sps:$4 sm:$0xff]   ;;  %v24998_v21 = vld [vmem:[%s26411_s10 + $0x32a0] ss:$16 sps:$4 sm:$0xff]  }
 0x682   : > { %16394 = vmatprep.subr.bf16.mxu0 %v24926_v38  ;;  %18230 = vmatprep.subr.bf16.mxu1 %v24929_v50  ;;  %v25001_v38 = vld [vmem:[%s26411_s10 + $0x32a8] ss:$16 sps:$4 sm:$0xff]   ;;  %v25006_v50 = vld [vmem:[%s26411_s10 + $0x32c4] ss:$16 sps:$4 sm:$0xff]   ;;  %v25009_v53 = vld [vmem:[%s26411_s10 + $0x32cc] ss:$16 sps:$4 sm:$0xff]  }
 0x683   : > { %v25004_v47 = vld [vmem:[%s26411_s10 + $0x32c0] ss:$16 sps:$4 sm:$0xff]  }
 0x685   : > { %16395 = vmatpush1.bf16.msra.mxu0 %v24924_v40  ;;  %18231 = vmatpush1.bf16.msra.mxu1 %v24927_v12  ;;  %v25007_v40 = vld [vmem:[%s26411_s10 + $0x32c8] ss:$16 sps:$4 sm:$0xff]   ;;  %v25012_v12 = vld [vmem:[%s26411_s10 + $0x32e4] ss:$16 sps:$4 sm:$0xff]  }
 0x686   : > { %16396 = vmatprep.subr.bf16.mxu0 %v24932_v25  ;;  %18232 = vmatprep.subr.bf16.mxu1 %v24935_v60  ;;  %v25015_v25 = vld [vmem:[%s26411_s10 + $0x32ec] ss:$16 sps:$4 sm:$0xff]   ;;  %v25010_v60 = vld [vmem:[%s26411_s10 + $0x32e0] ss:$16 sps:$4 sm:$0xff]  }
 0x689   : > { %16397 = vmatpush1.bf16.msra.mxu0 %v24930_v43  ;;  %18233 = vmatpush1.bf16.msra.mxu1 %v24933_v8  ;;  %v25013_v43 = vld [vmem:[%s26411_s10 + $0x32e8] ss:$16 sps:$4 sm:$0xff]   ;;  %v25018_v8 = vld [vmem:[%s26411_s10 + $0x3304] ss:$16 sps:$4 sm:$0xff]  }
 0x68a   : > { %16398 = vmatprep.subr.bf16.mxu0 %v24938_v10  ;;  %18234 = vmatprep.subr.bf16.mxu1 %v24941_v33  ;;  %v25021_v10 = vld [vmem:[%s26411_s10 + $0x330c] ss:$16 sps:$4 sm:$0xff]  }
 0x68d   : > { %16399 = vmatpush1.bf16.msra.mxu0 %v24936_v35  ;;  %18235 = vmatpush1.bf16.msra.mxu1 %v24939_v37 }
 0x68e   : > { %16400 = vmatprep.subr.bf16.mxu0 %v24944_v16  ;;  %18236 = vmatprep.subr.bf16.mxu1 %v24947_v62 }
 0x691   : > { %16401 = vmatpush1.bf16.msra.mxu0 %v24942_v49  ;;  %18237 = vmatpush1.bf16.msra.mxu1 %v24945_v45 }
 0x692   : > { %16402 = vmatprep.subr.bf16.mxu0 %v24950_v18  ;;  %18238 = vmatprep.subr.bf16.mxu1 %v24953_v42  ;;  %v25016_v42 = vld [vmem:[%s26411_s10 + $0x3300] ss:$16 sps:$4 sm:$0xff]  }
 0x695   : > { %16403 = vmatpush1.bf16.msra.mxu0 %v24948_v46  ;;  %18239 = vmatpush1.bf16.msra.mxu1 %v24951_v41  ;;  %v25019_v46 = vld [vmem:[%s26411_s10 + $0x3308] ss:$16 sps:$4 sm:$0xff]  }
 0x696   : > { %16404 = vmatprep.subr.bf16.mxu0 %v24956_v13  ;;  %18240 = vmatprep.subr.bf16.mxu1 %v24959_v7 }
 0x699   : > { %16405 = vmatpush1.bf16.msra.mxu0 %v24954_v20  ;;  %18241 = vmatpush1.bf16.msra.mxu1 %v24957_v44  ;;  %v25025_v20 = vld [vmem:[%s26411_s10 + $0x3328] ss:$16 sps:$4 sm:$0xff]   ;;  %v25030_v44 = vld [vmem:[%s26411_s10 + $0x3344] ss:$16 sps:$4 sm:$0xff]  }
 0x69a   : > { %16406 = vmatprep.subr.bf16.mxu0 %v24962_v5  ;;  %18242 = vmatprep.subr.bf16.mxu1 %v24965_v2  ;;  %v25033_v5 = vld [vmem:[%s26411_s10 + $0x334c] ss:$16 sps:$4 sm:$0xff]   ;;  %v25028_v2 = vld [vmem:[%s26411_s10 + $0x3340] ss:$16 sps:$4 sm:$0xff]  }
 0x69d   : > { %16407 = vmatpush1.bf16.msra.mxu0 %v24960_v32  ;;  %18243 = vmatpush1.bf16.msra.mxu1 %v24963_v29  ;;  %v25031_v32 = vld [vmem:[%s26411_s10 + $0x3348] ss:$16 sps:$4 sm:$0xff]   ;;  %v25036_v29 = vld [vmem:[%s26411_s10 + $0x3364] ss:$16 sps:$4 sm:$0xff]  }
 0x69e   : > { %16427 = vmatprep.subr.bf16.mxu0 %v24968_v52  ;;  %18263 = vmatprep.subr.bf16.mxu1 %v24971_v54  ;;  %v25039_v52 = vld [vmem:[%s26411_s10 + $0x336c] ss:$16 sps:$4 sm:$0xff]   ;;  %v25034_v54 = vld [vmem:[%s26411_s10 + $0x3360] ss:$16 sps:$4 sm:$0xff]  }
 0x6a0   : > { %16409 = vmatmul.mubr.bf16.vlgmr.msra.gmra.mrb[0].mxu0 %v19668_v56  ;;  %18245 = vmatmul.mubr.bf16.vlgmr.msra.gmra.mrb[0].mxu1 %v19668_v56  ;;  %v25037_v56 = vld [vmem:[%s26411_s10 + $0x3368] ss:$16 sps:$4 sm:$0xff]  }
 0x6a1   : > { %16428 = vmatpush1.bf16.msra.mxu0 %v24966_v11  ;;  %18264 = vmatpush1.bf16.msra.mxu1 %v24969_v59  ;;  %v25045_v11 = vld [vmem:[%s26411_s10 + $0x338c] ss:$16 sps:$4 sm:$0xff]   ;;  %v25040_v59 = vld [vmem:[%s26411_s10 + $0x3380] ss:$16 sps:$4 sm:$0xff]  }
 0x6a2   : > { %16429 = vmatprep.subr.bf16.mxu0 %v24974_v6  ;;  %18265 = vmatprep.subr.bf16.mxu1 %v24977_v39  ;;  %v25043_v6 = vld [vmem:[%s26411_s10 + $0x3388] ss:$16 sps:$4 sm:$0xff]   ;;  %v25048_v39 = vld [vmem:[%s26411_s10 + $0x33a4] ss:$16 sps:$4 sm:$0xff]  }
 0x6a3   : > { %16418 = vmatprep.mubr.bf16.mxu0 %v19741_v1  ;;  %18254 = vmatprep.mubr.bf16.mxu1 %v19741_v1  ;;  %v25051_v1 = vld [vmem:[%s26411_s10 + $0x33ac] ss:$16 sps:$4 sm:$0xff]  }
 0x6a5   : > { %16430 = vmatpush1.bf16.msra.mxu0 %v24972_v9  ;;  %18266 = vmatpush1.bf16.msra.mxu1 %v24975_v0  ;;  %v25046_v9 = vld [vmem:[%s26411_s10 + $0x33a0] ss:$16 sps:$4 sm:$0xff]   ;;  %v25049_v0 = vld [vmem:[%s26411_s10 + $0x33a8] ss:$16 sps:$4 sm:$0xff]  }
 0x6a6   : > { %16431 = vmatprep.subr.bf16.mxu0 %v24982_v22  ;;  %18267 = vmatprep.subr.bf16.mxu1 %v24985_v31  ;;  %v25054_v22 = vld [vmem:[%s26411_s10 + $0x33c4] ss:$16 sps:$4 sm:$0xff]   ;;  %v25057_v31 = vld [vmem:[%s26411_s10 + $0x33cc] ss:$16 sps:$4 sm:$0xff]  }
 0x6a8   : > { %16419 = vmatmul.mubr.bf16.gmra.mrb[100].mxu0 %v19740_v34  ;;  %18255 = vmatmul.mubr.bf16.gmra.mrb[100].mxu1 %v19740_v34  ;;  %v25052_v34 = vld [vmem:[%s26411_s10 + $0x33c0] ss:$16 sps:$4 sm:$0xff]  }
 0x6a9   : > { %16432 = vmatpush1.bf16.msra.mxu0 %v24980_v3  ;;  %18268 = vmatpush1.bf16.msra.mxu1 %v24983_v26  ;;  %v25055_v3 = vld [vmem:[%s26411_s10 + $0x33c8] ss:$16 sps:$4 sm:$0xff]   ;;  %v25060_v26 = vld [vmem:[%s26411_s10 + $0x33e4] ss:$16 sps:$4 sm:$0xff]  }
 0x6aa   : > { %16433 = vmatprep.subr.bf16.mxu0 %v24988_v23  ;;  %18269 = vmatprep.subr.bf16.mxu1 %v24991_v51  ;;  %v25063_v23 = vld [vmem:[%s26411_s10 + $0x33ec] ss:$16 sps:$4 sm:$0xff]   ;;  %v25058_v51 = vld [vmem:[%s26411_s10 + $0x33e0] ss:$16 sps:$4 sm:$0xff]  }
 0x6ab   : > { %16459 = vmatprep.mubr.bf16.mxu0 %v19671_v48  ;;  %18295 = vmatprep.mubr.bf16.mxu1 %v19671_v48  ;;  %v25061_v48 = vld [vmem:[%s26411_s10 + $0x33e8] ss:$16 sps:$4 sm:$0xff]  }
 0x6ad   : > { %16434 = vmatpush1.bf16.msra.mxu0 %v24986_v61  ;;  %18270 = vmatpush1.bf16.msra.mxu1 %v24989_v14  ;;  %v25066_v61 = vld [vmem:[%s26411_s10 + $0x3404] ss:$16 sps:$4 sm:$0xff]   ;;  %v25069_v14 = vld [vmem:[%s26411_s10 + $0x340c] ss:$16 sps:$4 sm:$0xff]  }
 0x6ae   : > { %16435 = vmatprep.subr.bf16.mxu0 %v24994_v15  ;;  %18271 = vmatprep.subr.bf16.mxu1 %v24997_v55  ;;  %v19670_v15 = vcombine.low %v28542_v28, %v28545_v19  ;;  %v705_v55 = vld [vmem:[%s26413_s15 + $0x308] sm:$0x11]  ;;  %v25070_v28 = vld [vmem:[%s26411_s10 + $0x3420] ss:$16 sps:$4 sm:$0xff]  }
 0x6af   : > { %v25073_v19 = vld [vmem:[%s26411_s10 + $0x3428] ss:$16 sps:$4 sm:$0xff]  }
 0x6b1   : > { %16436 = vmatpush1.bf16.msra.mxu0 %v24992_v30  ;;  %18272 = vmatpush1.bf16.msra.mxu1 %v24995_v24  ;;  %v25064_v30 = vld [vmem:[%s26411_s10 + $0x3400] ss:$16 sps:$4 sm:$0xff]   ;;  %v25067_v24 = vld [vmem:[%s26411_s10 + $0x3408] ss:$16 sps:$4 sm:$0xff]  }
 0x6b2   : > { %16437 = vmatprep.subr.bf16.mxu0 %v25000_v27  ;;  %18273 = vmatprep.subr.bf16.mxu1 %v25003_v58  ;;  %v25072_v27 = vld [vmem:[%s26411_s10 + $0x3424] ss:$16 sps:$4 sm:$0xff]   ;;  %v25075_v58 = vld [vmem:[%s26411_s10 + $0x342c] ss:$16 sps:$4 sm:$0xff]  }
 0x6b5   : > { %16438 = vmatpush1.bf16.msra.mxu0 %v24998_v21  ;;  %18274 = vmatpush1.bf16.msra.mxu1 %v25001_v38  ;;  %v19743_v21 = vcombine.high %v705_v55, %v705_v55  ;;  %v25080_v38 = vld [vmem:[%s26411_s10 + $0x3444] ss:$16 sps:$4 sm:$0xff]  }
 0x6b6   : > { %16439 = vmatprep.subr.bf16.mxu0 %v25006_v50  ;;  %18275 = vmatprep.subr.bf16.mxu1 %v25009_v53  ;;  %v25083_v50 = vld [vmem:[%s26411_s10 + $0x344c] ss:$16 sps:$4 sm:$0xff]   ;;  %v19742_v53 = vcombine.low %v705_v55, %v705_v55  ;;  %v25140_v55 = vld [vmem:[%s26411_s10 + $0x3584] ss:$16 sps:$4 sm:$0xff]  }
 0x6b9   : > { %16440 = vmatpush1.bf16.msra.mxu0 %v25004_v47  ;;  %18276 = vmatpush1.bf16.msra.mxu1 %v25007_v40  ;;  %v28629_v47 = vld [vmem:[%s26413_s15 + $0xd0] sm:$0xff] }
 0x6ba   : > { %16441 = vmatprep.subr.bf16.mxu0 %v25012_v12  ;;  %18277 = vmatprep.subr.bf16.mxu1 %v25015_v25  ;;  %v28632_v40 = vld [vmem:[%s26413_s15 + $0x1f0] sm:$0xff] }
 0x6bb   : > { %v16267_v33 = vpop.f32.mrb[88].mxu0  ;;  %v18103_v35 = vpop.f32.mrb[88].mxu1  ;;  %v25078_v12 = vld [vmem:[%s26411_s10 + $0x3440] ss:$16 sps:$4 sm:$0xff]   ;;  %v25081_v25 = vld [vmem:[%s26411_s10 + $0x3448] ss:$16 sps:$4 sm:$0xff]  }
 0x6bc   : > { %v28574_v37 = vadd.f32 %v16267_v33, %v28487_v17  ;;  %v28577_v16 = vadd.f32 %v18103_v35, %v28490_v57  ;;  %v16269_v62 = vpop.f32.mrb[89].mxu0  ;;  %v18105_v49 = vpop.f32.mrb[89].mxu1  ;;  %v25024_v57 = vld [vmem:[%s26411_s10 + $0x3324] ss:$16 sps:$4 sm:$0xff]   ;;  %v25087_v33 = vld [vmem:[%s26411_s10 + $0x3468] ss:$16 sps:$4 sm:$0xff]  }
 0x6bd   : > { %v28580_v45 = vadd.f32 %v16269_v62, %v28493_v4  ;;  %v28583_v18 = vadd.f32 %v18105_v49, %v28496_v63  ;;  %16442 = vmatpush1.bf16.msra.mxu0 %v25010_v60  ;;  %18278 = vmatpush1.bf16.msra.mxu1 %v25013_v43  ;;  %v16271_v17 = vpop.f32.mrb[90].mxu0  ;;  %v18107_v41 = vpop.f32.mrb[90].mxu1  ;;  %v25027_v4 = vld [vmem:[%s26411_s10 + $0x332c] ss:$16 sps:$4 sm:$0xff]   ;;  %v25022_v63 = vld [vmem:[%s26411_s10 + $0x3320] ss:$16 sps:$4 sm:$0xff]  }
 0x6be   : > { %16443 = vmatprep.subr.bf16.mxu0 %v25018_v8  ;;  %18279 = vmatprep.subr.bf16.mxu1 %v25021_v10  ;;  %v16272_v13 = vpop.f32.mrb[91].mxu0  ;;  %v18108_v7 = vpop.f32.mrb[91].mxu1  ;;  %v25086_v60 = vld [vmem:[%s26411_s10 + $0x3464] ss:$16 sps:$4 sm:$0xff]   ;;  %v25089_v43 = vld [vmem:[%s26411_s10 + $0x346c] ss:$16 sps:$4 sm:$0xff]   ;;  %v19673_v8 = vcombine.high %v28629_v47, %v28632_v40 }
 0x6bf   : > { %v25084_v10 = vld [vmem:[%s26411_s10 + $0x3460] ss:$16 sps:$4 sm:$0xff]   ;;  %v25092_v35 = vld [vmem:[%s26411_s10 + $0x3484] ss:$16 sps:$4 sm:$0xff]   ;;  %v25095_v62 = vld [vmem:[%s26411_s10 + $0x348c] ss:$16 sps:$4 sm:$0xff]  }
 0x6c0   : > { %v25090_v49 = vld [vmem:[%s26411_s10 + $0x3480] ss:$16 sps:$4 sm:$0xff]   ;;  %v25101_v17 = vld [vmem:[%s26411_s10 + $0x34ac] ss:$16 sps:$4 sm:$0xff]  }
 0x6c1   : > { %16444 = vmatpush1.bf16.msra.mxu0 %v25016_v42  ;;  %18280 = vmatpush1.bf16.msra.mxu1 %v25019_v46  ;;  %v25093_v42 = vld [vmem:[%s26411_s10 + $0x3488] ss:$16 sps:$4 sm:$0xff]   ;;  %v25098_v46 = vld [vmem:[%s26411_s10 + $0x34a4] ss:$16 sps:$4 sm:$0xff]   ;;  %v25096_v41 = vld [vmem:[%s26411_s10 + $0x34a0] ss:$16 sps:$4 sm:$0xff]  }
 0x6c2   : > { %16445 = vmatprep.subr.bf16.mxu0 %v25024_v57  ;;  %18281 = vmatprep.subr.bf16.mxu1 %v25027_v4  ;;  %v25099_v57 = vld [vmem:[%s26411_s10 + $0x34a8] ss:$16 sps:$4 sm:$0xff]   ;;  %v25104_v4 = vld [vmem:[%s26411_s10 + $0x34c4] ss:$16 sps:$4 sm:$0xff]   ;;  %v25107_v13 = vld [vmem:[%s26411_s10 + $0x34cc] ss:$16 sps:$4 sm:$0xff]  }
 0x6c3   : > { %v25102_v7 = vld [vmem:[%s26411_s10 + $0x34c0] ss:$16 sps:$4 sm:$0xff]  }
 0x6c5   : > { %16446 = vmatpush1.bf16.msra.mxu0 %v25022_v63  ;;  %18282 = vmatpush1.bf16.msra.mxu1 %v25025_v20  ;;  %v25105_v63 = vld [vmem:[%s26411_s10 + $0x34c8] ss:$16 sps:$4 sm:$0xff]   ;;  %v25110_v20 = vld [vmem:[%s26411_s10 + $0x34e4] ss:$16 sps:$4 sm:$0xff]  }
 0x6c6   : > { %16447 = vmatprep.subr.bf16.mxu0 %v25030_v44  ;;  %18283 = vmatprep.subr.bf16.mxu1 %v25033_v5  ;;  %v25113_v44 = vld [vmem:[%s26411_s10 + $0x34ec] ss:$16 sps:$4 sm:$0xff]   ;;  %v25108_v5 = vld [vmem:[%s26411_s10 + $0x34e0] ss:$16 sps:$4 sm:$0xff]  }
 0x6c9   : > { %16448 = vmatpush1.bf16.msra.mxu0 %v25028_v2  ;;  %18284 = vmatpush1.bf16.msra.mxu1 %v25031_v32  ;;  %v25111_v2 = vld [vmem:[%s26411_s10 + $0x34e8] ss:$16 sps:$4 sm:$0xff]   ;;  %v25116_v32 = vld [vmem:[%s26411_s10 + $0x3504] ss:$16 sps:$4 sm:$0xff]  }
 0x6ca   : > { %16449 = vmatprep.subr.bf16.mxu0 %v25036_v29  ;;  %18285 = vmatprep.subr.bf16.mxu1 %v25039_v52  ;;  %v25119_v29 = vld [vmem:[%s26411_s10 + $0x350c] ss:$16 sps:$4 sm:$0xff]  }
 0x6cd   : > { %16450 = vmatpush1.bf16.msra.mxu0 %v25034_v54  ;;  %18286 = vmatpush1.bf16.msra.mxu1 %v25037_v56 }
 0x6ce   : > { %16451 = vmatprep.subr.bf16.mxu0 %v25042_v36  ;;  %18287 = vmatprep.subr.bf16.mxu1 %v25045_v11 }
 0x6d1   : > { %16452 = vmatpush1.bf16.msra.mxu0 %v25040_v59  ;;  %18288 = vmatpush1.bf16.msra.mxu1 %v25043_v6 }
 0x6d2   : > { %16453 = vmatprep.subr.bf16.mxu0 %v25048_v39  ;;  %18289 = vmatprep.subr.bf16.mxu1 %v25051_v1  ;;  %v25114_v1 = vld [vmem:[%s26411_s10 + $0x3500] ss:$16 sps:$4 sm:$0xff]  }
 0x6d5   : > { %16454 = vmatpush1.bf16.msra.mxu0 %v25046_v9  ;;  %18290 = vmatpush1.bf16.msra.mxu1 %v25049_v0  ;;  %v25117_v9 = vld [vmem:[%s26411_s10 + $0x3508] ss:$16 sps:$4 sm:$0xff]  }
 0x6d6   : > { %16455 = vmatprep.subr.bf16.mxu0 %v25054_v22  ;;  %18291 = vmatprep.subr.bf16.mxu1 %v25057_v31 }
 0x6d9   : > { %16456 = vmatpush1.bf16.msra.mxu0 %v25052_v34  ;;  %18292 = vmatpush1.bf16.msra.mxu1 %v25055_v3  ;;  %v25123_v34 = vld [vmem:[%s26411_s10 + $0x3528] ss:$16 sps:$4 sm:$0xff]   ;;  %v25128_v3 = vld [vmem:[%s26411_s10 + $0x3544] ss:$16 sps:$4 sm:$0xff]  }
 0x6da   : > { %16457 = vmatprep.subr.bf16.mxu0 %v25060_v26  ;;  %18293 = vmatprep.subr.bf16.mxu1 %v25063_v23  ;;  %v25131_v26 = vld [vmem:[%s26411_s10 + $0x354c] ss:$16 sps:$4 sm:$0xff]   ;;  %v25126_v23 = vld [vmem:[%s26411_s10 + $0x3540] ss:$16 sps:$4 sm:$0xff]  }
 0x6dd   : > { %16458 = vmatpush1.bf16.msra.mxu0 %v25058_v51  ;;  %18294 = vmatpush1.bf16.msra.mxu1 %v25061_v48  ;;  %v25129_v51 = vld [vmem:[%s26411_s10 + $0x3548] ss:$16 sps:$4 sm:$0xff]   ;;  %v25134_v48 = vld [vmem:[%s26411_s10 + $0x3564] ss:$16 sps:$4 sm:$0xff]  }
 0x6de   : > { %16478 = vmatprep.subr.bf16.mxu0 %v25066_v61  ;;  %18314 = vmatprep.subr.bf16.mxu1 %v25069_v14  ;;  %v25137_v61 = vld [vmem:[%s26411_s10 + $0x356c] ss:$16 sps:$4 sm:$0xff]   ;;  %v25132_v14 = vld [vmem:[%s26411_s10 + $0x3560] ss:$16 sps:$4 sm:$0xff]  }
 0x6e0   : > { %16460 = vmatmul.mubr.bf16.vlgmr.msra.gmra.mrb[0].mxu0 %v19670_v15  ;;  %18296 = vmatmul.mubr.bf16.vlgmr.msra.gmra.mrb[0].mxu1 %v19670_v15  ;;  %v25135_v15 = vld [vmem:[%s26411_s10 + $0x3568] ss:$16 sps:$4 sm:$0xff]  }
 0x6e1   : > { %16479 = vmatpush1.bf16.msra.mxu0 %v25064_v30  ;;  %18315 = vmatpush1.bf16.msra.mxu1 %v25067_v24  ;;  %v25143_v30 = vld [vmem:[%s26411_s10 + $0x358c] ss:$16 sps:$4 sm:$0xff]   ;;  %v25138_v24 = vld [vmem:[%s26411_s10 + $0x3580] ss:$16 sps:$4 sm:$0xff]  }
 0x6e2   : > { %16480 = vmatprep.subr.bf16.mxu0 %v25072_v27  ;;  %18316 = vmatprep.subr.bf16.mxu1 %v25075_v58  ;;  %v25141_v27 = vld [vmem:[%s26411_s10 + $0x3588] ss:$16 sps:$4 sm:$0xff]   ;;  %v25146_v58 = vld [vmem:[%s26411_s10 + $0x35a4] ss:$16 sps:$4 sm:$0xff]  }
 0x6e3   : > { %16469 = vmatprep.mubr.bf16.mxu0 %v19743_v21  ;;  %18305 = vmatprep.mubr.bf16.mxu1 %v19743_v21  ;;  %v25149_v21 = vld [vmem:[%s26411_s10 + $0x35ac] ss:$16 sps:$4 sm:$0xff]  }
 0x6e5   : > { %16481 = vmatpush1.bf16.msra.mxu0 %v25070_v28  ;;  %18317 = vmatpush1.bf16.msra.mxu1 %v25073_v19  ;;  %v25144_v28 = vld [vmem:[%s26411_s10 + $0x35a0] ss:$16 sps:$4 sm:$0xff]   ;;  %v25147_v19 = vld [vmem:[%s26411_s10 + $0x35a8] ss:$16 sps:$4 sm:$0xff]  }
 0x6e6   : > { %16482 = vmatprep.subr.bf16.mxu0 %v25080_v38  ;;  %18318 = vmatprep.subr.bf16.mxu1 %v25083_v50  ;;  %v25152_v38 = vld [vmem:[%s26411_s10 + $0x35c4] ss:$16 sps:$4 sm:$0xff]   ;;  %v25155_v50 = vld [vmem:[%s26411_s10 + $0x35cc] ss:$16 sps:$4 sm:$0xff]  }
 0x6e8   : > { %16470 = vmatmul.mubr.bf16.gmra.mrb[104].mxu0 %v19742_v53  ;;  %18306 = vmatmul.mubr.bf16.gmra.mrb[104].mxu1 %v19742_v53  ;;  %v25150_v53 = vld [vmem:[%s26411_s10 + $0x35c0] ss:$16 sps:$4 sm:$0xff]  }
 0x6e9   : > { %16483 = vmatpush1.bf16.msra.mxu0 %v25078_v12  ;;  %18319 = vmatpush1.bf16.msra.mxu1 %v25081_v25  ;;  %v25153_v12 = vld [vmem:[%s26411_s10 + $0x35c8] ss:$16 sps:$4 sm:$0xff]   ;;  %v25158_v25 = vld [vmem:[%s26411_s10 + $0x35e4] ss:$16 sps:$4 sm:$0xff]  }
 0x6ea   : > { %16484 = vmatprep.subr.bf16.mxu0 %v25086_v60  ;;  %18320 = vmatprep.subr.bf16.mxu1 %v25089_v43  ;;  %v25161_v60 = vld [vmem:[%s26411_s10 + $0x35ec] ss:$16 sps:$4 sm:$0xff]   ;;  %v25156_v43 = vld [vmem:[%s26411_s10 + $0x35e0] ss:$16 sps:$4 sm:$0xff]  }
 0x6eb   : > { %16510 = vmatprep.mubr.bf16.mxu0 %v19673_v8  ;;  %18346 = vmatprep.mubr.bf16.mxu1 %v19673_v8  ;;  %v25159_v8 = vld [vmem:[%s26411_s10 + $0x35e8] ss:$16 sps:$4 sm:$0xff]  }
 0x6ed   : > { %16485 = vmatpush1.bf16.msra.mxu0 %v25084_v10  ;;  %18321 = vmatpush1.bf16.msra.mxu1 %v25087_v33  ;;  %v25164_v10 = vld [vmem:[%s26411_s10 + $0x3604] ss:$16 sps:$4 sm:$0xff]   ;;  %v25167_v33 = vld [vmem:[%s26411_s10 + $0x360c] ss:$16 sps:$4 sm:$0xff]  }
 0x6ee   : > { %16486 = vmatprep.subr.bf16.mxu0 %v25092_v35  ;;  %18322 = vmatprep.subr.bf16.mxu1 %v25095_v62  ;;  %v19672_v35 = vcombine.low %v28629_v47, %v28632_v40  ;;  %v706_v62 = vld [vmem:[%s26413_s15 + $0x310] sm:$0x11]  ;;  %v25171_v40 = vld [vmem:[%s26411_s10 + $0x3628] ss:$16 sps:$4 sm:$0xff]  }
 0x6ef   : > { %v25168_v47 = vld [vmem:[%s26411_s10 + $0x3620] ss:$16 sps:$4 sm:$0xff]  }
 0x6f1   : > { %16487 = vmatpush1.bf16.msra.mxu0 %v25090_v49  ;;  %18323 = vmatpush1.bf16.msra.mxu1 %v25093_v42  ;;  %v25162_v49 = vld [vmem:[%s26411_s10 + $0x3600] ss:$16 sps:$4 sm:$0xff]   ;;  %v25165_v42 = vld [vmem:[%s26411_s10 + $0x3608] ss:$16 sps:$4 sm:$0xff]  }
 0x6f2   : > { %16488 = vmatprep.subr.bf16.mxu0 %v25098_v46  ;;  %18324 = vmatprep.subr.bf16.mxu1 %v25101_v17  ;;  %v25170_v46 = vld [vmem:[%s26411_s10 + $0x3624] ss:$16 sps:$4 sm:$0xff]   ;;  %v25173_v17 = vld [vmem:[%s26411_s10 + $0x362c] ss:$16 sps:$4 sm:$0xff]  }
 0x6f5   : > { %16489 = vmatpush1.bf16.msra.mxu0 %v25096_v41  ;;  %18325 = vmatpush1.bf16.msra.mxu1 %v25099_v57  ;;  %v19745_v41 = vcombine.high %v706_v62, %v706_v62  ;;  %v25178_v57 = vld [vmem:[%s26411_s10 + $0x3644] ss:$16 sps:$4 sm:$0xff]  }
 0x6f6   : > { %16490 = vmatprep.subr.bf16.mxu0 %v25104_v4  ;;  %18326 = vmatprep.subr.bf16.mxu1 %v25107_v13  ;;  %v25181_v4 = vld [vmem:[%s26411_s10 + $0x364c] ss:$16 sps:$4 sm:$0xff]   ;;  %v19744_v13 = vcombine.low %v706_v62, %v706_v62  ;;  %v25238_v62 = vld [vmem:[%s26411_s10 + $0x3784] ss:$16 sps:$4 sm:$0xff]  }
 0x6f9   : > { %16491 = vmatpush1.bf16.msra.mxu0 %v25102_v7  ;;  %18327 = vmatpush1.bf16.msra.mxu1 %v25105_v63  ;;  %v28716_v7 = vld [vmem:[%s26413_s15 + $0xd8] sm:$0xff] }
 0x6fa   : > { %16492 = vmatprep.subr.bf16.mxu0 %v25110_v20  ;;  %18328 = vmatprep.subr.bf16.mxu1 %v25113_v44  ;;  %v28719_v63 = vld [vmem:[%s26413_s15 + $0x1f8] sm:$0xff] }
 0x6fb   : > { %v16318_v52 = vpop.f32.mrb[92].mxu0  ;;  %v18154_v54 = vpop.f32.mrb[92].mxu1  ;;  %v25176_v20 = vld [vmem:[%s26411_s10 + $0x3640] ss:$16 sps:$4 sm:$0xff]   ;;  %v25179_v44 = vld [vmem:[%s26411_s10 + $0x3648] ss:$16 sps:$4 sm:$0xff]  }
 0x6fc   : > { %v28661_v56 = vadd.f32 %v16318_v52, %v28574_v37  ;;  %v28664_v36 = vadd.f32 %v18154_v54, %v28577_v16  ;;  %v16320_v11 = vpop.f32.mrb[93].mxu0  ;;  %v18156_v59 = vpop.f32.mrb[93].mxu1  ;;  %v25122_v16 = vld [vmem:[%s26411_s10 + $0x3524] ss:$16 sps:$4 sm:$0xff]   ;;  %v25185_v52 = vld [vmem:[%s26411_s10 + $0x3668] ss:$16 sps:$4 sm:$0xff]  }
 0x6fd   : > { %v28667_v6 = vadd.f32 %v16320_v11, %v28580_v45  ;;  %v28670_v39 = vadd.f32 %v18156_v59, %v28583_v18  ;;  %16493 = vmatpush1.bf16.msra.mxu0 %v25108_v5  ;;  %18329 = vmatpush1.bf16.msra.mxu1 %v25111_v2  ;;  %v16322_v37 = vpop.f32.mrb[94].mxu0  ;;  %v18158_v0 = vpop.f32.mrb[94].mxu1  ;;  %v25125_v45 = vld [vmem:[%s26411_s10 + $0x352c] ss:$16 sps:$4 sm:$0xff]   ;;  %v25120_v18 = vld [vmem:[%s26411_s10 + $0x3520] ss:$16 sps:$4 sm:$0xff]  }
 0x6fe   : > { %16494 = vmatprep.subr.bf16.mxu0 %v25116_v32  ;;  %18330 = vmatprep.subr.bf16.mxu1 %v25119_v29  ;;  %v16323_v22 = vpop.f32.mrb[95].mxu0  ;;  %v18159_v31 = vpop.f32.mrb[95].mxu1  ;;  %v25184_v5 = vld [vmem:[%s26411_s10 + $0x3664] ss:$16 sps:$4 sm:$0xff]   ;;  %v25187_v2 = vld [vmem:[%s26411_s10 + $0x366c] ss:$16 sps:$4 sm:$0xff]   ;;  %v19675_v32 = vcombine.high %v28716_v7, %v28719_v63 }
 0x6ff   : > { %v25182_v29 = vld [vmem:[%s26411_s10 + $0x3660] ss:$16 sps:$4 sm:$0xff]   ;;  %v25190_v54 = vld [vmem:[%s26411_s10 + $0x3684] ss:$16 sps:$4 sm:$0xff]   ;;  %v25193_v11 = vld [vmem:[%s26411_s10 + $0x368c] ss:$16 sps:$4 sm:$0xff]  }
 0x700   : > { %v25188_v59 = vld [vmem:[%s26411_s10 + $0x3680] ss:$16 sps:$4 sm:$0xff]   ;;  %v25199_v37 = vld [vmem:[%s26411_s10 + $0x36ac] ss:$16 sps:$4 sm:$0xff]  }
 0x701   : > { %16495 = vmatpush1.bf16.msra.mxu0 %v25114_v1  ;;  %18331 = vmatpush1.bf16.msra.mxu1 %v25117_v9  ;;  %v25191_v1 = vld [vmem:[%s26411_s10 + $0x3688] ss:$16 sps:$4 sm:$0xff]   ;;  %v25196_v9 = vld [vmem:[%s26411_s10 + $0x36a4] ss:$16 sps:$4 sm:$0xff]   ;;  %v25194_v0 = vld [vmem:[%s26411_s10 + $0x36a0] ss:$16 sps:$4 sm:$0xff]  }
 0x702   : > { %16496 = vmatprep.subr.bf16.mxu0 %v25122_v16  ;;  %18332 = vmatprep.subr.bf16.mxu1 %v25125_v45  ;;  %v25197_v16 = vld [vmem:[%s26411_s10 + $0x36a8] ss:$16 sps:$4 sm:$0xff]   ;;  %v25202_v45 = vld [vmem:[%s26411_s10 + $0x36c4] ss:$16 sps:$4 sm:$0xff]   ;;  %v25205_v22 = vld [vmem:[%s26411_s10 + $0x36cc] ss:$16 sps:$4 sm:$0xff]  }
 0x703   : > { %v25200_v31 = vld [vmem:[%s26411_s10 + $0x36c0] ss:$16 sps:$4 sm:$0xff]  }
 0x705   : > { %16497 = vmatpush1.bf16.msra.mxu0 %v25120_v18  ;;  %18333 = vmatpush1.bf16.msra.mxu1 %v25123_v34  ;;  %v25203_v18 = vld [vmem:[%s26411_s10 + $0x36c8] ss:$16 sps:$4 sm:$0xff]   ;;  %v25208_v34 = vld [vmem:[%s26411_s10 + $0x36e4] ss:$16 sps:$4 sm:$0xff]  }
 0x706   : > { %16498 = vmatprep.subr.bf16.mxu0 %v25128_v3  ;;  %18334 = vmatprep.subr.bf16.mxu1 %v25131_v26  ;;  %v25211_v3 = vld [vmem:[%s26411_s10 + $0x36ec] ss:$16 sps:$4 sm:$0xff]   ;;  %v25206_v26 = vld [vmem:[%s26411_s10 + $0x36e0] ss:$16 sps:$4 sm:$0xff]  }
 0x709   : > { %16499 = vmatpush1.bf16.msra.mxu0 %v25126_v23  ;;  %18335 = vmatpush1.bf16.msra.mxu1 %v25129_v51  ;;  %v25209_v23 = vld [vmem:[%s26411_s10 + $0x36e8] ss:$16 sps:$4 sm:$0xff]   ;;  %v25214_v51 = vld [vmem:[%s26411_s10 + $0x3704] ss:$16 sps:$4 sm:$0xff]  }
 0x70a   : > { %16500 = vmatprep.subr.bf16.mxu0 %v25134_v48  ;;  %18336 = vmatprep.subr.bf16.mxu1 %v25137_v61  ;;  %v25217_v48 = vld [vmem:[%s26411_s10 + $0x370c] ss:$16 sps:$4 sm:$0xff]  }
 0x70d   : > { %16501 = vmatpush1.bf16.msra.mxu0 %v25132_v14  ;;  %18337 = vmatpush1.bf16.msra.mxu1 %v25135_v15 }
 0x70e   : > { %16502 = vmatprep.subr.bf16.mxu0 %v25140_v55  ;;  %18338 = vmatprep.subr.bf16.mxu1 %v25143_v30 }
 0x711   : > { %16503 = vmatpush1.bf16.msra.mxu0 %v25138_v24  ;;  %18339 = vmatpush1.bf16.msra.mxu1 %v25141_v27 }
 0x712   : > { %16504 = vmatprep.subr.bf16.mxu0 %v25146_v58  ;;  %18340 = vmatprep.subr.bf16.mxu1 %v25149_v21  ;;  %v25212_v21 = vld [vmem:[%s26411_s10 + $0x3700] ss:$16 sps:$4 sm:$0xff]  }
 0x715   : > { %16505 = vmatpush1.bf16.msra.mxu0 %v25144_v28  ;;  %18341 = vmatpush1.bf16.msra.mxu1 %v25147_v19  ;;  %v25215_v28 = vld [vmem:[%s26411_s10 + $0x3708] ss:$16 sps:$4 sm:$0xff]  }
 0x716   : > { %16506 = vmatprep.subr.bf16.mxu0 %v25152_v38  ;;  %18342 = vmatprep.subr.bf16.mxu1 %v25155_v50 }
 0x719   : > { %16507 = vmatpush1.bf16.msra.mxu0 %v25150_v53  ;;  %18343 = vmatpush1.bf16.msra.mxu1 %v25153_v12  ;;  %v25221_v53 = vld [vmem:[%s26411_s10 + $0x3728] ss:$16 sps:$4 sm:$0xff]   ;;  %v25226_v12 = vld [vmem:[%s26411_s10 + $0x3744] ss:$16 sps:$4 sm:$0xff]  }
 0x71a   : > { %16508 = vmatprep.subr.bf16.mxu0 %v25158_v25  ;;  %18344 = vmatprep.subr.bf16.mxu1 %v25161_v60  ;;  %v25229_v25 = vld [vmem:[%s26411_s10 + $0x374c] ss:$16 sps:$4 sm:$0xff]   ;;  %v25224_v60 = vld [vmem:[%s26411_s10 + $0x3740] ss:$16 sps:$4 sm:$0xff]  }
 0x71d   : > { %16509 = vmatpush1.bf16.msra.mxu0 %v25156_v43  ;;  %18345 = vmatpush1.bf16.msra.mxu1 %v25159_v8  ;;  %v25227_v43 = vld [vmem:[%s26411_s10 + $0x3748] ss:$16 sps:$4 sm:$0xff]   ;;  %v25232_v8 = vld [vmem:[%s26411_s10 + $0x3764] ss:$16 sps:$4 sm:$0xff]  }
 0x71e   : > { %16529 = vmatprep.subr.bf16.mxu0 %v25164_v10  ;;  %18365 = vmatprep.subr.bf16.mxu1 %v25167_v33  ;;  %v25235_v10 = vld [vmem:[%s26411_s10 + $0x376c] ss:$16 sps:$4 sm:$0xff]   ;;  %v25230_v33 = vld [vmem:[%s26411_s10 + $0x3760] ss:$16 sps:$4 sm:$0xff]  }
 0x720   : > { %16511 = vmatmul.mubr.bf16.vlgmr.msra.gmra.mrb[0].mxu0 %v19672_v35  ;;  %18347 = vmatmul.mubr.bf16.vlgmr.msra.gmra.mrb[0].mxu1 %v19672_v35  ;;  %v25233_v35 = vld [vmem:[%s26411_s10 + $0x3768] ss:$16 sps:$4 sm:$0xff]  }
 0x721   : > { %16530 = vmatpush1.bf16.msra.mxu0 %v25162_v49  ;;  %18366 = vmatpush1.bf16.msra.mxu1 %v25165_v42  ;;  %v25241_v49 = vld [vmem:[%s26411_s10 + $0x378c] ss:$16 sps:$4 sm:$0xff]   ;;  %v25236_v42 = vld [vmem:[%s26411_s10 + $0x3780] ss:$16 sps:$4 sm:$0xff]  }
 0x722   : > { %16531 = vmatprep.subr.bf16.mxu0 %v25170_v46  ;;  %18367 = vmatprep.subr.bf16.mxu1 %v25173_v17  ;;  %v25239_v46 = vld [vmem:[%s26411_s10 + $0x3788] ss:$16 sps:$4 sm:$0xff]   ;;  %v25244_v17 = vld [vmem:[%s26411_s10 + $0x37a4] ss:$16 sps:$4 sm:$0xff]  }
 0x723   : > { %16520 = vmatprep.mubr.bf16.mxu0 %v19745_v41  ;;  %18356 = vmatprep.mubr.bf16.mxu1 %v19745_v41  ;;  %v25247_v41 = vld [vmem:[%s26411_s10 + $0x37ac] ss:$16 sps:$4 sm:$0xff]  }
 0x725   : > { %16532 = vmatpush1.bf16.msra.mxu0 %v25168_v47  ;;  %18368 = vmatpush1.bf16.msra.mxu1 %v25171_v40  ;;  %v25242_v47 = vld [vmem:[%s26411_s10 + $0x37a0] ss:$16 sps:$4 sm:$0xff]   ;;  %v25245_v40 = vld [vmem:[%s26411_s10 + $0x37a8] ss:$16 sps:$4 sm:$0xff]  }
 0x726   : > { %16533 = vmatprep.subr.bf16.mxu0 %v25178_v57  ;;  %18369 = vmatprep.subr.bf16.mxu1 %v25181_v4  ;;  %v25250_v57 = vld [vmem:[%s26411_s10 + $0x37c4] ss:$16 sps:$4 sm:$0xff]   ;;  %v25253_v4 = vld [vmem:[%s26411_s10 + $0x37cc] ss:$16 sps:$4 sm:$0xff]  }
 0x728   : > { %16521 = vmatmul.mubr.bf16.gmra.mrb[108].mxu0 %v19744_v13  ;;  %18357 = vmatmul.mubr.bf16.gmra.mrb[108].mxu1 %v19744_v13  ;;  %v25248_v13 = vld [vmem:[%s26411_s10 + $0x37c0] ss:$16 sps:$4 sm:$0xff]  }
 0x729   : > { %16534 = vmatpush1.bf16.msra.mxu0 %v25176_v20  ;;  %18370 = vmatpush1.bf16.msra.mxu1 %v25179_v44  ;;  %v25251_v20 = vld [vmem:[%s26411_s10 + $0x37c8] ss:$16 sps:$4 sm:$0xff]   ;;  %v25256_v44 = vld [vmem:[%s26411_s10 + $0x37e4] ss:$16 sps:$4 sm:$0xff]  }
 0x72a   : > { %16535 = vmatprep.subr.bf16.mxu0 %v25184_v5  ;;  %18371 = vmatprep.subr.bf16.mxu1 %v25187_v2  ;;  %v25259_v5 = vld [vmem:[%s26411_s10 + $0x37ec] ss:$16 sps:$4 sm:$0xff]   ;;  %v25254_v2 = vld [vmem:[%s26411_s10 + $0x37e0] ss:$16 sps:$4 sm:$0xff]  }
 0x72b   : > { %16561 = vmatprep.mubr.bf16.mxu0 %v19675_v32  ;;  %18397 = vmatprep.mubr.bf16.mxu1 %v19675_v32  ;;  %v25257_v32 = vld [vmem:[%s26411_s10 + $0x37e8] ss:$16 sps:$4 sm:$0xff]  }
 0x72d   : > { %16536 = vmatpush1.bf16.msra.mxu0 %v25182_v29  ;;  %18372 = vmatpush1.bf16.msra.mxu1 %v25185_v52  ;;  %v25262_v29 = vld [vmem:[%s26411_s10 + $0x3804] ss:$16 sps:$4 sm:$0xff]   ;;  %v25265_v52 = vld [vmem:[%s26411_s10 + $0x380c] ss:$16 sps:$4 sm:$0xff]  }
 0x72e   : > { %16537 = vmatprep.subr.bf16.mxu0 %v25190_v54  ;;  %18373 = vmatprep.subr.bf16.mxu1 %v25193_v11  ;;  %v19674_v54 = vcombine.low %v28716_v7, %v28719_v63  ;;  %v707_v11 = vld [vmem:[%s26413_s15 + $0x318] sm:$0x11]  ;;  %v25266_v7 = vld [vmem:[%s26411_s10 + $0x3820] ss:$16 sps:$4 sm:$0xff]  }
 0x72f   : > { %v25269_v63 = vld [vmem:[%s26411_s10 + $0x3828] ss:$16 sps:$4 sm:$0xff]  }
 0x731   : > { %16538 = vmatpush1.bf16.msra.mxu0 %v25188_v59  ;;  %18374 = vmatpush1.bf16.msra.mxu1 %v25191_v1  ;;  %v25260_v59 = vld [vmem:[%s26411_s10 + $0x3800] ss:$16 sps:$4 sm:$0xff]   ;;  %v25263_v1 = vld [vmem:[%s26411_s10 + $0x3808] ss:$16 sps:$4 sm:$0xff]  }
 0x732   : > { %16539 = vmatprep.subr.bf16.mxu0 %v25196_v9  ;;  %18375 = vmatprep.subr.bf16.mxu1 %v25199_v37  ;;  %v25268_v9 = vld [vmem:[%s26411_s10 + $0x3824] ss:$16 sps:$4 sm:$0xff]   ;;  %v25271_v37 = vld [vmem:[%s26411_s10 + $0x382c] ss:$16 sps:$4 sm:$0xff]  }
 0x735   : > { %16540 = vmatpush1.bf16.msra.mxu0 %v25194_v0  ;;  %18376 = vmatpush1.bf16.msra.mxu1 %v25197_v16  ;;  %v19747_v0 = vcombine.high %v707_v11, %v707_v11  ;;  %v25276_v16 = vld [vmem:[%s26411_s10 + $0x3844] ss:$16 sps:$4 sm:$0xff]  }
 0x736   : > { %16541 = vmatprep.subr.bf16.mxu0 %v25202_v45  ;;  %18377 = vmatprep.subr.bf16.mxu1 %v25205_v22  ;;  %v25279_v45 = vld [vmem:[%s26411_s10 + $0x384c] ss:$16 sps:$4 sm:$0xff]   ;;  %v19746_v22 = vcombine.low %v707_v11, %v707_v11  ;;  %v25336_v11 = vld [vmem:[%s26411_s10 + $0x3984] ss:$16 sps:$4 sm:$0xff]  }
 0x739   : > { %16542 = vmatpush1.bf16.msra.mxu0 %v25200_v31  ;;  %18378 = vmatpush1.bf16.msra.mxu1 %v25203_v18  ;;  %v28803_v31 = vld [vmem:[%s26413_s15 + $0xe0] sm:$0xff] }
 0x73a   : > { %16543 = vmatprep.subr.bf16.mxu0 %v25208_v34  ;;  %18379 = vmatprep.subr.bf16.mxu1 %v25211_v3  ;;  %v28806_v18 = vld [vmem:[%s26413_s15 + $0x200] sm:$0xff] }
 0x73b   : > { %v16369_v61 = vpop.f32.mrb[96].mxu0  ;;  %v18205_v14 = vpop.f32.mrb[96].mxu1  ;;  %v25274_v34 = vld [vmem:[%s26411_s10 + $0x3840] ss:$16 sps:$4 sm:$0xff]   ;;  %v25277_v3 = vld [vmem:[%s26411_s10 + $0x3848] ss:$16 sps:$4 sm:$0xff]  }
 0x73c   : > { %v28748_v15 = vadd.f32 %v16369_v61, %v28661_v56  ;;  %v28751_v55 = vadd.f32 %v18205_v14, %v28664_v36  ;;  %v16371_v30 = vpop.f32.mrb[97].mxu0  ;;  %v18207_v24 = vpop.f32.mrb[97].mxu1  ;;  %v25220_v36 = vld [vmem:[%s26411_s10 + $0x3724] ss:$16 sps:$4 sm:$0xff]   ;;  %v25283_v61 = vld [vmem:[%s26411_s10 + $0x3868] ss:$16 sps:$4 sm:$0xff]  }
 0x73d   : > { %v28754_v27 = vadd.f32 %v16371_v30, %v28667_v6  ;;  %v28757_v58 = vadd.f32 %v18207_v24, %v28670_v39  ;;  %16544 = vmatpush1.bf16.msra.mxu0 %v25206_v26  ;;  %18380 = vmatpush1.bf16.msra.mxu1 %v25209_v23  ;;  %v16373_v56 = vpop.f32.mrb[98].mxu0  ;;  %v18209_v19 = vpop.f32.mrb[98].mxu1  ;;  %v25223_v6 = vld [vmem:[%s26411_s10 + $0x372c] ss:$16 sps:$4 sm:$0xff]   ;;  %v25218_v39 = vld [vmem:[%s26411_s10 + $0x3720] ss:$16 sps:$4 sm:$0xff]  }
 0x73e   : > { %16545 = vmatprep.subr.bf16.mxu0 %v25214_v51  ;;  %18381 = vmatprep.subr.bf16.mxu1 %v25217_v48  ;;  %v16374_v38 = vpop.f32.mrb[99].mxu0  ;;  %v18210_v50 = vpop.f32.mrb[99].mxu1  ;;  %v25282_v26 = vld [vmem:[%s26411_s10 + $0x3864] ss:$16 sps:$4 sm:$0xff]   ;;  %v25285_v23 = vld [vmem:[%s26411_s10 + $0x386c] ss:$16 sps:$4 sm:$0xff]   ;;  %v19677_v51 = vcombine.high %v28803_v31, %v28806_v18 }
 0x73f   : > { %v25280_v48 = vld [vmem:[%s26411_s10 + $0x3860] ss:$16 sps:$4 sm:$0xff]   ;;  %v25288_v14 = vld [vmem:[%s26411_s10 + $0x3884] ss:$16 sps:$4 sm:$0xff]   ;;  %v25291_v30 = vld [vmem:[%s26411_s10 + $0x388c] ss:$16 sps:$4 sm:$0xff]  }
 0x740   : > { %v25286_v24 = vld [vmem:[%s26411_s10 + $0x3880] ss:$16 sps:$4 sm:$0xff]   ;;  %v25297_v56 = vld [vmem:[%s26411_s10 + $0x38ac] ss:$16 sps:$4 sm:$0xff]  }
 0x741   : > { %16546 = vmatpush1.bf16.msra.mxu0 %v25212_v21  ;;  %18382 = vmatpush1.bf16.msra.mxu1 %v25215_v28  ;;  %v25289_v21 = vld [vmem:[%s26411_s10 + $0x3888] ss:$16 sps:$4 sm:$0xff]   ;;  %v25294_v28 = vld [vmem:[%s26411_s10 + $0x38a4] ss:$16 sps:$4 sm:$0xff]   ;;  %v25292_v19 = vld [vmem:[%s26411_s10 + $0x38a0] ss:$16 sps:$4 sm:$0xff]  }
 0x742   : > { %16547 = vmatprep.subr.bf16.mxu0 %v25220_v36  ;;  %18383 = vmatprep.subr.bf16.mxu1 %v25223_v6  ;;  %v25295_v36 = vld [vmem:[%s26411_s10 + $0x38a8] ss:$16 sps:$4 sm:$0xff]   ;;  %v25300_v6 = vld [vmem:[%s26411_s10 + $0x38c4] ss:$16 sps:$4 sm:$0xff]   ;;  %v25303_v38 = vld [vmem:[%s26411_s10 + $0x38cc] ss:$16 sps:$4 sm:$0xff]  }
 0x743   : > { %v25298_v50 = vld [vmem:[%s26411_s10 + $0x38c0] ss:$16 sps:$4 sm:$0xff]  }
 0x745   : > { %16548 = vmatpush1.bf16.msra.mxu0 %v25218_v39  ;;  %18384 = vmatpush1.bf16.msra.mxu1 %v25221_v53  ;;  %v25301_v39 = vld [vmem:[%s26411_s10 + $0x38c8] ss:$16 sps:$4 sm:$0xff]   ;;  %v25306_v53 = vld [vmem:[%s26411_s10 + $0x38e4] ss:$16 sps:$4 sm:$0xff]  }
 0x746   : > { %16549 = vmatprep.subr.bf16.mxu0 %v25226_v12  ;;  %18385 = vmatprep.subr.bf16.mxu1 %v25229_v25  ;;  %v25309_v12 = vld [vmem:[%s26411_s10 + $0x38ec] ss:$16 sps:$4 sm:$0xff]   ;;  %v25304_v25 = vld [vmem:[%s26411_s10 + $0x38e0] ss:$16 sps:$4 sm:$0xff]  }
 0x749   : > { %16550 = vmatpush1.bf16.msra.mxu0 %v25224_v60  ;;  %18386 = vmatpush1.bf16.msra.mxu1 %v25227_v43  ;;  %v25307_v60 = vld [vmem:[%s26411_s10 + $0x38e8] ss:$16 sps:$4 sm:$0xff]   ;;  %v25312_v43 = vld [vmem:[%s26411_s10 + $0x3904] ss:$16 sps:$4 sm:$0xff]  }
 0x74a   : > { %16551 = vmatprep.subr.bf16.mxu0 %v25232_v8  ;;  %18387 = vmatprep.subr.bf16.mxu1 %v25235_v10  ;;  %v25315_v8 = vld [vmem:[%s26411_s10 + $0x390c] ss:$16 sps:$4 sm:$0xff]  }
 0x74d   : > { %16552 = vmatpush1.bf16.msra.mxu0 %v25230_v33  ;;  %18388 = vmatpush1.bf16.msra.mxu1 %v25233_v35 }
 0x74e   : > { %16553 = vmatprep.subr.bf16.mxu0 %v25238_v62  ;;  %18389 = vmatprep.subr.bf16.mxu1 %v25241_v49 }
 0x751   : > { %16554 = vmatpush1.bf16.msra.mxu0 %v25236_v42  ;;  %18390 = vmatpush1.bf16.msra.mxu1 %v25239_v46 }
 0x752   : > { %16555 = vmatprep.subr.bf16.mxu0 %v25244_v17  ;;  %18391 = vmatprep.subr.bf16.mxu1 %v25247_v41  ;;  %v25310_v41 = vld [vmem:[%s26411_s10 + $0x3900] ss:$16 sps:$4 sm:$0xff]  }
 0x755   : > { %16556 = vmatpush1.bf16.msra.mxu0 %v25242_v47  ;;  %18392 = vmatpush1.bf16.msra.mxu1 %v25245_v40  ;;  %v25313_v47 = vld [vmem:[%s26411_s10 + $0x3908] ss:$16 sps:$4 sm:$0xff]  }
 0x756   : > { %16557 = vmatprep.subr.bf16.mxu0 %v25250_v57  ;;  %18393 = vmatprep.subr.bf16.mxu1 %v25253_v4 }
 0x759   : > { %16558 = vmatpush1.bf16.msra.mxu0 %v25248_v13  ;;  %18394 = vmatpush1.bf16.msra.mxu1 %v25251_v20  ;;  %v25319_v13 = vld [vmem:[%s26411_s10 + $0x3928] ss:$16 sps:$4 sm:$0xff]   ;;  %v25324_v20 = vld [vmem:[%s26411_s10 + $0x3944] ss:$16 sps:$4 sm:$0xff]  }
 0x75a   : > { %16559 = vmatprep.subr.bf16.mxu0 %v25256_v44  ;;  %18395 = vmatprep.subr.bf16.mxu1 %v25259_v5  ;;  %v25327_v44 = vld [vmem:[%s26411_s10 + $0x394c] ss:$16 sps:$4 sm:$0xff]   ;;  %v25322_v5 = vld [vmem:[%s26411_s10 + $0x3940] ss:$16 sps:$4 sm:$0xff]  }
 0x75d   : > { %16560 = vmatpush1.bf16.msra.mxu0 %v25254_v2  ;;  %18396 = vmatpush1.bf16.msra.mxu1 %v25257_v32  ;;  %v25325_v2 = vld [vmem:[%s26411_s10 + $0x3948] ss:$16 sps:$4 sm:$0xff]   ;;  %v25330_v32 = vld [vmem:[%s26411_s10 + $0x3964] ss:$16 sps:$4 sm:$0xff]  }
 0x75e   : > { %16580 = vmatprep.subr.bf16.mxu0 %v25262_v29  ;;  %18416 = vmatprep.subr.bf16.mxu1 %v25265_v52  ;;  %v25333_v29 = vld [vmem:[%s26411_s10 + $0x396c] ss:$16 sps:$4 sm:$0xff]   ;;  %v25328_v52 = vld [vmem:[%s26411_s10 + $0x3960] ss:$16 sps:$4 sm:$0xff]  }
 0x760   : > { %16562 = vmatmul.mubr.bf16.vlgmr.msra.gmra.mrb[0].mxu0 %v19674_v54  ;;  %18398 = vmatmul.mubr.bf16.vlgmr.msra.gmra.mrb[0].mxu1 %v19674_v54  ;;  %v25331_v54 = vld [vmem:[%s26411_s10 + $0x3968] ss:$16 sps:$4 sm:$0xff]  }
 0x761   : > { %16581 = vmatpush1.bf16.msra.mxu0 %v25260_v59  ;;  %18417 = vmatpush1.bf16.msra.mxu1 %v25263_v1  ;;  %v25339_v59 = vld [vmem:[%s26411_s10 + $0x398c] ss:$16 sps:$4 sm:$0xff]   ;;  %v25334_v1 = vld [vmem:[%s26411_s10 + $0x3980] ss:$16 sps:$4 sm:$0xff]  }
 0x762   : > { %16582 = vmatprep.subr.bf16.mxu0 %v25268_v9  ;;  %18418 = vmatprep.subr.bf16.mxu1 %v25271_v37  ;;  %v25337_v9 = vld [vmem:[%s26411_s10 + $0x3988] ss:$16 sps:$4 sm:$0xff]   ;;  %v25342_v37 = vld [vmem:[%s26411_s10 + $0x39a4] ss:$16 sps:$4 sm:$0xff]  }
 0x763   : > { %16571 = vmatprep.mubr.bf16.mxu0 %v19747_v0  ;;  %18407 = vmatprep.mubr.bf16.mxu1 %v19747_v0  ;;  %v25345_v0 = vld [vmem:[%s26411_s10 + $0x39ac] ss:$16 sps:$4 sm:$0xff]  }
 0x765   : > { %16583 = vmatpush1.bf16.msra.mxu0 %v25266_v7  ;;  %18419 = vmatpush1.bf16.msra.mxu1 %v25269_v63  ;;  %v25340_v7 = vld [vmem:[%s26411_s10 + $0x39a0] ss:$16 sps:$4 sm:$0xff]   ;;  %v25343_v63 = vld [vmem:[%s26411_s10 + $0x39a8] ss:$16 sps:$4 sm:$0xff]  }
 0x766   : > { %16584 = vmatprep.subr.bf16.mxu0 %v25276_v16  ;;  %18420 = vmatprep.subr.bf16.mxu1 %v25279_v45  ;;  %v25348_v16 = vld [vmem:[%s26411_s10 + $0x39c4] ss:$16 sps:$4 sm:$0xff]   ;;  %v25351_v45 = vld [vmem:[%s26411_s10 + $0x39cc] ss:$16 sps:$4 sm:$0xff]  }
 0x768   : > { %16572 = vmatmul.mubr.bf16.gmra.mrb[112].mxu0 %v19746_v22  ;;  %18408 = vmatmul.mubr.bf16.gmra.mrb[112].mxu1 %v19746_v22  ;;  %v25346_v22 = vld [vmem:[%s26411_s10 + $0x39c0] ss:$16 sps:$4 sm:$0xff]  }
 0x769   : > { %16585 = vmatpush1.bf16.msra.mxu0 %v25274_v34  ;;  %18421 = vmatpush1.bf16.msra.mxu1 %v25277_v3  ;;  %v25349_v34 = vld [vmem:[%s26411_s10 + $0x39c8] ss:$16 sps:$4 sm:$0xff]   ;;  %v25354_v3 = vld [vmem:[%s26411_s10 + $0x39e4] ss:$16 sps:$4 sm:$0xff]  }
 0x76a   : > { %16586 = vmatprep.subr.bf16.mxu0 %v25282_v26  ;;  %18422 = vmatprep.subr.bf16.mxu1 %v25285_v23  ;;  %v25357_v26 = vld [vmem:[%s26411_s10 + $0x39ec] ss:$16 sps:$4 sm:$0xff]   ;;  %v25352_v23 = vld [vmem:[%s26411_s10 + $0x39e0] ss:$16 sps:$4 sm:$0xff]  }
 0x76b   : > { %16612 = vmatprep.mubr.bf16.mxu0 %v19677_v51  ;;  %18448 = vmatprep.mubr.bf16.mxu1 %v19677_v51  ;;  %v25355_v51 = vld [vmem:[%s26411_s10 + $0x39e8] ss:$16 sps:$4 sm:$0xff]  }
 0x76d   : > { %16587 = vmatpush1.bf16.msra.mxu0 %v25280_v48  ;;  %18423 = vmatpush1.bf16.msra.mxu1 %v25283_v61  ;;  %v25360_v48 = vld [vmem:[%s26411_s10 + $0x3a04] ss:$16 sps:$4 sm:$0xff]   ;;  %v25363_v61 = vld [vmem:[%s26411_s10 + $0x3a0c] ss:$16 sps:$4 sm:$0xff]  }
 0x76e   : > { %16588 = vmatprep.subr.bf16.mxu0 %v25288_v14  ;;  %18424 = vmatprep.subr.bf16.mxu1 %v25291_v30  ;;  %v19676_v14 = vcombine.low %v28803_v31, %v28806_v18  ;;  %v708_v30 = vld [vmem:[%s26413_s15 + $0x320] sm:$0x11]  ;;  %v25367_v18 = vld [vmem:[%s26411_s10 + $0x3a28] ss:$16 sps:$4 sm:$0xff]  }
 0x76f   : > { %v25364_v31 = vld [vmem:[%s26411_s10 + $0x3a20] ss:$16 sps:$4 sm:$0xff]  }
 0x771   : > { %16589 = vmatpush1.bf16.msra.mxu0 %v25286_v24  ;;  %18425 = vmatpush1.bf16.msra.mxu1 %v25289_v21  ;;  %v25358_v24 = vld [vmem:[%s26411_s10 + $0x3a00] ss:$16 sps:$4 sm:$0xff]   ;;  %v25361_v21 = vld [vmem:[%s26411_s10 + $0x3a08] ss:$16 sps:$4 sm:$0xff]  }
 0x772   : > { %16590 = vmatprep.subr.bf16.mxu0 %v25294_v28  ;;  %18426 = vmatprep.subr.bf16.mxu1 %v25297_v56  ;;  %v25366_v28 = vld [vmem:[%s26411_s10 + $0x3a24] ss:$16 sps:$4 sm:$0xff]   ;;  %v25369_v56 = vld [vmem:[%s26411_s10 + $0x3a2c] ss:$16 sps:$4 sm:$0xff]  }
 0x775   : > { %16591 = vmatpush1.bf16.msra.mxu0 %v25292_v19  ;;  %18427 = vmatpush1.bf16.msra.mxu1 %v25295_v36  ;;  %v19749_v19 = vcombine.high %v708_v30, %v708_v30  ;;  %v25374_v36 = vld [vmem:[%s26411_s10 + $0x3a44] ss:$16 sps:$4 sm:$0xff]  }
 0x776   : > { %16592 = vmatprep.subr.bf16.mxu0 %v25300_v6  ;;  %18428 = vmatprep.subr.bf16.mxu1 %v25303_v38  ;;  %v25377_v6 = vld [vmem:[%s26411_s10 + $0x3a4c] ss:$16 sps:$4 sm:$0xff]   ;;  %v19748_v38 = vcombine.low %v708_v30, %v708_v30  ;;  %v25434_v30 = vld [vmem:[%s26411_s10 + $0x3b84] ss:$16 sps:$4 sm:$0xff]  }
 0x779   : > { %16593 = vmatpush1.bf16.msra.mxu0 %v25298_v50  ;;  %18429 = vmatpush1.bf16.msra.mxu1 %v25301_v39  ;;  %v28890_v50 = vld [vmem:[%s26413_s15 + $0xe8] sm:$0xff] }
 0x77a   : > { %16594 = vmatprep.subr.bf16.mxu0 %v25306_v53  ;;  %18430 = vmatprep.subr.bf16.mxu1 %v25309_v12  ;;  %v28893_v39 = vld [vmem:[%s26413_s15 + $0x208] sm:$0xff] }
 0x77b   : > { %v16420_v10 = vpop.f32.mrb[100].mxu0  ;;  %v18256_v33 = vpop.f32.mrb[100].mxu1  ;;  %v25372_v53 = vld [vmem:[%s26411_s10 + $0x3a40] ss:$16 sps:$4 sm:$0xff]   ;;  %v25375_v12 = vld [vmem:[%s26411_s10 + $0x3a48] ss:$16 sps:$4 sm:$0xff]  }
 0x77c   : > { %v28835_v35 = vadd.f32 %v16420_v10, %v28748_v15  ;;  %v28838_v62 = vadd.f32 %v18256_v33, %v28751_v55  ;;  %v16422_v49 = vpop.f32.mrb[101].mxu0  ;;  %v18258_v42 = vpop.f32.mrb[101].mxu1  ;;  %v25318_v55 = vld [vmem:[%s26411_s10 + $0x3924] ss:$16 sps:$4 sm:$0xff]   ;;  %v25381_v10 = vld [vmem:[%s26411_s10 + $0x3a68] ss:$16 sps:$4 sm:$0xff]  }
 0x77d   : > { %v28841_v46 = vadd.f32 %v16422_v49, %v28754_v27  ;;  %v28844_v17 = vadd.f32 %v18258_v42, %v28757_v58  ;;  %16595 = vmatpush1.bf16.msra.mxu0 %v25304_v25  ;;  %18431 = vmatpush1.bf16.msra.mxu1 %v25307_v60  ;;  %v16424_v15 = vpop.f32.mrb[102].mxu0  ;;  %v18260_v40 = vpop.f32.mrb[102].mxu1  ;;  %v25321_v27 = vld [vmem:[%s26411_s10 + $0x392c] ss:$16 sps:$4 sm:$0xff]   ;;  %v25316_v58 = vld [vmem:[%s26411_s10 + $0x3920] ss:$16 sps:$4 sm:$0xff]  }
 0x77e   : > { %16596 = vmatprep.subr.bf16.mxu0 %v25312_v43  ;;  %18432 = vmatprep.subr.bf16.mxu1 %v25315_v8  ;;  %v16425_v57 = vpop.f32.mrb[103].mxu0  ;;  %v18261_v4 = vpop.f32.mrb[103].mxu1  ;;  %v25380_v25 = vld [vmem:[%s26411_s10 + $0x3a64] ss:$16 sps:$4 sm:$0xff]   ;;  %v25383_v60 = vld [vmem:[%s26411_s10 + $0x3a6c] ss:$16 sps:$4 sm:$0xff]   ;;  %v19679_v43 = vcombine.high %v28890_v50, %v28893_v39 }
 0x77f   : > { %v25378_v8 = vld [vmem:[%s26411_s10 + $0x3a60] ss:$16 sps:$4 sm:$0xff]   ;;  %v25386_v33 = vld [vmem:[%s26411_s10 + $0x3a84] ss:$16 sps:$4 sm:$0xff]   ;;  %v25389_v49 = vld [vmem:[%s26411_s10 + $0x3a8c] ss:$16 sps:$4 sm:$0xff]  }
 0x780   : > { %v25384_v42 = vld [vmem:[%s26411_s10 + $0x3a80] ss:$16 sps:$4 sm:$0xff]   ;;  %v25395_v15 = vld [vmem:[%s26411_s10 + $0x3aac] ss:$16 sps:$4 sm:$0xff]  }
 0x781   : > { %16597 = vmatpush1.bf16.msra.mxu0 %v25310_v41  ;;  %18433 = vmatpush1.bf16.msra.mxu1 %v25313_v47  ;;  %v25387_v41 = vld [vmem:[%s26411_s10 + $0x3a88] ss:$16 sps:$4 sm:$0xff]   ;;  %v25392_v47 = vld [vmem:[%s26411_s10 + $0x3aa4] ss:$16 sps:$4 sm:$0xff]   ;;  %v25390_v40 = vld [vmem:[%s26411_s10 + $0x3aa0] ss:$16 sps:$4 sm:$0xff]  }
 0x782   : > { %16598 = vmatprep.subr.bf16.mxu0 %v25318_v55  ;;  %18434 = vmatprep.subr.bf16.mxu1 %v25321_v27  ;;  %v25393_v55 = vld [vmem:[%s26411_s10 + $0x3aa8] ss:$16 sps:$4 sm:$0xff]   ;;  %v25398_v27 = vld [vmem:[%s26411_s10 + $0x3ac4] ss:$16 sps:$4 sm:$0xff]   ;;  %v25401_v57 = vld [vmem:[%s26411_s10 + $0x3acc] ss:$16 sps:$4 sm:$0xff]  }
 0x783   : > { %v25396_v4 = vld [vmem:[%s26411_s10 + $0x3ac0] ss:$16 sps:$4 sm:$0xff]  }
 0x785   : > { %16599 = vmatpush1.bf16.msra.mxu0 %v25316_v58  ;;  %18435 = vmatpush1.bf16.msra.mxu1 %v25319_v13  ;;  %v25399_v58 = vld [vmem:[%s26411_s10 + $0x3ac8] ss:$16 sps:$4 sm:$0xff]   ;;  %v25404_v13 = vld [vmem:[%s26411_s10 + $0x3ae4] ss:$16 sps:$4 sm:$0xff]  }
 0x786   : > { %16600 = vmatprep.subr.bf16.mxu0 %v25324_v20  ;;  %18436 = vmatprep.subr.bf16.mxu1 %v25327_v44  ;;  %v25407_v20 = vld [vmem:[%s26411_s10 + $0x3aec] ss:$16 sps:$4 sm:$0xff]   ;;  %v25402_v44 = vld [vmem:[%s26411_s10 + $0x3ae0] ss:$16 sps:$4 sm:$0xff]  }
 0x789   : > { %16601 = vmatpush1.bf16.msra.mxu0 %v25322_v5  ;;  %18437 = vmatpush1.bf16.msra.mxu1 %v25325_v2  ;;  %v25405_v5 = vld [vmem:[%s26411_s10 + $0x3ae8] ss:$16 sps:$4 sm:$0xff]   ;;  %v25410_v2 = vld [vmem:[%s26411_s10 + $0x3b04] ss:$16 sps:$4 sm:$0xff]  }
 0x78a   : > { %16602 = vmatprep.subr.bf16.mxu0 %v25330_v32  ;;  %18438 = vmatprep.subr.bf16.mxu1 %v25333_v29  ;;  %v25413_v32 = vld [vmem:[%s26411_s10 + $0x3b0c] ss:$16 sps:$4 sm:$0xff]  }
 0x78d   : > { %16603 = vmatpush1.bf16.msra.mxu0 %v25328_v52  ;;  %18439 = vmatpush1.bf16.msra.mxu1 %v25331_v54 }
 0x78e   : > { %16604 = vmatprep.subr.bf16.mxu0 %v25336_v11  ;;  %18440 = vmatprep.subr.bf16.mxu1 %v25339_v59 }
 0x791   : > { %16605 = vmatpush1.bf16.msra.mxu0 %v25334_v1  ;;  %18441 = vmatpush1.bf16.msra.mxu1 %v25337_v9 }
 0x792   : > { %16606 = vmatprep.subr.bf16.mxu0 %v25342_v37  ;;  %18442 = vmatprep.subr.bf16.mxu1 %v25345_v0  ;;  %v25408_v0 = vld [vmem:[%s26411_s10 + $0x3b00] ss:$16 sps:$4 sm:$0xff]  }
 0x795   : > { %16607 = vmatpush1.bf16.msra.mxu0 %v25340_v7  ;;  %18443 = vmatpush1.bf16.msra.mxu1 %v25343_v63  ;;  %v25411_v7 = vld [vmem:[%s26411_s10 + $0x3b08] ss:$16 sps:$4 sm:$0xff]  }
 0x796   : > { %16608 = vmatprep.subr.bf16.mxu0 %v25348_v16  ;;  %18444 = vmatprep.subr.bf16.mxu1 %v25351_v45 }
 0x799   : > { %16609 = vmatpush1.bf16.msra.mxu0 %v25346_v22  ;;  %18445 = vmatpush1.bf16.msra.mxu1 %v25349_v34  ;;  %v25417_v22 = vld [vmem:[%s26411_s10 + $0x3b28] ss:$16 sps:$4 sm:$0xff]   ;;  %v25422_v34 = vld [vmem:[%s26411_s10 + $0x3b44] ss:$16 sps:$4 sm:$0xff]  }
 0x79a   : > { %16610 = vmatprep.subr.bf16.mxu0 %v25354_v3  ;;  %18446 = vmatprep.subr.bf16.mxu1 %v25357_v26  ;;  %v25425_v3 = vld [vmem:[%s26411_s10 + $0x3b4c] ss:$16 sps:$4 sm:$0xff]   ;;  %v25420_v26 = vld [vmem:[%s26411_s10 + $0x3b40] ss:$16 sps:$4 sm:$0xff]  }
 0x79d   : > { %16611 = vmatpush1.bf16.msra.mxu0 %v25352_v23  ;;  %18447 = vmatpush1.bf16.msra.mxu1 %v25355_v51  ;;  %v25423_v23 = vld [vmem:[%s26411_s10 + $0x3b48] ss:$16 sps:$4 sm:$0xff]   ;;  %v25428_v51 = vld [vmem:[%s26411_s10 + $0x3b64] ss:$16 sps:$4 sm:$0xff]  }
 0x79e   : > { %16631 = vmatprep.subr.bf16.mxu0 %v25360_v48  ;;  %18467 = vmatprep.subr.bf16.mxu1 %v25363_v61  ;;  %v25431_v48 = vld [vmem:[%s26411_s10 + $0x3b6c] ss:$16 sps:$4 sm:$0xff]   ;;  %v25426_v61 = vld [vmem:[%s26411_s10 + $0x3b60] ss:$16 sps:$4 sm:$0xff]  }
 0x7a0   : > { %16613 = vmatmul.mubr.bf16.vlgmr.msra.gmra.mrb[0].mxu0 %v19676_v14  ;;  %18449 = vmatmul.mubr.bf16.vlgmr.msra.gmra.mrb[0].mxu1 %v19676_v14  ;;  %v25429_v14 = vld [vmem:[%s26411_s10 + $0x3b68] ss:$16 sps:$4 sm:$0xff]  }
 0x7a1   : > { %16632 = vmatpush1.bf16.msra.mxu0 %v25358_v24  ;;  %18468 = vmatpush1.bf16.msra.mxu1 %v25361_v21  ;;  %v25437_v24 = vld [vmem:[%s26411_s10 + $0x3b8c] ss:$16 sps:$4 sm:$0xff]   ;;  %v25432_v21 = vld [vmem:[%s26411_s10 + $0x3b80] ss:$16 sps:$4 sm:$0xff]  }
 0x7a2   : > { %16633 = vmatprep.subr.bf16.mxu0 %v25366_v28  ;;  %18469 = vmatprep.subr.bf16.mxu1 %v25369_v56  ;;  %v25435_v28 = vld [vmem:[%s26411_s10 + $0x3b88] ss:$16 sps:$4 sm:$0xff]   ;;  %v25440_v56 = vld [vmem:[%s26411_s10 + $0x3ba4] ss:$16 sps:$4 sm:$0xff]  }
 0x7a3   : > { %16622 = vmatprep.mubr.bf16.mxu0 %v19749_v19  ;;  %18458 = vmatprep.mubr.bf16.mxu1 %v19749_v19  ;;  %v25443_v19 = vld [vmem:[%s26411_s10 + $0x3bac] ss:$16 sps:$4 sm:$0xff]  }
 0x7a5   : > { %16634 = vmatpush1.bf16.msra.mxu0 %v25364_v31  ;;  %18470 = vmatpush1.bf16.msra.mxu1 %v25367_v18  ;;  %v25438_v31 = vld [vmem:[%s26411_s10 + $0x3ba0] ss:$16 sps:$4 sm:$0xff]   ;;  %v25441_v18 = vld [vmem:[%s26411_s10 + $0x3ba8] ss:$16 sps:$4 sm:$0xff]  }
 0x7a6   : > { %16635 = vmatprep.subr.bf16.mxu0 %v25374_v36  ;;  %18471 = vmatprep.subr.bf16.mxu1 %v25377_v6  ;;  %v25446_v36 = vld [vmem:[%s26411_s10 + $0x3bc4] ss:$16 sps:$4 sm:$0xff]   ;;  %v25449_v6 = vld [vmem:[%s26411_s10 + $0x3bcc] ss:$16 sps:$4 sm:$0xff]  }
 0x7a8   : > { %16623 = vmatmul.mubr.bf16.gmra.mrb[116].mxu0 %v19748_v38  ;;  %18459 = vmatmul.mubr.bf16.gmra.mrb[116].mxu1 %v19748_v38  ;;  %v25444_v38 = vld [vmem:[%s26411_s10 + $0x3bc0] ss:$16 sps:$4 sm:$0xff]  }
 0x7a9   : > { %16636 = vmatpush1.bf16.msra.mxu0 %v25372_v53  ;;  %18472 = vmatpush1.bf16.msra.mxu1 %v25375_v12  ;;  %v25447_v53 = vld [vmem:[%s26411_s10 + $0x3bc8] ss:$16 sps:$4 sm:$0xff]   ;;  %v25452_v12 = vld [vmem:[%s26411_s10 + $0x3be4] ss:$16 sps:$4 sm:$0xff]  }
 0x7aa   : > { %16637 = vmatprep.subr.bf16.mxu0 %v25380_v25  ;;  %18473 = vmatprep.subr.bf16.mxu1 %v25383_v60  ;;  %v25455_v25 = vld [vmem:[%s26411_s10 + $0x3bec] ss:$16 sps:$4 sm:$0xff]   ;;  %v25450_v60 = vld [vmem:[%s26411_s10 + $0x3be0] ss:$16 sps:$4 sm:$0xff]  }
 0x7ab   : > { %16663 = vmatprep.mubr.bf16.mxu0 %v19679_v43  ;;  %18499 = vmatprep.mubr.bf16.mxu1 %v19679_v43  ;;  %v25453_v43 = vld [vmem:[%s26411_s10 + $0x3be8] ss:$16 sps:$4 sm:$0xff]  }
 0x7ad   : > { %16638 = vmatpush1.bf16.msra.mxu0 %v25378_v8  ;;  %18474 = vmatpush1.bf16.msra.mxu1 %v25381_v10  ;;  %v25458_v8 = vld [vmem:[%s26411_s10 + $0x3c04] ss:$16 sps:$4 sm:$0xff]   ;;  %v25461_v10 = vld [vmem:[%s26411_s10 + $0x3c0c] ss:$16 sps:$4 sm:$0xff]  }
 0x7ae   : > { %16639 = vmatprep.subr.bf16.mxu0 %v25386_v33  ;;  %18475 = vmatprep.subr.bf16.mxu1 %v25389_v49  ;;  %v19678_v33 = vcombine.low %v28890_v50, %v28893_v39  ;;  %v709_v49 = vld [vmem:[%s26413_s15 + $0x328] sm:$0x11]  ;;  %v25462_v50 = vld [vmem:[%s26411_s10 + $0x3c20] ss:$16 sps:$4 sm:$0xff]  }
 0x7af   : > { %v25465_v39 = vld [vmem:[%s26411_s10 + $0x3c28] ss:$16 sps:$4 sm:$0xff]  }
 0x7b1   : > { %16640 = vmatpush1.bf16.msra.mxu0 %v25384_v42  ;;  %18476 = vmatpush1.bf16.msra.mxu1 %v25387_v41  ;;  %v25456_v42 = vld [vmem:[%s26411_s10 + $0x3c00] ss:$16 sps:$4 sm:$0xff]   ;;  %v25459_v41 = vld [vmem:[%s26411_s10 + $0x3c08] ss:$16 sps:$4 sm:$0xff]  }
 0x7b2   : > { %16641 = vmatprep.subr.bf16.mxu0 %v25392_v47  ;;  %18477 = vmatprep.subr.bf16.mxu1 %v25395_v15  ;;  %v25464_v47 = vld [vmem:[%s26411_s10 + $0x3c24] ss:$16 sps:$4 sm:$0xff]   ;;  %v25467_v15 = vld [vmem:[%s26411_s10 + $0x3c2c] ss:$16 sps:$4 sm:$0xff]  }
 0x7b5   : > { %16642 = vmatpush1.bf16.msra.mxu0 %v25390_v40  ;;  %18478 = vmatpush1.bf16.msra.mxu1 %v25393_v55  ;;  %v19751_v40 = vcombine.high %v709_v49, %v709_v49  ;;  %v25472_v55 = vld [vmem:[%s26411_s10 + $0x3c44] ss:$16 sps:$4 sm:$0xff]  }
 0x7b6   : > { %16643 = vmatprep.subr.bf16.mxu0 %v25398_v27  ;;  %18479 = vmatprep.subr.bf16.mxu1 %v25401_v57  ;;  %v25475_v27 = vld [vmem:[%s26411_s10 + $0x3c4c] ss:$16 sps:$4 sm:$0xff]   ;;  %v19750_v57 = vcombine.low %v709_v49, %v709_v49  ;;  %v25532_v49 = vld [vmem:[%s26411_s10 + $0x3d84] ss:$16 sps:$4 sm:$0xff]  }
 0x7b9   : > { %16644 = vmatpush1.bf16.msra.mxu0 %v25396_v4  ;;  %18480 = vmatpush1.bf16.msra.mxu1 %v25399_v58  ;;  %v28977_v4 = vld [vmem:[%s26413_s15 + $0xf0] sm:$0xff] }
 0x7ba   : > { %16645 = vmatprep.subr.bf16.mxu0 %v25404_v13  ;;  %18481 = vmatprep.subr.bf16.mxu1 %v25407_v20  ;;  %v28980_v58 = vld [vmem:[%s26413_s15 + $0x210] sm:$0xff] }
 0x7bb   : > { %v16471_v29 = vpop.f32.mrb[104].mxu0  ;;  %v18307_v52 = vpop.f32.mrb[104].mxu1  ;;  %v25470_v13 = vld [vmem:[%s26411_s10 + $0x3c40] ss:$16 sps:$4 sm:$0xff]   ;;  %v25473_v20 = vld [vmem:[%s26411_s10 + $0x3c48] ss:$16 sps:$4 sm:$0xff]  }
 0x7bc   : > { %v28922_v54 = vadd.f32 %v16471_v29, %v28835_v35  ;;  %v28925_v11 = vadd.f32 %v18307_v52, %v28838_v62  ;;  %v16473_v59 = vpop.f32.mrb[105].mxu0  ;;  %v18309_v1 = vpop.f32.mrb[105].mxu1  ;;  %v25416_v62 = vld [vmem:[%s26411_s10 + $0x3b24] ss:$16 sps:$4 sm:$0xff]   ;;  %v25479_v29 = vld [vmem:[%s26411_s10 + $0x3c68] ss:$16 sps:$4 sm:$0xff]  }
 0x7bd   : > { %v28928_v9 = vadd.f32 %v16473_v59, %v28841_v46  ;;  %v28931_v37 = vadd.f32 %v18309_v1, %v28844_v17  ;;  %16646 = vmatpush1.bf16.msra.mxu0 %v25402_v44  ;;  %18482 = vmatpush1.bf16.msra.mxu1 %v25405_v5  ;;  %v16475_v35 = vpop.f32.mrb[106].mxu0  ;;  %v18311_v63 = vpop.f32.mrb[106].mxu1  ;;  %v25419_v46 = vld [vmem:[%s26411_s10 + $0x3b2c] ss:$16 sps:$4 sm:$0xff]   ;;  %v25414_v17 = vld [vmem:[%s26411_s10 + $0x3b20] ss:$16 sps:$4 sm:$0xff]  }
 0x7be   : > { %16647 = vmatprep.subr.bf16.mxu0 %v25410_v2  ;;  %18483 = vmatprep.subr.bf16.mxu1 %v25413_v32  ;;  %v16476_v16 = vpop.f32.mrb[107].mxu0  ;;  %v18312_v45 = vpop.f32.mrb[107].mxu1  ;;  %v25478_v44 = vld [vmem:[%s26411_s10 + $0x3c64] ss:$16 sps:$4 sm:$0xff]   ;;  %v25481_v5 = vld [vmem:[%s26411_s10 + $0x3c6c] ss:$16 sps:$4 sm:$0xff]   ;;  %v19681_v2 = vcombine.high %v28977_v4, %v28980_v58 }
 0x7bf   : > { %v25476_v32 = vld [vmem:[%s26411_s10 + $0x3c60] ss:$16 sps:$4 sm:$0xff]   ;;  %v25484_v52 = vld [vmem:[%s26411_s10 + $0x3c84] ss:$16 sps:$4 sm:$0xff]   ;;  %v25487_v59 = vld [vmem:[%s26411_s10 + $0x3c8c] ss:$16 sps:$4 sm:$0xff]  }
 0x7c0   : > { %v25482_v1 = vld [vmem:[%s26411_s10 + $0x3c80] ss:$16 sps:$4 sm:$0xff]   ;;  %v25493_v35 = vld [vmem:[%s26411_s10 + $0x3cac] ss:$16 sps:$4 sm:$0xff]  }
 0x7c1   : > { %16648 = vmatpush1.bf16.msra.mxu0 %v25408_v0  ;;  %18484 = vmatpush1.bf16.msra.mxu1 %v25411_v7  ;;  %v25485_v0 = vld [vmem:[%s26411_s10 + $0x3c88] ss:$16 sps:$4 sm:$0xff]   ;;  %v25490_v7 = vld [vmem:[%s26411_s10 + $0x3ca4] ss:$16 sps:$4 sm:$0xff]   ;;  %v25488_v63 = vld [vmem:[%s26411_s10 + $0x3ca0] ss:$16 sps:$4 sm:$0xff]  }
 0x7c2   : > { %16649 = vmatprep.subr.bf16.mxu0 %v25416_v62  ;;  %18485 = vmatprep.subr.bf16.mxu1 %v25419_v46  ;;  %v25491_v62 = vld [vmem:[%s26411_s10 + $0x3ca8] ss:$16 sps:$4 sm:$0xff]   ;;  %v25496_v46 = vld [vmem:[%s26411_s10 + $0x3cc4] ss:$16 sps:$4 sm:$0xff]   ;;  %v25499_v16 = vld [vmem:[%s26411_s10 + $0x3ccc] ss:$16 sps:$4 sm:$0xff]  }
 0x7c3   : > { %v25494_v45 = vld [vmem:[%s26411_s10 + $0x3cc0] ss:$16 sps:$4 sm:$0xff]  }
 0x7c5   : > { %16650 = vmatpush1.bf16.msra.mxu0 %v25414_v17  ;;  %18486 = vmatpush1.bf16.msra.mxu1 %v25417_v22  ;;  %v25497_v17 = vld [vmem:[%s26411_s10 + $0x3cc8] ss:$16 sps:$4 sm:$0xff]   ;;  %v25502_v22 = vld [vmem:[%s26411_s10 + $0x3ce4] ss:$16 sps:$4 sm:$0xff]  }
 0x7c6   : > { %16651 = vmatprep.subr.bf16.mxu0 %v25422_v34  ;;  %18487 = vmatprep.subr.bf16.mxu1 %v25425_v3  ;;  %v25505_v34 = vld [vmem:[%s26411_s10 + $0x3cec] ss:$16 sps:$4 sm:$0xff]   ;;  %v25500_v3 = vld [vmem:[%s26411_s10 + $0x3ce0] ss:$16 sps:$4 sm:$0xff]  }
 0x7c9   : > { %16652 = vmatpush1.bf16.msra.mxu0 %v25420_v26  ;;  %18488 = vmatpush1.bf16.msra.mxu1 %v25423_v23  ;;  %v25503_v26 = vld [vmem:[%s26411_s10 + $0x3ce8] ss:$16 sps:$4 sm:$0xff]   ;;  %v25508_v23 = vld [vmem:[%s26411_s10 + $0x3d04] ss:$16 sps:$4 sm:$0xff]  }
 0x7ca   : > { %16653 = vmatprep.subr.bf16.mxu0 %v25428_v51  ;;  %18489 = vmatprep.subr.bf16.mxu1 %v25431_v48  ;;  %v25511_v51 = vld [vmem:[%s26411_s10 + $0x3d0c] ss:$16 sps:$4 sm:$0xff]  }
 0x7cd   : > { %16654 = vmatpush1.bf16.msra.mxu0 %v25426_v61  ;;  %18490 = vmatpush1.bf16.msra.mxu1 %v25429_v14 }
 0x7ce   : > { %16655 = vmatprep.subr.bf16.mxu0 %v25434_v30  ;;  %18491 = vmatprep.subr.bf16.mxu1 %v25437_v24 }
 0x7d1   : > { %16656 = vmatpush1.bf16.msra.mxu0 %v25432_v21  ;;  %18492 = vmatpush1.bf16.msra.mxu1 %v25435_v28 }
 0x7d2   : > { %16657 = vmatprep.subr.bf16.mxu0 %v25440_v56  ;;  %18493 = vmatprep.subr.bf16.mxu1 %v25443_v19  ;;  %v25506_v19 = vld [vmem:[%s26411_s10 + $0x3d00] ss:$16 sps:$4 sm:$0xff]  }
 0x7d5   : > { %16658 = vmatpush1.bf16.msra.mxu0 %v25438_v31  ;;  %18494 = vmatpush1.bf16.msra.mxu1 %v25441_v18  ;;  %v25509_v31 = vld [vmem:[%s26411_s10 + $0x3d08] ss:$16 sps:$4 sm:$0xff]  }
 0x7d6   : > { %16659 = vmatprep.subr.bf16.mxu0 %v25446_v36  ;;  %18495 = vmatprep.subr.bf16.mxu1 %v25449_v6 }
 0x7d9   : > { %16660 = vmatpush1.bf16.msra.mxu0 %v25444_v38  ;;  %18496 = vmatpush1.bf16.msra.mxu1 %v25447_v53  ;;  %v25515_v38 = vld [vmem:[%s26411_s10 + $0x3d28] ss:$16 sps:$4 sm:$0xff]   ;;  %v25520_v53 = vld [vmem:[%s26411_s10 + $0x3d44] ss:$16 sps:$4 sm:$0xff]  }
 0x7da   : > { %16661 = vmatprep.subr.bf16.mxu0 %v25452_v12  ;;  %18497 = vmatprep.subr.bf16.mxu1 %v25455_v25  ;;  %v25523_v12 = vld [vmem:[%s26411_s10 + $0x3d4c] ss:$16 sps:$4 sm:$0xff]   ;;  %v25518_v25 = vld [vmem:[%s26411_s10 + $0x3d40] ss:$16 sps:$4 sm:$0xff]  }
 0x7dd   : > { %16662 = vmatpush1.bf16.msra.mxu0 %v25450_v60  ;;  %18498 = vmatpush1.bf16.msra.mxu1 %v25453_v43  ;;  %v25521_v60 = vld [vmem:[%s26411_s10 + $0x3d48] ss:$16 sps:$4 sm:$0xff]   ;;  %v25526_v43 = vld [vmem:[%s26411_s10 + $0x3d64] ss:$16 sps:$4 sm:$0xff]  }
 0x7de   : > { %16682 = vmatprep.subr.bf16.mxu0 %v25458_v8  ;;  %18518 = vmatprep.subr.bf16.mxu1 %v25461_v10  ;;  %v25529_v8 = vld [vmem:[%s26411_s10 + $0x3d6c] ss:$16 sps:$4 sm:$0xff]   ;;  %v25524_v10 = vld [vmem:[%s26411_s10 + $0x3d60] ss:$16 sps:$4 sm:$0xff]  }
 0x7e0   : > { %16664 = vmatmul.mubr.bf16.vlgmr.msra.gmra.mrb[0].mxu0 %v19678_v33  ;;  %18500 = vmatmul.mubr.bf16.vlgmr.msra.gmra.mrb[0].mxu1 %v19678_v33  ;;  %v25527_v33 = vld [vmem:[%s26411_s10 + $0x3d68] ss:$16 sps:$4 sm:$0xff]  }
 0x7e1   : > { %16683 = vmatpush1.bf16.msra.mxu0 %v25456_v42  ;;  %18519 = vmatpush1.bf16.msra.mxu1 %v25459_v41  ;;  %v25535_v42 = vld [vmem:[%s26411_s10 + $0x3d8c] ss:$16 sps:$4 sm:$0xff]   ;;  %v25530_v41 = vld [vmem:[%s26411_s10 + $0x3d80] ss:$16 sps:$4 sm:$0xff]  }
 0x7e2   : > { %16684 = vmatprep.subr.bf16.mxu0 %v25464_v47  ;;  %18520 = vmatprep.subr.bf16.mxu1 %v25467_v15  ;;  %v25533_v47 = vld [vmem:[%s26411_s10 + $0x3d88] ss:$16 sps:$4 sm:$0xff]   ;;  %v25538_v15 = vld [vmem:[%s26411_s10 + $0x3da4] ss:$16 sps:$4 sm:$0xff]  }
 0x7e3   : > { %16673 = vmatprep.mubr.bf16.mxu0 %v19751_v40  ;;  %18509 = vmatprep.mubr.bf16.mxu1 %v19751_v40  ;;  %v25541_v40 = vld [vmem:[%s26411_s10 + $0x3dac] ss:$16 sps:$4 sm:$0xff]  }
 0x7e5   : > { %16685 = vmatpush1.bf16.msra.mxu0 %v25462_v50  ;;  %18521 = vmatpush1.bf16.msra.mxu1 %v25465_v39  ;;  %v25536_v50 = vld [vmem:[%s26411_s10 + $0x3da0] ss:$16 sps:$4 sm:$0xff]   ;;  %v25539_v39 = vld [vmem:[%s26411_s10 + $0x3da8] ss:$16 sps:$4 sm:$0xff]  }
 0x7e6   : > { %16686 = vmatprep.subr.bf16.mxu0 %v25472_v55  ;;  %18522 = vmatprep.subr.bf16.mxu1 %v25475_v27  ;;  %v25544_v55 = vld [vmem:[%s26411_s10 + $0x3dc4] ss:$16 sps:$4 sm:$0xff]   ;;  %v25547_v27 = vld [vmem:[%s26411_s10 + $0x3dcc] ss:$16 sps:$4 sm:$0xff]  }
 0x7e8   : > { %16674 = vmatmul.mubr.bf16.gmra.mrb[120].mxu0 %v19750_v57  ;;  %18510 = vmatmul.mubr.bf16.gmra.mrb[120].mxu1 %v19750_v57  ;;  %v25542_v57 = vld [vmem:[%s26411_s10 + $0x3dc0] ss:$16 sps:$4 sm:$0xff]  }
 0x7e9   : > { %16687 = vmatpush1.bf16.msra.mxu0 %v25470_v13  ;;  %18523 = vmatpush1.bf16.msra.mxu1 %v25473_v20  ;;  %v25545_v13 = vld [vmem:[%s26411_s10 + $0x3dc8] ss:$16 sps:$4 sm:$0xff]   ;;  %v25550_v20 = vld [vmem:[%s26411_s10 + $0x3de4] ss:$16 sps:$4 sm:$0xff]  }
 0x7ea   : > { %16688 = vmatprep.subr.bf16.mxu0 %v25478_v44  ;;  %18524 = vmatprep.subr.bf16.mxu1 %v25481_v5  ;;  %v25553_v44 = vld [vmem:[%s26411_s10 + $0x3dec] ss:$16 sps:$4 sm:$0xff]   ;;  %v25548_v5 = vld [vmem:[%s26411_s10 + $0x3de0] ss:$16 sps:$4 sm:$0xff]  }
 0x7eb   : > { %16714 = vmatprep.mubr.bf16.mxu0 %v19681_v2  ;;  %18550 = vmatprep.mubr.bf16.mxu1 %v19681_v2  ;;  %v25551_v2 = vld [vmem:[%s26411_s10 + $0x3de8] ss:$16 sps:$4 sm:$0xff]  }
 0x7ed   : > { %16689 = vmatpush1.bf16.msra.mxu0 %v25476_v32  ;;  %18525 = vmatpush1.bf16.msra.mxu1 %v25479_v29  ;;  %v25556_v32 = vld [vmem:[%s26411_s10 + $0x3e04] ss:$16 sps:$4 sm:$0xff]   ;;  %v25559_v29 = vld [vmem:[%s26411_s10 + $0x3e0c] ss:$16 sps:$4 sm:$0xff]  }
 0x7ee   : > { %16690 = vmatprep.subr.bf16.mxu0 %v25484_v52  ;;  %18526 = vmatprep.subr.bf16.mxu1 %v25487_v59  ;;  %v19680_v52 = vcombine.low %v28977_v4, %v28980_v58  ;;  %v710_v59 = vld [vmem:[%s26413_s15 + $0x330] sm:$0x11]  ;;  %v25563_v58 = vld [vmem:[%s26411_s10 + $0x3e28] ss:$16 sps:$4 sm:$0xff]  }
 0x7ef   : > { %v25560_v4 = vld [vmem:[%s26411_s10 + $0x3e20] ss:$16 sps:$4 sm:$0xff]  }
 0x7f1   : > { %16691 = vmatpush1.bf16.msra.mxu0 %v25482_v1  ;;  %18527 = vmatpush1.bf16.msra.mxu1 %v25485_v0  ;;  %v25554_v1 = vld [vmem:[%s26411_s10 + $0x3e00] ss:$16 sps:$4 sm:$0xff]   ;;  %v25557_v0 = vld [vmem:[%s26411_s10 + $0x3e08] ss:$16 sps:$4 sm:$0xff]  }
 0x7f2   : > { %16692 = vmatprep.subr.bf16.mxu0 %v25490_v7  ;;  %18528 = vmatprep.subr.bf16.mxu1 %v25493_v35  ;;  %v25562_v7 = vld [vmem:[%s26411_s10 + $0x3e24] ss:$16 sps:$4 sm:$0xff]   ;;  %v25565_v35 = vld [vmem:[%s26411_s10 + $0x3e2c] ss:$16 sps:$4 sm:$0xff]  }
 0x7f5   : > { %16693 = vmatpush1.bf16.msra.mxu0 %v25488_v63  ;;  %18529 = vmatpush1.bf16.msra.mxu1 %v25491_v62  ;;  %v19753_v63 = vcombine.high %v710_v59, %v710_v59  ;;  %v25570_v62 = vld [vmem:[%s26411_s10 + $0x3e44] ss:$16 sps:$4 sm:$0xff]  }
 0x7f6   : > { %16694 = vmatprep.subr.bf16.mxu0 %v25496_v46  ;;  %18530 = vmatprep.subr.bf16.mxu1 %v25499_v16  ;;  %v25573_v46 = vld [vmem:[%s26411_s10 + $0x3e4c] ss:$16 sps:$4 sm:$0xff]   ;;  %v19752_v16 = vcombine.low %v710_v59, %v710_v59  ;;  %v25630_v59 = vld [vmem:[%s26411_s10 + $0x3f84] ss:$16 sps:$4 sm:$0xff]  }
 0x7f9   : > { %16695 = vmatpush1.bf16.msra.mxu0 %v25494_v45  ;;  %18531 = vmatpush1.bf16.msra.mxu1 %v25497_v17  ;;  %v29064_v45 = vld [vmem:[%s26413_s15 + $0xf8] sm:$0xff] }
 0x7fa   : > { %16696 = vmatprep.subr.bf16.mxu0 %v25502_v22  ;;  %18532 = vmatprep.subr.bf16.mxu1 %v25505_v34  ;;  %v29067_v17 = vld [vmem:[%s26413_s15 + $0x218] sm:$0xff] }
 0x7fb   : > { %v16522_v48 = vpop.f32.mrb[108].mxu0  ;;  %v18358_v61 = vpop.f32.mrb[108].mxu1  ;;  %v25568_v22 = vld [vmem:[%s26411_s10 + $0x3e40] ss:$16 sps:$4 sm:$0xff]   ;;  %v25571_v34 = vld [vmem:[%s26411_s10 + $0x3e48] ss:$16 sps:$4 sm:$0xff]  }
 0x7fc   : > { %v29009_v14 = vadd.f32 %v16522_v48, %v28922_v54  ;;  %v29012_v30 = vadd.f32 %v18358_v61, %v28925_v11  ;;  %v16524_v24 = vpop.f32.mrb[109].mxu0  ;;  %v18360_v21 = vpop.f32.mrb[109].mxu1  ;;  %v25514_v11 = vld [vmem:[%s26411_s10 + $0x3d24] ss:$16 sps:$4 sm:$0xff]   ;;  %v25577_v48 = vld [vmem:[%s26411_s10 + $0x3e68] ss:$16 sps:$4 sm:$0xff]  }
 0x7fd   : > { %v29015_v28 = vadd.f32 %v16524_v24, %v28928_v9  ;;  %v29018_v56 = vadd.f32 %v18360_v21, %v28931_v37  ;;  %16697 = vmatpush1.bf16.msra.mxu0 %v25500_v3  ;;  %18533 = vmatpush1.bf16.msra.mxu1 %v25503_v26  ;;  %v16526_v54 = vpop.f32.mrb[110].mxu0  ;;  %v18362_v18 = vpop.f32.mrb[110].mxu1  ;;  %v25517_v9 = vld [vmem:[%s26411_s10 + $0x3d2c] ss:$16 sps:$4 sm:$0xff]   ;;  %v25512_v37 = vld [vmem:[%s26411_s10 + $0x3d20] ss:$16 sps:$4 sm:$0xff]  }
 0x7fe   : > { %16698 = vmatprep.subr.bf16.mxu0 %v25508_v23  ;;  %18534 = vmatprep.subr.bf16.mxu1 %v25511_v51  ;;  %v16527_v36 = vpop.f32.mrb[111].mxu0  ;;  %v18363_v6 = vpop.f32.mrb[111].mxu1  ;;  %v25576_v3 = vld [vmem:[%s26411_s10 + $0x3e64] ss:$16 sps:$4 sm:$0xff]   ;;  %v25579_v26 = vld [vmem:[%s26411_s10 + $0x3e6c] ss:$16 sps:$4 sm:$0xff]   ;;  %v19683_v23 = vcombine.high %v29064_v45, %v29067_v17 }
 0x7ff   : > { %v25574_v51 = vld [vmem:[%s26411_s10 + $0x3e60] ss:$16 sps:$4 sm:$0xff]   ;;  %v25582_v61 = vld [vmem:[%s26411_s10 + $0x3e84] ss:$16 sps:$4 sm:$0xff]   ;;  %v25585_v24 = vld [vmem:[%s26411_s10 + $0x3e8c] ss:$16 sps:$4 sm:$0xff]  }
 0x800   : > { %v25580_v21 = vld [vmem:[%s26411_s10 + $0x3e80] ss:$16 sps:$4 sm:$0xff]   ;;  %v25591_v54 = vld [vmem:[%s26411_s10 + $0x3eac] ss:$16 sps:$4 sm:$0xff]  }
 0x801   : > { %16699 = vmatpush1.bf16.msra.mxu0 %v25506_v19  ;;  %18535 = vmatpush1.bf16.msra.mxu1 %v25509_v31  ;;  %v25583_v19 = vld [vmem:[%s26411_s10 + $0x3e88] ss:$16 sps:$4 sm:$0xff]   ;;  %v25588_v31 = vld [vmem:[%s26411_s10 + $0x3ea4] ss:$16 sps:$4 sm:$0xff]   ;;  %v25586_v18 = vld [vmem:[%s26411_s10 + $0x3ea0] ss:$16 sps:$4 sm:$0xff]  }
 0x802   : > { %16700 = vmatprep.subr.bf16.mxu0 %v25514_v11  ;;  %18536 = vmatprep.subr.bf16.mxu1 %v25517_v9  ;;  %v25589_v11 = vld [vmem:[%s26411_s10 + $0x3ea8] ss:$16 sps:$4 sm:$0xff]   ;;  %v25594_v9 = vld [vmem:[%s26411_s10 + $0x3ec4] ss:$16 sps:$4 sm:$0xff]   ;;  %v25597_v36 = vld [vmem:[%s26411_s10 + $0x3ecc] ss:$16 sps:$4 sm:$0xff]  }
 0x803   : > { %v25592_v6 = vld [vmem:[%s26411_s10 + $0x3ec0] ss:$16 sps:$4 sm:$0xff]  }
 0x805   : > { %16701 = vmatpush1.bf16.msra.mxu0 %v25512_v37  ;;  %18537 = vmatpush1.bf16.msra.mxu1 %v25515_v38  ;;  %v25595_v37 = vld [vmem:[%s26411_s10 + $0x3ec8] ss:$16 sps:$4 sm:$0xff]   ;;  %v25600_v38 = vld [vmem:[%s26411_s10 + $0x3ee4] ss:$16 sps:$4 sm:$0xff]  }
 0x806   : > { %16702 = vmatprep.subr.bf16.mxu0 %v25520_v53  ;;  %18538 = vmatprep.subr.bf16.mxu1 %v25523_v12  ;;  %v25603_v53 = vld [vmem:[%s26411_s10 + $0x3eec] ss:$16 sps:$4 sm:$0xff]   ;;  %v25598_v12 = vld [vmem:[%s26411_s10 + $0x3ee0] ss:$16 sps:$4 sm:$0xff]  }
 0x809   : > { %16703 = vmatpush1.bf16.msra.mxu0 %v25518_v25  ;;  %18539 = vmatpush1.bf16.msra.mxu1 %v25521_v60  ;;  %v25601_v25 = vld [vmem:[%s26411_s10 + $0x3ee8] ss:$16 sps:$4 sm:$0xff]   ;;  %v25606_v60 = vld [vmem:[%s26411_s10 + $0x3f04] ss:$16 sps:$4 sm:$0xff]  }
 0x80a   : > { %16704 = vmatprep.subr.bf16.mxu0 %v25526_v43  ;;  %18540 = vmatprep.subr.bf16.mxu1 %v25529_v8  ;;  %v25609_v43 = vld [vmem:[%s26411_s10 + $0x3f0c] ss:$16 sps:$4 sm:$0xff]  }
 0x80d   : > { %16705 = vmatpush1.bf16.msra.mxu0 %v25524_v10  ;;  %18541 = vmatpush1.bf16.msra.mxu1 %v25527_v33 }
 0x80e   : > { %16706 = vmatprep.subr.bf16.mxu0 %v25532_v49  ;;  %18542 = vmatprep.subr.bf16.mxu1 %v25535_v42 }
 0x811   : > { %16707 = vmatpush1.bf16.msra.mxu0 %v25530_v41  ;;  %18543 = vmatpush1.bf16.msra.mxu1 %v25533_v47 }
 0x812   : > { %16708 = vmatprep.subr.bf16.mxu0 %v25538_v15  ;;  %18544 = vmatprep.subr.bf16.mxu1 %v25541_v40  ;;  %v25604_v40 = vld [vmem:[%s26411_s10 + $0x3f00] ss:$16 sps:$4 sm:$0xff]  }
 0x815   : > { %16709 = vmatpush1.bf16.msra.mxu0 %v25536_v50  ;;  %18545 = vmatpush1.bf16.msra.mxu1 %v25539_v39  ;;  %v25607_v50 = vld [vmem:[%s26411_s10 + $0x3f08] ss:$16 sps:$4 sm:$0xff]  }
 0x816   : > { %16710 = vmatprep.subr.bf16.mxu0 %v25544_v55  ;;  %18546 = vmatprep.subr.bf16.mxu1 %v25547_v27 }
 0x819   : > { %16711 = vmatpush1.bf16.msra.mxu0 %v25542_v57  ;;  %18547 = vmatpush1.bf16.msra.mxu1 %v25545_v13  ;;  %v25613_v57 = vld [vmem:[%s26411_s10 + $0x3f28] ss:$16 sps:$4 sm:$0xff]   ;;  %v25618_v13 = vld [vmem:[%s26411_s10 + $0x3f44] ss:$16 sps:$4 sm:$0xff]  }
 0x81a   : > { %16712 = vmatprep.subr.bf16.mxu0 %v25550_v20  ;;  %18548 = vmatprep.subr.bf16.mxu1 %v25553_v44  ;;  %v25621_v20 = vld [vmem:[%s26411_s10 + $0x3f4c] ss:$16 sps:$4 sm:$0xff]   ;;  %v25616_v44 = vld [vmem:[%s26411_s10 + $0x3f40] ss:$16 sps:$4 sm:$0xff]  }
 0x81d   : > { %16713 = vmatpush1.bf16.msra.mxu0 %v25548_v5  ;;  %18549 = vmatpush1.bf16.msra.mxu1 %v25551_v2  ;;  %v25619_v5 = vld [vmem:[%s26411_s10 + $0x3f48] ss:$16 sps:$4 sm:$0xff]   ;;  %v25624_v2 = vld [vmem:[%s26411_s10 + $0x3f64] ss:$16 sps:$4 sm:$0xff]  }
 0x81e   : > { %16733 = vmatprep.subr.bf16.mxu0 %v25556_v32  ;;  %18569 = vmatprep.subr.bf16.mxu1 %v25559_v29  ;;  %v25627_v32 = vld [vmem:[%s26411_s10 + $0x3f6c] ss:$16 sps:$4 sm:$0xff]   ;;  %v25622_v29 = vld [vmem:[%s26411_s10 + $0x3f60] ss:$16 sps:$4 sm:$0xff]  }
 0x820   : > { %16715 = vmatmul.mubr.bf16.vlgmr.msra.gmra.mrb[0].mxu0 %v19680_v52  ;;  %18551 = vmatmul.mubr.bf16.vlgmr.msra.gmra.mrb[0].mxu1 %v19680_v52  ;;  %v25625_v52 = vld [vmem:[%s26411_s10 + $0x3f68] ss:$16 sps:$4 sm:$0xff]  }
 0x821   : > { %16734 = vmatpush1.bf16.msra.mxu0 %v25554_v1  ;;  %18570 = vmatpush1.bf16.msra.mxu1 %v25557_v0  ;;  %v25633_v1 = vld [vmem:[%s26411_s10 + $0x3f8c] ss:$16 sps:$4 sm:$0xff]   ;;  %v25628_v0 = vld [vmem:[%s26411_s10 + $0x3f80] ss:$16 sps:$4 sm:$0xff]  }
 0x822   : > { %16735 = vmatprep.subr.bf16.mxu0 %v25562_v7  ;;  %18571 = vmatprep.subr.bf16.mxu1 %v25565_v35  ;;  %v25631_v7 = vld [vmem:[%s26411_s10 + $0x3f88] ss:$16 sps:$4 sm:$0xff]   ;;  %v25636_v35 = vld [vmem:[%s26411_s10 + $0x3fa4] ss:$16 sps:$4 sm:$0xff]  }
 0x823   : > { %16724 = vmatprep.mubr.bf16.mxu0 %v19753_v63  ;;  %18560 = vmatprep.mubr.bf16.mxu1 %v19753_v63  ;;  %v25639_v63 = vld [vmem:[%s26411_s10 + $0x3fac] ss:$16 sps:$4 sm:$0xff]  }
 0x825   : > { %16736 = vmatpush1.bf16.msra.mxu0 %v25560_v4  ;;  %18572 = vmatpush1.bf16.msra.mxu1 %v25563_v58  ;;  %v25634_v4 = vld [vmem:[%s26411_s10 + $0x3fa0] ss:$16 sps:$4 sm:$0xff]   ;;  %v25637_v58 = vld [vmem:[%s26411_s10 + $0x3fa8] ss:$16 sps:$4 sm:$0xff]  }
 0x826   : > { %16737 = vmatprep.subr.bf16.mxu0 %v25570_v62  ;;  %18573 = vmatprep.subr.bf16.mxu1 %v25573_v46  ;;  %v25642_v62 = vld [vmem:[%s26411_s10 + $0x3fc4] ss:$16 sps:$4 sm:$0xff]   ;;  %v25645_v46 = vld [vmem:[%s26411_s10 + $0x3fcc] ss:$16 sps:$4 sm:$0xff]  }
 0x828   : > { %16725 = vmatmul.mubr.bf16.gmra.mrb[124].mxu0 %v19752_v16  ;;  %18561 = vmatmul.mubr.bf16.gmra.mrb[124].mxu1 %v19752_v16  ;;  %v25640_v16 = vld [vmem:[%s26411_s10 + $0x3fc0] ss:$16 sps:$4 sm:$0xff]  }
 0x829   : > { %16738 = vmatpush1.bf16.msra.mxu0 %v25568_v22  ;;  %18574 = vmatpush1.bf16.msra.mxu1 %v25571_v34  ;;  %v25643_v22 = vld [vmem:[%s26411_s10 + $0x3fc8] ss:$16 sps:$4 sm:$0xff]   ;;  %v25648_v34 = vld [vmem:[%s26411_s10 + $0x3fe4] ss:$16 sps:$4 sm:$0xff]  }
 0x82a   : > { %16739 = vmatprep.subr.bf16.mxu0 %v25576_v3  ;;  %18575 = vmatprep.subr.bf16.mxu1 %v25579_v26  ;;  %v25651_v3 = vld [vmem:[%s26411_s10 + $0x3fec] ss:$16 sps:$4 sm:$0xff]   ;;  %v25646_v26 = vld [vmem:[%s26411_s10 + $0x3fe0] ss:$16 sps:$4 sm:$0xff]  }
 0x82b   : > { %16765 = vmatprep.mubr.bf16.mxu0 %v19683_v23  ;;  %18601 = vmatprep.mubr.bf16.mxu1 %v19683_v23  ;;  %v25649_v23 = vld [vmem:[%s26411_s10 + $0x3fe8] ss:$16 sps:$4 sm:$0xff]  }
 0x82d   : > { %16740 = vmatpush1.bf16.msra.mxu0 %v25574_v51  ;;  %18576 = vmatpush1.bf16.msra.mxu1 %v25577_v48  ;;  %v25654_v51 = vld [vmem:[%s26411_s10 + $0x4004] ss:$16 sps:$4 sm:$0xff]   ;;  %v25657_v48 = vld [vmem:[%s26411_s10 + $0x400c] ss:$16 sps:$4 sm:$0xff]  }
 0x82e   : > { %16741 = vmatprep.subr.bf16.mxu0 %v25582_v61  ;;  %18577 = vmatprep.subr.bf16.mxu1 %v25585_v24  ;;  %v19682_v61 = vcombine.low %v29064_v45, %v29067_v17  ;;  %v711_v24 = vld [vmem:[%s26413_s15 + $0x338] sm:$0x11]  ;;  %v25658_v45 = vld [vmem:[%s26411_s10 + $0x4020] ss:$16 sps:$4 sm:$0xff]  }
 0x82f   : > { %v25661_v17 = vld [vmem:[%s26411_s10 + $0x4028] ss:$16 sps:$4 sm:$0xff]  }
 0x831   : > { %16742 = vmatpush1.bf16.msra.mxu0 %v25580_v21  ;;  %18578 = vmatpush1.bf16.msra.mxu1 %v25583_v19  ;;  %v25652_v21 = vld [vmem:[%s26411_s10 + $0x4000] ss:$16 sps:$4 sm:$0xff]   ;;  %v25655_v19 = vld [vmem:[%s26411_s10 + $0x4008] ss:$16 sps:$4 sm:$0xff]  }
 0x832   : > { %16743 = vmatprep.subr.bf16.mxu0 %v25588_v31  ;;  %18579 = vmatprep.subr.bf16.mxu1 %v25591_v54  ;;  %v25660_v31 = vld [vmem:[%s26411_s10 + $0x4024] ss:$16 sps:$4 sm:$0xff]   ;;  %v25663_v54 = vld [vmem:[%s26411_s10 + $0x402c] ss:$16 sps:$4 sm:$0xff]  }
 0x835   : > { %16744 = vmatpush1.bf16.msra.mxu0 %v25586_v18  ;;  %18580 = vmatpush1.bf16.msra.mxu1 %v25589_v11  ;;  %v19755_v18 = vcombine.high %v711_v24, %v711_v24  ;;  %v25668_v11 = vld [vmem:[%s26411_s10 + $0x4044] ss:$16 sps:$4 sm:$0xff]  }
 0x836   : > { %16745 = vmatprep.subr.bf16.mxu0 %v25594_v9  ;;  %18581 = vmatprep.subr.bf16.mxu1 %v25597_v36  ;;  %v25671_v9 = vld [vmem:[%s26411_s10 + $0x404c] ss:$16 sps:$4 sm:$0xff]   ;;  %v19754_v36 = vcombine.low %v711_v24, %v711_v24  ;;  %v25728_v24 = vld [vmem:[%s26411_s10 + $0x4184] ss:$16 sps:$4 sm:$0xff]  }
 0x839   : > { %16746 = vmatpush1.bf16.msra.mxu0 %v25592_v6  ;;  %18582 = vmatpush1.bf16.msra.mxu1 %v25595_v37  ;;  %v29151_v6 = vld [vmem:[%s26413_s15 + $0x100] sm:$0xff] }
 0x83a   : > { %16747 = vmatprep.subr.bf16.mxu0 %v25600_v38  ;;  %18583 = vmatprep.subr.bf16.mxu1 %v25603_v53  ;;  %v29154_v37 = vld [vmem:[%s26413_s15 + $0x220] sm:$0xff] }
 0x83b   : > { %v16573_v8 = vpop.f32.mrb[112].mxu0  ;;  %v18409_v10 = vpop.f32.mrb[112].mxu1  ;;  %v25666_v38 = vld [vmem:[%s26411_s10 + $0x4040] ss:$16 sps:$4 sm:$0xff]   ;;  %v25669_v53 = vld [vmem:[%s26411_s10 + $0x4048] ss:$16 sps:$4 sm:$0xff]  }
 0x83c   : > { %v29096_v33 = vadd.f32 %v16573_v8, %v29009_v14  ;;  %v29099_v49 = vadd.f32 %v18409_v10, %v29012_v30  ;;  %v16575_v42 = vpop.f32.mrb[113].mxu0  ;;  %v18411_v41 = vpop.f32.mrb[113].mxu1  ;;  %v25612_v30 = vld [vmem:[%s26411_s10 + $0x3f24] ss:$16 sps:$4 sm:$0xff]   ;;  %v25675_v8 = vld [vmem:[%s26411_s10 + $0x4068] ss:$16 sps:$4 sm:$0xff]  }
 0x83d   : > { %v29102_v47 = vadd.f32 %v16575_v42, %v29015_v28  ;;  %v29105_v15 = vadd.f32 %v18411_v41, %v29018_v56  ;;  %16748 = vmatpush1.bf16.msra.mxu0 %v25598_v12  ;;  %18584 = vmatpush1.bf16.msra.mxu1 %v25601_v25  ;;  %v16577_v14 = vpop.f32.mrb[114].mxu0  ;;  %v18413_v39 = vpop.f32.mrb[114].mxu1  ;;  %v25615_v28 = vld [vmem:[%s26411_s10 + $0x3f2c] ss:$16 sps:$4 sm:$0xff]   ;;  %v25610_v56 = vld [vmem:[%s26411_s10 + $0x3f20] ss:$16 sps:$4 sm:$0xff]  }
 0x83e   : > { %16749 = vmatprep.subr.bf16.mxu0 %v25606_v60  ;;  %18585 = vmatprep.subr.bf16.mxu1 %v25609_v43  ;;  %v16578_v55 = vpop.f32.mrb[115].mxu0  ;;  %v18414_v27 = vpop.f32.mrb[115].mxu1  ;;  %v25674_v12 = vld [vmem:[%s26411_s10 + $0x4064] ss:$16 sps:$4 sm:$0xff]   ;;  %v25677_v25 = vld [vmem:[%s26411_s10 + $0x406c] ss:$16 sps:$4 sm:$0xff]   ;;  %v19685_v60 = vcombine.high %v29151_v6, %v29154_v37 }
 0x83f   : > { %v25672_v43 = vld [vmem:[%s26411_s10 + $0x4060] ss:$16 sps:$4 sm:$0xff]   ;;  %v25680_v10 = vld [vmem:[%s26411_s10 + $0x4084] ss:$16 sps:$4 sm:$0xff]   ;;  %v25683_v42 = vld [vmem:[%s26411_s10 + $0x408c] ss:$16 sps:$4 sm:$0xff]  }
 0x840   : > { %v25678_v41 = vld [vmem:[%s26411_s10 + $0x4080] ss:$16 sps:$4 sm:$0xff]   ;;  %v25689_v14 = vld [vmem:[%s26411_s10 + $0x40ac] ss:$16 sps:$4 sm:$0xff]  }
 0x841   : > { %16750 = vmatpush1.bf16.msra.mxu0 %v25604_v40  ;;  %18586 = vmatpush1.bf16.msra.mxu1 %v25607_v50  ;;  %v25681_v40 = vld [vmem:[%s26411_s10 + $0x4088] ss:$16 sps:$4 sm:$0xff]   ;;  %v25686_v50 = vld [vmem:[%s26411_s10 + $0x40a4] ss:$16 sps:$4 sm:$0xff]   ;;  %v25684_v39 = vld [vmem:[%s26411_s10 + $0x40a0] ss:$16 sps:$4 sm:$0xff]  }
 0x842   : > { %16751 = vmatprep.subr.bf16.mxu0 %v25612_v30  ;;  %18587 = vmatprep.subr.bf16.mxu1 %v25615_v28  ;;  %v25687_v30 = vld [vmem:[%s26411_s10 + $0x40a8] ss:$16 sps:$4 sm:$0xff]   ;;  %v25692_v28 = vld [vmem:[%s26411_s10 + $0x40c4] ss:$16 sps:$4 sm:$0xff]   ;;  %v25695_v55 = vld [vmem:[%s26411_s10 + $0x40cc] ss:$16 sps:$4 sm:$0xff]  }
 0x843   : > { %v25690_v27 = vld [vmem:[%s26411_s10 + $0x40c0] ss:$16 sps:$4 sm:$0xff]  }
 0x845   : > { %16752 = vmatpush1.bf16.msra.mxu0 %v25610_v56  ;;  %18588 = vmatpush1.bf16.msra.mxu1 %v25613_v57  ;;  %v25693_v56 = vld [vmem:[%s26411_s10 + $0x40c8] ss:$16 sps:$4 sm:$0xff]   ;;  %v25698_v57 = vld [vmem:[%s26411_s10 + $0x40e4] ss:$16 sps:$4 sm:$0xff]  }
 0x846   : > { %16753 = vmatprep.subr.bf16.mxu0 %v25618_v13  ;;  %18589 = vmatprep.subr.bf16.mxu1 %v25621_v20  ;;  %v25701_v13 = vld [vmem:[%s26411_s10 + $0x40ec] ss:$16 sps:$4 sm:$0xff]   ;;  %v25696_v20 = vld [vmem:[%s26411_s10 + $0x40e0] ss:$16 sps:$4 sm:$0xff]  }
 0x849   : > { %16754 = vmatpush1.bf16.msra.mxu0 %v25616_v44  ;;  %18590 = vmatpush1.bf16.msra.mxu1 %v25619_v5  ;;  %v25699_v44 = vld [vmem:[%s26411_s10 + $0x40e8] ss:$16 sps:$4 sm:$0xff]   ;;  %v25704_v5 = vld [vmem:[%s26411_s10 + $0x4104] ss:$16 sps:$4 sm:$0xff]  }
 0x84a   : > { %16755 = vmatprep.subr.bf16.mxu0 %v25624_v2  ;;  %18591 = vmatprep.subr.bf16.mxu1 %v25627_v32  ;;  %v25707_v2 = vld [vmem:[%s26411_s10 + $0x410c] ss:$16 sps:$4 sm:$0xff]  }
 0x84d   : > { %16756 = vmatpush1.bf16.msra.mxu0 %v25622_v29  ;;  %18592 = vmatpush1.bf16.msra.mxu1 %v25625_v52 }
 0x84e   : > { %16757 = vmatprep.subr.bf16.mxu0 %v25630_v59  ;;  %18593 = vmatprep.subr.bf16.mxu1 %v25633_v1 }
 0x851   : > { %16758 = vmatpush1.bf16.msra.mxu0 %v25628_v0  ;;  %18594 = vmatpush1.bf16.msra.mxu1 %v25631_v7 }
 0x852   : > { %16759 = vmatprep.subr.bf16.mxu0 %v25636_v35  ;;  %18595 = vmatprep.subr.bf16.mxu1 %v25639_v63  ;;  %v25702_v63 = vld [vmem:[%s26411_s10 + $0x4100] ss:$16 sps:$4 sm:$0xff]  }
 0x855   : > { %16760 = vmatpush1.bf16.msra.mxu0 %v25634_v4  ;;  %18596 = vmatpush1.bf16.msra.mxu1 %v25637_v58  ;;  %v25705_v4 = vld [vmem:[%s26411_s10 + $0x4108] ss:$16 sps:$4 sm:$0xff]  }
 0x856   : > { %16761 = vmatprep.subr.bf16.mxu0 %v25642_v62  ;;  %18597 = vmatprep.subr.bf16.mxu1 %v25645_v46 }
 0x859   : > { %16762 = vmatpush1.bf16.msra.mxu0 %v25640_v16  ;;  %18598 = vmatpush1.bf16.msra.mxu1 %v25643_v22  ;;  %v25711_v16 = vld [vmem:[%s26411_s10 + $0x4128] ss:$16 sps:$4 sm:$0xff]   ;;  %v25716_v22 = vld [vmem:[%s26411_s10 + $0x4144] ss:$16 sps:$4 sm:$0xff]  }
 0x85a   : > { %16763 = vmatprep.subr.bf16.mxu0 %v25648_v34  ;;  %18599 = vmatprep.subr.bf16.mxu1 %v25651_v3  ;;  %v25719_v34 = vld [vmem:[%s26411_s10 + $0x414c] ss:$16 sps:$4 sm:$0xff]   ;;  %v25714_v3 = vld [vmem:[%s26411_s10 + $0x4140] ss:$16 sps:$4 sm:$0xff]  }
 0x85d   : > { %16764 = vmatpush1.bf16.msra.mxu0 %v25646_v26  ;;  %18600 = vmatpush1.bf16.msra.mxu1 %v25649_v23  ;;  %v25717_v26 = vld [vmem:[%s26411_s10 + $0x4148] ss:$16 sps:$4 sm:$0xff]   ;;  %v25722_v23 = vld [vmem:[%s26411_s10 + $0x4164] ss:$16 sps:$4 sm:$0xff]  }
 0x85e   : > { %16784 = vmatprep.subr.bf16.mxu0 %v25654_v51  ;;  %18620 = vmatprep.subr.bf16.mxu1 %v25657_v48  ;;  %v25725_v51 = vld [vmem:[%s26411_s10 + $0x416c] ss:$16 sps:$4 sm:$0xff]   ;;  %v25720_v48 = vld [vmem:[%s26411_s10 + $0x4160] ss:$16 sps:$4 sm:$0xff]  }
 0x860   : > { %16766 = vmatmul.mubr.bf16.vlgmr.msra.gmra.mrb[0].mxu0 %v19682_v61  ;;  %18602 = vmatmul.mubr.bf16.vlgmr.msra.gmra.mrb[0].mxu1 %v19682_v61  ;;  %v25723_v61 = vld [vmem:[%s26411_s10 + $0x4168] ss:$16 sps:$4 sm:$0xff]  }
 0x861   : > { %16785 = vmatpush1.bf16.msra.mxu0 %v25652_v21  ;;  %18621 = vmatpush1.bf16.msra.mxu1 %v25655_v19  ;;  %v25731_v21 = vld [vmem:[%s26411_s10 + $0x418c] ss:$16 sps:$4 sm:$0xff]   ;;  %v25726_v19 = vld [vmem:[%s26411_s10 + $0x4180] ss:$16 sps:$4 sm:$0xff]  }
 0x862   : > { %16786 = vmatprep.subr.bf16.mxu0 %v25660_v31  ;;  %18622 = vmatprep.subr.bf16.mxu1 %v25663_v54  ;;  %v25729_v31 = vld [vmem:[%s26411_s10 + $0x4188] ss:$16 sps:$4 sm:$0xff]   ;;  %v25734_v54 = vld [vmem:[%s26411_s10 + $0x41a4] ss:$16 sps:$4 sm:$0xff]  }
 0x863   : > { %16775 = vmatprep.mubr.bf16.mxu0 %v19755_v18  ;;  %18611 = vmatprep.mubr.bf16.mxu1 %v19755_v18  ;;  %v25737_v18 = vld [vmem:[%s26411_s10 + $0x41ac] ss:$16 sps:$4 sm:$0xff]  }
 0x865   : > { %16787 = vmatpush1.bf16.msra.mxu0 %v25658_v45  ;;  %18623 = vmatpush1.bf16.msra.mxu1 %v25661_v17  ;;  %v25732_v45 = vld [vmem:[%s26411_s10 + $0x41a0] ss:$16 sps:$4 sm:$0xff]   ;;  %v25735_v17 = vld [vmem:[%s26411_s10 + $0x41a8] ss:$16 sps:$4 sm:$0xff]  }
 0x866   : > { %16788 = vmatprep.subr.bf16.mxu0 %v25668_v11  ;;  %18624 = vmatprep.subr.bf16.mxu1 %v25671_v9  ;;  %v25740_v11 = vld [vmem:[%s26411_s10 + $0x41c4] ss:$16 sps:$4 sm:$0xff]   ;;  %v25743_v9 = vld [vmem:[%s26411_s10 + $0x41cc] ss:$16 sps:$4 sm:$0xff]  }
 0x868   : > { %16776 = vmatmul.mubr.bf16.gmra.mrb[128].mxu0 %v19754_v36  ;;  %18612 = vmatmul.mubr.bf16.gmra.mrb[128].mxu1 %v19754_v36  ;;  %v25738_v36 = vld [vmem:[%s26411_s10 + $0x41c0] ss:$16 sps:$4 sm:$0xff]  }
 0x869   : > { %16789 = vmatpush1.bf16.msra.mxu0 %v25666_v38  ;;  %18625 = vmatpush1.bf16.msra.mxu1 %v25669_v53  ;;  %v25741_v38 = vld [vmem:[%s26411_s10 + $0x41c8] ss:$16 sps:$4 sm:$0xff]   ;;  %v25746_v53 = vld [vmem:[%s26411_s10 + $0x41e4] ss:$16 sps:$4 sm:$0xff]  }
 0x86a   : > { %16790 = vmatprep.subr.bf16.mxu0 %v25674_v12  ;;  %18626 = vmatprep.subr.bf16.mxu1 %v25677_v25  ;;  %v25749_v12 = vld [vmem:[%s26411_s10 + $0x41ec] ss:$16 sps:$4 sm:$0xff]   ;;  %v25744_v25 = vld [vmem:[%s26411_s10 + $0x41e0] ss:$16 sps:$4 sm:$0xff]  }
 0x86b   : > { %16816 = vmatprep.mubr.bf16.mxu0 %v19685_v60  ;;  %18652 = vmatprep.mubr.bf16.mxu1 %v19685_v60  ;;  %v25747_v60 = vld [vmem:[%s26411_s10 + $0x41e8] ss:$16 sps:$4 sm:$0xff]  }
 0x86d   : > { %16791 = vmatpush1.bf16.msra.mxu0 %v25672_v43  ;;  %18627 = vmatpush1.bf16.msra.mxu1 %v25675_v8  ;;  %v25752_v43 = vld [vmem:[%s26411_s10 + $0x4204] ss:$16 sps:$4 sm:$0xff]   ;;  %v25755_v8 = vld [vmem:[%s26411_s10 + $0x420c] ss:$16 sps:$4 sm:$0xff]  }
 0x86e   : > { %16792 = vmatprep.subr.bf16.mxu0 %v25680_v10  ;;  %18628 = vmatprep.subr.bf16.mxu1 %v25683_v42  ;;  %v19684_v10 = vcombine.low %v29151_v6, %v29154_v37  ;;  %v712_v42 = vld [vmem:[%s26413_s15 + $0x340] sm:$0x11]  ;;  %v25759_v37 = vld [vmem:[%s26411_s10 + $0x4228] ss:$16 sps:$4 sm:$0xff]  }
 0x86f   : > { %v25756_v6 = vld [vmem:[%s26411_s10 + $0x4220] ss:$16 sps:$4 sm:$0xff]  }
 0x871   : > { %16793 = vmatpush1.bf16.msra.mxu0 %v25678_v41  ;;  %18629 = vmatpush1.bf16.msra.mxu1 %v25681_v40  ;;  %v25750_v41 = vld [vmem:[%s26411_s10 + $0x4200] ss:$16 sps:$4 sm:$0xff]   ;;  %v25753_v40 = vld [vmem:[%s26411_s10 + $0x4208] ss:$16 sps:$4 sm:$0xff]  }
 0x872   : > { %16794 = vmatprep.subr.bf16.mxu0 %v25686_v50  ;;  %18630 = vmatprep.subr.bf16.mxu1 %v25689_v14  ;;  %v25758_v50 = vld [vmem:[%s26411_s10 + $0x4224] ss:$16 sps:$4 sm:$0xff]   ;;  %v25761_v14 = vld [vmem:[%s26411_s10 + $0x422c] ss:$16 sps:$4 sm:$0xff]  }
 0x875   : > { %16795 = vmatpush1.bf16.msra.mxu0 %v25684_v39  ;;  %18631 = vmatpush1.bf16.msra.mxu1 %v25687_v30  ;;  %v19757_v39 = vcombine.high %v712_v42, %v712_v42  ;;  %v25766_v30 = vld [vmem:[%s26411_s10 + $0x4244] ss:$16 sps:$4 sm:$0xff]  }
 0x876   : > { %16796 = vmatprep.subr.bf16.mxu0 %v25692_v28  ;;  %18632 = vmatprep.subr.bf16.mxu1 %v25695_v55  ;;  %v25769_v28 = vld [vmem:[%s26411_s10 + $0x424c] ss:$16 sps:$4 sm:$0xff]   ;;  %v19756_v55 = vcombine.low %v712_v42, %v712_v42  ;;  %v25826_v42 = vld [vmem:[%s26411_s10 + $0x4384] ss:$16 sps:$4 sm:$0xff]  }
 0x879   : > { %16797 = vmatpush1.bf16.msra.mxu0 %v25690_v27  ;;  %18633 = vmatpush1.bf16.msra.mxu1 %v25693_v56  ;;  %v29238_v27 = vld [vmem:[%s26413_s15 + $0x108] sm:$0xff] }
 0x87a   : > { %16798 = vmatprep.subr.bf16.mxu0 %v25698_v57  ;;  %18634 = vmatprep.subr.bf16.mxu1 %v25701_v13  ;;  %v29241_v56 = vld [vmem:[%s26413_s15 + $0x228] sm:$0xff] }
 0x87b   : > { %v16624_v32 = vpop.f32.mrb[116].mxu0  ;;  %v18460_v29 = vpop.f32.mrb[116].mxu1  ;;  %v25764_v57 = vld [vmem:[%s26411_s10 + $0x4240] ss:$16 sps:$4 sm:$0xff]   ;;  %v25767_v13 = vld [vmem:[%s26411_s10 + $0x4248] ss:$16 sps:$4 sm:$0xff]  }
 0x87c   : > { %v29183_v52 = vadd.f32 %v16624_v32, %v29096_v33  ;;  %v29186_v59 = vadd.f32 %v18460_v29, %v29099_v49  ;;  %v16626_v1 = vpop.f32.mrb[117].mxu0  ;;  %v18462_v0 = vpop.f32.mrb[117].mxu1  ;;  %v25710_v49 = vld [vmem:[%s26411_s10 + $0x4124] ss:$16 sps:$4 sm:$0xff]   ;;  %v25773_v32 = vld [vmem:[%s26411_s10 + $0x4268] ss:$16 sps:$4 sm:$0xff]  }
 0x87d   : > { %v29189_v7 = vadd.f32 %v16626_v1, %v29102_v47  ;;  %v29192_v35 = vadd.f32 %v18462_v0, %v29105_v15  ;;  %16799 = vmatpush1.bf16.msra.mxu0 %v25696_v20  ;;  %18635 = vmatpush1.bf16.msra.mxu1 %v25699_v44  ;;  %v16628_v33 = vpop.f32.mrb[118].mxu0  ;;  %v18464_v58 = vpop.f32.mrb[118].mxu1  ;;  %v25713_v47 = vld [vmem:[%s26411_s10 + $0x412c] ss:$16 sps:$4 sm:$0xff]   ;;  %v25708_v15 = vld [vmem:[%s26411_s10 + $0x4120] ss:$16 sps:$4 sm:$0xff]  }
 0x87e   : > { %16800 = vmatprep.subr.bf16.mxu0 %v25704_v5  ;;  %18636 = vmatprep.subr.bf16.mxu1 %v25707_v2  ;;  %v16629_v62 = vpop.f32.mrb[119].mxu0  ;;  %v18465_v46 = vpop.f32.mrb[119].mxu1  ;;  %v25772_v20 = vld [vmem:[%s26411_s10 + $0x4264] ss:$16 sps:$4 sm:$0xff]   ;;  %v25775_v44 = vld [vmem:[%s26411_s10 + $0x426c] ss:$16 sps:$4 sm:$0xff]   ;;  %v19687_v5 = vcombine.high %v29238_v27, %v29241_v56 }
 0x87f   : > { %v25770_v2 = vld [vmem:[%s26411_s10 + $0x4260] ss:$16 sps:$4 sm:$0xff]   ;;  %v25778_v29 = vld [vmem:[%s26411_s10 + $0x4284] ss:$16 sps:$4 sm:$0xff]   ;;  %v25781_v1 = vld [vmem:[%s26411_s10 + $0x428c] ss:$16 sps:$4 sm:$0xff]  }
 0x880   : > { %v25776_v0 = vld [vmem:[%s26411_s10 + $0x4280] ss:$16 sps:$4 sm:$0xff]   ;;  %v25787_v33 = vld [vmem:[%s26411_s10 + $0x42ac] ss:$16 sps:$4 sm:$0xff]  }
 0x881   : > { %16801 = vmatpush1.bf16.msra.mxu0 %v25702_v63  ;;  %18637 = vmatpush1.bf16.msra.mxu1 %v25705_v4  ;;  %v25779_v63 = vld [vmem:[%s26411_s10 + $0x4288] ss:$16 sps:$4 sm:$0xff]   ;;  %v25784_v4 = vld [vmem:[%s26411_s10 + $0x42a4] ss:$16 sps:$4 sm:$0xff]   ;;  %v25782_v58 = vld [vmem:[%s26411_s10 + $0x42a0] ss:$16 sps:$4 sm:$0xff]  }
 0x882   : > { %16802 = vmatprep.subr.bf16.mxu0 %v25710_v49  ;;  %18638 = vmatprep.subr.bf16.mxu1 %v25713_v47  ;;  %v25785_v49 = vld [vmem:[%s26411_s10 + $0x42a8] ss:$16 sps:$4 sm:$0xff]   ;;  %v25790_v47 = vld [vmem:[%s26411_s10 + $0x42c4] ss:$16 sps:$4 sm:$0xff]   ;;  %v25793_v62 = vld [vmem:[%s26411_s10 + $0x42cc] ss:$16 sps:$4 sm:$0xff]  }
 0x883   : > { %v25788_v46 = vld [vmem:[%s26411_s10 + $0x42c0] ss:$16 sps:$4 sm:$0xff]  }
 0x885   : > { %16803 = vmatpush1.bf16.msra.mxu0 %v25708_v15  ;;  %18639 = vmatpush1.bf16.msra.mxu1 %v25711_v16  ;;  %v25791_v15 = vld [vmem:[%s26411_s10 + $0x42c8] ss:$16 sps:$4 sm:$0xff]   ;;  %v25796_v16 = vld [vmem:[%s26411_s10 + $0x42e4] ss:$16 sps:$4 sm:$0xff]  }
 0x886   : > { %16804 = vmatprep.subr.bf16.mxu0 %v25716_v22  ;;  %18640 = vmatprep.subr.bf16.mxu1 %v25719_v34  ;;  %v25799_v22 = vld [vmem:[%s26411_s10 + $0x42ec] ss:$16 sps:$4 sm:$0xff]   ;;  %v25794_v34 = vld [vmem:[%s26411_s10 + $0x42e0] ss:$16 sps:$4 sm:$0xff]  }
 0x889   : > { %16805 = vmatpush1.bf16.msra.mxu0 %v25714_v3  ;;  %18641 = vmatpush1.bf16.msra.mxu1 %v25717_v26  ;;  %v25797_v3 = vld [vmem:[%s26411_s10 + $0x42e8] ss:$16 sps:$4 sm:$0xff]   ;;  %v25802_v26 = vld [vmem:[%s26411_s10 + $0x4304] ss:$16 sps:$4 sm:$0xff]  }
 0x88a   : > { %16806 = vmatprep.subr.bf16.mxu0 %v25722_v23  ;;  %18642 = vmatprep.subr.bf16.mxu1 %v25725_v51  ;;  %v25805_v23 = vld [vmem:[%s26411_s10 + $0x430c] ss:$16 sps:$4 sm:$0xff]  }
 0x88d   : > { %16807 = vmatpush1.bf16.msra.mxu0 %v25720_v48  ;;  %18643 = vmatpush1.bf16.msra.mxu1 %v25723_v61 }
 0x88e   : > { %16808 = vmatprep.subr.bf16.mxu0 %v25728_v24  ;;  %18644 = vmatprep.subr.bf16.mxu1 %v25731_v21 }
 0x891   : > { %16809 = vmatpush1.bf16.msra.mxu0 %v25726_v19  ;;  %18645 = vmatpush1.bf16.msra.mxu1 %v25729_v31 }
 0x892   : > { %16810 = vmatprep.subr.bf16.mxu0 %v25734_v54  ;;  %18646 = vmatprep.subr.bf16.mxu1 %v25737_v18  ;;  %v25800_v18 = vld [vmem:[%s26411_s10 + $0x4300] ss:$16 sps:$4 sm:$0xff]  }
 0x895   : > { %16811 = vmatpush1.bf16.msra.mxu0 %v25732_v45  ;;  %18647 = vmatpush1.bf16.msra.mxu1 %v25735_v17  ;;  %v25803_v45 = vld [vmem:[%s26411_s10 + $0x4308] ss:$16 sps:$4 sm:$0xff]  }
 0x896   : > { %16812 = vmatprep.subr.bf16.mxu0 %v25740_v11  ;;  %18648 = vmatprep.subr.bf16.mxu1 %v25743_v9 }
 0x899   : > { %16813 = vmatpush1.bf16.msra.mxu0 %v25738_v36  ;;  %18649 = vmatpush1.bf16.msra.mxu1 %v25741_v38  ;;  %v25809_v36 = vld [vmem:[%s26411_s10 + $0x4328] ss:$16 sps:$4 sm:$0xff]   ;;  %v25814_v38 = vld [vmem:[%s26411_s10 + $0x4344] ss:$16 sps:$4 sm:$0xff]  }
 0x89a   : > { %16814 = vmatprep.subr.bf16.mxu0 %v25746_v53  ;;  %18650 = vmatprep.subr.bf16.mxu1 %v25749_v12  ;;  %v25817_v53 = vld [vmem:[%s26411_s10 + $0x434c] ss:$16 sps:$4 sm:$0xff]   ;;  %v25812_v12 = vld [vmem:[%s26411_s10 + $0x4340] ss:$16 sps:$4 sm:$0xff]  }
 0x89d   : > { %16815 = vmatpush1.bf16.msra.mxu0 %v25744_v25  ;;  %18651 = vmatpush1.bf16.msra.mxu1 %v25747_v60  ;;  %v25815_v25 = vld [vmem:[%s26411_s10 + $0x4348] ss:$16 sps:$4 sm:$0xff]   ;;  %v25820_v60 = vld [vmem:[%s26411_s10 + $0x4364] ss:$16 sps:$4 sm:$0xff]  }
 0x89e   : > { %16835 = vmatprep.subr.bf16.mxu0 %v25752_v43  ;;  %18671 = vmatprep.subr.bf16.mxu1 %v25755_v8  ;;  %v25823_v43 = vld [vmem:[%s26411_s10 + $0x436c] ss:$16 sps:$4 sm:$0xff]   ;;  %v25818_v8 = vld [vmem:[%s26411_s10 + $0x4360] ss:$16 sps:$4 sm:$0xff]  }
 0x8a0   : > { %16817 = vmatmul.mubr.bf16.vlgmr.msra.gmra.mrb[0].mxu0 %v19684_v10  ;;  %18653 = vmatmul.mubr.bf16.vlgmr.msra.gmra.mrb[0].mxu1 %v19684_v10  ;;  %v25821_v10 = vld [vmem:[%s26411_s10 + $0x4368] ss:$16 sps:$4 sm:$0xff]  }
 0x8a1   : > { %16836 = vmatpush1.bf16.msra.mxu0 %v25750_v41  ;;  %18672 = vmatpush1.bf16.msra.mxu1 %v25753_v40  ;;  %v25829_v41 = vld [vmem:[%s26411_s10 + $0x438c] ss:$16 sps:$4 sm:$0xff]   ;;  %v25824_v40 = vld [vmem:[%s26411_s10 + $0x4380] ss:$16 sps:$4 sm:$0xff]  }
 0x8a2   : > { %16837 = vmatprep.subr.bf16.mxu0 %v25758_v50  ;;  %18673 = vmatprep.subr.bf16.mxu1 %v25761_v14  ;;  %v25827_v50 = vld [vmem:[%s26411_s10 + $0x4388] ss:$16 sps:$4 sm:$0xff]   ;;  %v25832_v14 = vld [vmem:[%s26411_s10 + $0x43a4] ss:$16 sps:$4 sm:$0xff]  }
 0x8a3   : > { %16826 = vmatprep.mubr.bf16.mxu0 %v19757_v39  ;;  %18662 = vmatprep.mubr.bf16.mxu1 %v19757_v39  ;;  %v25835_v39 = vld [vmem:[%s26411_s10 + $0x43ac] ss:$16 sps:$4 sm:$0xff]  }
 0x8a5   : > { %16838 = vmatpush1.bf16.msra.mxu0 %v25756_v6  ;;  %18674 = vmatpush1.bf16.msra.mxu1 %v25759_v37  ;;  %v25830_v6 = vld [vmem:[%s26411_s10 + $0x43a0] ss:$16 sps:$4 sm:$0xff]   ;;  %v25833_v37 = vld [vmem:[%s26411_s10 + $0x43a8] ss:$16 sps:$4 sm:$0xff]  }
 0x8a6   : > { %16839 = vmatprep.subr.bf16.mxu0 %v25766_v30  ;;  %18675 = vmatprep.subr.bf16.mxu1 %v25769_v28  ;;  %v25838_v30 = vld [vmem:[%s26411_s10 + $0x43c4] ss:$16 sps:$4 sm:$0xff]   ;;  %v25841_v28 = vld [vmem:[%s26411_s10 + $0x43cc] ss:$16 sps:$4 sm:$0xff]  }
 0x8a8   : > { %16827 = vmatmul.mubr.bf16.gmra.mrb[132].mxu0 %v19756_v55  ;;  %18663 = vmatmul.mubr.bf16.gmra.mrb[132].mxu1 %v19756_v55  ;;  %v25836_v55 = vld [vmem:[%s26411_s10 + $0x43c0] ss:$16 sps:$4 sm:$0xff]  }
 0x8a9   : > { %16840 = vmatpush1.bf16.msra.mxu0 %v25764_v57  ;;  %18676 = vmatpush1.bf16.msra.mxu1 %v25767_v13  ;;  %v25839_v57 = vld [vmem:[%s26411_s10 + $0x43c8] ss:$16 sps:$4 sm:$0xff]   ;;  %v25844_v13 = vld [vmem:[%s26411_s10 + $0x43e4] ss:$16 sps:$4 sm:$0xff]  }
 0x8aa   : > { %16841 = vmatprep.subr.bf16.mxu0 %v25772_v20  ;;  %18677 = vmatprep.subr.bf16.mxu1 %v25775_v44  ;;  %v25847_v20 = vld [vmem:[%s26411_s10 + $0x43ec] ss:$16 sps:$4 sm:$0xff]   ;;  %v25842_v44 = vld [vmem:[%s26411_s10 + $0x43e0] ss:$16 sps:$4 sm:$0xff]  }
 0x8ab   : > { %16867 = vmatprep.mubr.bf16.mxu0 %v19687_v5  ;;  %18703 = vmatprep.mubr.bf16.mxu1 %v19687_v5  ;;  %v25845_v5 = vld [vmem:[%s26411_s10 + $0x43e8] ss:$16 sps:$4 sm:$0xff]  }
 0x8ad   : > { %16842 = vmatpush1.bf16.msra.mxu0 %v25770_v2  ;;  %18678 = vmatpush1.bf16.msra.mxu1 %v25773_v32  ;;  %v25850_v2 = vld [vmem:[%s26411_s10 + $0x4404] ss:$16 sps:$4 sm:$0xff]   ;;  %v25853_v32 = vld [vmem:[%s26411_s10 + $0x440c] ss:$16 sps:$4 sm:$0xff]  }
 0x8ae   : > { %16843 = vmatprep.subr.bf16.mxu0 %v25778_v29  ;;  %18679 = vmatprep.subr.bf16.mxu1 %v25781_v1  ;;  %v19686_v29 = vcombine.low %v29238_v27, %v29241_v56  ;;  %v713_v1 = vld [vmem:[%s26413_s15 + $0x348] sm:$0x11]  ;;  %v25854_v27 = vld [vmem:[%s26411_s10 + $0x4420] ss:$16 sps:$4 sm:$0xff]  }
 0x8af   : > { %v25857_v56 = vld [vmem:[%s26411_s10 + $0x4428] ss:$16 sps:$4 sm:$0xff]  }
 0x8b1   : > { %16844 = vmatpush1.bf16.msra.mxu0 %v25776_v0  ;;  %18680 = vmatpush1.bf16.msra.mxu1 %v25779_v63  ;;  %v25848_v0 = vld [vmem:[%s26411_s10 + $0x4400] ss:$16 sps:$4 sm:$0xff]   ;;  %v25851_v63 = vld [vmem:[%s26411_s10 + $0x4408] ss:$16 sps:$4 sm:$0xff]  }
 0x8b2   : > { %16845 = vmatprep.subr.bf16.mxu0 %v25784_v4  ;;  %18681 = vmatprep.subr.bf16.mxu1 %v25787_v33  ;;  %v25856_v4 = vld [vmem:[%s26411_s10 + $0x4424] ss:$16 sps:$4 sm:$0xff]   ;;  %v25859_v33 = vld [vmem:[%s26411_s10 + $0x442c] ss:$16 sps:$4 sm:$0xff]  }
 0x8b5   : > { %16846 = vmatpush1.bf16.msra.mxu0 %v25782_v58  ;;  %18682 = vmatpush1.bf16.msra.mxu1 %v25785_v49  ;;  %v19759_v58 = vcombine.high %v713_v1, %v713_v1  ;;  %v25864_v49 = vld [vmem:[%s26411_s10 + $0x4444] ss:$16 sps:$4 sm:$0xff]  }
 0x8b6   : > { %16847 = vmatprep.subr.bf16.mxu0 %v25790_v47  ;;  %18683 = vmatprep.subr.bf16.mxu1 %v25793_v62  ;;  %v25867_v47 = vld [vmem:[%s26411_s10 + $0x444c] ss:$16 sps:$4 sm:$0xff]   ;;  %v19758_v62 = vcombine.low %v713_v1, %v713_v1  ;;  %v25924_v1 = vld [vmem:[%s26411_s10 + $0x4584] ss:$16 sps:$4 sm:$0xff]  }
 0x8b9   : > { %16848 = vmatpush1.bf16.msra.mxu0 %v25788_v46  ;;  %18684 = vmatpush1.bf16.msra.mxu1 %v25791_v15  ;;  %v29325_v46 = vld [vmem:[%s26413_s15 + $0x110] sm:$0xff] }
 0x8ba   : > { %16849 = vmatprep.subr.bf16.mxu0 %v25796_v16  ;;  %18685 = vmatprep.subr.bf16.mxu1 %v25799_v22  ;;  %v29328_v15 = vld [vmem:[%s26413_s15 + $0x230] sm:$0xff] }
 0x8bb   : > { %v16675_v51 = vpop.f32.mrb[120].mxu0  ;;  %v18511_v48 = vpop.f32.mrb[120].mxu1  ;;  %v25862_v16 = vld [vmem:[%s26411_s10 + $0x4440] ss:$16 sps:$4 sm:$0xff]   ;;  %v25865_v22 = vld [vmem:[%s26411_s10 + $0x4448] ss:$16 sps:$4 sm:$0xff]  }
 0x8bc   : > { %v29270_v61 = vadd.f32 %v16675_v51, %v29183_v52  ;;  %v29273_v24 = vadd.f32 %v18511_v48, %v29186_v59  ;;  %v16677_v21 = vpop.f32.mrb[121].mxu0  ;;  %v18513_v19 = vpop.f32.mrb[121].mxu1  ;;  %v25808_v59 = vld [vmem:[%s26411_s10 + $0x4324] ss:$16 sps:$4 sm:$0xff]   ;;  %v25871_v51 = vld [vmem:[%s26411_s10 + $0x4468] ss:$16 sps:$4 sm:$0xff]  }
 0x8bd   : > { %v29276_v31 = vadd.f32 %v16677_v21, %v29189_v7  ;;  %v29279_v54 = vadd.f32 %v18513_v19, %v29192_v35  ;;  %16850 = vmatpush1.bf16.msra.mxu0 %v25794_v34  ;;  %18686 = vmatpush1.bf16.msra.mxu1 %v25797_v3  ;;  %v16679_v52 = vpop.f32.mrb[122].mxu0  ;;  %v18515_v17 = vpop.f32.mrb[122].mxu1  ;;  %v25811_v7 = vld [vmem:[%s26411_s10 + $0x432c] ss:$16 sps:$4 sm:$0xff]   ;;  %v25806_v35 = vld [vmem:[%s26411_s10 + $0x4320] ss:$16 sps:$4 sm:$0xff]  }
 0x8be   : > { %16851 = vmatprep.subr.bf16.mxu0 %v25802_v26  ;;  %18687 = vmatprep.subr.bf16.mxu1 %v25805_v23  ;;  %v16680_v11 = vpop.f32.mrb[123].mxu0  ;;  %v18516_v9 = vpop.f32.mrb[123].mxu1  ;;  %v25870_v34 = vld [vmem:[%s26411_s10 + $0x4464] ss:$16 sps:$4 sm:$0xff]   ;;  %v25873_v3 = vld [vmem:[%s26411_s10 + $0x446c] ss:$16 sps:$4 sm:$0xff]   ;;  %v19689_v26 = vcombine.high %v29325_v46, %v29328_v15 }
 0x8bf   : > { %v25868_v23 = vld [vmem:[%s26411_s10 + $0x4460] ss:$16 sps:$4 sm:$0xff]   ;;  %v25876_v48 = vld [vmem:[%s26411_s10 + $0x4484] ss:$16 sps:$4 sm:$0xff]   ;;  %v25879_v21 = vld [vmem:[%s26411_s10 + $0x448c] ss:$16 sps:$4 sm:$0xff]  }
 0x8c0   : > { %v25874_v19 = vld [vmem:[%s26411_s10 + $0x4480] ss:$16 sps:$4 sm:$0xff]   ;;  %v25885_v52 = vld [vmem:[%s26411_s10 + $0x44ac] ss:$16 sps:$4 sm:$0xff]  }
 0x8c1   : > { %16852 = vmatpush1.bf16.msra.mxu0 %v25800_v18  ;;  %18688 = vmatpush1.bf16.msra.mxu1 %v25803_v45  ;;  %v25877_v18 = vld [vmem:[%s26411_s10 + $0x4488] ss:$16 sps:$4 sm:$0xff]   ;;  %v25882_v45 = vld [vmem:[%s26411_s10 + $0x44a4] ss:$16 sps:$4 sm:$0xff]   ;;  %v25880_v17 = vld [vmem:[%s26411_s10 + $0x44a0] ss:$16 sps:$4 sm:$0xff]  }
 0x8c2   : > { %16853 = vmatprep.subr.bf16.mxu0 %v25808_v59  ;;  %18689 = vmatprep.subr.bf16.mxu1 %v25811_v7  ;;  %v25883_v59 = vld [vmem:[%s26411_s10 + $0x44a8] ss:$16 sps:$4 sm:$0xff]   ;;  %v25888_v7 = vld [vmem:[%s26411_s10 + $0x44c4] ss:$16 sps:$4 sm:$0xff]   ;;  %v25891_v11 = vld [vmem:[%s26411_s10 + $0x44cc] ss:$16 sps:$4 sm:$0xff]  }
 0x8c3   : > { %v25886_v9 = vld [vmem:[%s26411_s10 + $0x44c0] ss:$16 sps:$4 sm:$0xff]  }
 0x8c5   : > { %16854 = vmatpush1.bf16.msra.mxu0 %v25806_v35  ;;  %18690 = vmatpush1.bf16.msra.mxu1 %v25809_v36  ;;  %v25889_v35 = vld [vmem:[%s26411_s10 + $0x44c8] ss:$16 sps:$4 sm:$0xff]   ;;  %v25894_v36 = vld [vmem:[%s26411_s10 + $0x44e4] ss:$16 sps:$4 sm:$0xff]  }
 0x8c6   : > { %16855 = vmatprep.subr.bf16.mxu0 %v25814_v38  ;;  %18691 = vmatprep.subr.bf16.mxu1 %v25817_v53  ;;  %v25897_v38 = vld [vmem:[%s26411_s10 + $0x44ec] ss:$16 sps:$4 sm:$0xff]   ;;  %v25892_v53 = vld [vmem:[%s26411_s10 + $0x44e0] ss:$16 sps:$4 sm:$0xff]  }
 0x8c9   : > { %16856 = vmatpush1.bf16.msra.mxu0 %v25812_v12  ;;  %18692 = vmatpush1.bf16.msra.mxu1 %v25815_v25  ;;  %v25895_v12 = vld [vmem:[%s26411_s10 + $0x44e8] ss:$16 sps:$4 sm:$0xff]   ;;  %v25900_v25 = vld [vmem:[%s26411_s10 + $0x4504] ss:$16 sps:$4 sm:$0xff]  }
 0x8ca   : > { %16857 = vmatprep.subr.bf16.mxu0 %v25820_v60  ;;  %18693 = vmatprep.subr.bf16.mxu1 %v25823_v43  ;;  %v25903_v60 = vld [vmem:[%s26411_s10 + $0x450c] ss:$16 sps:$4 sm:$0xff]  }
 0x8cd   : > { %16858 = vmatpush1.bf16.msra.mxu0 %v25818_v8  ;;  %18694 = vmatpush1.bf16.msra.mxu1 %v25821_v10 }
 0x8ce   : > { %16859 = vmatprep.subr.bf16.mxu0 %v25826_v42  ;;  %18695 = vmatprep.subr.bf16.mxu1 %v25829_v41 }
 0x8d1   : > { %16860 = vmatpush1.bf16.msra.mxu0 %v25824_v40  ;;  %18696 = vmatpush1.bf16.msra.mxu1 %v25827_v50 }
 0x8d2   : > { %16861 = vmatprep.subr.bf16.mxu0 %v25832_v14  ;;  %18697 = vmatprep.subr.bf16.mxu1 %v25835_v39  ;;  %v25898_v39 = vld [vmem:[%s26411_s10 + $0x4500] ss:$16 sps:$4 sm:$0xff]  }
 0x8d5   : > { %16862 = vmatpush1.bf16.msra.mxu0 %v25830_v6  ;;  %18698 = vmatpush1.bf16.msra.mxu1 %v25833_v37  ;;  %v25901_v6 = vld [vmem:[%s26411_s10 + $0x4508] ss:$16 sps:$4 sm:$0xff]  }
 0x8d6   : > { %16863 = vmatprep.subr.bf16.mxu0 %v25838_v30  ;;  %18699 = vmatprep.subr.bf16.mxu1 %v25841_v28 }
 0x8d9   : > { %16864 = vmatpush1.bf16.msra.mxu0 %v25836_v55  ;;  %18700 = vmatpush1.bf16.msra.mxu1 %v25839_v57  ;;  %v25907_v55 = vld [vmem:[%s26411_s10 + $0x4528] ss:$16 sps:$4 sm:$0xff]   ;;  %v25912_v57 = vld [vmem:[%s26411_s10 + $0x4544] ss:$16 sps:$4 sm:$0xff]  }
 0x8da   : > { %16865 = vmatprep.subr.bf16.mxu0 %v25844_v13  ;;  %18701 = vmatprep.subr.bf16.mxu1 %v25847_v20  ;;  %v25915_v13 = vld [vmem:[%s26411_s10 + $0x454c] ss:$16 sps:$4 sm:$0xff]   ;;  %v25910_v20 = vld [vmem:[%s26411_s10 + $0x4540] ss:$16 sps:$4 sm:$0xff]  }
 0x8dd   : > { %16866 = vmatpush1.bf16.msra.mxu0 %v25842_v44  ;;  %18702 = vmatpush1.bf16.msra.mxu1 %v25845_v5  ;;  %v25913_v44 = vld [vmem:[%s26411_s10 + $0x4548] ss:$16 sps:$4 sm:$0xff]   ;;  %v25918_v5 = vld [vmem:[%s26411_s10 + $0x4564] ss:$16 sps:$4 sm:$0xff]  }
 0x8de   : > { %16886 = vmatprep.subr.bf16.mxu0 %v25850_v2  ;;  %18722 = vmatprep.subr.bf16.mxu1 %v25853_v32  ;;  %v25921_v2 = vld [vmem:[%s26411_s10 + $0x456c] ss:$16 sps:$4 sm:$0xff]   ;;  %v25916_v32 = vld [vmem:[%s26411_s10 + $0x4560] ss:$16 sps:$4 sm:$0xff]  }
 0x8e0   : > { %16868 = vmatmul.mubr.bf16.vlgmr.msra.gmra.mrb[0].mxu0 %v19686_v29  ;;  %18704 = vmatmul.mubr.bf16.vlgmr.msra.gmra.mrb[0].mxu1 %v19686_v29  ;;  %v25919_v29 = vld [vmem:[%s26411_s10 + $0x4568] ss:$16 sps:$4 sm:$0xff]  }
 0x8e1   : > { %16887 = vmatpush1.bf16.msra.mxu0 %v25848_v0  ;;  %18723 = vmatpush1.bf16.msra.mxu1 %v25851_v63  ;;  %v25927_v0 = vld [vmem:[%s26411_s10 + $0x458c] ss:$16 sps:$4 sm:$0xff]   ;;  %v25922_v63 = vld [vmem:[%s26411_s10 + $0x4580] ss:$16 sps:$4 sm:$0xff]  }
 0x8e2   : > { %16888 = vmatprep.subr.bf16.mxu0 %v25856_v4  ;;  %18724 = vmatprep.subr.bf16.mxu1 %v25859_v33  ;;  %v25925_v4 = vld [vmem:[%s26411_s10 + $0x4588] ss:$16 sps:$4 sm:$0xff]   ;;  %v25930_v33 = vld [vmem:[%s26411_s10 + $0x45a4] ss:$16 sps:$4 sm:$0xff]  }
 0x8e3   : > { %16877 = vmatprep.mubr.bf16.mxu0 %v19759_v58  ;;  %18713 = vmatprep.mubr.bf16.mxu1 %v19759_v58  ;;  %v25933_v58 = vld [vmem:[%s26411_s10 + $0x45ac] ss:$16 sps:$4 sm:$0xff]  }
 0x8e5   : > { %16889 = vmatpush1.bf16.msra.mxu0 %v25854_v27  ;;  %18725 = vmatpush1.bf16.msra.mxu1 %v25857_v56  ;;  %v25928_v27 = vld [vmem:[%s26411_s10 + $0x45a0] ss:$16 sps:$4 sm:$0xff]   ;;  %v25931_v56 = vld [vmem:[%s26411_s10 + $0x45a8] ss:$16 sps:$4 sm:$0xff]  }
 0x8e6   : > { %16890 = vmatprep.subr.bf16.mxu0 %v25864_v49  ;;  %18726 = vmatprep.subr.bf16.mxu1 %v25867_v47  ;;  %v25936_v49 = vld [vmem:[%s26411_s10 + $0x45c4] ss:$16 sps:$4 sm:$0xff]   ;;  %v25939_v47 = vld [vmem:[%s26411_s10 + $0x45cc] ss:$16 sps:$4 sm:$0xff]  }
 0x8e8   : > { %16878 = vmatmul.mubr.bf16.gmra.mrb[136].mxu0 %v19758_v62  ;;  %18714 = vmatmul.mubr.bf16.gmra.mrb[136].mxu1 %v19758_v62  ;;  %v25934_v62 = vld [vmem:[%s26411_s10 + $0x45c0] ss:$16 sps:$4 sm:$0xff]  }
 0x8e9   : > { %16891 = vmatpush1.bf16.msra.mxu0 %v25862_v16  ;;  %18727 = vmatpush1.bf16.msra.mxu1 %v25865_v22  ;;  %v25937_v16 = vld [vmem:[%s26411_s10 + $0x45c8] ss:$16 sps:$4 sm:$0xff]   ;;  %v25942_v22 = vld [vmem:[%s26411_s10 + $0x45e4] ss:$16 sps:$4 sm:$0xff]  }
 0x8ea   : > { %16892 = vmatprep.subr.bf16.mxu0 %v25870_v34  ;;  %18728 = vmatprep.subr.bf16.mxu1 %v25873_v3  ;;  %v25945_v34 = vld [vmem:[%s26411_s10 + $0x45ec] ss:$16 sps:$4 sm:$0xff]   ;;  %v25940_v3 = vld [vmem:[%s26411_s10 + $0x45e0] ss:$16 sps:$4 sm:$0xff]  }
 0x8eb   : > { %16918 = vmatprep.mubr.bf16.mxu0 %v19689_v26  ;;  %18754 = vmatprep.mubr.bf16.mxu1 %v19689_v26  ;;  %v25943_v26 = vld [vmem:[%s26411_s10 + $0x45e8] ss:$16 sps:$4 sm:$0xff]  }
 0x8ed   : > { %16893 = vmatpush1.bf16.msra.mxu0 %v25868_v23  ;;  %18729 = vmatpush1.bf16.msra.mxu1 %v25871_v51  ;;  %v25948_v23 = vld [vmem:[%s26411_s10 + $0x4604] ss:$16 sps:$4 sm:$0xff]   ;;  %v25951_v51 = vld [vmem:[%s26411_s10 + $0x460c] ss:$16 sps:$4 sm:$0xff]  }
 0x8ee   : > { %16894 = vmatprep.subr.bf16.mxu0 %v25876_v48  ;;  %18730 = vmatprep.subr.bf16.mxu1 %v25879_v21  ;;  %v19688_v48 = vcombine.low %v29325_v46, %v29328_v15  ;;  %v714_v21 = vld [vmem:[%s26413_s15 + $0x350] sm:$0x11]  ;;  %v25955_v15 = vld [vmem:[%s26411_s10 + $0x4628] ss:$16 sps:$4 sm:$0xff]  }
 0x8ef   : > { %v25952_v46 = vld [vmem:[%s26411_s10 + $0x4620] ss:$16 sps:$4 sm:$0xff]  }
 0x8f1   : > { %16895 = vmatpush1.bf16.msra.mxu0 %v25874_v19  ;;  %18731 = vmatpush1.bf16.msra.mxu1 %v25877_v18  ;;  %v25946_v19 = vld [vmem:[%s26411_s10 + $0x4600] ss:$16 sps:$4 sm:$0xff]   ;;  %v25949_v18 = vld [vmem:[%s26411_s10 + $0x4608] ss:$16 sps:$4 sm:$0xff]  }
 0x8f2   : > { %16896 = vmatprep.subr.bf16.mxu0 %v25882_v45  ;;  %18732 = vmatprep.subr.bf16.mxu1 %v25885_v52  ;;  %v25954_v45 = vld [vmem:[%s26411_s10 + $0x4624] ss:$16 sps:$4 sm:$0xff]   ;;  %v25957_v52 = vld [vmem:[%s26411_s10 + $0x462c] ss:$16 sps:$4 sm:$0xff]  }
 0x8f5   : > { %16897 = vmatpush1.bf16.msra.mxu0 %v25880_v17  ;;  %18733 = vmatpush1.bf16.msra.mxu1 %v25883_v59  ;;  %v19761_v17 = vcombine.high %v714_v21, %v714_v21  ;;  %v25962_v59 = vld [vmem:[%s26411_s10 + $0x4644] ss:$16 sps:$4 sm:$0xff]  }
 0x8f6   : > { %16898 = vmatprep.subr.bf16.mxu0 %v25888_v7  ;;  %18734 = vmatprep.subr.bf16.mxu1 %v25891_v11  ;;  %v25965_v7 = vld [vmem:[%s26411_s10 + $0x464c] ss:$16 sps:$4 sm:$0xff]   ;;  %v19760_v11 = vcombine.low %v714_v21, %v714_v21  ;;  %v26022_v21 = vld [vmem:[%s26411_s10 + $0x4784] ss:$16 sps:$4 sm:$0xff]  }
 0x8f9   : > { %16899 = vmatpush1.bf16.msra.mxu0 %v25886_v9  ;;  %18735 = vmatpush1.bf16.msra.mxu1 %v25889_v35  ;;  %v29412_v9 = vld [vmem:[%s26413_s15 + $0x118] sm:$0xff] }
 0x8fa   : > { %16900 = vmatprep.subr.bf16.mxu0 %v25894_v36  ;;  %18736 = vmatprep.subr.bf16.mxu1 %v25897_v38  ;;  %v29415_v35 = vld [vmem:[%s26413_s15 + $0x238] sm:$0xff] }
 0x8fb   : > { %v16726_v43 = vpop.f32.mrb[124].mxu0  ;;  %v18562_v8 = vpop.f32.mrb[124].mxu1  ;;  %v25960_v36 = vld [vmem:[%s26411_s10 + $0x4640] ss:$16 sps:$4 sm:$0xff]   ;;  %v25963_v38 = vld [vmem:[%s26411_s10 + $0x4648] ss:$16 sps:$4 sm:$0xff]  }
 0x8fc   : > { %v29357_v10 = vadd.f32 %v16726_v43, %v29270_v61  ;;  %v29360_v42 = vadd.f32 %v18562_v8, %v29273_v24  ;;  %v16728_v41 = vpop.f32.mrb[125].mxu0  ;;  %v18564_v40 = vpop.f32.mrb[125].mxu1  ;;  %v25906_v24 = vld [vmem:[%s26411_s10 + $0x4524] ss:$16 sps:$4 sm:$0xff]   ;;  %v25969_v43 = vld [vmem:[%s26411_s10 + $0x4668] ss:$16 sps:$4 sm:$0xff]  }
 0x8fd   : > { %v29363_v50 = vadd.f32 %v16728_v41, %v29276_v31  ;;  %v29366_v14 = vadd.f32 %v18564_v40, %v29279_v54  ;;  %16901 = vmatpush1.bf16.msra.mxu0 %v25892_v53  ;;  %18737 = vmatpush1.bf16.msra.mxu1 %v25895_v12  ;;  %v16730_v61 = vpop.f32.mrb[126].mxu0  ;;  %v18566_v37 = vpop.f32.mrb[126].mxu1  ;;  %v25909_v31 = vld [vmem:[%s26411_s10 + $0x452c] ss:$16 sps:$4 sm:$0xff]   ;;  %v25904_v54 = vld [vmem:[%s26411_s10 + $0x4520] ss:$16 sps:$4 sm:$0xff]  }
 0x8fe   : > { %16902 = vmatprep.subr.bf16.mxu0 %v25900_v25  ;;  %18738 = vmatprep.subr.bf16.mxu1 %v25903_v60  ;;  %v16731_v30 = vpop.f32.mrb[127].mxu0  ;;  %v18567_v28 = vpop.f32.mrb[127].mxu1  ;;  %v25968_v53 = vld [vmem:[%s26411_s10 + $0x4664] ss:$16 sps:$4 sm:$0xff]   ;;  %v25971_v12 = vld [vmem:[%s26411_s10 + $0x466c] ss:$16 sps:$4 sm:$0xff]   ;;  %v19691_v25 = vcombine.high %v29412_v9, %v29415_v35 }
 0x8ff   : > { %v25966_v60 = vld [vmem:[%s26411_s10 + $0x4660] ss:$16 sps:$4 sm:$0xff]   ;;  %v25974_v8 = vld [vmem:[%s26411_s10 + $0x4684] ss:$16 sps:$4 sm:$0xff]   ;;  %v25977_v41 = vld [vmem:[%s26411_s10 + $0x468c] ss:$16 sps:$4 sm:$0xff]  }
 0x900   : > { %v25972_v40 = vld [vmem:[%s26411_s10 + $0x4680] ss:$16 sps:$4 sm:$0xff]   ;;  %v25983_v61 = vld [vmem:[%s26411_s10 + $0x46ac] ss:$16 sps:$4 sm:$0xff]  }
 0x901   : > { %16903 = vmatpush1.bf16.msra.mxu0 %v25898_v39  ;;  %18739 = vmatpush1.bf16.msra.mxu1 %v25901_v6  ;;  %v25975_v39 = vld [vmem:[%s26411_s10 + $0x4688] ss:$16 sps:$4 sm:$0xff]   ;;  %v25980_v6 = vld [vmem:[%s26411_s10 + $0x46a4] ss:$16 sps:$4 sm:$0xff]   ;;  %v25978_v37 = vld [vmem:[%s26411_s10 + $0x46a0] ss:$16 sps:$4 sm:$0xff]  }
 0x902   : > { %16904 = vmatprep.subr.bf16.mxu0 %v25906_v24  ;;  %18740 = vmatprep.subr.bf16.mxu1 %v25909_v31  ;;  %v25981_v24 = vld [vmem:[%s26411_s10 + $0x46a8] ss:$16 sps:$4 sm:$0xff]   ;;  %v25986_v31 = vld [vmem:[%s26411_s10 + $0x46c4] ss:$16 sps:$4 sm:$0xff]   ;;  %v25989_v30 = vld [vmem:[%s26411_s10 + $0x46cc] ss:$16 sps:$4 sm:$0xff]  }
 0x903   : > { %v25984_v28 = vld [vmem:[%s26411_s10 + $0x46c0] ss:$16 sps:$4 sm:$0xff]  }
 0x905   : > { %16905 = vmatpush1.bf16.msra.mxu0 %v25904_v54  ;;  %18741 = vmatpush1.bf16.msra.mxu1 %v25907_v55  ;;  %v25987_v54 = vld [vmem:[%s26411_s10 + $0x46c8] ss:$16 sps:$4 sm:$0xff]   ;;  %v25992_v55 = vld [vmem:[%s26411_s10 + $0x46e4] ss:$16 sps:$4 sm:$0xff]  }
 0x906   : > { %16906 = vmatprep.subr.bf16.mxu0 %v25912_v57  ;;  %18742 = vmatprep.subr.bf16.mxu1 %v25915_v13  ;;  %v25995_v57 = vld [vmem:[%s26411_s10 + $0x46ec] ss:$16 sps:$4 sm:$0xff]   ;;  %v25990_v13 = vld [vmem:[%s26411_s10 + $0x46e0] ss:$16 sps:$4 sm:$0xff]  }
 0x909   : > { %16907 = vmatpush1.bf16.msra.mxu0 %v25910_v20  ;;  %18743 = vmatpush1.bf16.msra.mxu1 %v25913_v44  ;;  %v25993_v20 = vld [vmem:[%s26411_s10 + $0x46e8] ss:$16 sps:$4 sm:$0xff]   ;;  %v25998_v44 = vld [vmem:[%s26411_s10 + $0x4704] ss:$16 sps:$4 sm:$0xff]  }
 0x90a   : > { %16908 = vmatprep.subr.bf16.mxu0 %v25918_v5  ;;  %18744 = vmatprep.subr.bf16.mxu1 %v25921_v2  ;;  %v26001_v5 = vld [vmem:[%s26411_s10 + $0x470c] ss:$16 sps:$4 sm:$0xff]  }
 0x90d   : > { %16909 = vmatpush1.bf16.msra.mxu0 %v25916_v32  ;;  %18745 = vmatpush1.bf16.msra.mxu1 %v25919_v29 }
 0x90e   : > { %16910 = vmatprep.subr.bf16.mxu0 %v25924_v1  ;;  %18746 = vmatprep.subr.bf16.mxu1 %v25927_v0 }
 0x911   : > { %16911 = vmatpush1.bf16.msra.mxu0 %v25922_v63  ;;  %18747 = vmatpush1.bf16.msra.mxu1 %v25925_v4 }
 0x912   : > { %16912 = vmatprep.subr.bf16.mxu0 %v25930_v33  ;;  %18748 = vmatprep.subr.bf16.mxu1 %v25933_v58  ;;  %v25996_v58 = vld [vmem:[%s26411_s10 + $0x4700] ss:$16 sps:$4 sm:$0xff]  }
 0x915   : > { %16913 = vmatpush1.bf16.msra.mxu0 %v25928_v27  ;;  %18749 = vmatpush1.bf16.msra.mxu1 %v25931_v56  ;;  %v25999_v27 = vld [vmem:[%s26411_s10 + $0x4708] ss:$16 sps:$4 sm:$0xff]  }
 0x916   : > { %16914 = vmatprep.subr.bf16.mxu0 %v25936_v49  ;;  %18750 = vmatprep.subr.bf16.mxu1 %v25939_v47 }
 0x919   : > { %16915 = vmatpush1.bf16.msra.mxu0 %v25934_v62  ;;  %18751 = vmatpush1.bf16.msra.mxu1 %v25937_v16  ;;  %v26005_v62 = vld [vmem:[%s26411_s10 + $0x4728] ss:$16 sps:$4 sm:$0xff]   ;;  %v26010_v16 = vld [vmem:[%s26411_s10 + $0x4744] ss:$16 sps:$4 sm:$0xff]  }
 0x91a   : > { %16916 = vmatprep.subr.bf16.mxu0 %v25942_v22  ;;  %18752 = vmatprep.subr.bf16.mxu1 %v25945_v34  ;;  %v26013_v22 = vld [vmem:[%s26411_s10 + $0x474c] ss:$16 sps:$4 sm:$0xff]   ;;  %v26008_v34 = vld [vmem:[%s26411_s10 + $0x4740] ss:$16 sps:$4 sm:$0xff]  }
 0x91d   : > { %16917 = vmatpush1.bf16.msra.mxu0 %v25940_v3  ;;  %18753 = vmatpush1.bf16.msra.mxu1 %v25943_v26  ;;  %v26011_v3 = vld [vmem:[%s26411_s10 + $0x4748] ss:$16 sps:$4 sm:$0xff]   ;;  %v26016_v26 = vld [vmem:[%s26411_s10 + $0x4764] ss:$16 sps:$4 sm:$0xff]  }
 0x91e   : > { %16937 = vmatprep.subr.bf16.mxu0 %v25948_v23  ;;  %18773 = vmatprep.subr.bf16.mxu1 %v25951_v51  ;;  %v26019_v23 = vld [vmem:[%s26411_s10 + $0x476c] ss:$16 sps:$4 sm:$0xff]   ;;  %v26014_v51 = vld [vmem:[%s26411_s10 + $0x4760] ss:$16 sps:$4 sm:$0xff]  }
 0x920   : > { %16919 = vmatmul.mubr.bf16.vlgmr.msra.gmra.mrb[0].mxu0 %v19688_v48  ;;  %18755 = vmatmul.mubr.bf16.vlgmr.msra.gmra.mrb[0].mxu1 %v19688_v48  ;;  %v26017_v48 = vld [vmem:[%s26411_s10 + $0x4768] ss:$16 sps:$4 sm:$0xff]  }
 0x921   : > { %16938 = vmatpush1.bf16.msra.mxu0 %v25946_v19  ;;  %18774 = vmatpush1.bf16.msra.mxu1 %v25949_v18  ;;  %v26025_v19 = vld [vmem:[%s26411_s10 + $0x478c] ss:$16 sps:$4 sm:$0xff]   ;;  %v26020_v18 = vld [vmem:[%s26411_s10 + $0x4780] ss:$16 sps:$4 sm:$0xff]  }
 0x922   : > { %16939 = vmatprep.subr.bf16.mxu0 %v25954_v45  ;;  %18775 = vmatprep.subr.bf16.mxu1 %v25957_v52  ;;  %v26023_v45 = vld [vmem:[%s26411_s10 + $0x4788] ss:$16 sps:$4 sm:$0xff]   ;;  %v26028_v52 = vld [vmem:[%s26411_s10 + $0x47a4] ss:$16 sps:$4 sm:$0xff]  }
 0x923   : > { %16928 = vmatprep.mubr.bf16.mxu0 %v19761_v17  ;;  %18764 = vmatprep.mubr.bf16.mxu1 %v19761_v17  ;;  %v26031_v17 = vld [vmem:[%s26411_s10 + $0x47ac] ss:$16 sps:$4 sm:$0xff]  }
 0x925   : > { %16940 = vmatpush1.bf16.msra.mxu0 %v25952_v46  ;;  %18776 = vmatpush1.bf16.msra.mxu1 %v25955_v15  ;;  %v26026_v46 = vld [vmem:[%s26411_s10 + $0x47a0] ss:$16 sps:$4 sm:$0xff]   ;;  %v26029_v15 = vld [vmem:[%s26411_s10 + $0x47a8] ss:$16 sps:$4 sm:$0xff]  }
 0x926   : > { %16941 = vmatprep.subr.bf16.mxu0 %v25962_v59  ;;  %18777 = vmatprep.subr.bf16.mxu1 %v25965_v7  ;;  %v26034_v59 = vld [vmem:[%s26411_s10 + $0x47c4] ss:$16 sps:$4 sm:$0xff]   ;;  %v26037_v7 = vld [vmem:[%s26411_s10 + $0x47cc] ss:$16 sps:$4 sm:$0xff]  }
 0x928   : > { %16929 = vmatmul.mubr.bf16.gmra.mrb[140].mxu0 %v19760_v11  ;;  %18765 = vmatmul.mubr.bf16.gmra.mrb[140].mxu1 %v19760_v11  ;;  %v26032_v11 = vld [vmem:[%s26411_s10 + $0x47c0] ss:$16 sps:$4 sm:$0xff]  }
 0x929   : > { %16942 = vmatpush1.bf16.msra.mxu0 %v25960_v36  ;;  %18778 = vmatpush1.bf16.msra.mxu1 %v25963_v38  ;;  %v26035_v36 = vld [vmem:[%s26411_s10 + $0x47c8] ss:$16 sps:$4 sm:$0xff]   ;;  %v26040_v38 = vld [vmem:[%s26411_s10 + $0x47e4] ss:$16 sps:$4 sm:$0xff]  }
 0x92a   : > { %16943 = vmatprep.subr.bf16.mxu0 %v25968_v53  ;;  %18779 = vmatprep.subr.bf16.mxu1 %v25971_v12  ;;  %v26043_v53 = vld [vmem:[%s26411_s10 + $0x47ec] ss:$16 sps:$4 sm:$0xff]   ;;  %v26038_v12 = vld [vmem:[%s26411_s10 + $0x47e0] ss:$16 sps:$4 sm:$0xff]  }
 0x92b   : > { %16969 = vmatprep.mubr.bf16.mxu0 %v19691_v25  ;;  %18805 = vmatprep.mubr.bf16.mxu1 %v19691_v25  ;;  %v26041_v25 = vld [vmem:[%s26411_s10 + $0x47e8] ss:$16 sps:$4 sm:$0xff]  }
 0x92d   : > { %16944 = vmatpush1.bf16.msra.mxu0 %v25966_v60  ;;  %18780 = vmatpush1.bf16.msra.mxu1 %v25969_v43  ;;  %v715_v60 = vld [vmem:[%s26413_s15 + $0x358] sm:$0x11]  ;;  %v19690_v43 = vcombine.low %v29412_v9, %v29415_v35 }
 0x92e   : > { %16945 = vmatprep.subr.bf16.mxu0 %v25974_v8  ;;  %18781 = vmatprep.subr.bf16.mxu1 %v25977_v41  ;;  %v19763_v8 = vcombine.high %v715_v60, %v715_v60  ;;  %v19762_v41 = vcombine.low %v715_v60, %v715_v60  ;;  %v604_v60 = vld [vmem:[#allocation2 + $0x40] sm:$0x3] }
 0x931   : > { %16946 = vmatpush1.bf16.msra.mxu0 %v25972_v40  ;;  %18782 = vmatpush1.bf16.msra.mxu1 %v25975_v39 }
 0x932   : > { %16947 = vmatprep.subr.bf16.mxu0 %v25980_v6  ;;  %18783 = vmatprep.subr.bf16.mxu1 %v25983_v61 }
 0x935   : > { %16948 = vmatpush1.bf16.msra.mxu0 %v25978_v37  ;;  %18784 = vmatpush1.bf16.msra.mxu1 %v25981_v24 }
 0x936   : > { %16949 = vmatprep.subr.bf16.mxu0 %v25986_v31  ;;  %18785 = vmatprep.subr.bf16.mxu1 %v25989_v30 }
 0x939   : > { %16950 = vmatpush1.bf16.msra.mxu0 %v25984_v28  ;;  %18786 = vmatpush1.bf16.msra.mxu1 %v25987_v54 }
 0x93a   : > { %16951 = vmatprep.subr.bf16.mxu0 %v25992_v55  ;;  %18787 = vmatprep.subr.bf16.mxu1 %v25995_v57 }
 0x93b   : > { %v16777_v2 = vpop.f32.mrb[128].mxu0  ;;  %v18613_v32 = vpop.f32.mrb[128].mxu1 }
 0x93c   : > { %v29444_v29 = vadd.f32 %v16777_v2, %v29357_v10  ;;  %v29447_v1 = vadd.f32 %v18613_v32, %v29360_v42  ;;  %v16779_v0 = vpop.f32.mrb[129].mxu0  ;;  %v18615_v63 = vpop.f32.mrb[129].mxu1  ;;  %v26004_v42 = vld [vmem:[%s26411_s10 + $0x4724] ss:$16 sps:$4 sm:$0xff]  }
 0x93d   : > { %v29450_v4 = vadd.f32 %v16779_v0, %v29363_v50  ;;  %v29453_v33 = vadd.f32 %v18615_v63, %v29366_v14  ;;  %16952 = vmatpush1.bf16.msra.mxu0 %v25990_v13  ;;  %18788 = vmatpush1.bf16.msra.mxu1 %v25993_v20  ;;  %v16781_v10 = vpop.f32.mrb[130].mxu0  ;;  %v18617_v56 = vpop.f32.mrb[130].mxu1  ;;  %v26007_v50 = vld [vmem:[%s26411_s10 + $0x472c] ss:$16 sps:$4 sm:$0xff]   ;;  %v26002_v14 = vld [vmem:[%s26411_s10 + $0x4720] ss:$16 sps:$4 sm:$0xff]  }
 0x93e   : > { %16953 = vmatprep.subr.bf16.mxu0 %v25998_v44  ;;  %18789 = vmatprep.subr.bf16.mxu1 %v26001_v5  ;;  %v16782_v49 = vpop.f32.mrb[131].mxu0  ;;  %v18618_v47 = vpop.f32.mrb[131].mxu1 }
 0x941   : > { %16954 = vmatpush1.bf16.msra.mxu0 %v25996_v58  ;;  %18790 = vmatpush1.bf16.msra.mxu1 %v25999_v27 }
 0x942   : > { %16955 = vmatprep.subr.bf16.mxu0 %v26004_v42  ;;  %18791 = vmatprep.subr.bf16.mxu1 %v26007_v50 }
 0x945   : > { %16956 = vmatpush1.bf16.msra.mxu0 %v26002_v14  ;;  %18792 = vmatpush1.bf16.msra.mxu1 %v26005_v62 }
 0x946   : > { %16957 = vmatprep.subr.bf16.mxu0 %v26010_v16  ;;  %18793 = vmatprep.subr.bf16.mxu1 %v26013_v22  ;;  %v596_v16 = vld [vmem:[#allocation2] sm:$0xff]  ;;  %v598_v22 = vld [vmem:[#allocation2 + $0x10] sm:$0xff] }
 0x949   : > { %16958 = vmatpush1.bf16.msra.mxu0 %v26008_v34  ;;  %18794 = vmatpush1.bf16.msra.mxu1 %v26011_v3  ;;  %v597_v34 = vld [vmem:[#allocation2 + $0x8] sm:$0xff]  ;;  %v599_v3 = vld [vmem:[#allocation2 + $0x18] sm:$0xff] }
 0x94a   : > { %16959 = vmatprep.subr.bf16.mxu0 %v26016_v26  ;;  %18795 = vmatprep.subr.bf16.mxu1 %v26019_v23 }
 0x94d   : > { %16960 = vmatpush1.bf16.msra.mxu0 %v26014_v51  ;;  %18796 = vmatpush1.bf16.msra.mxu1 %v26017_v48  ;;  %v600_v51 = vld [vmem:[#allocation2 + $0x20] sm:$0xff]  ;;  %v602_v48 = vld [vmem:[#allocation2 + $0x30] sm:$0xff] }
 0x94e   : > { %16961 = vmatprep.subr.bf16.mxu0 %v26022_v21  ;;  %18797 = vmatprep.subr.bf16.mxu1 %v26025_v19 }
 0x951   : > { %16962 = vmatpush1.bf16.msra.mxu0 %v26020_v18  ;;  %18798 = vmatpush1.bf16.msra.mxu1 %v26023_v45 }
 0x952   : > { %16963 = vmatprep.subr.bf16.mxu0 %v26028_v52  ;;  %18799 = vmatprep.subr.bf16.mxu1 %v26031_v17  ;;  %v601_v52 = vld [vmem:[#allocation2 + $0x28] sm:$0xff]  ;;  %v603_v17 = vld [vmem:[#allocation2 + $0x38] sm:$0xff] }
 0x955   : > { %16964 = vmatpush1.bf16.msra.mxu0 %v26026_v46  ;;  %18800 = vmatpush1.bf16.msra.mxu1 %v26029_v15 }
 0x956   : > { %16965 = vmatprep.subr.bf16.mxu0 %v26034_v59  ;;  %18801 = vmatprep.subr.bf16.mxu1 %v26037_v7 }
 0x959   : > { %16966 = vmatpush1.bf16.msra.mxu0 %v26032_v11  ;;  %18802 = vmatpush1.bf16.msra.mxu1 %v26035_v36 }
 0x95a   : > { %16967 = vmatprep.subr.bf16.mxu0 %v26040_v38  ;;  %18803 = vmatprep.subr.bf16.mxu1 %v26043_v53 }
 0x95d   : > { %16968 = vmatpush1.bf16.msra.mxu0 %v26038_v12  ;;  %18804 = vmatpush1.bf16.msra.mxu1 %v26041_v25 }
 0x960   : > { %16970 = vmatmul.mubr.bf16.vlgmr.msra.gmra.mrb[0].mxu0 %v19690_v43  ;;  %18806 = vmatmul.mubr.bf16.vlgmr.msra.gmra.mrb[0].mxu1 %v19690_v43 }
 0x961   : > { %16979 = vmatprep.mubr.bf16.mxu0 %v19763_v8  ;;  %18815 = vmatprep.mubr.bf16.mxu1 %v19763_v8  ;;  %v606_v8 = vld [vmem:[#allocation2 + $0x50] sm:$0x3] }
 0x968   : > { %16980 = vmatmul.mubr.bf16.gmra.mrb[144].mxu0 %v19762_v41  ;;  %18816 = vmatmul.mubr.bf16.gmra.mrb[144].mxu1 %v19762_v41 }
 0x97b   : > { %v16828_v40 = vpop.f32.mrb[132].mxu0  ;;  %v18664_v39 = vpop.f32.mrb[132].mxu1 }
 0x97c   : > { %v16829_v6 = vadd.f32 %v16828_v40, %v29444_v29  ;;  %v18665_v61 = vadd.f32 %v18664_v39, %v29447_v1  ;;  %v16830_v37 = vpop.f32.mrb[133].mxu0  ;;  %v18666_v24 = vpop.f32.mrb[133].mxu1 }
 0x97d   : > { %v16831_v9 = vadd.f32 %v16830_v37, %v29450_v4  ;;  %v18667_v35 = vadd.f32 %v18666_v24, %v29453_v33  ;;  %v16832_v31 = vpop.f32.mrb[134].mxu0  ;;  %v18668_v30 = vpop.f32.mrb[134].mxu1  ;;  %v607_v37 = vld [vmem:[#allocation2 + $0x58] sm:$0x3] }
 0x97e   : > { %v16833_v28 = vpop.f32.mrb[135].mxu0  ;;  %v18669_v54 = vpop.f32.mrb[135].mxu1 }
 0x9bb   : > { %v16879_v55 = vpop.f32.mrb[136].mxu0  ;;  %v18715_v57 = vpop.f32.mrb[136].mxu1 }
 0x9bc   : > { %v16880_v13 = vadd.f32 %v16879_v55, %v16829_v6  ;;  %v18716_v20 = vadd.f32 %v18715_v57, %v18665_v61  ;;  %v16881_v44 = vpop.f32.mrb[137].mxu0  ;;  %v18717_v5 = vpop.f32.mrb[137].mxu1  ;;  %v605_v6 = vld [vmem:[#allocation2 + $0x48] sm:$0x3] }
 0x9bd   : > { %v16882_v2 = vadd.f32 %v16881_v44, %v16831_v9  ;;  %v18718_v32 = vadd.f32 %v18717_v5, %v18667_v35  ;;  %v16883_v29 = vpop.f32.mrb[138].mxu0  ;;  %v18719_v1 = vpop.f32.mrb[138].mxu1  ;;  %v19095_v44 = vld [vmem:[%s30072_s4 + $0x8] sm:$0xff] (!%p22068_p10)  ;;  %v19097_v5 = vld [vmem:[%s30072_s4 + $0x18] sm:$0xff] (!%p22068_p10) }
 0x9be   : > { %v16884_v0 = vpop.f32.mrb[139].mxu0  ;;  %v18720_v63 = vpop.f32.mrb[139].mxu1  ;;  %v19161_v29 = vld [vmem:[%s30072_s4 + $0x218] sm:$0xff] (!%p22068_p10)  ;;  %v19094_v1 = vld [vmem:[%s30072_s4] sm:$0xff] (!%p22068_p10) }
 0x9bf   : > { %v19096_v0 = vld [vmem:[%s30072_s4 + $0x10] sm:$0xff] (!%p22068_p10) }
 0x9fb   : > { %v16930_v58 = vpop.f32.mrb[140].mxu0  ;;  %v18766_v4 = vpop.f32.mrb[140].mxu1 }
 0x9fc   : > { %v16931_v27 = vadd.f32 %v16930_v58, %v16880_v13  ;;  %v18767_v33 = vadd.f32 %v18766_v4, %v18716_v20  ;;  %v16932_v10 = vpop.f32.mrb[141].mxu0  ;;  %v18768_v56 = vpop.f32.mrb[141].mxu1  ;;  %v22079_v58 = vpack.c.bf16 (!%p22068_p10), %v19096_v0, %v19094_v1  ;;  %v19158_v4 = vld [vmem:[%s30072_s4 + $0x200] sm:$0xff] (!%p22068_p10)  ;;  %v19180_v1 = vld [vmem:[%s30072_s4 + $0x2b0] sm:$0xff] (!%p22068_p10)  ;;  %v19119_v0 = vld [vmem:[%s30072_s4 + $0xc8] sm:$0xff] (!%p22068_p10) }
 0x9fd   : > { %v16933_v42 = vadd.f32 %v16932_v10, %v16882_v2  ;;  %v18769_v50 = vadd.f32 %v18768_v56, %v18718_v32  ;;  %v16934_v49 = vpop.f32.mrb[142].mxu0  ;;  %v18770_v47 = vpop.f32.mrb[142].mxu1  ;;  %v19159_v2 = vld [vmem:[%s30072_s4 + $0x208] sm:$0xff] (!%p22068_p10)  ;;  %v22077_v32 = vpack.c.bf16 (!%p22068_p10), %v19097_v5, %v19095_v44  ;;  %v19101_v56 = vld [vmem:[%s30072_s4 + $0x38] sm:$0xff] (!%p22068_p10)  ;;  %v19114_v5 = vld [vmem:[%s30072_s4 + $0xa0] sm:$0xff] (!%p22068_p10) }
 0x9fe   : > { %v16935_v14 = vpop.f32.mrb[143].mxu0  ;;  %v18771_v62 = vpop.f32.mrb[143].mxu1  ;;  %v22141_v63 = vpack.c.bf16 (!%p22068_p10), %v19161_v29, %v19159_v2  ;;  %v19116_v2 = vld [vmem:[%s30072_s4 + $0xb0] sm:$0xff] (!%p22068_p10) }
 0x9ff   : > { %22078 = vmatprep.subr.bf16.mxu1 (!%p22068_p10), %v22077_v32  ;;  %v19098_v14 = vld [vmem:[%s30072_s4 + $0x20] sm:$0xff] (!%p22068_p10)  ;;  %v19100_v62 = vld [vmem:[%s30072_s4 + $0x30] sm:$0xff] (!%p22068_p10) }
 0xa00   : > { %22142 = vmatprep.subr.bf16.mxu0 (!%p22068_p10), %v22141_v63  ;;  %22080 = vmatpush1.bf16.msra.mxu1 (!%p22068_p10), %v22079_v58  ;;  %v19178_v32 = vld [vmem:[%s30072_s4 + $0x2a0] sm:$0xff] (!%p22068_p10)  ;;  %v19121_v63 = vld [vmem:[%s30072_s4 + $0xd8] sm:$0xff] (!%p22068_p10)  ;;  %v19183_v58 = vld [vmem:[%s30072_s4 + $0x2c8] sm:$0xff] (!%p22068_p10) }
 0xa33   : > { %v16971_v26 = vpop.f32.mrb[0].mxu0  ;;  %v18807_v23 = vpop.f32.mrb[0].mxu1 }
 0xa34   : > { %v18824_v21 = vadd.f32 %v16971_v26, %v596_v16  ;;  %v18826_v19 = vadd.f32 %v18807_v23, %v598_v22  ;;  %v16973_v18 = vpop.f32.mrb[1].mxu0  ;;  %v18809_v45 = vpop.f32.mrb[1].mxu1  ;;  %v19162_v16 = vld [vmem:[%s30072_s4 + $0x220] sm:$0xff] (!%p22068_p10)  ;;  %v22083_v22 = vpack.c.bf16 (!%p22068_p10), %v19100_v62, %v19098_v14  ;;  %v19105_v26 = vld [vmem:[%s30072_s4 + $0x58] sm:$0xff] (!%p22068_p10)  ;;  %v19123_v14 = vld [vmem:[%s30072_s4 + $0xe8] sm:$0xff] (!%p22068_p10) }
 0xa35   : > { %v18825_v46 = vadd.f32 %v16973_v18, %v597_v34  ;;  %v18827_v15 = vadd.f32 %v18809_v45, %v599_v3  ;;  %v16975_v59 = vpop.f32.mrb[2].mxu0  ;;  %v18811_v7 = vpop.f32.mrb[2].mxu1  ;;  %v19164_v34 = vld [vmem:[%s30072_s4 + $0x230] sm:$0xff] (!%p22068_p10)  ;;  %v19103_v3 = vld [vmem:[%s30072_s4 + $0x48] sm:$0xff] (!%p22068_p10)  ;;  %v19125_v62 = vld [vmem:[%s30072_s4 + $0xf8] sm:$0xff] (!%p22068_p10) }
 0xa36   : > { %18836 = vst [vmem:[#allocation2] sm:$0xff] %v18824_v21  ;;  %18838 = vst [vmem:[#allocation2 + $0x10] sm:$0xff] %v18826_v19  ;;  %v18828_v11 = vadd.f32 %v16975_v59, %v600_v51  ;;  %v18830_v36 = vadd.f32 %v18811_v7, %v602_v48  ;;  %v16977_v38 = vpop.f32.mrb[3].mxu0  ;;  %v18813_v53 = vpop.f32.mrb[3].mxu1  ;;  %v22147_v23 = vpack.c.bf16 (!%p22068_p10), %v19164_v34, %v19162_v16  ;;  %v19167_v48 = vld [vmem:[%s30072_s4 + $0x248] sm:$0xff] (!%p22068_p10)  ;;  %v19169_v21 = vld [vmem:[%s30072_s4 + $0x258] sm:$0xff] (!%p22068_p10) }
 0xa37   : > { %18837 = vst [vmem:[#allocation2 + $0x8] sm:$0xff] %v18825_v46  ;;  %18839 = vst [vmem:[#allocation2 + $0x18] sm:$0xff] %v18827_v15  ;;  %v18829_v12 = vadd.f32 %v16977_v38, %v601_v52  ;;  %v18831_v25 = vadd.f32 %v18813_v53, %v603_v17  ;;  %v22085_v51 = vpack.c.bf16 (!%p22068_p10), %v19105_v26, %v19103_v3  ;;  %v19102_v19 = vld [vmem:[%s30072_s4 + $0x40] sm:$0xff] (!%p22068_p10)  ;;  %v19104_v45 = vld [vmem:[%s30072_s4 + $0x50] sm:$0xff] (!%p22068_p10) }
 0xa38   : > { %18840 = vst [vmem:[#allocation2 + $0x20] sm:$0xff] %v18828_v11  ;;  %18842 = vst [vmem:[#allocation2 + $0x30] sm:$0xff] %v18830_v36  ;;  %v22149_v18 = vpack.c.bf16 (!%p22068_p10), %v19169_v21, %v19167_v48  ;;  %v19166_v52 = vld [vmem:[%s30072_s4 + $0x240] sm:$0xff] (!%p22068_p10)  ;;  %v19168_v17 = vld [vmem:[%s30072_s4 + $0x250] sm:$0xff] (!%p22068_p10)  ;;  %v22087_v46 = vpack.c.bf16 (!%p22068_p10), %v19104_v45, %v19102_v19  ;;  %v22105_v26 = vpack.c.bf16 (!%p22068_p10), %v19125_v62, %v19123_v14 }
 0xa39   : > { %18841 = vst [vmem:[#allocation2 + $0x28] sm:$0xff] %v18829_v12  ;;  %18843 = vst [vmem:[#allocation2 + $0x38] sm:$0xff] %v18831_v25  ;;  %v19107_v15 = vld [vmem:[%s30072_s4 + $0x68] sm:$0xff] (!%p22068_p10)  ;;  %v19109_v59 = vld [vmem:[%s30072_s4 + $0x78] sm:$0xff] (!%p22068_p10)  ;;  %v22151_v11 = vpack.c.bf16 (!%p22068_p10), %v19168_v17, %v19166_v52 }
 0xa3a   : > { %v19171_v7 = vld [vmem:[%s30072_s4 + $0x268] sm:$0xff] (!%p22068_p10)  ;;  %v22089_v36 = vpack.c.bf16 (!%p22068_p10), %v19109_v59, %v19107_v15  ;;  %v19173_v38 = vld [vmem:[%s30072_s4 + $0x278] sm:$0xff] (!%p22068_p10)  ;;  %v19106_v53 = vld [vmem:[%s30072_s4 + $0x60] sm:$0xff] (!%p22068_p10) }
 0xa3b   : > { %v16981_v43 = vpop.f32.mrb[144].mxu0  ;;  %v18817_v41 = vpop.f32.mrb[144].mxu1  ;;  %18851 = sbr.rel (%p22068_p10) target bundleno = 3186 (0xc72), region = 87  ;;  %v19108_v12 = vld [vmem:[%s30072_s4 + $0x70] sm:$0xff] (!%p22068_p10)  ;;  %v22153_v25 = vpack.c.bf16 (!%p22068_p10), %v19173_v38, %v19171_v7  ;;  %v19187_v16 = vld [vmem:[%s30072_s4 + $0x2e8] sm:$0xff] (!%p22068_p10)  ;;  %v19186_v48 = vld [vmem:[%s30072_s4 + $0x2e0] sm:$0xff] (!%p22068_p10) }
 0xa3c   : > { %v16982_v40 = vadd.f32 %v16981_v43, %v16931_v27  ;;  %v18818_v39 = vadd.f32 %v18817_v41, %v18767_v33  ;;  %v16983_v61 = vpop.f32.mrb[145].mxu0  ;;  %v18819_v24 = vpop.f32.mrb[145].mxu1  ;;  %v19160_v27 = vld [vmem:[%s30072_s4 + $0x210] sm:$0xff] (!%p22068_p10)  ;;  %v19099_v33 = vld [vmem:[%s30072_s4 + $0x28] sm:$0xff] (!%p22068_p10)  ;;  %v19113_v41 = vld [vmem:[%s30072_s4 + $0x98] sm:$0xff] (!%p22068_p10) }
 0xa3d   : > { %v16984_v9 = vadd.f32 %v16983_v61, %v16933_v42  ;;  %v18820_v35 = vadd.f32 %v18819_v24, %v18769_v50  ;;  %v16985_v31 = vpop.f32.mrb[146].mxu0  ;;  %v18821_v30 = vpop.f32.mrb[146].mxu1  ;;  %v22143_v10 = vpack.c.bf16 (!%p22068_p10), %v19160_v27, %v19158_v4  ;;  %v19163_v42 = vld [vmem:[%s30072_s4 + $0x228] sm:$0xff] (!%p22068_p10)  ;;  %v19165_v50 = vld [vmem:[%s30072_s4 + $0x238] sm:$0xff] (!%p22068_p10)  ;;  %v22081_v49 = vpack.c.bf16 (!%p22068_p10), %v19101_v56, %v19099_v33  ;;  %v19172_v43 = vld [vmem:[%s30072_s4 + $0x270] sm:$0xff] (!%p22068_p10) }
 0xa3e   : > { %v18832_v28 = vadd.f32 %v16982_v40, %v604_v60  ;;  %v18834_v54 = vadd.f32 %v18818_v39, %v606_v8  ;;  %v16986_v55 = vpop.f32.mrb[147].mxu0  ;;  %v18822_v57 = vpop.f32.mrb[147].mxu1  ;;  %v22145_v47 = vpack.c.bf16 (!%p22068_p10), %v19165_v50, %v19163_v42  ;;  %v19170_v60 = vld [vmem:[%s30072_s4 + $0x260] sm:$0xff] (!%p22068_p10)  ;;  %v19111_v8 = vld [vmem:[%s30072_s4 + $0x88] sm:$0xff] (!%p22068_p10)  ;;  %v19177_v39 = vld [vmem:[%s30072_s4 + $0x298] sm:$0xff] (!%p22068_p10)  ;;  %v22099_v27 = vpack.c.bf16 (!%p22068_p10), %v19116_v2, %v19114_v5 }
 0xa3f   : > { %v18833_v13 = vadd.f32 %v16984_v9, %v605_v6  ;;  %v18835_v20 = vadd.f32 %v18820_v35, %v607_v37  ;;  %22144 = vmatpush1.bf16.msra.mxu0 (!%p22068_p10), %v22143_v10  ;;  %22082 = vmatprep.subr.bf16.mxu1 (!%p22068_p10), %v22081_v49  ;;  %v19175_v40 = vld [vmem:[%s30072_s4 + $0x288] sm:$0xff] (!%p22068_p10)  ;;  %v22091_v6 = vpack.c.bf16 (!%p22068_p10), %v19108_v12, %v19106_v53  ;;  %v19110_v24 = vld [vmem:[%s30072_s4 + $0x80] sm:$0xff] (!%p22068_p10)  ;;  %v19112_v9 = vld [vmem:[%s30072_s4 + $0x90] sm:$0xff] (!%p22068_p10) }
 0xa40   : > { %18844 = vst [vmem:[#allocation2 + $0x40] sm:$0x3] %v18832_v28  ;;  %18846 = vst [vmem:[#allocation2 + $0x50] sm:$0x3] %v18834_v54  ;;  %22146 = vmatprep.subr.bf16.mxu0 (!%p22068_p10), %v22145_v47  ;;  %22084 = vmatpush1.bf16.msra.mxu1 (!%p22068_p10), %v22083_v22  ;;  %v22155_v61 = vpack.c.bf16 (!%p22068_p10), %v19172_v43, %v19170_v60  ;;  %v22093_v37 = vpack.c.bf16 (!%p22068_p10), %v19113_v41, %v19111_v8  ;;  %v19174_v35 = vld [vmem:[%s30072_s4 + $0x280] sm:$0xff] (!%p22068_p10)  ;;  %v19176_v30 = vld [vmem:[%s30072_s4 + $0x290] sm:$0xff] (!%p22068_p10) }
 0xa41   : > { %18845 = vst [vmem:[#allocation2 + $0x48] sm:$0x3] %v18833_v13  ;;  %18847 = vst [vmem:[#allocation2 + $0x58] sm:$0x3] %v18835_v20  ;;  %22086 = vmatprep.subr.bf16.mxu1 (!%p22068_p10), %v22085_v51  ;;  %v22157_v31 = vpack.c.bf16 (!%p22068_p10), %v19177_v39, %v19175_v40  ;;  %v19115_v28 = vld [vmem:[%s30072_s4 + $0xa8] sm:$0xff] (!%p22068_p10)  ;;  %v19117_v54 = vld [vmem:[%s30072_s4 + $0xb8] sm:$0xff] (!%p22068_p10)  ;;  %v22095_v13 = vpack.c.bf16 (!%p22068_p10), %v19112_v9, %v19110_v24  ;;  %v22159_v20 = vpack.c.bf16 (!%p22068_p10), %v19176_v30, %v19174_v35 }
 0xa42   : > { %v19179_v55 = vld [vmem:[%s30072_s4 + $0x2a8] sm:$0xff]  ;;  %v19181_v57 = vld [vmem:[%s30072_s4 + $0x2b8] sm:$0xff]  ;;  %v22097_v44 = vpack.c.bf16 %v19117_v54, %v19115_v28  ;;  %v22163_v33 = vpack.c.bf16 %v19180_v1, %v19178_v32  ;;  %v22101_v10 = vpack.c.bf16 %v19121_v63, %v19119_v0  ;;  %v19118_v56 = vld [vmem:[%s30072_s4 + $0xc0] sm:$0xff] }
 0xa43   : > { %22148 = vmatpush1.bf16.msra.mxu0 %v22147_v23  ;;  %v22161_v29 = vpack.c.bf16 %v19181_v57, %v19179_v55  ;;  %v19185_v4 = vld [vmem:[%s30072_s4 + $0x2d8] sm:$0xff]  ;;  %v19120_v42 = vld [vmem:[%s30072_s4 + $0xd0] sm:$0xff]  ;;  %v19182_v50 = vld [vmem:[%s30072_s4 + $0x2c0] sm:$0xff] }
 0xa44   : > { %22150 = vmatprep.subr.bf16.mxu0 %v22149_v18  ;;  %22088 = vmatpush1.bf16.msra.mxu1 %v22087_v46  ;;  %v22165_v49 = vpack.c.bf16 %v19185_v4, %v19183_v58  ;;  %v19184_v47 = vld [vmem:[%s30072_s4 + $0x2d0] sm:$0xff]  ;;  %v19189_v22 = vld [vmem:[%s30072_s4 + $0x2f8] sm:$0xff]  ;;  %v22103_v34 = vpack.c.bf16 %v19120_v42, %v19118_v56  ;;  %v19122_v23 = vld [vmem:[%s30072_s4 + $0xe0] sm:$0xff] }
 0xa45   : > { %22090 = vmatprep.subr.bf16.mxu1 %v22089_v36  ;;  %v22167_v3 = vpack.c.bf16 %v19184_v47, %v19182_v50  ;;  %v19124_v51 = vld [vmem:[%s30072_s4 + $0xf0] sm:$0xff]  ;;  %v22169_v21 = vpack.c.bf16 %v19189_v22, %v19187_v16  ;;  %v19127_v18 = vld [vmem:[%s30072_s4 + $0x108] sm:$0xff]  ;;  %v19129_v45 = vld [vmem:[%s30072_s4 + $0x118] sm:$0xff] }
 0xa46   : > { %v19188_v19 = vld [vmem:[%s30072_s4 + $0x2f0] sm:$0xff]  ;;  %v19191_v52 = vld [vmem:[%s30072_s4 + $0x308] sm:$0xff]  ;;  %v19193_v17 = vld [vmem:[%s30072_s4 + $0x318] sm:$0xff]  ;;  %v22107_v46 = vpack.c.bf16 %v19124_v51, %v19122_v23  ;;  %v22109_v59 = vpack.c.bf16 %v19129_v45, %v19127_v18 }
 0xa47   : > { %22152 = vmatpush1.bf16.msra.mxu0 %v22151_v11  ;;  %v22171_v15 = vpack.c.bf16 %v19188_v19, %v19186_v48  ;;  %v19126_v7 = vld [vmem:[%s30072_s4 + $0x100] sm:$0xff]  ;;  %v19128_v11 = vld [vmem:[%s30072_s4 + $0x110] sm:$0xff]  ;;  %v22173_v38 = vpack.c.bf16 %v19193_v17, %v19191_v52  ;;  %v19131_v12 = vld [vmem:[%s30072_s4 + $0x128] sm:$0xff] }
 0xa48   : > { %22154 = vmatprep.subr.bf16.mxu0 %v22153_v25  ;;  %22092 = vmatpush1.bf16.msra.mxu1 %v22091_v6  ;;  %v19190_v36 = vld [vmem:[%s30072_s4 + $0x300] sm:$0xff]  ;;  %v19192_v53 = vld [vmem:[%s30072_s4 + $0x310] sm:$0xff]  ;;  %v19133_v25 = vld [vmem:[%s30072_s4 + $0x138] sm:$0xff]  ;;  %v22111_v8 = vpack.c.bf16 %v19128_v11, %v19126_v7 }
 0xa49   : > { %22094 = vmatprep.subr.bf16.mxu1 %v22093_v37  ;;  %v19195_v60 = vld [vmem:[%s30072_s4 + $0x328] sm:$0xff]  ;;  %v19197_v43 = vld [vmem:[%s30072_s4 + $0x338] sm:$0xff]  ;;  %v22175_v41 = vpack.c.bf16 %v19192_v53, %v19190_v36  ;;  %v22113_v40 = vpack.c.bf16 %v19133_v25, %v19131_v12  ;;  %v19130_v39 = vld [vmem:[%s30072_s4 + $0x120] sm:$0xff] }
 0xa4a   : > { %v19132_v6 = vld [vmem:[%s30072_s4 + $0x130] sm:$0xff]  ;;  %v22177_v37 = vpack.c.bf16 %v19197_v43, %v19195_v60  ;;  %v19135_v9 = vld [vmem:[%s30072_s4 + $0x148] sm:$0xff]  ;;  %v19137_v35 = vld [vmem:[%s30072_s4 + $0x158] sm:$0xff] }
 0xa4b   : > { %22156 = vmatpush1.bf16.msra.mxu0 %v22155_v61  ;;  %v19194_v61 = vld [vmem:[%s30072_s4 + $0x320] sm:$0xff]  ;;  %v19196_v24 = vld [vmem:[%s30072_s4 + $0x330] sm:$0xff]  ;;  %v19201_v30 = vld [vmem:[%s30072_s4 + $0x358] sm:$0xff]  ;;  %v22115_v28 = vpack.c.bf16 %v19132_v6, %v19130_v39  ;;  %v22117_v55 = vpack.c.bf16 %v19137_v35, %v19135_v9 }
 0xa4c   : > { %22158 = vmatprep.subr.bf16.mxu0 %v22157_v31  ;;  %22096 = vmatpush1.bf16.msra.mxu1 %v22095_v13  ;;  %v19199_v31 = vld [vmem:[%s30072_s4 + $0x348] sm:$0xff]  ;;  %v22179_v54 = vpack.c.bf16 %v19196_v24, %v19194_v61  ;;  %v19134_v57 = vld [vmem:[%s30072_s4 + $0x140] sm:$0xff]  ;;  %v19136_v13 = vld [vmem:[%s30072_s4 + $0x150] sm:$0xff] }
 0xa4d   : > { %22098 = vmatprep.subr.bf16.mxu1 %v22097_v44  ;;  %v22181_v44 = vpack.c.bf16 %v19201_v30, %v19199_v31  ;;  %v19200_v5 = vld [vmem:[%s30072_s4 + $0x350] sm:$0xff]  ;;  %v19139_v2 = vld [vmem:[%s30072_s4 + $0x168] sm:$0xff]  ;;  %v19141_v32 = vld [vmem:[%s30072_s4 + $0x178] sm:$0xff]  ;;  %v22119_v0 = vpack.c.bf16 %v19136_v13, %v19134_v57 }
 0xa4e   : > { %v19205_v1 = vld [vmem:[%s30072_s4 + $0x378] sm:$0xff]  ;;  %v19138_v63 = vld [vmem:[%s30072_s4 + $0x160] sm:$0xff]  ;;  %v19140_v58 = vld [vmem:[%s30072_s4 + $0x170] sm:$0xff] }
 0xa4f   : > { %22160 = vmatpush1.bf16.msra.mxu0 %v22159_v20  ;;  %v19198_v20 = vld [vmem:[%s30072_s4 + $0x340] sm:$0xff]  ;;  %v19143_v56 = vld [vmem:[%s30072_s4 + $0x188] sm:$0xff]  ;;  %v19145_v42 = vld [vmem:[%s30072_s4 + $0x198] sm:$0xff] }
 0xa50   : > { %22162 = vmatprep.subr.bf16.mxu0 %v22161_v29  ;;  %22100 = vmatpush1.bf16.msra.mxu1 %v22099_v27  ;;  %v19203_v29 = vld [vmem:[%s30072_s4 + $0x368] sm:$0xff]  ;;  %v19202_v4 = vld [vmem:[%s30072_s4 + $0x360] sm:$0xff]  ;;  %v22183_v27 = vpack.c.bf16 %v19200_v5, %v19198_v20  ;;  %v19209_v47 = vld [vmem:[%s30072_s4 + $0x398] sm:$0xff]  ;;  %v22125_v17 = vpack.c.bf16 %v19145_v42, %v19143_v56 }
 0xa51   : > { %22102 = vmatprep.subr.bf16.mxu1 %v22101_v10  ;;  %v19204_v10 = vld [vmem:[%s30072_s4 + $0x370] sm:$0xff]  ;;  %v22185_v50 = vpack.c.bf16 %v19205_v1, %v19203_v29  ;;  %v29793_v14 = vld [vmem:[#allocation2 + $0x8] sm:$0xff]  ;;  %v19142_v62 = vld [vmem:[%s30072_s4 + $0x180] sm:$0xff] }
 0xa52   : > { %v19144_v16 = vld [vmem:[%s30072_s4 + $0x190] sm:$0xff]  ;;  %v29801_v22 = vld [vmem:[#allocation2 + $0x28] sm:$0xff]  ;;  %v19149_v48 = vld [vmem:[%s30072_s4 + $0x1b8] sm:$0xff]  ;;  %v22187_v52 = vpack.c.bf16 %v19204_v10, %v19202_v4 }
 0xa53   : > { %22164 = vmatpush1.bf16.msra.mxu0 %v22163_v33  ;;  %v22121_v33 = vpack.c.bf16 %v19141_v32, %v19139_v2  ;;  %v19208_v23 = vld [vmem:[%s30072_s4 + $0x390] sm:$0xff]  ;;  %v19147_v51 = vld [vmem:[%s30072_s4 + $0x1a8] sm:$0xff]  ;;  %v29821_v18 = vld [vmem:[#allocation2 + $0x18] sm:$0xff]  ;;  %v22127_v61 = vpack.c.bf16 %v19144_v16, %v19142_v62 }
 0xa54   : > { %22166 = vmatprep.subr.bf16.mxu0 %v22165_v49  ;;  %22104 = vmatpush1.bf16.msra.mxu1 %v22103_v34  ;;  %v19207_v49 = vld [vmem:[%s30072_s4 + $0x388] sm:$0xff]  ;;  %v29823_v45 = vld [vmem:[#allocation2 + $0x38] sm:$0xff]  ;;  %v29831_v7 = vld [vmem:[#allocation2 + $0x20] sm:$0xff]  ;;  %v22129_v31 = vpack.c.bf16 %v19149_v48, %v19147_v51 }
 0xa55   : > { %22106 = vmatprep.subr.bf16.mxu1 %v22105_v26  ;;  %v29803_v34 = vld [vmem:[#allocation2 + $0x48] sm:$0x3]  ;;  %v19206_v26 = vld [vmem:[%s30072_s4 + $0x380] sm:$0xff]  ;;  %v22189_v11 = vpack.c.bf16 %v19209_v47, %v19207_v49  ;;  %v29839_v25 = vld [vmem:[#allocation2 + $0x10] sm:$0xff] }
 0xa56   : > { %v18875_v19 = vsel %vm18865_vm0, %v29803_v34, 0.0  ;;  %v29835_v53 = vld [vmem:[#allocation2 + $0x40] sm:$0x3]  ;;  %v29841_v60 = vld [vmem:[#allocation2 + $0x30] sm:$0xff]  ;;  %v19211_v43 = vld [vmem:[%s30072_s4 + $0x3a8] sm:$0xff]  ;;  %v22191_v35 = vpack.c.bf16 %v19208_v23, %v19206_v26 }
 0xa57   : > { %22168 = vmatpush1.bf16.msra.mxu0 %v22167_v3  ;;  %v22123_v3 = vpack.c.bf16 %v19140_v58, %v19138_v63  ;;  %v29851_v39 = vld [vmem:[#allocation2 + $0x50] sm:$0x3]  ;;  %v18883_v6 = vadd.f32 %v29841_v60, %v29839_v25  ;;  %v19146_v30 = vld [vmem:[%s30072_s4 + $0x1a0] sm:$0xff]  ;;  %v19153_v5 = vld [vmem:[%s30072_s4 + $0x1d8] sm:$0xff] }
 0xa58   : > { %22170 = vmatprep.subr.bf16.mxu0 %v22169_v21  ;;  %22108 = vmatpush1.bf16.msra.mxu1 %v22107_v46  ;;  %v18874_v21 = vadd.f32 %v29801_v22, %v29793_v14  ;;  %v29825_v46 = vld [vmem:[#allocation2 + $0x58] sm:$0x3]  ;;  %v18884_v9 = vsel %vm18865_vm0, %v29851_v39, 0.0  ;;  %v19212_v20 = vld [vmem:[%s30072_s4 + $0x3b0] sm:$0xff]  ;;  %v19215_v29 = vld [vmem:[%s30072_s4 + $0x3c8] sm:$0xff] }
 0xa59   : > { %22110 = vmatprep.subr.bf16.mxu1 %v22109_v59  ;;  %v29829_v59 = vld [vmem:[#allocation2] sm:$0xff]  ;;  %v18885_v57 = vadd.f32 %v18884_v9, %v18883_v6  ;;  %v19217_v1 = vld [vmem:[%s30072_s4 + $0x3d8] sm:$0xff]  ;;  %v19152_v42 = vld [vmem:[%s30072_s4 + $0x1d0] sm:$0xff] }
 0xa5a   : > { %v18876_v36 = vadd.f32 %v18875_v19, %v18874_v21  ;;  %v18864_v12 = vadd.f32 %v29831_v7, %v29829_v59  ;;  %v19150_v56 = vld [vmem:[%s30072_s4 + $0x1c0] sm:$0xff]  ;;  %v22197_v62 = vpack.c.bf16 %v19217_v1, %v19215_v29  ;;  %v19216_v16 = vld [vmem:[%s30072_s4 + $0x3d0] sm:$0xff]  ;;  %v19157_v26 = vld [vmem:[%s30072_s4 + $0x1f8] sm:$0xff] }
 0xa5b   : > { %22172 = vmatpush1.bf16.msra.mxu0 %v22171_v15  ;;  %v18892_v15 = vadd.f32 %v29823_v45, %v29821_v18  ;;  %v18886_v63 = vrot.slane %v18885_v57, 4  ;;  %v19219_v48 = vld [vmem:[%s30072_s4 + $0x3e8] sm:$0xff]  ;;  %v19221_v21 = vld [vmem:[%s30072_s4 + $0x3f8] sm:$0xff]  ;;  %v19218_v6 = vld [vmem:[%s30072_s4 + $0x3e0] sm:$0xff] }
 0xa5c   : > { %22174 = vmatprep.subr.bf16.mxu0 %v22173_v38  ;;  %22112 = vmatpush1.bf16.msra.mxu1 %v22111_v8  ;;  %v18893_v38 = vsel %vm18865_vm0, %v29825_v46, 0.0  ;;  %v19213_v8 = vld [vmem:[%s30072_s4 + $0x3b8] sm:$0xff] }
 0xa5d   : > { %22114 = vmatprep.subr.bf16.mxu1 %v22113_v40  ;;  %v18866_v40 = vsel %vm18865_vm0, %v29835_v53, 0.0  ;;  %v22193_v13 = vpack.c.bf16 %v19213_v8, %v19211_v43  ;;  %v18887_v47 = vadd.f32 %v18886_v63, %v18885_v57  ;;  %v19156_v43 = vld [vmem:[%s30072_s4 + $0x1f0] sm:$0xff] }
 0xa5e   : > { %v18867_v24 = vadd.f32 %v18866_v40, %v18864_v12  ;;  %v19154_v12 = vld [vmem:[%s30072_s4 + $0x1e0] sm:$0xff]  ;;  %v22201_v40 = vpack.c.bf16 %v19221_v21, %v19219_v48 }
 0xa5f   : > { %22176 = vmatpush1.bf16.msra.mxu0 %v22175_v41  ;;  %v18894_v41 = vadd.f32 %v18893_v38, %v18892_v15 }
 0xa60   : > { %22178 = vmatprep.subr.bf16.mxu0 %v22177_v37  ;;  %22116 = vmatpush1.bf16.msra.mxu1 %v22115_v28  ;;  %v18877_v37 = vrot.slane %v18876_v36, 4  ;;  %v19148_v28 = vld [vmem:[%s30072_s4 + $0x1b0] sm:$0xff]  ;;  %v18868_v32 = vrot.slane %v18867_v24, 4 }
 0xa61   : > { %22118 = vmatprep.subr.bf16.mxu1 %v22117_v55  ;;  %v18895_v55 = vrot.slane %v18894_v41, 4  ;;  %v22131_v58 = vpack.c.bf16 %v19148_v28, %v19146_v30 }
 0xa62   : > { %v18878_v2 = vadd.f32 %v18877_v37, %v18876_v36 }
 0xa63   : > { %22180 = vmatpush1.bf16.msra.mxu0 %v22179_v54  ;;  %v19210_v54 = vld [vmem:[%s30072_s4 + $0x3a0] sm:$0xff] }
 0xa64   : > { %22182 = vmatprep.subr.bf16.mxu0 %v22181_v44  ;;  %22120 = vmatpush1.bf16.msra.mxu1 %v22119_v0  ;;  %v19151_v44 = vld [vmem:[%s30072_s4 + $0x1c8] sm:$0xff]  ;;  %v18896_v0 = vadd.f32 %v18895_v55, %v18894_v41  ;;  %v18879_v4 = vrot.slane %v18878_v2, 2 }
 0xa65   : > { %22122 = vmatprep.subr.bf16.mxu1 %v22121_v33  ;;  %v22195_v33 = vpack.c.bf16 %v19212_v20, %v19210_v54  ;;  %v22133_v10 = vpack.c.bf16 %v19153_v5, %v19151_v44 }
 0xa66   : > { %v18897_v49 = vrot.slane %v18896_v0, 2  ;;  %v18880_v23 = vadd.f32 %v18879_v4, %v18878_v2 }
 0xa67   : > { %22184 = vmatpush1.bf16.msra.mxu0 %v22183_v27  ;;  %v18869_v27 = vadd.f32 %v18868_v32, %v18867_v24 }
 0xa68   : > { %22186 = vmatprep.subr.bf16.mxu0 %v22185_v50  ;;  %22124 = vmatpush1.bf16.msra.mxu1 %v22123_v3  ;;  %v19214_v50 = vld [vmem:[%s30072_s4 + $0x3c0] sm:$0xff]  ;;  %v19155_v3 = vld [vmem:[%s30072_s4 + $0x1e8] sm:$0xff]  ;;  %v18898_v19 = vadd.f32 %v18897_v49, %v18896_v0  ;;  %v18881_v15 = vrot.slane %v18880_v23, 1 }
 0xa69   : > { %22126 = vmatprep.subr.bf16.mxu1 %v22125_v17  ;;  %v18870_v51 = vrot.slane %v18869_v27, 2  ;;  %v22135_v17 = vpack.c.bf16 %v19152_v42, %v19150_v56  ;;  %v22199_v36 = vpack.c.bf16 %v19216_v16, %v19214_v50  ;;  %v22137_v38 = vpack.c.bf16 %v19157_v26, %v19155_v3 }
 0xa6a   : > { %v18899_v8 = vrot.slane %v18898_v19, 1  ;;  %v18882_v37 = vadd.f32 %v18881_v15, %v18880_v23 }
 0xa6b   : > { %22188 = vmatpush1.bf16.msra.mxu0 %v22187_v52  ;;  %v18888_v52 = vrot.slane %v18887_v47, 2 }
 0xa6c   : > { %22190 = vmatprep.subr.bf16.mxu0 %v22189_v11  ;;  %22128 = vmatpush1.bf16.msra.mxu1 %v22127_v61  ;;  %v18871_v11 = vadd.f32 %v18870_v51, %v18869_v27  ;;  %v19220_v61 = vld [vmem:[%s30072_s4 + $0x3f0] sm:$0xff]  ;;  %v18900_v9 = vadd.f32 %v18899_v8, %v18898_v19  ;;  %v18903_v30 = vmul.f32 0.055555556, %v18882_v37 }
 0xa6d   : > { %22130 = vmatprep.subr.bf16.mxu1 %v22129_v31  ;;  %v18889_v41 = vadd.f32 %v18888_v52, %v18887_v47  ;;  %v22139_v31 = vpack.c.bf16 %v19156_v43, %v19154_v12  ;;  %v22203_v54 = vpack.c.bf16 %v19220_v61, %v19218_v6 }
 0xa6e   : > { %v18872_v24 = vrot.slane %v18871_v11, 1  ;;  %v18905_v55 = vmul.f32 0.055555556, %v18900_v9  ;;  %v29921_v20 = vsub.f32 %v29801_v22, %v18903_v30  ;;  %v29924_v44 = vsub.f32 %v29803_v34, %v18903_v30 }
 0xa6f   : > { %22192 = vmatpush1.bf16.msra.mxu0 %v22191_v35  ;;  %v18890_v35 = vrot.slane %v18889_v41, 1 }
 0xa70   : > { %22194 = vmatprep.subr.bf16.mxu0 %v22193_v13  ;;  %22132 = vmatpush1.bf16.msra.mxu1 %v22131_v58  ;;  %v18873_v28 = vadd.f32 %v18872_v24, %v18871_v11  ;;  %v29918_v13 = vsub.f32 %v29793_v14, %v18903_v30  ;;  %v29927_v2 = vsub.f32 %v29821_v18, %v18905_v55 }
 0xa71   : > { %22134 = vmatprep.subr.bf16.mxu1 %v22133_v10  ;;  %v18891_v57 = vadd.f32 %v18890_v35, %v18889_v41  ;;  %v29930_v32 = vsub.f32 %v29823_v45, %v18905_v55  ;;  %v29933_v29 = vsub.f32 %v29825_v46, %v18905_v55  ;;  %v18923_v22 = vmul.f32 %v29921_v20, %v29921_v20 }
 0xa72   : > { %v18902_v5 = vmul.f32 0.055555556, %v18873_v28  ;;  %v18919_v14 = vmul.f32 %v29918_v13, %v29918_v13  ;;  %v18927_v34 = vmul.f32 %v29924_v44, %v29924_v44  ;;  %v18921_v45 = vmul.f32 %v29927_v2, %v29927_v2 }
 0xa73   : > { %22196 = vmatpush1.bf16.msra.mxu0 %v22195_v33  ;;  %v18904_v1 = vmul.f32 0.055555556, %v18891_v57  ;;  %v18925_v46 = vmul.f32 %v29930_v32, %v29930_v32  ;;  %v18929_v0 = vmul.f32 %v29933_v29, %v29933_v29  ;;  %v18992_v28 = vlaneseq }
 0xa74   : > { %22198 = vmatprep.subr.bf16.mxu0 %v22197_v62  ;;  %22136 = vmatpush1.bf16.msra.mxu1 %v22135_v17  ;;  %v29942_v18 = vsub.f32 %v29829_v59, %v18902_v5  ;;  %v29951_v63 = vsub.f32 %v29831_v7, %v18902_v5  ;;  %v18939_v58 = vadd.f32 %v18923_v22, %v18919_v14  ;;  %v18940_v4 = vsel %vm18865_vm0, %v18927_v34, 0.0 }
 0xa75   : > { %22138 = vmatprep.subr.bf16.mxu1 %v22137_v38  ;;  %v29955_v27 = vsub.f32 %v29835_v53, %v18902_v5  ;;  %v18957_v33 = vadd.f32 %v18925_v46, %v18921_v45  ;;  %v18958_v10 = vsel %vm18865_vm0, %v18929_v0, 0.0  ;;  %v29963_v42 = vsub.f32 %v29839_v25, %v18904_v1 }
 0xa76   : > { %v18918_v59 = vmul.f32 %v29942_v18, %v29942_v18  ;;  %v18922_v56 = vmul.f32 %v29951_v63, %v29951_v63  ;;  %v18941_v7 = vadd.f32 %v18940_v4, %v18939_v58  ;;  %v29968_v49 = vsub.f32 %v29841_v60, %v18904_v1  ;;  %v18990_v4 = vld [vmem:[%s30070_s2] sm:$0xf] }
 0xa77   : > { %22200 = vmatpush1.bf16.msra.mxu0 %v22199_v36  ;;  %v18926_v50 = vmul.f32 %v29955_v27, %v29955_v27  ;;  %v29971_v53 = vsub.f32 %v29851_v39, %v18904_v1  ;;  %v18959_v47 = vadd.f32 %v18958_v10, %v18957_v33  ;;  %v18920_v16 = vmul.f32 %v29963_v42, %v29963_v42  ;;  %v19024_v10 = vld [vmem:[%s30071_s3] sm:$0xf] }
 0xa78   : > { %22202 = vmatprep.subr.bf16.mxu0 %v22201_v40  ;;  %22140 = vmatpush1.bf16.msra.mxu1 %v22139_v31  ;;  %v18930_v62 = vadd.f32 %v18922_v56, %v18918_v59  ;;  %v18942_v3 = vrot.slane %v18941_v7, 4  ;;  %v18924_v25 = vmul.f32 %v29968_v49, %v29968_v49  ;;  %v18993_v34 = vshrl.u32 %v18992_v28, 7 }
 0xa79   : > { %v18931_v26 = vsel %vm18865_vm0, %v18926_v50, 0.0  ;;  %v18928_v23 = vmul.f32 %v29971_v53, %v29971_v53  ;;  %v18960_v51 = vrot.slane %v18959_v47, 4 }
 0xa7a   : > { %v18932_v60 = vadd.f32 %v18931_v26, %v18930_v62  ;;  %v18943_v48 = vadd.f32 %v18942_v3, %v18941_v7  ;;  %v18948_v21 = vadd.f32 %v18924_v25, %v18920_v16  ;;  %v29981_v58 = vsub.s32 1, %v18993_v34 }
 0xa7b   : > { %22204 = vmatpush1.bf16.msra.mxu0 %v22203_v54  ;;  %v18949_v39 = vsel %vm18865_vm0, %v18928_v23, 0.0  ;;  %v18961_v19 = vadd.f32 %v18960_v51, %v18959_v47  ;;  %v19006_v59 = vsub.s32 3, %v18993_v34  ;;  %v29986_v33 = vsub.s32 0, %v18993_v34 }
 0xa7c   : > { %v18933_v52 = vrot.slane %v18932_v60, 4  ;;  %v18944_v17 = vrot.slane %v18943_v48, 2  ;;  %v18950_v15 = vadd.f32 %v18949_v39, %v18948_v21  ;;  %v19002_v56 = vsub.s32 2, %v18993_v34 }
 0xa7d   : > { %v18962_v11 = vrot.slane %v18961_v19, 2  ;;  %v18999_v7 = vrot.slane %v18990_v4, %v29981_v58  ;;  %v19033_v47 = vrot.slane %v19024_v10, %v29981_v58  ;;  %v19007_v62 = vrot.slane %v18990_v4, %v19006_v59 }
 0xa7e   : > { %v18934_v36 = vadd.f32 %v18933_v52, %v18932_v60  ;;  %v18945_v38 = vadd.f32 %v18944_v17, %v18943_v48  ;;  %v18951_v12 = vrot.slane %v18950_v15, 4  ;;  %v19041_v16 = vrot.slane %v19024_v10, %v19006_v59 }
 0xa7f   : > { %v18963_v43 = vadd.f32 %v18962_v11, %v18961_v19  ;;  %v29994_v3 = vrot.slane %v18990_v4, %v29986_v33  ;;  %v29998_v23 = vrot.slane %v19024_v10, %v29986_v33  ;;  %v30003_v21 = vrot.slane %v18990_v4, %v19002_v56 }
 0xa80   : > { %v18935_v8 = vrot.slane %v18934_v36, 2  ;;  %v18946_v41 = vrot.slane %v18945_v38, 1  ;;  %v18952_v40 = vadd.f32 %v18951_v12, %v18950_v15  ;;  %v30007_v15 = vrot.slane %v19024_v10, %v19002_v56 }
 0xa81   : > { %v18964_v6 = vrot.slane %v18963_v43, 1 }
 0xa82   : > { %v18936_v61 = vadd.f32 %v18935_v8, %v18934_v36  ;;  %v18947_v37 = vadd.f32 %v18946_v41, %v18945_v38  ;;  %v18953_v24 = vrot.slane %v18952_v40, 2 }
 0xa83   : > { %v18965_v9 = vadd.f32 %v18964_v6, %v18963_v43 }
 0xa84   : > { %v18937_v35 = vrot.slane %v18936_v61, 1  ;;  %v18967_v31 = vmul.f32 0.055555556, %v18947_v37  ;;  %v18954_v30 = vadd.f32 %v18953_v24, %v18952_v40 }
 0xa85   : > { %v18969_v54 = vmul.f32 0.055555556, %v18965_v9 }
 0xa86   : > { %v18938_v55 = vadd.f32 %v18937_v35, %v18936_v61  ;;  %v18971_v57 = vadd.f32 1e-05, %v18967_v31  ;;  %v18955_v5 = vrot.slane %v18954_v30, 1 }
 0xa87   : > { %v18973_v1 = vadd.f32 1e-05, %v18969_v54 }
 0xa88   : > { %v18966_v14 = vmul.f32 0.055555556, %v18938_v55  ;;  %26046 = vrsqrt.f32 %v18971_v57  ;;  %v18956_v22 = vadd.f32 %v18955_v5, %v18954_v30 }
 0xa89   : > { %26048 = vrsqrt.f32 %v18973_v1 }
 0xa8a   : > { %v18970_v45 = vadd.f32 1e-05, %v18966_v14  ;;  %v18968_v46 = vmul.f32 0.055555556, %v18956_v22 }
 0xa8c   : > { %26050 = vrsqrt.f32 %v18970_v45  ;;  %v18972_v0 = vadd.f32 1e-05, %v18968_v46 }
 0xa8e   : > { %26052 = vrsqrt.f32 %v18972_v0 }
 0xa92   : > { %v26047_v50 = vpop.eup %26046 }
 0xa93   : > { %v26049_v26 = vpop.eup %26048  ;;  %v18979_v25 = vmul.f32 %v26047_v50, %v29918_v13  ;;  %v18983_v51 = vmul.f32 %v26047_v50, %v29921_v20  ;;  %v18987_v60 = vmul.f32 %v26047_v50, %v29924_v44 }
 0xa94   : > { %v18981_v48 = vmul.f32 %v26049_v26, %v29927_v2  ;;  %v18985_v39 = vmul.f32 %v26049_v26, %v29930_v32  ;;  %v18989_v19 = vmul.f32 %v26049_v26, %v29933_v29 }
 0xa95   : > { %v19013_v17 = vmul.f32 %v18999_v7, %v18979_v25  ;;  %v19017_v13 = vmul.f32 %v18999_v7, %v18983_v51  ;;  %v19021_v11 = vmul.f32 %v18999_v7, %v18987_v60 }
 0xa96   : > { %v26051_v52 = vpop.eup %26050  ;;  %v19015_v36 = vmul.f32 %v19007_v62, %v18981_v48  ;;  %v19019_v20 = vmul.f32 %v19007_v62, %v18985_v39  ;;  %v19023_v8 = vmul.f32 %v19007_v62, %v18989_v19 }
 0xa97   : > { %v18978_v38 = vmul.f32 %v26051_v52, %v29942_v18  ;;  %v18982_v44 = vmul.f32 %v26051_v52, %v29951_v63  ;;  %v19047_v12 = vadd.f32 %v19033_v47, %v19013_v17  ;;  %v19051_v2 = vadd.f32 %v19033_v47, %v19017_v13 }
 0xa98   : > { %v19055_v43 = vadd.f32 %v19033_v47, %v19021_v11  ;;  %v26053_v41 = vpop.eup %26052  ;;  %v19049_v32 = vadd.f32 %v19041_v16, %v19015_v36  ;;  %v19053_v40 = vadd.f32 %v19041_v16, %v19019_v20  ;;  %v19057_v14 = vadd.f32 %v19041_v16, %v19023_v8 }
 0xa99   : > { %v19012_v29 = vmul.f32 %v29994_v3, %v18978_v38  ;;  %v19016_v6 = vmul.f32 %v29994_v3, %v18982_v44  ;;  %vm19059_vm1 = vcmp.gt.f32.partialorder %v19047_v12, 0.0  ;;  %v19071_v61 = vmul.f32 0.2, %v19047_v12 }
 0xa9a   : > { %v18980_v37 = vmul.f32 %v26053_v41, %v29963_v42  ;;  %vm19063_vm2 = vcmp.gt.f32.partialorder %v19051_v2, 0.0  ;;  %vm19061_vm3 = vcmp.gt.f32.partialorder %v19049_v32, 0.0  ;;  %v19073_v18 = vmul.f32 0.2, %v19049_v32 }
 0xa9b   : > { %v19046_v63 = vadd.f32 %v29998_v23, %v19012_v29  ;;  %v19075_v24 = vmul.f32 0.2, %v19051_v2  ;;  %v19083_v9 = vsel %vm19059_vm1, %v19047_v12, %v19071_v61  ;;  %vm19065_vm4 = vcmp.gt.f32.partialorder %v19053_v40, 0.0 }
 0xa9c   : > { %v19014_v35 = vmul.f32 %v30003_v21, %v18980_v37  ;;  %19286 = vmatprep.mubr.f32.mxu1 %v19083_v9  ;;  %v19085_v31 = vsel %vm19061_vm3, %v19049_v32, %v19073_v18  ;;  %v19077_v28 = vmul.f32 0.2, %v19053_v40  ;;  %v19050_v42 = vadd.f32 %v29998_v23, %v19016_v6 }
 0xa9d   : > { %vm19058_vm5 = vcmp.gt.f32.partialorder %v19046_v63, 0.0  ;;  %v19070_v30 = vmul.f32 0.2, %v19046_v63  ;;  %19369 = vmatprep.mubr.f32.mxu0 %v19085_v31  ;;  %v19087_v55 = vsel %vm19063_vm2, %v19051_v2, %v19075_v24  ;;  %v18984_v57 = vmul.f32 %v26053_v41, %v29968_v49 }
 0xa9e   : > { %v19048_v54 = vadd.f32 %v30007_v15, %v19014_v35  ;;  %vm19067_vm6 = vcmp.gt.f32.partialorder %v19055_v43, 0.0  ;;  %v19079_v1 = vmul.f32 0.2, %v19055_v43  ;;  %vm19062_vm8 = vcmp.gt.f32.partialorder %v19050_v42, 0.0 }
 0xa9f   : > { %v19082_v5 = vsel %vm19058_vm5, %v19046_v63, %v19070_v30  ;;  %v19074_v34 = vmul.f32 0.2, %v19050_v42  ;;  %v19089_v45 = vsel %vm19065_vm4, %v19053_v40, %v19077_v28  ;;  %v19018_v46 = vmul.f32 %v30003_v21, %v18984_v57 }
 0xaa0   : > { %19287 = vmatmul.mubr.f32.vlgmr.msra.gmra.mrb[0].mxu1 %v19082_v5  ;;  %vm19060_vm7 = vcmp.gt.f32.partialorder %v19048_v54, 0.0  ;;  %v19072_v22 = vmul.f32 0.2, %v19048_v54  ;;  %v19091_v0 = vsel %vm19067_vm6, %v19055_v43, %v19079_v1  ;;  %v19081_v4 = vmul.f32 0.2, %v19057_v14 }
 0xaa1   : > { %19292 = vmatprep.mubr.f32.mxu1 %v19087_v55  ;;  %v19086_v10 = vsel %vm19062_vm8, %v19050_v42, %v19074_v34  ;;  %v18986_v49 = vmul.f32 %v26051_v52, %v29955_v27  ;;  %v18988_v56 = vmul.f32 %v26053_v41, %v29971_v53  ;;  %v19052_v7 = vadd.f32 %v30007_v15, %v19018_v46 }
 0xaa2   : > { %v19084_v59 = vsel %vm19060_vm7, %v19048_v54, %v19072_v22  ;;  %vm19069_vm9 = vcmp.gt.f32.partialorder %v19057_v14, 0.0  ;;  %vm19564_vm4 = vcmask 1024  }
 0xaa3   : > { %19370 = vmatmul.mubr.f32.vlgmr.msra.gmra.mrb[0].mxu0 %v19084_v59  ;;  %v19020_v50 = vmul.f32 %v29994_v3, %v18986_v49  ;;  %v19022_v47 = vmul.f32 %v30003_v21, %v18988_v56  ;;  %vm19064_vm10 = vcmp.gt.f32.partialorder %v19052_v7, 0.0  ;;  %v19076_v62 = vmul.f32 0.2, %v19052_v7 }
 0xaa4   : > { %19375 = vmatprep.mubr.f32.mxu0 %v19089_v45  ;;  %19293 = vmatmul.mubr.f32.gmra.mrb[2].mxu1 %v19086_v10  ;;  %v19093_v16 = vsel %vm19069_vm9, %v19057_v14, %v19081_v4 }
 0xaa5   : > { %19298 = vmatprep.mubr.f32.mxu1 %v19091_v0  ;;  %v19054_v26 = vadd.f32 %v29998_v23, %v19020_v50  ;;  %v19056_v27 = vadd.f32 %v30007_v15, %v19022_v47  ;;  %v19088_v25 = vsel %vm19064_vm10, %v19052_v7, %v19076_v62 }
 0xaa7   : > { %19376 = vmatmul.mubr.f32.gmra.mrb[2].mxu0 %v19088_v25  ;;  %vm19066_vm11 = vcmp.gt.f32.partialorder %v19054_v26, 0.0  ;;  %v19078_v53 = vmul.f32 0.2, %v19054_v26  ;;  %vm19068_vm12 = vcmp.gt.f32.partialorder %v19056_v27, 0.0  ;;  %v19080_v51 = vmul.f32 0.2, %v19056_v27 }
 0xaa8   : > { %19381 = vmatprep.mubr.f32.mxu0 %v19093_v16 }
 0xaa9   : > { %v19090_v60 = vsel %vm19066_vm11, %v19054_v26, %v19078_v53  ;;  %v19092_v48 = vsel %vm19068_vm12, %v19056_v27, %v19080_v51 }
 0xaaa   : > { %19299 = vmatmul.mubr.f32.gmra.mrb[4].mxu1 %v19090_v60 }
 0xaab   : > { %19382 = vmatmul.mubr.f32.gmra.mrb[4].mxu0 %v19092_v48 }
 0xb73   : > { %v19288_v3 = vpop.f32.mrb[0].mxu1 }
 0xb74   : > { %v19290_v21 = vpop.f32.mrb[1].mxu1 }
 0xb76   : > { %v19371_v39 = vpop.f32.mrb[0].mxu0 }
 0xb77   : > { %v19372_v19 = vadd.f32 %v19371_v39, %v19288_v3  ;;  %v19373_v52 = vpop.f32.mrb[1].mxu0  ;;  %v19294_v17 = vpop.f32.mrb[2].mxu1 }
 0xb78   : > { %v19374_v23 = vadd.f32 %v19373_v52, %v19290_v21  ;;  %v19296_v13 = vpop.f32.mrb[3].mxu1 }
 0xb7a   : > { %v19377_v15 = vpop.f32.mrb[2].mxu0 }
 0xb7b   : > { %v19378_v11 = vadd.f32 %v19377_v15, %v19294_v17  ;;  %v19379_v36 = vpop.f32.mrb[3].mxu0 }
 0xb7c   : > { %v19380_v38 = vadd.f32 %v19379_v36, %v19296_v13  ;;  %v19450_v36 = vld [vmem:[%s30073_s5] sm:$0x3] }
 0xb7d   : > { %v19388_v20 = vadd.f32 %v19378_v11, %v19372_v19  ;;  %v19300_v44 = vpop.f32.mrb[4].mxu1 }
 0xb7e   : > { %v19397_v12 = vadd.f32 %v19380_v38, %v19374_v23  ;;  %v19383_v2 = vpop.f32.mrb[4].mxu0  ;;  %v19302_v43 = vpop.f32.mrb[5].mxu1 }
 0xb7f   : > { %v19384_v8 = vadd.f32 %v19383_v2, %v19300_v44  ;;  %v19385_v41 = vpop.f32.mrb[5].mxu0 }
 0xb80   : > { %v19386_v32 = vadd.f32 %v19385_v41, %v19302_v43 }
 0xb81   : > { %v19389_v29 = vsel %vm18865_vm0, %v19384_v8, 0.0 }
 0xb82   : > { %v19390_v40 = vadd.f32 %v19389_v29, %v19388_v20  ;;  %v19398_v6 = vsel %vm18865_vm0, %v19386_v32, 0.0  ;;  %v19455_v20 = vrot.slane %v19450_v36, %v29986_v33 }
 0xb83   : > { %v19399_v61 = vadd.f32 %v19398_v6, %v19397_v12  ;;  %v19459_v12 = vrot.slane %v19450_v36, %v29981_v58 }
 0xb84   : > { %v19391_v37 = vrot.slane %v19390_v40, 4 }
 0xb85   : > { %v19400_v18 = vrot.slane %v19399_v61, 4 }
 0xb86   : > { %v19392_v63 = vadd.f32 %v19391_v37, %v19390_v40 }
 0xb87   : > { %v19401_v24 = vadd.f32 %v19400_v18, %v19399_v61  ;;  %v19504_v61 = vld [vmem:[%s30075_s7] sm:$0x3] }
 0xb88   : > { %v19393_v9 = vrot.slane %v19392_v63, 2 }
 0xb89   : > { %v19402_v35 = vrot.slane %v19401_v24, 2 }
 0xb8a   : > { %v19394_v31 = vadd.f32 %v19393_v9, %v19392_v63 }
 0xb8b   : > { %v19403_v30 = vadd.f32 %v19402_v35, %v19401_v24 }
 0xb8c   : > { %v19395_v28 = vrot.slane %v19394_v31, 1 }
 0xb8d   : > { %v19404_v54 = vrot.slane %v19403_v30, 1 }
 0xb8e   : > { %v19396_v55 = vadd.f32 %v19395_v28, %v19394_v31  ;;  %v19509_v28 = vrot.slane %v19504_v61, %v29986_v33 }
 0xb8f   : > { %v19405_v42 = vadd.f32 %v19404_v54, %v19403_v30 }
 0xb90   : > { %v19406_v57 = vmul.f32 0.055555556, %v19396_v55 }
 0xb91   : > { %v19407_v5 = vmul.f32 0.055555556, %v19405_v42 }
 0xb92   : > { %v19408_v1 = vsub.f32 %v19372_v19, %v19406_v57  ;;  %v19410_v14 = vsub.f32 %v19378_v11, %v19406_v57  ;;  %v19412_v22 = vsub.f32 %v19384_v8, %v19406_v57  ;;  %v19513_v57 = vrot.slane %v19504_v61, %v29981_v58 }
 0xb93   : > { %v19409_v34 = vsub.f32 %v19374_v23, %v19407_v5  ;;  %v19411_v45 = vsub.f32 %v19380_v38, %v19407_v5  ;;  %v19413_v46 = vsub.f32 %v19386_v32, %v19407_v5  ;;  %v19468_v38 = vld [vmem:[%s30074_s6] sm:$0x3] }
 0xb94   : > { %v19414_v0 = vmul.f32 %v19408_v1, %v19408_v1  ;;  %v19416_v4 = vmul.f32 %v19410_v14, %v19410_v14  ;;  %v19418_v59 = vmul.f32 %v19412_v22, %v19412_v22  ;;  %v19473_v41 = vrot.slane %v19468_v38, %v29986_v33 }
 0xb95   : > { %v19415_v10 = vmul.f32 %v19409_v34, %v19409_v34  ;;  %v19417_v49 = vmul.f32 %v19411_v45, %v19411_v45  ;;  %v19419_v56 = vmul.f32 %v19413_v46, %v19413_v46  ;;  %v19477_v6 = vrot.slane %v19468_v38, %v29981_v58 }
 0xb96   : > { %v19420_v7 = vadd.f32 %v19416_v4, %v19414_v0  ;;  %v19421_v50 = vsel %vm18865_vm0, %v19418_v59, 0.0 }
 0xb97   : > { %v19429_v47 = vadd.f32 %v19417_v49, %v19415_v10  ;;  %v19430_v62 = vsel %vm18865_vm0, %v19419_v56, 0.0 }
 0xb98   : > { %v19422_v16 = vadd.f32 %v19421_v50, %v19420_v7 }
 0xb99   : > { %v19431_v26 = vadd.f32 %v19430_v62, %v19429_v47 }
 0xb9a   : > { %v19423_v27 = vrot.slane %v19422_v16, 4 }
 0xb9b   : > { %v19432_v25 = vrot.slane %v19431_v26, 4 }
 0xb9c   : > { %v19424_v53 = vadd.f32 %v19423_v27, %v19422_v16 }
 0xb9d   : > { %v19433_v51 = vadd.f32 %v19432_v25, %v19431_v26 }
 0xb9e   : > { %v19425_v60 = vrot.slane %v19424_v53, 2 }
 0xb9f   : > { %v19434_v48 = vrot.slane %v19433_v51, 2 }
 0xba0   : > { %v19426_v3 = vadd.f32 %v19425_v60, %v19424_v53  ;;  %v22069_v60 = vld [vmem:[#allocation3] ss:$0 sm:$0xff] }
 0xba1   : > { %v19435_v21 = vadd.f32 %v19434_v48, %v19433_v51 }
 0xba2   : > { %v19427_v39 = vrot.slane %v19426_v3, 1 }
 0xba3   : > { %v19436_v19 = vrot.slane %v19435_v21, 1 }
 0xba4   : > { %v19428_v52 = vadd.f32 %v19427_v39, %v19426_v3 }
 0xba5   : > { %v19437_v17 = vadd.f32 %v19436_v19, %v19435_v21 }
 0xba6   : > { %v19438_v23 = vmul.f32 0.055555556, %v19428_v52 }
 0xba7   : > { %v19439_v13 = vmul.f32 0.055555556, %v19437_v17 }
 0xba8   : > { %v19440_v15 = vadd.f32 1e-05, %v19438_v23 }
 0xba9   : > { %v19441_v11 = vadd.f32 1e-05, %v19439_v13 }
 0xbaa   : > { %26054 = vrsqrt.f32 %v19440_v15 }
 0xbab   : > { %26056 = vrsqrt.f32 %v19441_v11 }
 0xbb4   : > { %v26055_v44 = vpop.eup %26054 }
 0xbb5   : > { %v26057_v2 = vpop.eup %26056  ;;  %v19448_v43 = vmul.f32 %v26055_v44, %v19412_v22  ;;  %v19444_v8 = vmul.f32 %v26055_v44, %v19408_v1  ;;  %v19446_v32 = vmul.f32 %v26055_v44, %v19410_v14 }
 0xbb6   : > { %v19449_v29 = vmul.f32 %v26057_v2, %v19413_v46  ;;  %v19445_v40 = vmul.f32 %v26057_v2, %v19409_v34  ;;  %v19447_v37 = vmul.f32 %v26057_v2, %v19411_v45 }
 0xbb7   : > { %v19466_v18 = vmul.f32 %v19455_v20, %v19448_v43  ;;  %v19462_v63 = vmul.f32 %v19455_v20, %v19444_v8  ;;  %v19464_v24 = vmul.f32 %v19455_v20, %v19446_v32 }
 0xbb8   : > { %v19467_v9 = vmul.f32 %v19459_v12, %v19449_v29  ;;  %v19463_v35 = vmul.f32 %v19459_v12, %v19445_v40  ;;  %v19465_v31 = vmul.f32 %v19459_v12, %v19447_v37 }
 0xbb9   : > { %v19480_v30 = vadd.f32 %v19473_v41, %v19462_v63  ;;  %v19484_v54 = vadd.f32 %v19473_v41, %v19466_v18  ;;  %v19482_v55 = vadd.f32 %v19473_v41, %v19464_v24 }
 0xbba   : > { %v19481_v42 = vadd.f32 %v19477_v6, %v19463_v35  ;;  %v19485_v5 = vadd.f32 %v19477_v6, %v19467_v9  ;;  %v19483_v1 = vadd.f32 %v19477_v6, %v19465_v31 }
 0xbbb   : > { %vm19486_vm13 = vcmp.gt.f32.partialorder %v19480_v30, 0.0  ;;  %v19492_v14 = vmul.f32 0.2, %v19480_v30  ;;  %vm19490_vm14 = vcmp.gt.f32.partialorder %v19484_v54, 0.0  ;;  %v19496_v22 = vmul.f32 0.2, %v19484_v54 }
 0xbbc   : > { %vm19487_vm15 = vcmp.gt.f32.partialorder %v19481_v42, 0.0  ;;  %v19493_v34 = vmul.f32 0.2, %v19481_v42  ;;  %vm19491_vm1 = vcmp.gt.f32.partialorder %v19485_v5, 0.0  ;;  %v19497_v45 = vmul.f32 0.2, %v19485_v5 }
 0xbbd   : > { %v19498_v46 = vsel %vm19486_vm13, %v19480_v30, %v19492_v14  ;;  %v19502_v0 = vsel %vm19490_vm14, %v19484_v54, %v19496_v22  ;;  %vm19488_vm2 = vcmp.gt.f32.partialorder %v19482_v55, 0.0  ;;  %vm19489_vm3 = vcmp.gt.f32.partialorder %v19483_v1, 0.0 }
 0xbbe   : > { %v19499_v33 = vsel %vm19487_vm15, %v19481_v42, %v19493_v34  ;;  %v19516_v4 = vmul.f32 %v19509_v28, %v19498_v46  ;;  %v19503_v59 = vsel %vm19491_vm1, %v19485_v5, %v19497_v45  ;;  %v19520_v10 = vmul.f32 %v19509_v28, %v19502_v0 }
 0xbbf   : > { %v19517_v49 = vmul.f32 %v19513_v57, %v19499_v33  ;;  %v19521_v58 = vmul.f32 %v19513_v57, %v19503_v59  ;;  %v19494_v56 = vmul.f32 0.2, %v19482_v55  ;;  %v19495_v7 = vmul.f32 0.2, %v19483_v1 }
 0xbc0   : > { %v19528_v50 = vsel %vm18865_vm0, %v19520_v10, 0.0 }
 0xbc1   : > { %v19522_v47 = vadd.f32 %v19517_v49, %v19516_v4  ;;  %v19529_v62 = vsel %vm18865_vm0, %v19521_v58, 0.0  ;;  %v19500_v16 = vsel %vm19488_vm2, %v19482_v55, %v19494_v56  ;;  %v19501_v26 = vsel %vm19489_vm3, %v19483_v1, %v19495_v7 }
 0xbc2   : > { %v19530_v27 = vadd.f32 %v19529_v62, %v19528_v50  ;;  %v19518_v25 = vmul.f32 %v19509_v28, %v19500_v16  ;;  %v19519_v53 = vmul.f32 %v19513_v57, %v19501_v26  ;;  %vm19561_vm0 = vcmask 7168  }
 0xbc3   : > { %19523 = vadd.xlane.f32.xlu0 %v19522_v47 }
 0xbc4   : > { %19531 = vadd.xlane.f32.xlu1 %v19530_v27  ;;  %v19525_v51 = vadd.f32 %v19519_v53, %v19518_v25 }
 0xbc7   : > { %19526 = vadd.xlane.f32.xlu0 %v19525_v51 }
 0xc50   : > { %v19524_v48 = vpop.xlane.xlu0 %19523 }
 0xc51   : > { %v19540_v3 = vadd.f32 %v22069_v60, %v19524_v48  ;;  %v19532_v21 = vpop.xlane.xlu1 %19531 }
 0xc52   : > { %v19542_v39 = vadd.f32 %v22069_v60, %v19532_v21 }
 0xc53   : > { %v22070_v19 = vmul.f32 -1.442695, %v19540_v3 }
 0xc54   : > { %v22072_v52 = vmul.f32 -1.442695, %v19542_v39  ;;  %v19527_v17 = vpop.xlane.xlu0 %19526 }
 0xc55   : > { %26058 = vpow2.f32 %v22070_v19  ;;  %v19541_v23 = vadd.f32 %v22069_v60, %v19527_v17 }
 0xc56   : > { %26060 = vpow2.f32 %v22072_v52 }
 0xc57   : > { %v22071_v13 = vmul.f32 -1.442695, %v19541_v23 }
 0xc59   : > { %26062 = vpow2.f32 %v22071_v13 }
 0xc5f   : > { %v26059_v15 = vpop.eup %26058 }
 0xc60   : > { %v26061_v11 = vpop.eup %26060  ;;  %v19552_v36 = vadd.f32 1.0, %v26059_v15 }
 0xc61   : > { %v19554_v38 = vadd.f32 1.0, %v26061_v11 }
 0xc62   : > { %26064 = vrcp.f32 %v19552_v36 }
 0xc63   : > { %v26063_v20 = vpop.eup %26062  ;;  %26066 = vrcp.f32 %v19554_v38 }
 0xc64   : > { %v19553_v44 = vadd.f32 1.0, %v26063_v20 }
 0xc66   : > { %26068 = vrcp.f32 %v19553_v44 }
 0xc6c   : > { %v26065_v12 = vpop.eup %26064 }
 0xc6d   : > { %v26067_v2 = vpop.eup %26066  ;;  %19562 = vst.msk [vmem:[%s30077_s9] sm:$0xff] %vm19561_vm0, %v26065_v12 }
 0xc6e   : > { %19565 = vst.msk [vmem:[%s30077_s9 + $0x10] sm:$0x3] %vm19564_vm4, %v26067_v2 }
 0xc70   : > { %v26069_v43 = vpop.eup %26068 }
 0xc71   : > { %19563 = vst.msk [vmem:[%s30077_s9 + $0x8] sm:$0xff] %vm19561_vm0, %v26069_v43 }
 0xc72 PF: > { %p18_p11 = scmp.ge.s32.totalorder %s26167_s14, 4   ;;  %s30078_s11 = smov %s26088_s12 }
 0xc73   : > { %s30079_s12 = smov %s26176_s17  ;;  %s30080_s13 = smov %s26167_s14 }
 0xc74   :  { %20 = sbr.rel (!%p18_p11) target bundleno = 5 (0x5), region = 121 }

</bundles_post_ra>
